<compile_context>
chip_gen: v5e
topology: v5e:2x2
jax: 0.10.0
libtpu: 0.0.40
codegen_flags: <defaults>
</compile_context>

<pallas_src>
import functools
import numpy as np
import jax
import jax.numpy as jnp
from jax.experimental import pallas as pl
from jax.experimental.pallas import tpu as pltpu

# ---------------------------------------------------------------------------
# Module-consistent configuration
DIM = 64
NUM_HEADS = 8                       # module default
HEAD_DIM = DIM // NUM_HEADS
WINDOW = 3                          # module default (odd)
LOCAL_LEN = WINDOW * WINDOW
SR_RATIO = 2
H = W = 8
N = H * W
POOL_H, POOL_W = H // SR_RATIO, W // SR_RATIO
POOL_LEN = POOL_H * POOL_W
B = 2

NEG_INF = -1e30                     # stands in for the CUDA kernel's -inf mask


# ---------------------------------------------------------------------------
# In-kernel helpers (traced into the Pallas kernel)
def _mm_t(a, b_t):
    """a @ b_t.T on the MXU:  a (M, K), b_t (R, K) -> (M, R)."""
    return jax.lax.dot_general(a, b_t, (((1,), (1,)), ((), ())),
                               preferred_element_type=jnp.float32)


def _gelu_exact(x):
    # Exact (erf-based) GELU.  lax.erf has no Mosaic lowering, so erf is
    # evaluated with the Abramowitz-Stegun 7.1.26 polynomial (|err| < 1.5e-7).
    # TODO(synk): switch to lax.erf if/when Mosaic grows a lowering rule.
    z = x * 0.7071067811865476
    az = jnp.where(z >= 0.0, z, -z)
    t = 1.0 / (1.0 + 0.3275911 * az)
    poly = t * (0.254829592 + t * (-0.284496736 + t * (1.421413741
               + t * (-1.453152027 + t * 1.061405429))))
    erf_abs = 1.0 - poly * jnp.exp(-az * az)
    erf = jnp.where(z >= 0.0, erf_abs, -erf_abs)
    return 0.5 * x * (1.0 + erf)


# ---------------------------------------------------------------------------
# The fused kernel: one grid step == one batch element, all heads inside.
def _fused_attention_kernel(x_ref, qw_ref, qb_ref, kw_ref, kb_ref, vw_ref, vb_ref,
                            srw_ref, srb_ref, pjw_ref, pjb_ref, nw_ref, nb_ref,
                            pm_ref, oblk_ref, scl_ref, qe_ref, bias_ref, msel_ref,
                            ltexp_ref, lbexp_ref, o_ref, xo_ref):
    f32, bf16 = jnp.float32, jnp.bfloat16
    x2 = x_ref[0]                                                   # (N, C) f32
    xb = x2.astype(bf16)

    # ---- pooled branch: sr (1x1 conv) -> GELU -> adaptive avg pool -> LN ---
    xsr = jnp.dot(xb, srw_ref[...], preferred_element_type=f32) + srb_ref[...]
    xg = _gelu_exact(xsr)                                           # f32
    pooled = jnp.dot(pm_ref[...], xg.astype(bf16),
                     preferred_element_type=f32)                    # (P, C)
    mu = jnp.mean(pooled, axis=-1, keepdims=True)
    var = jnp.mean((pooled - mu) ** 2, axis=-1, keepdims=True)
    pooled = (pooled - mu) * jax.lax.rsqrt(var + 1e-5) * nw_ref[...] + nb_ref[...]
    pooled_b = pooled.astype(bf16)

    # ---- head-packed projections: one well-shaped (.,C)x(C,C) matmul each ---
    q = jnp.dot(xb, qw_ref[...], preferred_element_type=f32) + qb_ref[...]      # (N, C)
    k = jnp.dot(xb, kw_ref[...], preferred_element_type=f32) + kb_ref[...]      # (N, C)
    v = jnp.dot(xb, vw_ref[...], preferred_element_type=f32) + vb_ref[...]      # (N, C)
    kp = jnp.dot(pooled_b, kw_ref[...], preferred_element_type=f32) + kb_ref[...]  # (P, C)
    vp = jnp.dot(pooled_b, vw_ref[...], preferred_element_type=f32) + vb_ref[...]  # (P, C)

    # ---- per-head F.normalize, head-packed via block-diagonal ones matmul ----
    oblk = oblk_ref[...]

    def head_l2norm(t):
        ss = jnp.dot(t * t, oblk, preferred_element_type=f32)       # per-head sum-sq
        return t * jax.lax.rsqrt(jnp.maximum(ss, 1e-24))

    qn = head_l2norm(q)                                              # (N, C)
    kn = head_l2norm(k)                                              # (N, C)
    kpn = head_l2norm(kp)                                            # (P, C)
    qsc = (qn + qe_ref[...]) * scl_ref[...]                          # scaled query

    kcat = jnp.concatenate([kn, kpn], axis=0)                        # (N+P, C)
    vcat = jnp.concatenate([v, vp], axis=0)                          # (N+P, C)

    # ---- per-head joint [local | pooled] attention on one (N, N+P) tile -----
    for h in range(NUM_HEADS):
        sl = slice(h * HEAD_DIM, (h + 1) * HEAD_DIM)
        s = _mm_t(qsc[:, sl], kcat[:, sl]) + bias_ref[h].astype(f32)  # (N, N+P)
        e = jnp.exp(s - jnp.max(s, axis=-1, keepdims=True))
        a = e * (1.0 / jnp.sum(e, axis=-1, keepdims=True))           # exact softmax
        xo_ref[:, sl] = jnp.dot(a, vcat[:, sl], preferred_element_type=f32)

    # ---- learnable-token correction, head-packed & applied in output space --
    # lc for all heads in one matmul (block-diagonal, lane-replicated tokens);
    # the window scatter becomes 9 full-width gather matmuls + fused FMAs.
    lcexp = (jnp.dot(qn.astype(bf16), ltexp_ref[...],
                     preferred_element_type=f32) + lbexp_ref[...])   # (N, L*C)
    v_b = v.astype(bf16)
    delta = jnp.zeros((N, DIM), f32)
    for l in range(LOCAL_LEN):
        vg = jnp.dot(msel_ref[l], v_b, preferred_element_type=f32)   # gathered V (N, C)
        delta = delta + lcexp[:, l * DIM:(l + 1) * DIM] * vg

    # ---- output projection: one (C,C) matmul on the concatenated heads ------
    y = jnp.dot((xo_ref[...] + delta).astype(bf16), pjw_ref[...],
                preferred_element_type=f32) + pjb_ref[...]
    # Output block last dim is C=64 (<128, masked stores); flattening to a
    # (1, N*C) lane-dense slab would need a full cross-lane reshape that costs
    # more than the ~16 KiB masked writeback it saves, so it is not done.
    o_ref[0] = y


# ---------------------------------------------------------------------------
# Static (numpy) precomputation of the window / pooling structure.
def build_window_index(h, w, ws):
    """Neighbor gather indices + validity mask in nn.Unfold (row-major) order."""
    r = ws // 2
    ii, jj = np.meshgrid(np.arange(h), np.arange(w), indexing="ij")
    idx, mask = [], []
    for wy in range(ws):
        for wx in range(ws):
            ni, nj = ii + wy - r, jj + wx - r
            valid = (ni >= 0) & (ni < h) & (nj >= 0) & (nj < w)
            nic, njc = np.clip(ni, 0, h - 1), np.clip(nj, 0, w - 1)
            idx.append((nic * w + njc).reshape(-1))
            mask.append(valid.reshape(-1))
    return (np.stack(idx, axis=1).astype(np.int32),
            np.stack(mask, axis=1).astype(np.float32))


def build_msel(nbr_idx, nbr_mask):
    """One-hot scatter masks: msel[l, i, j] = 1 iff j is the l-th (valid) neighbor of i."""
    n, ll = nbr_idx.shape
    msel = np.zeros((ll, n, n), np.float32)
    for l in range(ll):
        for i in range(n):
            if nbr_mask[i, l] > 0:
                msel[l, i, nbr_idx[i, l]] = 1.0
    return msel


def build_pool_matrix(h, w, ph, pw):
    """AdaptiveAvgPool2d((ph, pw)) expressed as a (ph*pw, h*w) averaging matrix."""
    pm = np.zeros((ph * pw, h * w), np.float32)
    for pi in range(ph):
        i0 = (pi * h) // ph
        i1 = -((-(pi + 1) * h) // ph)
        for pj in range(pw):
            j0 = (pj * w) // pw
            j1 = -((-(pj + 1) * w) // pw)
            cnt = float((i1 - i0) * (j1 - j0))
            for ii in range(i0, i1):
                for jj in range(j0, j1):
                    pm[pi * pw + pj, ii * w + jj] = 1.0 / cnt
    return pm


def build_relative_position(h, w, ph, pw):
    """relative_coords_table (T, 2) and relative_pos_index (N, pool_len)."""
    qi = np.arange(h, dtype=np.float32)
    qj = np.arange(w, dtype=np.float32)
    ki = (np.arange(ph, dtype=np.float32) + 0.5) * h / ph - 0.5
    kj = (np.arange(pw, dtype=np.float32) + 0.5) * w / pw - 0.5
    di = (qi[:, None] - ki[None, :]) / float(h)
    dj = (qj[:, None] - kj[None, :]) / float(w)
    rel = np.zeros((h, w, ph, pw, 2), np.float32)
    rel[..., 0] = di[:, None, :, None]
    rel[..., 1] = dj[None, :, None, :]
    flat = rel.reshape(-1, 2)
    table, index = np.unique(flat, axis=0, return_inverse=True)
    return table.astype(np.float32), np.asarray(index).reshape(h * w, ph * pw).astype(np.int32)


# ---------------------------------------------------------------------------
def init_params(key):
    ks = jax.random.split(key, 16)

    def nrm(k, shape, std=0.02):
        return std * jax.random.normal(k, shape, jnp.float32)

    p = {}
    p["q_w"] = nrm(ks[0], (DIM, DIM));         p["q_b"] = nrm(ks[1], (DIM,))
    p["kv_w"] = nrm(ks[2], (DIM, 2 * DIM));    p["kv_b"] = nrm(ks[3], (2 * DIM,))
    p["proj_w"] = nrm(ks[4], (DIM, DIM));      p["proj_b"] = nrm(ks[5], (DIM,))
    p["sr_w"] = nrm(ks[6], (DIM, DIM));        p["sr_b"] = nrm(ks[7], (DIM,))
    p["norm_w"] = jnp.ones((DIM,), jnp.float32)
    p["norm_b"] = jnp.zeros((DIM,), jnp.float32)
    p["cpb1_w"] = nrm(ks[8], (2, 512));        p["cpb1_b"] = jnp.zeros((512,), jnp.float32)
    p["cpb2_w"] = nrm(ks[9], (512, NUM_HEADS)); p["cpb2_b"] = jnp.zeros((NUM_HEADS,), jnp.float32)
    p["temperature"] = jnp.full((NUM_HEADS, 1, 1),
                                float(np.log(np.exp(1.0 / 0.24) - 1.0)), jnp.float32)
    p["query_embedding"] = nrm(ks[10], (NUM_HEADS, 1, HEAD_DIM))
    p["rpb_local"] = nrm(ks[11], (NUM_HEADS, LOCAL_LEN), std=0.0004)
    p["learnable_tokens"] = nrm(ks[12], (NUM_HEADS, HEAD_DIM, LOCAL_LEN))
    p["learnable_bias"] = jnp.zeros((NUM_HEADS, 1, LOCAL_LEN), jnp.float32)
    return p


# ---------------------------------------------------------------------------
def aggregated_attention_forward(params, x, relative_pos_index, relative_coords_table,
                                 msel, poolmat, seq_scale):
    B_, N_, C = x.shape
    nh, hd, L, P = NUM_HEADS, HEAD_DIM, LOCAL_LEN, POOL_LEN
    bf16 = jnp.bfloat16

    # ---- full-width weight layouts (head blocks are sliced in-kernel) -------
    qw = params["q_w"].astype(bf16)
    kw = params["kv_w"][:, :C].astype(bf16)
    vw = params["kv_w"][:, C:].astype(bf16)
    srw = params["sr_w"].astype(bf16)
    pjw = params["proj_w"].astype(bf16)
    qb = params["q_b"].reshape(1, C)
    kb = params["kv_b"][:C].reshape(1, C)
    vb = params["kv_b"][C:].reshape(1, C)
    srb = params["sr_b"].reshape(1, C)
    pjb = params["proj_b"].reshape(1, C)
    nw = params["norm_w"].reshape(1, C)
    nb = params["norm_b"].reshape(1, C)

    # block-diagonal ones matrix: per-head sum-of-squares for F.normalize
    oblk = jnp.asarray(np.kron(np.eye(nh, dtype=np.float32),
                               np.ones((hd, hd), np.float32)))

    # per-token / per-lane query scale: softplus(temperature_h) * seq_scale_i
    tsp = jax.nn.softplus(params["temperature"]).reshape(nh)
    scl = jnp.repeat(tsp, hd)[None, :] * seq_scale.reshape(N_, 1)    # (N, C)
    qemb = params["query_embedding"].reshape(1, C)

    # dense local-window bias (rpb inside the 3x3 window, NEG_INF outside),
    # concatenated with the continuous pooled position bias -> one (N, N+P) bias
    valid = jnp.sum(msel, axis=0)                                    # (N, N)
    wbias = (jnp.einsum("hl,lnm->hnm", params["rpb_local"], msel)
             + (1.0 - valid) * NEG_INF)                              # (nh, N, N)
    t = jnp.maximum(relative_coords_table @ params["cpb1_w"] + params["cpb1_b"], 0.0)
    t = t @ params["cpb2_w"] + params["cpb2_b"]                      # (T, nh)
    pbias = t.T[:, relative_pos_index.reshape(-1)].reshape(nh, N_, P)
    bias_cat = jnp.concatenate([wbias, pbias], axis=-1).astype(bf16)  # (nh, N, N+P)

    # learnable-token expansion: block-diagonal over heads, lane-replicated over
    # each head's 8 output lanes, so one matmul yields every head's coefficients
    lt = params["learnable_tokens"]                                  # (nh, hd, L)
    ltexp = jnp.einsum("adl,ab->adlb", lt, jnp.eye(nh, dtype=lt.dtype))
    ltexp = jnp.repeat(ltexp[..., None], hd, axis=-1).reshape(C, L * C).astype(bf16)
    lb = params["learnable_bias"].reshape(nh, L)
    lbexp = jnp.repeat(lb.T[:, :, None], hd, axis=-1).reshape(1, L * C)

    msel_b = msel.astype(bf16)
    pm_b = poolmat.astype(bf16)

    def fullspec(shape):
        nd = len(shape)
        return pl.BlockSpec(shape, lambda b, nd=nd: (0,) * nd)

    out = pl.pallas_call(
        _fused_attention_kernel,
        out_shape=jax.ShapeDtypeStruct((B_, N_, C), jnp.float32),
        grid=(B_,),
        in_specs=[pl.BlockSpec((1, N_, C), lambda b: (b, 0, 0)),     # x
                  fullspec((C, C)), fullspec((1, C)),                # qw, qb
                  fullspec((C, C)), fullspec((1, C)),                # kw, kb
                  fullspec((C, C)), fullspec((1, C)),                # vw, vb
                  fullspec((C, C)), fullspec((1, C)),                # srw, srb
                  fullspec((C, C)), fullspec((1, C)),                # proj_w, proj_b
                  fullspec((1, C)), fullspec((1, C)),                # LN w, b
                  fullspec((P, N_)),                                 # pooling matrix
                  fullspec((C, C)),                                  # block-ones (l2 norm)
                  fullspec((N_, C)), fullspec((1, C)),               # q scale, q embedding
                  fullspec((nh, N_, N_ + P)),                        # [local|pool] bias
                  fullspec((L, N_, N_)),                             # window gather masks
                  fullspec((C, L * C)), fullspec((1, L * C))],       # learnable tok / bias
        out_specs=pl.BlockSpec((1, N_, C), lambda b: (b, 0, 0)),
        scratch_shapes=[pltpu.VMEM((N_, C), jnp.float32)],           # head-packed attn out
        # On v7x the B=2 "parallel" axis shards across the two TensorCores; if a
        # profile shows both steps serialized on one TC, switch this to
        # (pltpu.CORE_PARALLEL,).  On single-TC v5e/v6e it is a no-op.
        compiler_params=pltpu.CompilerParams(
            dimension_semantics=("parallel",)),
    )(x, qw, qb, kw, kb, vw, vb, srw, srb, pjw, pjb, nw, nb,
      pm_b, oblk, scl, qemb, bias_cat, msel_b, ltexp, lbexp)
    # attn_drop / proj_drop have p = 0 -> identity
    return out


# ---------------------------------------------------------------------------
if __name__ == "__main__":
    key = jax.random.PRNGKey(0)
    pkey, xkey = jax.random.split(key)
    params = init_params(pkey)

    x = jax.random.normal(xkey, (B, N, DIM), jnp.float32)

    nbr_idx, nbr_mask = build_window_index(H, W, WINDOW)
    rel_table, rel_index = build_relative_position(H, W, POOL_H, POOL_W)
    msel = build_msel(nbr_idx, nbr_mask)
    poolmat = build_pool_matrix(H, W, POOL_H, POOL_W)
    seq_scale = np.log(nbr_mask.sum(axis=1) + POOL_LEN).astype(np.float32)

    fwd = jax.jit(functools.partial(aggregated_attention_forward, params))
    out = fwd(x, jnp.asarray(rel_index), jnp.asarray(rel_table),
              jnp.asarray(msel), jnp.asarray(poolmat), jnp.asarray(seq_scale))
    out = jax.block_until_ready(out)

    assert out.shape == (B, N, DIM), out.shape
    assert bool(jnp.all(jnp.isfinite(out)))
    print("KERNEL_OK")
</pallas_src>

<mosaic_0001>
module attributes {stable_mosaic.version = 11 : i64} {
  func.func @_fused_attention_kernel(%arg0: i32, %arg1: memref<1x64x64xf32, #tpu.memory_space<vmem>>, %arg2: memref<64x64xbf16, #tpu.memory_space<vmem>>, %arg3: memref<1x64xf32, #tpu.memory_space<vmem>>, %arg4: memref<64x64xbf16, #tpu.memory_space<vmem>>, %arg5: memref<1x64xf32, #tpu.memory_space<vmem>>, %arg6: memref<64x64xbf16, #tpu.memory_space<vmem>>, %arg7: memref<1x64xf32, #tpu.memory_space<vmem>>, %arg8: memref<64x64xbf16, #tpu.memory_space<vmem>>, %arg9: memref<1x64xf32, #tpu.memory_space<vmem>>, %arg10: memref<64x64xbf16, #tpu.memory_space<vmem>>, %arg11: memref<1x64xf32, #tpu.memory_space<vmem>>, %arg12: memref<1x64xf32, #tpu.memory_space<vmem>>, %arg13: memref<1x64xf32, #tpu.memory_space<vmem>>, %arg14: memref<16x64xbf16, #tpu.memory_space<vmem>>, %arg15: memref<64x64xf32, #tpu.memory_space<vmem>>, %arg16: memref<64x64xf32, #tpu.memory_space<vmem>>, %arg17: memref<1x64xf32, #tpu.memory_space<vmem>>, %arg18: memref<8x64x80xbf16, #tpu.memory_space<vmem>>, %arg19: memref<9x64x64xbf16, #tpu.memory_space<vmem>>, %arg20: memref<64x576xbf16, #tpu.memory_space<vmem>>, %arg21: memref<1x576xf32, #tpu.memory_space<vmem>>, %arg22: memref<1x64x64xf32, #tpu.memory_space<vmem>>, %arg23: memref<64x64xf32, #tpu.memory_space<vmem>>) attributes {dimension_semantics = [#tpu.dimension_semantics<parallel>], iteration_bounds = array<i64: 2>, scalar_prefetch = 0 : i64, scratch_operands = 1 : i64, tpu.core_type = #tpu.core_type<tc>, window_params = [{transform_indices = @transform_0, window_bounds = array<i64: 1, 64, 64>}, {pipeline_mode = #tpu.pipeline_mode<synchronous>, transform_indices = @transform_1, window_bounds = array<i64: 64, 64>}, {pipeline_mode = #tpu.pipeline_mode<synchronous>, transform_indices = @transform_2, window_bounds = array<i64: 1, 64>}, {pipeline_mode = #tpu.pipeline_mode<synchronous>, transform_indices = @transform_3, window_bounds = array<i64: 64, 64>}, {pipeline_mode = #tpu.pipeline_mode<synchronous>, transform_indices = @transform_4, window_bounds = array<i64: 1, 64>}, {pipeline_mode = #tpu.pipeline_mode<synchronous>, transform_indices = @transform_5, window_bounds = array<i64: 64, 64>}, {pipeline_mode = #tpu.pipeline_mode<synchronous>, transform_indices = @transform_6, window_bounds = array<i64: 1, 64>}, {pipeline_mode = #tpu.pipeline_mode<synchronous>, transform_indices = @transform_7, window_bounds = array<i64: 64, 64>}, {pipeline_mode = #tpu.pipeline_mode<synchronous>, transform_indices = @transform_8, window_bounds = array<i64: 1, 64>}, {pipeline_mode = #tpu.pipeline_mode<synchronous>, transform_indices = @transform_9, window_bounds = array<i64: 64, 64>}, {pipeline_mode = #tpu.pipeline_mode<synchronous>, transform_indices = @transform_10, window_bounds = array<i64: 1, 64>}, {pipeline_mode = #tpu.pipeline_mode<synchronous>, transform_indices = @transform_11, window_bounds = array<i64: 1, 64>}, {pipeline_mode = #tpu.pipeline_mode<synchronous>, transform_indices = @transform_12, window_bounds = array<i64: 1, 64>}, {pipeline_mode = #tpu.pipeline_mode<synchronous>, transform_indices = @transform_13, window_bounds = array<i64: 16, 64>}, {pipeline_mode = #tpu.pipeline_mode<synchronous>, transform_indices = @transform_14, window_bounds = array<i64: 64, 64>}, {pipeline_mode = #tpu.pipeline_mode<synchronous>, transform_indices = @transform_15, window_bounds = array<i64: 64, 64>}, {pipeline_mode = #tpu.pipeline_mode<synchronous>, transform_indices = @transform_16, window_bounds = array<i64: 1, 64>}, {pipeline_mode = #tpu.pipeline_mode<synchronous>, transform_indices = @transform_17, window_bounds = array<i64: 8, 64, 80>}, {pipeline_mode = #tpu.pipeline_mode<synchronous>, transform_indices = @transform_18, window_bounds = array<i64: 9, 64, 64>}, {pipeline_mode = #tpu.pipeline_mode<synchronous>, transform_indices = @transform_19, window_bounds = array<i64: 64, 576>}, {pipeline_mode = #tpu.pipeline_mode<synchronous>, transform_indices = @transform_20, window_bounds = array<i64: 1, 576>}, {transform_indices = @transform_21, window_bounds = array<i64: 1, 64, 64>}]} {
    %c0 = arith.constant 0 : index
    %c0_0 = arith.constant 0 : index
    %c0_1 = arith.constant 0 : index
    %0 = vector.load %arg1[%c0, %c0_0, %c0_1] : memref<1x64x64xf32, #tpu.memory_space<vmem>>, vector<1x64x64xf32>
    %1 = vector.shape_cast %0 : vector<1x64x64xf32> to vector<64x64xf32>
    %2 = arith.truncf %1 : vector<64x64xf32> to vector<64x64xbf16>
    %c0_2 = arith.constant 0 : index
    %c0_3 = arith.constant 0 : index
    %3 = vector.load %arg8[%c0_2, %c0_3] : memref<64x64xbf16, #tpu.memory_space<vmem>>, vector<64x64xbf16>
    %cst = arith.constant dense<0.000000e+00> : vector<64x64xf32>
    %4 = tpu.matmul %2, %3, %cst {dimension_numbers = #tpu.dot_dimension_numbers<[1], [0], [0], [1], [0, 0, 1, 1], [], []>} : vector<64x64xbf16>, vector<64x64xbf16>, vector<64x64xf32> -> vector<64x64xf32>
    %c0_4 = arith.constant 0 : index
    %c0_5 = arith.constant 0 : index
    %5 = vector.load %arg9[%c0_4, %c0_5] : memref<1x64xf32, #tpu.memory_space<vmem>>, vector<1x64xf32>
    %6 = vector.broadcast %5 : vector<1x64xf32> to vector<64x64xf32>
    %7 = arith.addf %4, %6 : vector<64x64xf32>
    %cst_6 = arith.constant 0.707106769 : f32
    %8 = vector.broadcast %cst_6 : f32 to vector<64x64xf32>
    %9 = arith.mulf %7, %8 : vector<64x64xf32>
    %cst_7 = arith.constant 0.000000e+00 : f32
    %10 = vector.broadcast %cst_7 : f32 to vector<64x64xf32>
    %11 = arith.cmpf oge, %9, %10 : vector<64x64xf32>
    %cst_8 = arith.constant 0.000000e+00 : f32
    %12 = vector.broadcast %cst_8 : f32 to vector<64x64xf32>
    %13 = arith.subf %12, %9 : vector<64x64xf32>
    %14 = arith.select %11, %9, %13 : vector<64x64xi1>, vector<64x64xf32>
    %cst_9 = arith.constant 0.327591091 : f32
    %15 = vector.broadcast %cst_9 : f32 to vector<64x64xf32>
    %16 = arith.mulf %15, %14 : vector<64x64xf32>
    %cst_10 = arith.constant 1.000000e+00 : f32
    %17 = vector.broadcast %cst_10 : f32 to vector<64x64xf32>
    %18 = arith.addf %17, %16 : vector<64x64xf32>
    %cst_11 = arith.constant 1.000000e+00 : f32
    %19 = vector.broadcast %cst_11 : f32 to vector<64x64xf32>
    %20 = arith.divf %19, %18 : vector<64x64xf32>
    %cst_12 = arith.constant 1.06140542 : f32
    %21 = vector.broadcast %cst_12 : f32 to vector<64x64xf32>
    %22 = arith.mulf %20, %21 : vector<64x64xf32>
    %cst_13 = arith.constant -1.45315206 : f32
    %23 = vector.broadcast %cst_13 : f32 to vector<64x64xf32>
    %24 = arith.addf %23, %22 : vector<64x64xf32>
    %25 = arith.mulf %20, %24 : vector<64x64xf32>
    %cst_14 = arith.constant 1.42141378 : f32
    %26 = vector.broadcast %cst_14 : f32 to vector<64x64xf32>
    %27 = arith.addf %26, %25 : vector<64x64xf32>
    %28 = arith.mulf %20, %27 : vector<64x64xf32>
    %cst_15 = arith.constant -0.284496725 : f32
    %29 = vector.broadcast %cst_15 : f32 to vector<64x64xf32>
    %30 = arith.addf %29, %28 : vector<64x64xf32>
    %31 = arith.mulf %20, %30 : vector<64x64xf32>
    %cst_16 = arith.constant 0.254829586 : f32
    %32 = vector.broadcast %cst_16 : f32 to vector<64x64xf32>
    %33 = arith.addf %32, %31 : vector<64x64xf32>
    %34 = arith.mulf %20, %33 : vector<64x64xf32>
    %cst_17 = arith.constant 0.000000e+00 : f32
    %35 = vector.broadcast %cst_17 : f32 to vector<64x64xf32>
    %36 = arith.subf %35, %14 : vector<64x64xf32>
    %37 = arith.mulf %36, %14 : vector<64x64xf32>
    %38 = math.exp %37 : vector<64x64xf32>
    %39 = arith.mulf %34, %38 : vector<64x64xf32>
    %cst_18 = arith.constant 1.000000e+00 : f32
    %40 = vector.broadcast %cst_18 : f32 to vector<64x64xf32>
    %41 = arith.subf %40, %39 : vector<64x64xf32>
    %cst_19 = arith.constant 0.000000e+00 : f32
    %42 = vector.broadcast %cst_19 : f32 to vector<64x64xf32>
    %43 = arith.cmpf oge, %9, %42 : vector<64x64xf32>
    %cst_20 = arith.constant 0.000000e+00 : f32
    %44 = vector.broadcast %cst_20 : f32 to vector<64x64xf32>
    %45 = arith.subf %44, %41 : vector<64x64xf32>
    %46 = arith.select %43, %41, %45 : vector<64x64xi1>, vector<64x64xf32>
    %cst_21 = arith.constant 5.000000e-01 : f32
    %47 = vector.broadcast %cst_21 : f32 to vector<64x64xf32>
    %48 = arith.mulf %47, %7 : vector<64x64xf32>
    %cst_22 = arith.constant 1.000000e+00 : f32
    %49 = vector.broadcast %cst_22 : f32 to vector<64x64xf32>
    %50 = arith.addf %49, %46 : vector<64x64xf32>
    %51 = arith.mulf %48, %50 : vector<64x64xf32>
    %c0_23 = arith.constant 0 : index
    %c0_24 = arith.constant 0 : index
    %52 = vector.load %arg14[%c0_23, %c0_24] : memref<16x64xbf16, #tpu.memory_space<vmem>>, vector<16x64xbf16>
    %53 = arith.truncf %51 : vector<64x64xf32> to vector<64x64xbf16>
    %cst_25 = arith.constant dense<0.000000e+00> : vector<16x64xf32>
    %54 = tpu.matmul %52, %53, %cst_25 {dimension_numbers = #tpu.dot_dimension_numbers<[1], [0], [0], [1], [0, 0, 1, 1], [], []>} : vector<16x64xbf16>, vector<64x64xbf16>, vector<16x64xf32> -> vector<16x64xf32>
    %cst_26 = arith.constant dense<0.000000e+00> : vector<16xf32>
    %55 = vector.multi_reduction <add>, %54, %cst_26 [1] : vector<16x64xf32> to vector<16xf32>
    %56 = vector.shape_cast %55 : vector<16xf32> to vector<16x1xf32>
    %cst_27 = arith.constant 6.400000e+01 : f32
    %57 = vector.broadcast %cst_27 : f32 to vector<16x1xf32>
    %58 = arith.divf %56, %57 : vector<16x1xf32>
    %59 = vector.broadcast %58 : vector<16x1xf32> to vector<16x64xf32>
    %60 = arith.subf %54, %59 : vector<16x64xf32>
    %61 = arith.mulf %60, %60 : vector<16x64xf32>
    %cst_28 = arith.constant dense<0.000000e+00> : vector<16xf32>
    %62 = vector.multi_reduction <add>, %61, %cst_28 [1] : vector<16x64xf32> to vector<16xf32>
    %63 = vector.shape_cast %62 : vector<16xf32> to vector<16x1xf32>
    %cst_29 = arith.constant 6.400000e+01 : f32
    %64 = vector.broadcast %cst_29 : f32 to vector<16x1xf32>
    %65 = arith.divf %63, %64 : vector<16x1xf32>
    %66 = vector.broadcast %58 : vector<16x1xf32> to vector<16x64xf32>
    %67 = arith.subf %54, %66 : vector<16x64xf32>
    %cst_30 = arith.constant 9.99999974E-6 : f32
    %68 = vector.broadcast %cst_30 : f32 to vector<16x1xf32>
    %69 = arith.addf %65, %68 : vector<16x1xf32>
    %70 = math.rsqrt %69 : vector<16x1xf32>
    %71 = vector.broadcast %70 : vector<16x1xf32> to vector<16x64xf32>
    %72 = arith.mulf %67, %71 : vector<16x64xf32>
    %c0_31 = arith.constant 0 : index
    %c0_32 = arith.constant 0 : index
    %73 = vector.load %arg12[%c0_31, %c0_32] : memref<1x64xf32, #tpu.memory_space<vmem>>, vector<1x64xf32>
    %74 = vector.broadcast %73 : vector<1x64xf32> to vector<16x64xf32>
    %75 = arith.mulf %72, %74 : vector<16x64xf32>
    %c0_33 = arith.constant 0 : index
    %c0_34 = arith.constant 0 : index
    %76 = vector.load %arg13[%c0_33, %c0_34] : memref<1x64xf32, #tpu.memory_space<vmem>>, vector<1x64xf32>
    %77 = vector.broadcast %76 : vector<1x64xf32> to vector<16x64xf32>
    %78 = arith.addf %75, %77 : vector<16x64xf32>
    %79 = arith.truncf %78 : vector<16x64xf32> to vector<16x64xbf16>
    %c0_35 = arith.constant 0 : index
    %c0_36 = arith.constant 0 : index
    %80 = vector.load %arg2[%c0_35, %c0_36] : memref<64x64xbf16, #tpu.memory_space<vmem>>, vector<64x64xbf16>
    %cst_37 = arith.constant dense<0.000000e+00> : vector<64x64xf32>
    %81 = tpu.matmul %2, %80, %cst_37 {dimension_numbers = #tpu.dot_dimension_numbers<[1], [0], [0], [1], [0, 0, 1, 1], [], []>} : vector<64x64xbf16>, vector<64x64xbf16>, vector<64x64xf32> -> vector<64x64xf32>
    %c0_38 = arith.constant 0 : index
    %c0_39 = arith.constant 0 : index
    %82 = vector.load %arg3[%c0_38, %c0_39] : memref<1x64xf32, #tpu.memory_space<vmem>>, vector<1x64xf32>
    %83 = vector.broadcast %82 : vector<1x64xf32> to vector<64x64xf32>
    %84 = arith.addf %81, %83 : vector<64x64xf32>
    %c0_40 = arith.constant 0 : index
    %c0_41 = arith.constant 0 : index
    %85 = vector.load %arg4[%c0_40, %c0_41] : memref<64x64xbf16, #tpu.memory_space<vmem>>, vector<64x64xbf16>
    %cst_42 = arith.constant dense<0.000000e+00> : vector<64x64xf32>
    %86 = tpu.matmul %2, %85, %cst_42 {dimension_numbers = #tpu.dot_dimension_numbers<[1], [0], [0], [1], [0, 0, 1, 1], [], []>} : vector<64x64xbf16>, vector<64x64xbf16>, vector<64x64xf32> -> vector<64x64xf32>
    %c0_43 = arith.constant 0 : index
    %c0_44 = arith.constant 0 : index
    %87 = vector.load %arg5[%c0_43, %c0_44] : memref<1x64xf32, #tpu.memory_space<vmem>>, vector<1x64xf32>
    %88 = vector.broadcast %87 : vector<1x64xf32> to vector<64x64xf32>
    %89 = arith.addf %86, %88 : vector<64x64xf32>
    %c0_45 = arith.constant 0 : index
    %c0_46 = arith.constant 0 : index
    %90 = vector.load %arg6[%c0_45, %c0_46] : memref<64x64xbf16, #tpu.memory_space<vmem>>, vector<64x64xbf16>
    %cst_47 = arith.constant dense<0.000000e+00> : vector<64x64xf32>
    %91 = tpu.matmul %2, %90, %cst_47 {dimension_numbers = #tpu.dot_dimension_numbers<[1], [0], [0], [1], [0, 0, 1, 1], [], []>} : vector<64x64xbf16>, vector<64x64xbf16>, vector<64x64xf32> -> vector<64x64xf32>
    %c0_48 = arith.constant 0 : index
    %c0_49 = arith.constant 0 : index
    %92 = vector.load %arg7[%c0_48, %c0_49] : memref<1x64xf32, #tpu.memory_space<vmem>>, vector<1x64xf32>
    %93 = vector.broadcast %92 : vector<1x64xf32> to vector<64x64xf32>
    %94 = arith.addf %91, %93 : vector<64x64xf32>
    %c0_50 = arith.constant 0 : index
    %c0_51 = arith.constant 0 : index
    %95 = vector.load %arg4[%c0_50, %c0_51] : memref<64x64xbf16, #tpu.memory_space<vmem>>, vector<64x64xbf16>
    %cst_52 = arith.constant dense<0.000000e+00> : vector<16x64xf32>
    %96 = tpu.matmul %79, %95, %cst_52 {dimension_numbers = #tpu.dot_dimension_numbers<[1], [0], [0], [1], [0, 0, 1, 1], [], []>} : vector<16x64xbf16>, vector<64x64xbf16>, vector<16x64xf32> -> vector<16x64xf32>
    %c0_53 = arith.constant 0 : index
    %c0_54 = arith.constant 0 : index
    %97 = vector.load %arg5[%c0_53, %c0_54] : memref<1x64xf32, #tpu.memory_space<vmem>>, vector<1x64xf32>
    %98 = vector.broadcast %97 : vector<1x64xf32> to vector<16x64xf32>
    %99 = arith.addf %96, %98 : vector<16x64xf32>
    %c0_55 = arith.constant 0 : index
    %c0_56 = arith.constant 0 : index
    %100 = vector.load %arg6[%c0_55, %c0_56] : memref<64x64xbf16, #tpu.memory_space<vmem>>, vector<64x64xbf16>
    %cst_57 = arith.constant dense<0.000000e+00> : vector<16x64xf32>
    %101 = tpu.matmul %79, %100, %cst_57 {dimension_numbers = #tpu.dot_dimension_numbers<[1], [0], [0], [1], [0, 0, 1, 1], [], []>} : vector<16x64xbf16>, vector<64x64xbf16>, vector<16x64xf32> -> vector<16x64xf32>
    %c0_58 = arith.constant 0 : index
    %c0_59 = arith.constant 0 : index
    %102 = vector.load %arg7[%c0_58, %c0_59] : memref<1x64xf32, #tpu.memory_space<vmem>>, vector<1x64xf32>
    %103 = vector.broadcast %102 : vector<1x64xf32> to vector<16x64xf32>
    %104 = arith.addf %101, %103 : vector<16x64xf32>
    %c0_60 = arith.constant 0 : index
    %c0_61 = arith.constant 0 : index
    %105 = vector.load %arg15[%c0_60, %c0_61] : memref<64x64xf32, #tpu.memory_space<vmem>>, vector<64x64xf32>
    %106 = arith.mulf %84, %84 : vector<64x64xf32>
    %cst_62 = arith.constant dense<0.000000e+00> : vector<64x64xf32>
    %107 = tpu.matmul %106, %105, %cst_62 {dimension_numbers = #tpu.dot_dimension_numbers<[1], [0], [0], [1], [0, 0, 1, 1], [], []>} : vector<64x64xf32>, vector<64x64xf32>, vector<64x64xf32> -> vector<64x64xf32>
    %cst_63 = arith.constant 1.000000e-24 : f32
    %108 = vector.broadcast %cst_63 : f32 to vector<64x64xf32>
    %109 = arith.maximumf %107, %108 : vector<64x64xf32>
    %110 = math.rsqrt %109 : vector<64x64xf32>
    %111 = arith.mulf %84, %110 : vector<64x64xf32>
    %112 = arith.mulf %89, %89 : vector<64x64xf32>
    %cst_64 = arith.constant dense<0.000000e+00> : vector<64x64xf32>
    %113 = tpu.matmul %112, %105, %cst_64 {dimension_numbers = #tpu.dot_dimension_numbers<[1], [0], [0], [1], [0, 0, 1, 1], [], []>} : vector<64x64xf32>, vector<64x64xf32>, vector<64x64xf32> -> vector<64x64xf32>
    %cst_65 = arith.constant 1.000000e-24 : f32
    %114 = vector.broadcast %cst_65 : f32 to vector<64x64xf32>
    %115 = arith.maximumf %113, %114 : vector<64x64xf32>
    %116 = math.rsqrt %115 : vector<64x64xf32>
    %117 = arith.mulf %89, %116 : vector<64x64xf32>
    %118 = arith.mulf %99, %99 : vector<16x64xf32>
    %cst_66 = arith.constant dense<0.000000e+00> : vector<16x64xf32>
    %119 = tpu.matmul %118, %105, %cst_66 {dimension_numbers = #tpu.dot_dimension_numbers<[1], [0], [0], [1], [0, 0, 1, 1], [], []>} : vector<16x64xf32>, vector<64x64xf32>, vector<16x64xf32> -> vector<16x64xf32>
    %cst_67 = arith.constant 1.000000e-24 : f32
    %120 = vector.broadcast %cst_67 : f32 to vector<16x64xf32>
    %121 = arith.maximumf %119, %120 : vector<16x64xf32>
    %122 = math.rsqrt %121 : vector<16x64xf32>
    %123 = arith.mulf %99, %122 : vector<16x64xf32>
    %c0_68 = arith.constant 0 : index
    %c0_69 = arith.constant 0 : index
    %124 = vector.load %arg17[%c0_68, %c0_69] : memref<1x64xf32, #tpu.memory_space<vmem>>, vector<1x64xf32>
    %125 = vector.broadcast %124 : vector<1x64xf32> to vector<64x64xf32>
    %126 = arith.addf %111, %125 : vector<64x64xf32>
    %c0_70 = arith.constant 0 : index
    %c0_71 = arith.constant 0 : index
    %127 = vector.load %arg16[%c0_70, %c0_71] : memref<64x64xf32, #tpu.memory_space<vmem>>, vector<64x64xf32>
    %128 = arith.mulf %126, %127 : vector<64x64xf32>
    %129 = tpu.concatenate %117, %123 in 0 : vector<64x64xf32>, vector<16x64xf32> -> vector<80x64xf32>
    %130 = tpu.concatenate %94, %104 in 0 : vector<64x64xf32>, vector<16x64xf32> -> vector<80x64xf32>
    %131 = vector.extract_strided_slice %128 {offsets = [0, 0], sizes = [64, 8], strides = [1, 1]} : vector<64x64xf32> to vector<64x8xf32>
    %132 = vector.extract_strided_slice %129 {offsets = [0, 0], sizes = [80, 8], strides = [1, 1]} : vector<80x64xf32> to vector<80x8xf32>
    %cst_72 = arith.constant dense<0.000000e+00> : vector<64x80xf32>
    %133 = tpu.matmul %131, %132, %cst_72 {dimension_numbers = #tpu.dot_dimension_numbers<[1], [1], [0], [0], [0, 0, 1, 0], [], []>} : vector<64x8xf32>, vector<80x8xf32>, vector<64x80xf32> -> vector<64x80xf32>
    %c0_73 = arith.constant 0 : index
    %c0_74 = arith.constant 0 : index
    %c0_75 = arith.constant 0 : index
    %134 = vector.load %arg18[%c0_73, %c0_74, %c0_75] : memref<8x64x80xbf16, #tpu.memory_space<vmem>>, vector<1x64x80xbf16>
    %135 = vector.shape_cast %134 : vector<1x64x80xbf16> to vector<64x80xbf16>
    %136 = arith.extf %135 : vector<64x80xbf16> to vector<64x80xf32>
    %137 = arith.addf %133, %136 : vector<64x80xf32>
    %cst_76 = arith.constant dense<0xFF800000> : vector<64xf32>
    %138 = vector.multi_reduction <maximumf>, %137, %cst_76 [1] : vector<64x80xf32> to vector<64xf32>
    %139 = vector.shape_cast %138 : vector<64xf32> to vector<64x1xf32>
    %140 = vector.broadcast %139 : vector<64x1xf32> to vector<64x80xf32>
    %141 = arith.subf %137, %140 : vector<64x80xf32>
    %142 = math.exp %141 : vector<64x80xf32>
    %cst_77 = arith.constant dense<0.000000e+00> : vector<64xf32>
    %143 = vector.multi_reduction <add>, %142, %cst_77 [1] : vector<64x80xf32> to vector<64xf32>
    %144 = vector.shape_cast %143 : vector<64xf32> to vector<64x1xf32>
    %cst_78 = arith.constant 1.000000e+00 : f32
    %145 = vector.broadcast %cst_78 : f32 to vector<64x1xf32>
    %146 = arith.divf %145, %144 : vector<64x1xf32>
    %147 = vector.broadcast %146 : vector<64x1xf32> to vector<64x80xf32>
    %148 = arith.mulf %142, %147 : vector<64x80xf32>
    %149 = vector.extract_strided_slice %130 {offsets = [0, 0], sizes = [80, 8], strides = [1, 1]} : vector<80x64xf32> to vector<80x8xf32>
    %cst_79 = arith.constant dense<0.000000e+00> : vector<64x8xf32>
    %150 = tpu.matmul %148, %149, %cst_79 {dimension_numbers = #tpu.dot_dimension_numbers<[1], [0], [0], [1], [0, 0, 1, 1], [], []>} : vector<64x80xf32>, vector<80x8xf32>, vector<64x8xf32> -> vector<64x8xf32>
    %c0_80 = arith.constant 0 : index
    %c0_81 = arith.constant 0 : index
    %151 = vector.load %arg23[%c0_80, %c0_81] : memref<64x64xf32, #tpu.memory_space<vmem>>, vector<64x8xf32>
    tpu.vector_store %arg23[%c0_80, %c0_81], %150 {strides = array<i32>} : memref<64x64xf32, #tpu.memory_space<vmem>>, vector<64x8xf32>,
    %152 = vector.extract_strided_slice %128 {offsets = [0, 8], sizes = [64, 8], strides = [1, 1]} : vector<64x64xf32> to vector<64x8xf32>
    %153 = vector.extract_strided_slice %129 {offsets = [0, 8], sizes = [80, 8], strides = [1, 1]} : vector<80x64xf32> to vector<80x8xf32>
    %cst_82 = arith.constant dense<0.000000e+00> : vector<64x80xf32>
    %154 = tpu.matmul %152, %153, %cst_82 {dimension_numbers = #tpu.dot_dimension_numbers<[1], [1], [0], [0], [0, 0, 1, 0], [], []>} : vector<64x8xf32>, vector<80x8xf32>, vector<64x80xf32> -> vector<64x80xf32>
    %c1 = arith.constant 1 : index
    %c0_83 = arith.constant 0 : index
    %c0_84 = arith.constant 0 : index
    %155 = vector.load %arg18[%c1, %c0_83, %c0_84] : memref<8x64x80xbf16, #tpu.memory_space<vmem>>, vector<1x64x80xbf16>
    %156 = vector.shape_cast %155 : vector<1x64x80xbf16> to vector<64x80xbf16>
    %157 = arith.extf %156 : vector<64x80xbf16> to vector<64x80xf32>
    %158 = arith.addf %154, %157 : vector<64x80xf32>
    %cst_85 = arith.constant dense<0xFF800000> : vector<64xf32>
    %159 = vector.multi_reduction <maximumf>, %158, %cst_85 [1] : vector<64x80xf32> to vector<64xf32>
    %160 = vector.shape_cast %159 : vector<64xf32> to vector<64x1xf32>
    %161 = vector.broadcast %160 : vector<64x1xf32> to vector<64x80xf32>
    %162 = arith.subf %158, %161 : vector<64x80xf32>
    %163 = math.exp %162 : vector<64x80xf32>
    %cst_86 = arith.constant dense<0.000000e+00> : vector<64xf32>
    %164 = vector.multi_reduction <add>, %163, %cst_86 [1] : vector<64x80xf32> to vector<64xf32>
    %165 = vector.shape_cast %164 : vector<64xf32> to vector<64x1xf32>
    %cst_87 = arith.constant 1.000000e+00 : f32
    %166 = vector.broadcast %cst_87 : f32 to vector<64x1xf32>
    %167 = arith.divf %166, %165 : vector<64x1xf32>
    %168 = vector.broadcast %167 : vector<64x1xf32> to vector<64x80xf32>
    %169 = arith.mulf %163, %168 : vector<64x80xf32>
    %170 = vector.extract_strided_slice %130 {offsets = [0, 8], sizes = [80, 8], strides = [1, 1]} : vector<80x64xf32> to vector<80x8xf32>
    %cst_88 = arith.constant dense<0.000000e+00> : vector<64x8xf32>
    %171 = tpu.matmul %169, %170, %cst_88 {dimension_numbers = #tpu.dot_dimension_numbers<[1], [0], [0], [1], [0, 0, 1, 1], [], []>} : vector<64x80xf32>, vector<80x8xf32>, vector<64x8xf32> -> vector<64x8xf32>
    %c0_89 = arith.constant 0 : index
    %c8 = arith.constant 8 : index
    %172 = vector.load %arg23[%c0_89, %c8] : memref<64x64xf32, #tpu.memory_space<vmem>>, vector<64x8xf32>
    tpu.vector_store %arg23[%c0_89, %c8], %171 {strides = array<i32>} : memref<64x64xf32, #tpu.memory_space<vmem>>, vector<64x8xf32>,
    %173 = vector.extract_strided_slice %128 {offsets = [0, 16], sizes = [64, 8], strides = [1, 1]} : vector<64x64xf32> to vector<64x8xf32>
    %174 = vector.extract_strided_slice %129 {offsets = [0, 16], sizes = [80, 8], strides = [1, 1]} : vector<80x64xf32> to vector<80x8xf32>
    %cst_90 = arith.constant dense<0.000000e+00> : vector<64x80xf32>
    %175 = tpu.matmul %173, %174, %cst_90 {dimension_numbers = #tpu.dot_dimension_numbers<[1], [1], [0], [0], [0, 0, 1, 0], [], []>} : vector<64x8xf32>, vector<80x8xf32>, vector<64x80xf32> -> vector<64x80xf32>
    %c2 = arith.constant 2 : index
    %c0_91 = arith.constant 0 : index
    %c0_92 = arith.constant 0 : index
    %176 = vector.load %arg18[%c2, %c0_91, %c0_92] : memref<8x64x80xbf16, #tpu.memory_space<vmem>>, vector<1x64x80xbf16>
    %177 = vector.shape_cast %176 : vector<1x64x80xbf16> to vector<64x80xbf16>
    %178 = arith.extf %177 : vector<64x80xbf16> to vector<64x80xf32>
    %179 = arith.addf %175, %178 : vector<64x80xf32>
    %cst_93 = arith.constant dense<0xFF800000> : vector<64xf32>
    %180 = vector.multi_reduction <maximumf>, %179, %cst_93 [1] : vector<64x80xf32> to vector<64xf32>
    %181 = vector.shape_cast %180 : vector<64xf32> to vector<64x1xf32>
    %182 = vector.broadcast %181 : vector<64x1xf32> to vector<64x80xf32>
    %183 = arith.subf %179, %182 : vector<64x80xf32>
    %184 = math.exp %183 : vector<64x80xf32>
    %cst_94 = arith.constant dense<0.000000e+00> : vector<64xf32>
    %185 = vector.multi_reduction <add>, %184, %cst_94 [1] : vector<64x80xf32> to vector<64xf32>
    %186 = vector.shape_cast %185 : vector<64xf32> to vector<64x1xf32>
    %cst_95 = arith.constant 1.000000e+00 : f32
    %187 = vector.broadcast %cst_95 : f32 to vector<64x1xf32>
    %188 = arith.divf %187, %186 : vector<64x1xf32>
    %189 = vector.broadcast %188 : vector<64x1xf32> to vector<64x80xf32>
    %190 = arith.mulf %184, %189 : vector<64x80xf32>
    %191 = vector.extract_strided_slice %130 {offsets = [0, 16], sizes = [80, 8], strides = [1, 1]} : vector<80x64xf32> to vector<80x8xf32>
    %cst_96 = arith.constant dense<0.000000e+00> : vector<64x8xf32>
    %192 = tpu.matmul %190, %191, %cst_96 {dimension_numbers = #tpu.dot_dimension_numbers<[1], [0], [0], [1], [0, 0, 1, 1], [], []>} : vector<64x80xf32>, vector<80x8xf32>, vector<64x8xf32> -> vector<64x8xf32>
    %c0_97 = arith.constant 0 : index
    %c16 = arith.constant 16 : index
    %193 = vector.load %arg23[%c0_97, %c16] : memref<64x64xf32, #tpu.memory_space<vmem>>, vector<64x8xf32>
    tpu.vector_store %arg23[%c0_97, %c16], %192 {strides = array<i32>} : memref<64x64xf32, #tpu.memory_space<vmem>>, vector<64x8xf32>,
    %194 = vector.extract_strided_slice %128 {offsets = [0, 24], sizes = [64, 8], strides = [1, 1]} : vector<64x64xf32> to vector<64x8xf32>
    %195 = vector.extract_strided_slice %129 {offsets = [0, 24], sizes = [80, 8], strides = [1, 1]} : vector<80x64xf32> to vector<80x8xf32>
    %cst_98 = arith.constant dense<0.000000e+00> : vector<64x80xf32>
    %196 = tpu.matmul %194, %195, %cst_98 {dimension_numbers = #tpu.dot_dimension_numbers<[1], [1], [0], [0], [0, 0, 1, 0], [], []>} : vector<64x8xf32>, vector<80x8xf32>, vector<64x80xf32> -> vector<64x80xf32>
    %c3 = arith.constant 3 : index
    %c0_99 = arith.constant 0 : index
    %c0_100 = arith.constant 0 : index
    %197 = vector.load %arg18[%c3, %c0_99, %c0_100] : memref<8x64x80xbf16, #tpu.memory_space<vmem>>, vector<1x64x80xbf16>
    %198 = vector.shape_cast %197 : vector<1x64x80xbf16> to vector<64x80xbf16>
    %199 = arith.extf %198 : vector<64x80xbf16> to vector<64x80xf32>
    %200 = arith.addf %196, %199 : vector<64x80xf32>
    %cst_101 = arith.constant dense<0xFF800000> : vector<64xf32>
    %201 = vector.multi_reduction <maximumf>, %200, %cst_101 [1] : vector<64x80xf32> to vector<64xf32>
    %202 = vector.shape_cast %201 : vector<64xf32> to vector<64x1xf32>
    %203 = vector.broadcast %202 : vector<64x1xf32> to vector<64x80xf32>
    %204 = arith.subf %200, %203 : vector<64x80xf32>
    %205 = math.exp %204 : vector<64x80xf32>
    %cst_102 = arith.constant dense<0.000000e+00> : vector<64xf32>
    %206 = vector.multi_reduction <add>, %205, %cst_102 [1] : vector<64x80xf32> to vector<64xf32>
    %207 = vector.shape_cast %206 : vector<64xf32> to vector<64x1xf32>
    %cst_103 = arith.constant 1.000000e+00 : f32
    %208 = vector.broadcast %cst_103 : f32 to vector<64x1xf32>
    %209 = arith.divf %208, %207 : vector<64x1xf32>
    %210 = vector.broadcast %209 : vector<64x1xf32> to vector<64x80xf32>
    %211 = arith.mulf %205, %210 : vector<64x80xf32>
    %212 = vector.extract_strided_slice %130 {offsets = [0, 24], sizes = [80, 8], strides = [1, 1]} : vector<80x64xf32> to vector<80x8xf32>
    %cst_104 = arith.constant dense<0.000000e+00> : vector<64x8xf32>
    %213 = tpu.matmul %211, %212, %cst_104 {dimension_numbers = #tpu.dot_dimension_numbers<[1], [0], [0], [1], [0, 0, 1, 1], [], []>} : vector<64x80xf32>, vector<80x8xf32>, vector<64x8xf32> -> vector<64x8xf32>
    %c0_105 = arith.constant 0 : index
    %c24 = arith.constant 24 : index
    %214 = vector.load %arg23[%c0_105, %c24] : memref<64x64xf32, #tpu.memory_space<vmem>>, vector<64x8xf32>
    tpu.vector_store %arg23[%c0_105, %c24], %213 {strides = array<i32>} : memref<64x64xf32, #tpu.memory_space<vmem>>, vector<64x8xf32>,
    %215 = vector.extract_strided_slice %128 {offsets = [0, 32], sizes = [64, 8], strides = [1, 1]} : vector<64x64xf32> to vector<64x8xf32>
    %216 = vector.extract_strided_slice %129 {offsets = [0, 32], sizes = [80, 8], strides = [1, 1]} : vector<80x64xf32> to vector<80x8xf32>
    %cst_106 = arith.constant dense<0.000000e+00> : vector<64x80xf32>
    %217 = tpu.matmul %215, %216, %cst_106 {dimension_numbers = #tpu.dot_dimension_numbers<[1], [1], [0], [0], [0, 0, 1, 0], [], []>} : vector<64x8xf32>, vector<80x8xf32>, vector<64x80xf32> -> vector<64x80xf32>
    %c4 = arith.constant 4 : index
    %c0_107 = arith.constant 0 : index
    %c0_108 = arith.constant 0 : index
    %218 = vector.load %arg18[%c4, %c0_107, %c0_108] : memref<8x64x80xbf16, #tpu.memory_space<vmem>>, vector<1x64x80xbf16>
    %219 = vector.shape_cast %218 : vector<1x64x80xbf16> to vector<64x80xbf16>
    %220 = arith.extf %219 : vector<64x80xbf16> to vector<64x80xf32>
    %221 = arith.addf %217, %220 : vector<64x80xf32>
    %cst_109 = arith.constant dense<0xFF800000> : vector<64xf32>
    %222 = vector.multi_reduction <maximumf>, %221, %cst_109 [1] : vector<64x80xf32> to vector<64xf32>
    %223 = vector.shape_cast %222 : vector<64xf32> to vector<64x1xf32>
    %224 = vector.broadcast %223 : vector<64x1xf32> to vector<64x80xf32>
    %225 = arith.subf %221, %224 : vector<64x80xf32>
    %226 = math.exp %225 : vector<64x80xf32>
    %cst_110 = arith.constant dense<0.000000e+00> : vector<64xf32>
    %227 = vector.multi_reduction <add>, %226, %cst_110 [1] : vector<64x80xf32> to vector<64xf32>
    %228 = vector.shape_cast %227 : vector<64xf32> to vector<64x1xf32>
    %cst_111 = arith.constant 1.000000e+00 : f32
    %229 = vector.broadcast %cst_111 : f32 to vector<64x1xf32>
    %230 = arith.divf %229, %228 : vector<64x1xf32>
    %231 = vector.broadcast %230 : vector<64x1xf32> to vector<64x80xf32>
    %232 = arith.mulf %226, %231 : vector<64x80xf32>
    %233 = vector.extract_strided_slice %130 {offsets = [0, 32], sizes = [80, 8], strides = [1, 1]} : vector<80x64xf32> to vector<80x8xf32>
    %cst_112 = arith.constant dense<0.000000e+00> : vector<64x8xf32>
    %234 = tpu.matmul %232, %233, %cst_112 {dimension_numbers = #tpu.dot_dimension_numbers<[1], [0], [0], [1], [0, 0, 1, 1], [], []>} : vector<64x80xf32>, vector<80x8xf32>, vector<64x8xf32> -> vector<64x8xf32>
    %c0_113 = arith.constant 0 : index
    %c32 = arith.constant 32 : index
    %235 = vector.load %arg23[%c0_113, %c32] : memref<64x64xf32, #tpu.memory_space<vmem>>, vector<64x8xf32>
    tpu.vector_store %arg23[%c0_113, %c32], %234 {strides = array<i32>} : memref<64x64xf32, #tpu.memory_space<vmem>>, vector<64x8xf32>,
    %236 = vector.extract_strided_slice %128 {offsets = [0, 40], sizes = [64, 8], strides = [1, 1]} : vector<64x64xf32> to vector<64x8xf32>
    %237 = vector.extract_strided_slice %129 {offsets = [0, 40], sizes = [80, 8], strides = [1, 1]} : vector<80x64xf32> to vector<80x8xf32>
    %cst_114 = arith.constant dense<0.000000e+00> : vector<64x80xf32>
    %238 = tpu.matmul %236, %237, %cst_114 {dimension_numbers = #tpu.dot_dimension_numbers<[1], [1], [0], [0], [0, 0, 1, 0], [], []>} : vector<64x8xf32>, vector<80x8xf32>, vector<64x80xf32> -> vector<64x80xf32>
    %c5 = arith.constant 5 : index
    %c0_115 = arith.constant 0 : index
    %c0_116 = arith.constant 0 : index
    %239 = vector.load %arg18[%c5, %c0_115, %c0_116] : memref<8x64x80xbf16, #tpu.memory_space<vmem>>, vector<1x64x80xbf16>
    %240 = vector.shape_cast %239 : vector<1x64x80xbf16> to vector<64x80xbf16>
    %241 = arith.extf %240 : vector<64x80xbf16> to vector<64x80xf32>
    %242 = arith.addf %238, %241 : vector<64x80xf32>
    %cst_117 = arith.constant dense<0xFF800000> : vector<64xf32>
    %243 = vector.multi_reduction <maximumf>, %242, %cst_117 [1] : vector<64x80xf32> to vector<64xf32>
    %244 = vector.shape_cast %243 : vector<64xf32> to vector<64x1xf32>
    %245 = vector.broadcast %244 : vector<64x1xf32> to vector<64x80xf32>
    %246 = arith.subf %242, %245 : vector<64x80xf32>
    %247 = math.exp %246 : vector<64x80xf32>
    %cst_118 = arith.constant dense<0.000000e+00> : vector<64xf32>
    %248 = vector.multi_reduction <add>, %247, %cst_118 [1] : vector<64x80xf32> to vector<64xf32>
    %249 = vector.shape_cast %248 : vector<64xf32> to vector<64x1xf32>
    %cst_119 = arith.constant 1.000000e+00 : f32
    %250 = vector.broadcast %cst_119 : f32 to vector<64x1xf32>
    %251 = arith.divf %250, %249 : vector<64x1xf32>
    %252 = vector.broadcast %251 : vector<64x1xf32> to vector<64x80xf32>
    %253 = arith.mulf %247, %252 : vector<64x80xf32>
    %254 = vector.extract_strided_slice %130 {offsets = [0, 40], sizes = [80, 8], strides = [1, 1]} : vector<80x64xf32> to vector<80x8xf32>
    %cst_120 = arith.constant dense<0.000000e+00> : vector<64x8xf32>
    %255 = tpu.matmul %253, %254, %cst_120 {dimension_numbers = #tpu.dot_dimension_numbers<[1], [0], [0], [1], [0, 0, 1, 1], [], []>} : vector<64x80xf32>, vector<80x8xf32>, vector<64x8xf32> -> vector<64x8xf32>
    %c0_121 = arith.constant 0 : index
    %c40 = arith.constant 40 : index
    %256 = vector.load %arg23[%c0_121, %c40] : memref<64x64xf32, #tpu.memory_space<vmem>>, vector<64x8xf32>
    tpu.vector_store %arg23[%c0_121, %c40], %255 {strides = array<i32>} : memref<64x64xf32, #tpu.memory_space<vmem>>, vector<64x8xf32>,
    %257 = vector.extract_strided_slice %128 {offsets = [0, 48], sizes = [64, 8], strides = [1, 1]} : vector<64x64xf32> to vector<64x8xf32>
    %258 = vector.extract_strided_slice %129 {offsets = [0, 48], sizes = [80, 8], strides = [1, 1]} : vector<80x64xf32> to vector<80x8xf32>
    %cst_122 = arith.constant dense<0.000000e+00> : vector<64x80xf32>
    %259 = tpu.matmul %257, %258, %cst_122 {dimension_numbers = #tpu.dot_dimension_numbers<[1], [1], [0], [0], [0, 0, 1, 0], [], []>} : vector<64x8xf32>, vector<80x8xf32>, vector<64x80xf32> -> vector<64x80xf32>
    %c6 = arith.constant 6 : index
    %c0_123 = arith.constant 0 : index
    %c0_124 = arith.constant 0 : index
    %260 = vector.load %arg18[%c6, %c0_123, %c0_124] : memref<8x64x80xbf16, #tpu.memory_space<vmem>>, vector<1x64x80xbf16>
    %261 = vector.shape_cast %260 : vector<1x64x80xbf16> to vector<64x80xbf16>
    %262 = arith.extf %261 : vector<64x80xbf16> to vector<64x80xf32>
    %263 = arith.addf %259, %262 : vector<64x80xf32>
    %cst_125 = arith.constant dense<0xFF800000> : vector<64xf32>
    %264 = vector.multi_reduction <maximumf>, %263, %cst_125 [1] : vector<64x80xf32> to vector<64xf32>
    %265 = vector.shape_cast %264 : vector<64xf32> to vector<64x1xf32>
    %266 = vector.broadcast %265 : vector<64x1xf32> to vector<64x80xf32>
    %267 = arith.subf %263, %266 : vector<64x80xf32>
    %268 = math.exp %267 : vector<64x80xf32>
    %cst_126 = arith.constant dense<0.000000e+00> : vector<64xf32>
    %269 = vector.multi_reduction <add>, %268, %cst_126 [1] : vector<64x80xf32> to vector<64xf32>
    %270 = vector.shape_cast %269 : vector<64xf32> to vector<64x1xf32>
    %cst_127 = arith.constant 1.000000e+00 : f32
    %271 = vector.broadcast %cst_127 : f32 to vector<64x1xf32>
    %272 = arith.divf %271, %270 : vector<64x1xf32>
    %273 = vector.broadcast %272 : vector<64x1xf32> to vector<64x80xf32>
    %274 = arith.mulf %268, %273 : vector<64x80xf32>
    %275 = vector.extract_strided_slice %130 {offsets = [0, 48], sizes = [80, 8], strides = [1, 1]} : vector<80x64xf32> to vector<80x8xf32>
    %cst_128 = arith.constant dense<0.000000e+00> : vector<64x8xf32>
    %276 = tpu.matmul %274, %275, %cst_128 {dimension_numbers = #tpu.dot_dimension_numbers<[1], [0], [0], [1], [0, 0, 1, 1], [], []>} : vector<64x80xf32>, vector<80x8xf32>, vector<64x8xf32> -> vector<64x8xf32>
    %c0_129 = arith.constant 0 : index
    %c48 = arith.constant 48 : index
    %277 = vector.load %arg23[%c0_129, %c48] : memref<64x64xf32, #tpu.memory_space<vmem>>, vector<64x8xf32>
    tpu.vector_store %arg23[%c0_129, %c48], %276 {strides = array<i32>} : memref<64x64xf32, #tpu.memory_space<vmem>>, vector<64x8xf32>,
    %278 = vector.extract_strided_slice %128 {offsets = [0, 56], sizes = [64, 8], strides = [1, 1]} : vector<64x64xf32> to vector<64x8xf32>
    %279 = vector.extract_strided_slice %129 {offsets = [0, 56], sizes = [80, 8], strides = [1, 1]} : vector<80x64xf32> to vector<80x8xf32>
    %cst_130 = arith.constant dense<0.000000e+00> : vector<64x80xf32>
    %280 = tpu.matmul %278, %279, %cst_130 {dimension_numbers = #tpu.dot_dimension_numbers<[1], [1], [0], [0], [0, 0, 1, 0], [], []>} : vector<64x8xf32>, vector<80x8xf32>, vector<64x80xf32> -> vector<64x80xf32>
    %c7 = arith.constant 7 : index
    %c0_131 = arith.constant 0 : index
    %c0_132 = arith.constant 0 : index
    %281 = vector.load %arg18[%c7, %c0_131, %c0_132] : memref<8x64x80xbf16, #tpu.memory_space<vmem>>, vector<1x64x80xbf16>
    %282 = vector.shape_cast %281 : vector<1x64x80xbf16> to vector<64x80xbf16>
    %283 = arith.extf %282 : vector<64x80xbf16> to vector<64x80xf32>
    %284 = arith.addf %280, %283 : vector<64x80xf32>
    %cst_133 = arith.constant dense<0xFF800000> : vector<64xf32>
    %285 = vector.multi_reduction <maximumf>, %284, %cst_133 [1] : vector<64x80xf32> to vector<64xf32>
    %286 = vector.shape_cast %285 : vector<64xf32> to vector<64x1xf32>
    %287 = vector.broadcast %286 : vector<64x1xf32> to vector<64x80xf32>
    %288 = arith.subf %284, %287 : vector<64x80xf32>
    %289 = math.exp %288 : vector<64x80xf32>
    %cst_134 = arith.constant dense<0.000000e+00> : vector<64xf32>
    %290 = vector.multi_reduction <add>, %289, %cst_134 [1] : vector<64x80xf32> to vector<64xf32>
    %291 = vector.shape_cast %290 : vector<64xf32> to vector<64x1xf32>
    %cst_135 = arith.constant 1.000000e+00 : f32
    %292 = vector.broadcast %cst_135 : f32 to vector<64x1xf32>
    %293 = arith.divf %292, %291 : vector<64x1xf32>
    %294 = vector.broadcast %293 : vector<64x1xf32> to vector<64x80xf32>
    %295 = arith.mulf %289, %294 : vector<64x80xf32>
    %296 = vector.extract_strided_slice %130 {offsets = [0, 56], sizes = [80, 8], strides = [1, 1]} : vector<80x64xf32> to vector<80x8xf32>
    %cst_136 = arith.constant dense<0.000000e+00> : vector<64x8xf32>
    %297 = tpu.matmul %295, %296, %cst_136 {dimension_numbers = #tpu.dot_dimension_numbers<[1], [0], [0], [1], [0, 0, 1, 1], [], []>} : vector<64x80xf32>, vector<80x8xf32>, vector<64x8xf32> -> vector<64x8xf32>
    %c0_137 = arith.constant 0 : index
    %c56 = arith.constant 56 : index
    %298 = vector.load %arg23[%c0_137, %c56] : memref<64x64xf32, #tpu.memory_space<vmem>>, vector<64x8xf32>
    tpu.vector_store %arg23[%c0_137, %c56], %297 {strides = array<i32>} : memref<64x64xf32, #tpu.memory_space<vmem>>, vector<64x8xf32>,
    %299 = arith.truncf %111 : vector<64x64xf32> to vector<64x64xbf16>
    %c0_138 = arith.constant 0 : index
    %c0_139 = arith.constant 0 : index
    %300 = vector.load %arg20[%c0_138, %c0_139] : memref<64x576xbf16, #tpu.memory_space<vmem>>, vector<64x576xbf16>
    %cst_140 = arith.constant dense<0.000000e+00> : vector<64x576xf32>
    %301 = tpu.matmul %299, %300, %cst_140 {dimension_numbers = #tpu.dot_dimension_numbers<[1], [0], [0], [1], [0, 0, 1, 1], [], []>} : vector<64x64xbf16>, vector<64x576xbf16>, vector<64x576xf32> -> vector<64x576xf32>
    %c0_141 = arith.constant 0 : index
    %c0_142 = arith.constant 0 : index
    %302 = vector.load %arg21[%c0_141, %c0_142] : memref<1x576xf32, #tpu.memory_space<vmem>>, vector<1x576xf32>
    %303 = vector.broadcast %302 : vector<1x576xf32> to vector<64x576xf32>
    %304 = arith.addf %301, %303 : vector<64x576xf32>
    %305 = arith.truncf %94 : vector<64x64xf32> to vector<64x64xbf16>
    %cst_143 = arith.constant 0.000000e+00 : f32
    %306 = vector.broadcast %cst_143 : f32 to vector<64x64xf32>
    %c0_144 = arith.constant 0 : index
    %c0_145 = arith.constant 0 : index
    %c0_146 = arith.constant 0 : index
    %307 = vector.load %arg19[%c0_144, %c0_145, %c0_146] : memref<9x64x64xbf16, #tpu.memory_space<vmem>>, vector<1x64x64xbf16>
    %308 = vector.shape_cast %307 : vector<1x64x64xbf16> to vector<64x64xbf16>
    %cst_147 = arith.constant dense<0.000000e+00> : vector<64x64xf32>
    %309 = tpu.matmul %308, %305, %cst_147 {dimension_numbers = #tpu.dot_dimension_numbers<[1], [0], [0], [1], [0, 0, 1, 1], [], []>} : vector<64x64xbf16>, vector<64x64xbf16>, vector<64x64xf32> -> vector<64x64xf32>
    %310 = vector.extract_strided_slice %304 {offsets = [0, 0], sizes = [64, 64], strides = [1, 1]} : vector<64x576xf32> to vector<64x64xf32>
    %311 = arith.mulf %310, %309 : vector<64x64xf32>
    %312 = arith.addf %306, %311 : vector<64x64xf32>
    %c1_148 = arith.constant 1 : index
    %c0_149 = arith.constant 0 : index
    %c0_150 = arith.constant 0 : index
    %313 = vector.load %arg19[%c1_148, %c0_149, %c0_150] : memref<9x64x64xbf16, #tpu.memory_space<vmem>>, vector<1x64x64xbf16>
    %314 = vector.shape_cast %313 : vector<1x64x64xbf16> to vector<64x64xbf16>
    %cst_151 = arith.constant dense<0.000000e+00> : vector<64x64xf32>
    %315 = tpu.matmul %314, %305, %cst_151 {dimension_numbers = #tpu.dot_dimension_numbers<[1], [0], [0], [1], [0, 0, 1, 1], [], []>} : vector<64x64xbf16>, vector<64x64xbf16>, vector<64x64xf32> -> vector<64x64xf32>
    %316 = vector.extract_strided_slice %304 {offsets = [0, 64], sizes = [64, 64], strides = [1, 1]} : vector<64x576xf32> to vector<64x64xf32>
    %317 = arith.mulf %316, %315 : vector<64x64xf32>
    %318 = arith.addf %312, %317 : vector<64x64xf32>
    %c2_152 = arith.constant 2 : index
    %c0_153 = arith.constant 0 : index
    %c0_154 = arith.constant 0 : index
    %319 = vector.load %arg19[%c2_152, %c0_153, %c0_154] : memref<9x64x64xbf16, #tpu.memory_space<vmem>>, vector<1x64x64xbf16>
    %320 = vector.shape_cast %319 : vector<1x64x64xbf16> to vector<64x64xbf16>
    %cst_155 = arith.constant dense<0.000000e+00> : vector<64x64xf32>
    %321 = tpu.matmul %320, %305, %cst_155 {dimension_numbers = #tpu.dot_dimension_numbers<[1], [0], [0], [1], [0, 0, 1, 1], [], []>} : vector<64x64xbf16>, vector<64x64xbf16>, vector<64x64xf32> -> vector<64x64xf32>
    %322 = vector.extract_strided_slice %304 {offsets = [0, 128], sizes = [64, 64], strides = [1, 1]} : vector<64x576xf32> to vector<64x64xf32>
    %323 = arith.mulf %322, %321 : vector<64x64xf32>
    %324 = arith.addf %318, %323 : vector<64x64xf32>
    %c3_156 = arith.constant 3 : index
    %c0_157 = arith.constant 0 : index
    %c0_158 = arith.constant 0 : index
    %325 = vector.load %arg19[%c3_156, %c0_157, %c0_158] : memref<9x64x64xbf16, #tpu.memory_space<vmem>>, vector<1x64x64xbf16>
    %326 = vector.shape_cast %325 : vector<1x64x64xbf16> to vector<64x64xbf16>
    %cst_159 = arith.constant dense<0.000000e+00> : vector<64x64xf32>
    %327 = tpu.matmul %326, %305, %cst_159 {dimension_numbers = #tpu.dot_dimension_numbers<[1], [0], [0], [1], [0, 0, 1, 1], [], []>} : vector<64x64xbf16>, vector<64x64xbf16>, vector<64x64xf32> -> vector<64x64xf32>
    %328 = vector.extract_strided_slice %304 {offsets = [0, 192], sizes = [64, 64], strides = [1, 1]} : vector<64x576xf32> to vector<64x64xf32>
    %329 = arith.mulf %328, %327 : vector<64x64xf32>
    %330 = arith.addf %324, %329 : vector<64x64xf32>
    %c4_160 = arith.constant 4 : index
    %c0_161 = arith.constant 0 : index
    %c0_162 = arith.constant 0 : index
    %331 = vector.load %arg19[%c4_160, %c0_161, %c0_162] : memref<9x64x64xbf16, #tpu.memory_space<vmem>>, vector<1x64x64xbf16>
    %332 = vector.shape_cast %331 : vector<1x64x64xbf16> to vector<64x64xbf16>
    %cst_163 = arith.constant dense<0.000000e+00> : vector<64x64xf32>
    %333 = tpu.matmul %332, %305, %cst_163 {dimension_numbers = #tpu.dot_dimension_numbers<[1], [0], [0], [1], [0, 0, 1, 1], [], []>} : vector<64x64xbf16>, vector<64x64xbf16>, vector<64x64xf32> -> vector<64x64xf32>
    %334 = vector.extract_strided_slice %304 {offsets = [0, 256], sizes = [64, 64], strides = [1, 1]} : vector<64x576xf32> to vector<64x64xf32>
    %335 = arith.mulf %334, %333 : vector<64x64xf32>
    %336 = arith.addf %330, %335 : vector<64x64xf32>
    %c5_164 = arith.constant 5 : index
    %c0_165 = arith.constant 0 : index
    %c0_166 = arith.constant 0 : index
    %337 = vector.load %arg19[%c5_164, %c0_165, %c0_166] : memref<9x64x64xbf16, #tpu.memory_space<vmem>>, vector<1x64x64xbf16>
    %338 = vector.shape_cast %337 : vector<1x64x64xbf16> to vector<64x64xbf16>
    %cst_167 = arith.constant dense<0.000000e+00> : vector<64x64xf32>
    %339 = tpu.matmul %338, %305, %cst_167 {dimension_numbers = #tpu.dot_dimension_numbers<[1], [0], [0], [1], [0, 0, 1, 1], [], []>} : vector<64x64xbf16>, vector<64x64xbf16>, vector<64x64xf32> -> vector<64x64xf32>
    %340 = vector.extract_strided_slice %304 {offsets = [0, 320], sizes = [64, 64], strides = [1, 1]} : vector<64x576xf32> to vector<64x64xf32>
    %341 = arith.mulf %340, %339 : vector<64x64xf32>
    %342 = arith.addf %336, %341 : vector<64x64xf32>
    %c6_168 = arith.constant 6 : index
    %c0_169 = arith.constant 0 : index
    %c0_170 = arith.constant 0 : index
    %343 = vector.load %arg19[%c6_168, %c0_169, %c0_170] : memref<9x64x64xbf16, #tpu.memory_space<vmem>>, vector<1x64x64xbf16>
    %344 = vector.shape_cast %343 : vector<1x64x64xbf16> to vector<64x64xbf16>
    %cst_171 = arith.constant dense<0.000000e+00> : vector<64x64xf32>
    %345 = tpu.matmul %344, %305, %cst_171 {dimension_numbers = #tpu.dot_dimension_numbers<[1], [0], [0], [1], [0, 0, 1, 1], [], []>} : vector<64x64xbf16>, vector<64x64xbf16>, vector<64x64xf32> -> vector<64x64xf32>
    %346 = vector.extract_strided_slice %304 {offsets = [0, 384], sizes = [64, 64], strides = [1, 1]} : vector<64x576xf32> to vector<64x64xf32>
    %347 = arith.mulf %346, %345 : vector<64x64xf32>
    %348 = arith.addf %342, %347 : vector<64x64xf32>
    %c7_172 = arith.constant 7 : index
    %c0_173 = arith.constant 0 : index
    %c0_174 = arith.constant 0 : index
    %349 = vector.load %arg19[%c7_172, %c0_173, %c0_174] : memref<9x64x64xbf16, #tpu.memory_space<vmem>>, vector<1x64x64xbf16>
    %350 = vector.shape_cast %349 : vector<1x64x64xbf16> to vector<64x64xbf16>
    %cst_175 = arith.constant dense<0.000000e+00> : vector<64x64xf32>
    %351 = tpu.matmul %350, %305, %cst_175 {dimension_numbers = #tpu.dot_dimension_numbers<[1], [0], [0], [1], [0, 0, 1, 1], [], []>} : vector<64x64xbf16>, vector<64x64xbf16>, vector<64x64xf32> -> vector<64x64xf32>
    %352 = vector.extract_strided_slice %304 {offsets = [0, 448], sizes = [64, 64], strides = [1, 1]} : vector<64x576xf32> to vector<64x64xf32>
    %353 = arith.mulf %352, %351 : vector<64x64xf32>
    %354 = arith.addf %348, %353 : vector<64x64xf32>
    %c8_176 = arith.constant 8 : index
    %c0_177 = arith.constant 0 : index
    %c0_178 = arith.constant 0 : index
    %355 = vector.load %arg19[%c8_176, %c0_177, %c0_178] : memref<9x64x64xbf16, #tpu.memory_space<vmem>>, vector<1x64x64xbf16>
    %356 = vector.shape_cast %355 : vector<1x64x64xbf16> to vector<64x64xbf16>
    %cst_179 = arith.constant dense<0.000000e+00> : vector<64x64xf32>
    %357 = tpu.matmul %356, %305, %cst_179 {dimension_numbers = #tpu.dot_dimension_numbers<[1], [0], [0], [1], [0, 0, 1, 1], [], []>} : vector<64x64xbf16>, vector<64x64xbf16>, vector<64x64xf32> -> vector<64x64xf32>
    %358 = vector.extract_strided_slice %304 {offsets = [0, 512], sizes = [64, 64], strides = [1, 1]} : vector<64x576xf32> to vector<64x64xf32>
    %359 = arith.mulf %358, %357 : vector<64x64xf32>
    %360 = arith.addf %354, %359 : vector<64x64xf32>
    %c0_180 = arith.constant 0 : index
    %c0_181 = arith.constant 0 : index
    %361 = vector.load %arg23[%c0_180, %c0_181] : memref<64x64xf32, #tpu.memory_space<vmem>>, vector<64x64xf32>
    %362 = arith.addf %361, %360 : vector<64x64xf32>
    %363 = arith.truncf %362 : vector<64x64xf32> to vector<64x64xbf16>
    %c0_182 = arith.constant 0 : index
    %c0_183 = arith.constant 0 : index
    %364 = vector.load %arg10[%c0_182, %c0_183] : memref<64x64xbf16, #tpu.memory_space<vmem>>, vector<64x64xbf16>
    %cst_184 = arith.constant dense<0.000000e+00> : vector<64x64xf32>
    %365 = tpu.matmul %363, %364, %cst_184 {dimension_numbers = #tpu.dot_dimension_numbers<[1], [0], [0], [1], [0, 0, 1, 1], [], []>} : vector<64x64xbf16>, vector<64x64xbf16>, vector<64x64xf32> -> vector<64x64xf32>
    %c0_185 = arith.constant 0 : index
    %c0_186 = arith.constant 0 : index
    %366 = vector.load %arg11[%c0_185, %c0_186] : memref<1x64xf32, #tpu.memory_space<vmem>>, vector<1x64xf32>
    %367 = vector.broadcast %366 : vector<1x64xf32> to vector<64x64xf32>
    %368 = arith.addf %365, %367 : vector<64x64xf32>
    %c0_187 = arith.constant 0 : index
    %c0_188 = arith.constant 0 : index
    %c0_189 = arith.constant 0 : index
    %369 = vector.load %arg22[%c0_187, %c0_188, %c0_189] : memref<1x64x64xf32, #tpu.memory_space<vmem>>, vector<1x64x64xf32>
    %370 = vector.shape_cast %369 : vector<1x64x64xf32> to vector<64x64xf32>
    %371 = vector.shape_cast %368 : vector<64x64xf32> to vector<1x64x64xf32>
    tpu.vector_store %arg22[%c0_187, %c0_188, %c0_189], %371 {strides = array<i32>} : memref<1x64x64xf32, #tpu.memory_space<vmem>>, vector<1x64x64xf32>,
    return
  }
  func.func @transform_0(%arg0: i32) -> (i32, i32, i32) {
    %c0_i32 = arith.constant 0 : i32
    %c0_i32_0 = arith.constant 0 : i32
    %c0_i32_1 = arith.constant 0 : i32
    return %arg0, %c0_i32, %c0_i32_0 : i32, i32, i32
  }
  func.func @transform_1(%arg0: i32) -> (i32, i32) {
    %c0_i32 = arith.constant 0 : i32
    %c0_i32_0 = arith.constant 0 : i32
    %c0_i32_1 = arith.constant 0 : i32
    return %c0_i32, %c0_i32_0 : i32, i32
  }
  func.func @transform_2(%arg0: i32) -> (i32, i32) {
    %c0_i32 = arith.constant 0 : i32
    %c0_i32_0 = arith.constant 0 : i32
    %c0_i32_1 = arith.constant 0 : i32
    return %c0_i32, %c0_i32_0 : i32, i32
  }
  func.func @transform_3(%arg0: i32) -> (i32, i32) {
    %c0_i32 = arith.constant 0 : i32
    %c0_i32_0 = arith.constant 0 : i32
    %c0_i32_1 = arith.constant 0 : i32
    return %c0_i32, %c0_i32_0 : i32, i32
  }
  func.func @transform_4(%arg0: i32) -> (i32, i32) {
    %c0_i32 = arith.constant 0 : i32
    %c0_i32_0 = arith.constant 0 : i32
    %c0_i32_1 = arith.constant 0 : i32
    return %c0_i32, %c0_i32_0 : i32, i32
  }
  func.func @transform_5(%arg0: i32) -> (i32, i32) {
    %c0_i32 = arith.constant 0 : i32
    %c0_i32_0 = arith.constant 0 : i32
    %c0_i32_1 = arith.constant 0 : i32
    return %c0_i32, %c0_i32_0 : i32, i32
  }
  func.func @transform_6(%arg0: i32) -> (i32, i32) {
    %c0_i32 = arith.constant 0 : i32
    %c0_i32_0 = arith.constant 0 : i32
    %c0_i32_1 = arith.constant 0 : i32
    return %c0_i32, %c0_i32_0 : i32, i32
  }
  func.func @transform_7(%arg0: i32) -> (i32, i32) {
    %c0_i32 = arith.constant 0 : i32
    %c0_i32_0 = arith.constant 0 : i32
    %c0_i32_1 = arith.constant 0 : i32
    return %c0_i32, %c0_i32_0 : i32, i32
  }
  func.func @transform_8(%arg0: i32) -> (i32, i32) {
    %c0_i32 = arith.constant 0 : i32
    %c0_i32_0 = arith.constant 0 : i32
    %c0_i32_1 = arith.constant 0 : i32
    return %c0_i32, %c0_i32_0 : i32, i32
  }
  func.func @transform_9(%arg0: i32) -> (i32, i32) {
    %c0_i32 = arith.constant 0 : i32
    %c0_i32_0 = arith.constant 0 : i32
    %c0_i32_1 = arith.constant 0 : i32
    return %c0_i32, %c0_i32_0 : i32, i32
  }
  func.func @transform_10(%arg0: i32) -> (i32, i32) {
    %c0_i32 = arith.constant 0 : i32
    %c0_i32_0 = arith.constant 0 : i32
    %c0_i32_1 = arith.constant 0 : i32
    return %c0_i32, %c0_i32_0 : i32, i32
  }
  func.func @transform_11(%arg0: i32) -> (i32, i32) {
    %c0_i32 = arith.constant 0 : i32
    %c0_i32_0 = arith.constant 0 : i32
    %c0_i32_1 = arith.constant 0 : i32
    return %c0_i32, %c0_i32_0 : i32, i32
  }
  func.func @transform_12(%arg0: i32) -> (i32, i32) {
    %c0_i32 = arith.constant 0 : i32
    %c0_i32_0 = arith.constant 0 : i32
    %c0_i32_1 = arith.constant 0 : i32
    return %c0_i32, %c0_i32_0 : i32, i32
  }
  func.func @transform_13(%arg0: i32) -> (i32, i32) {
    %c0_i32 = arith.constant 0 : i32
    %c0_i32_0 = arith.constant 0 : i32
    %c0_i32_1 = arith.constant 0 : i32
    return %c0_i32, %c0_i32_0 : i32, i32
  }
  func.func @transform_14(%arg0: i32) -> (i32, i32) {
    %c0_i32 = arith.constant 0 : i32
    %c0_i32_0 = arith.constant 0 : i32
    %c0_i32_1 = arith.constant 0 : i32
    return %c0_i32, %c0_i32_0 : i32, i32
  }
  func.func @transform_15(%arg0: i32) -> (i32, i32) {
    %c0_i32 = arith.constant 0 : i32
    %c0_i32_0 = arith.constant 0 : i32
    %c0_i32_1 = arith.constant 0 : i32
    return %c0_i32, %c0_i32_0 : i32, i32
  }
  func.func @transform_16(%arg0: i32) -> (i32, i32) {
    %c0_i32 = arith.constant 0 : i32
    %c0_i32_0 = arith.constant 0 : i32
    %c0_i32_1 = arith.constant 0 : i32
    return %c0_i32, %c0_i32_0 : i32, i32
  }
  func.func @transform_17(%arg0: i32) -> (i32, i32, i32) {
    %c0_i32 = arith.constant 0 : i32
    %c0_i32_0 = arith.constant 0 : i32
    %c0_i32_1 = arith.constant 0 : i32
    %c0_i32_2 = arith.constant 0 : i32
    return %c0_i32, %c0_i32_0, %c0_i32_1 : i32, i32, i32
  }
  func.func @transform_18(%arg0: i32) -> (i32, i32, i32) {
    %c0_i32 = arith.constant 0 : i32
    %c0_i32_0 = arith.constant 0 : i32
    %c0_i32_1 = arith.constant 0 : i32
    %c0_i32_2 = arith.constant 0 : i32
    return %c0_i32, %c0_i32_0, %c0_i32_1 : i32, i32, i32
  }
  func.func @transform_19(%arg0: i32) -> (i32, i32) {
    %c0_i32 = arith.constant 0 : i32
    %c0_i32_0 = arith.constant 0 : i32
    %c0_i32_1 = arith.constant 0 : i32
    return %c0_i32, %c0_i32_0 : i32, i32
  }
  func.func @transform_20(%arg0: i32) -> (i32, i32) {
    %c0_i32 = arith.constant 0 : i32
    %c0_i32_0 = arith.constant 0 : i32
    %c0_i32_1 = arith.constant 0 : i32
    return %c0_i32, %c0_i32_0 : i32, i32
  }
  func.func @transform_21(%arg0: i32) -> (i32, i32, i32) {
    %c0_i32 = arith.constant 0 : i32
    %c0_i32_0 = arith.constant 0 : i32
    %c0_i32_1 = arith.constant 0 : i32
    return %arg0, %c0_i32, %c0_i32_0 : i32, i32, i32
  }
}

</mosaic_0001>

<bundles_post_ra>
// kernel: aggregated_attention_forward.1
= control target key start
LH: loop header
LB: loop body
LE: loop exit
PB: predicated region body
PF: predicated region fallthrough
CT: control target
= control target key end

     0   :  { %s13577_s0 = inlined_call_operand.vmem [shape: f32[2,64,64], index: 0, kind: input, shape index: {}]   ;;  %s13578_s1 = inlined_call_operand.vmem [shape: bf16[64,64], index: 1, kind: input, shape index: {}]   ;;  %s13579_s2 = inlined_call_operand.vmem [shape: f32[1,64], index: 2, kind: input, shape index: {}]   ;;  %s13580_s3 = inlined_call_operand.vmem [shape: bf16[64,64], index: 3, kind: input, shape index: {}]   ;;  %s13581_s4 = inlined_call_operand.vmem [shape: f32[1,64], index: 4, kind: input, shape index: {}]   ;;  %s13582_s5 = inlined_call_operand.vmem [shape: bf16[64,64], index: 5, kind: input, shape index: {}]   ;;  %s13583_s6 = inlined_call_operand.vmem [shape: f32[1,64], index: 6, kind: input, shape index: {}]   ;;  %s13584_s7 = inlined_call_operand.vmem [shape: bf16[64,64], index: 7, kind: input, shape index: {}]   ;;  %s13585_s8 = inlined_call_operand.vmem [shape: f32[1,64], index: 8, kind: input, shape index: {}]   ;;  %s13586_s9 = inlined_call_operand.vmem [shape: bf16[64,64], index: 9, kind: input, shape index: {}]   ;;  %s13587_s10 = inlined_call_operand.vmem [shape: f32[1,64], index: 10, kind: input, shape index: {}]   ;;  %s13588_s11 = inlined_call_operand.vmem [shape: f32[1,64], index: 11, kind: input, shape index: {}]   ;;  %s13589_s12 = inlined_call_operand.vmem [shape: f32[1,64], index: 12, kind: input, shape index: {}]   ;;  %s13590_s13 = inlined_call_operand.vmem [shape: bf16[16,64], index: 13, kind: input, shape index: {}]   ;;  %s13591_s14 = inlined_call_operand.vmem [shape: f32[64,64], index: 14, kind: input, shape index: {}]   ;;  %s13592_s15 = inlined_call_operand.vmem [shape: f32[64,64], index: 15, kind: input, shape index: {}]   ;;  %s13593_s16 = inlined_call_operand.vmem [shape: f32[1,64], index: 16, kind: input, shape index: {}]   ;;  %s13594_s17 = inlined_call_operand.vmem [shape: bf16[8,64,80], index: 17, kind: input, shape index: {}]   ;;  %s13595_s18 = inlined_call_operand.vmem [shape: bf16[9,64,64], index: 18, kind: input, shape index: {}]   ;;  %s13596_s19 = inlined_call_operand.vmem [shape: bf16[64,576], index: 19, kind: input, shape index: {}]   ;;  %s13597_s20 = inlined_call_operand.vmem [shape: f32[1,576], index: 20, kind: input, shape index: {}]   ;;  %s13598_s21 = inlined_call_operand.hbm [shape: f32[2,64,64], index: 21, kind: output, shape index: {}]  }
   0x1   :  { %13700 = sst [smem:[#allocation102_spill]] %s13577_s0 }
   0x2   :  { %13701 = sst [smem:[#allocation103_spill]] %s13578_s1 }
   0x3   :  { %13702 = sst [smem:[#allocation104_spill]] %s13579_s2 }
   0x4   :  { %13703 = sst [smem:[#allocation105_spill]] %s13580_s3 }
   0x5   :  { %13704 = sst [smem:[#allocation106_spill]] %s13581_s4 }
   0x6   :  { %13705 = sst [smem:[#allocation107_spill]] %s13582_s5 }
   0x7   :  { %13706 = sst [smem:[#allocation108_spill]] %s13583_s6 }
   0x8   :  { %13707 = sst [smem:[#allocation109_spill]] %s13584_s7 }
   0x9   :  { %13708 = sst [smem:[#allocation110_spill]] %s13585_s8 }
   0xa   :  { %13709 = sst [smem:[#allocation111_spill]] %s13586_s9 }
   0xb   :  { %13710 = sst [smem:[#allocation112_spill]] %s13587_s10 }
   0xc   :  { %26 = vsyncpa [#allocation4], 0 }
   0xd   :  { %28 = vsyncpa [#allocation4 + $0x1], 0  ;;  %s8756_s2 = smov 0   ;;  %s8758_s25 = smov 0  }
   0xe   :  { %s8760_s26 = smov 0   ;;  %s8762_s27 = smov 0  }
   0xf LB: > { %13711 = sst [smem:[#allocation6_spill]] %s8615_s2  ;;  %s8777_s3 = sadd.s32 4294967295, %s8627_s27   ;;  %s8627_s27 = sphi %s8762_s27, %s14166_s27   ;;  %s8623_s26 = sphi %s8760_s26, %s14168_s26   ;;  %s8619_s25 = sphi %s8758_s25, %s14170_s25   ;;  %s8615_s2 = sphi %s8756_s2, %s14169_s2  }
  0x10   : > { %13712 = sst [smem:[#allocation7_spill]] %s8623_s26  ;;  %s6996_s28 = sadd.s32 4294967294, %s8627_s27  }
  0x11   : > { %13713 = sst [smem:[#allocation8_spill]] %s8627_s27  ;;  %s8781_s29 = sadd.s32 1, %s8627_s27  }
  0x12   : > { %13714 = sst [smem:[#allocation9_spill]] %s8781_s29  ;;  %s487_s0 = sadd.s32 1, %s8623_s26 }
  0x13   : > { %s484_s4 = ssub.s32 %s8627_s27, %s8781_s29  ;;  %p497_p0 = scmp.ne.s32.totalorder %s8623_s26, %s8619_s25 }
  0x14   : > { %p485_p1 = scmp.eq.s32.totalorder %s484_s4, 0  ;;  %p498_p2 = scmp.eq.s32.totalorder %s8777_s3, 1 }
  0x15   : > { %p503_p3 = scmp.ne.s32.totalorder %s8619_s25, %s8615_s2  ;;  %p504_p4 = scmp.eq.s32.totalorder %s6996_s28, 1 }
  0x16   : > { %s8792_s30 = scalar_select %p485_p1, %s8623_s26, %s487_s0  }
  0x17   : > { %p8794_p5 = por %p498_p2, %p497_p0  ;;  %p8798_p6 = por %p504_p4, %p503_p3 }
  0x18   : > { %13715 = sst [smem:[#allocation10_spill]] %s8792_s30  ;;  %p6999_p7 = scmp.ge.s32.totalorder %s8627_s27, 1 }
  0x19   : > { %s13717_s22 = scalar_select %p8798_p6, 1, 0 }
  0x1a   : > { %p590_p8 = scmp.lt.s32.totalorder %s8627_s27, 3 }
  0x1b   : > { %13718 = sst [smem:[#allocation11_spill]] %s13717_s22 }
  0x1c   : > { %p591_p9 = pnand %p6999_p7, %p590_p8 }
  0x1e   : > { %594 = sbr.rel (%p591_p9) target bundleno = 3141 (0xc45), region = 104 }
  0x23   : > { %s13719_s7 = sld [smem:[#allocation109_spill]]  ;;  %p650_p10 = scmp.lt.s32.totalorder %s8777_s3, 1  ;;  %vm704_vm0 = vcmask 523264   ;;  %v8965_v62 = vld [vmem:[%s13591_s14 + $0x38] sm:$0xff]  ;;  %v8970_v63 = vld [vmem:[%s13591_s14 + $0x30] sm:$0xff] }
  0x24   : > { %s13720_s2 = sld [smem:[#allocation102_spill]]  ;;  %s13617_s24 = smov 120  }
  0x25   : > { %s651_s0 = scalar_select %p650_p10, %s8777_s3, 1 }
  0x26   : > { %s13722_s27 = sld [smem:[#allocation103_spill]]  ;;  %s13619_s28 = smov 112  }
  0x27   : > { %s7741_s4 = sshll.u32 %s651_s0, 6  ;;  %s13726_s8 = sld [smem:[#allocation110_spill]] }
  0x28   : > { %s13747_s22 = sld [smem:[#allocation104_spill]]  ;;  %s13615_s1 = smov 104  }
  0x29   : > { %v7745_v0 = vld [vmem:[%s13719_s7 + $0x18] sm:$0xff]  ;;  %v7744_v1 = vld [vmem:[%s13719_s7 + $0x10] sm:$0xff]  ;;  %v7743_v2 = vld [vmem:[%s13719_s7 + $0x8] sm:$0xff]  ;;  %s13758_s6 = sld [smem:[#allocation108_spill]]  ;;  %s13625_s26 = smov 88  }
  0x2a   : > { %721 = vmatpush.bf16.msra.mxu0 %v7745_v0  ;;  %s654_s23 = scalar_lea.vmem %s13720_s2, %s7741_s4  ;;  %v7742_v3 = vld [vmem:[%s13719_s7] sm:$0xff]  ;;  %s13623_s2 = smov 96  }
  0x2b   : > { %v656_v4 = vld [vmem:[%s654_s23] sm:$0xff]  ;;  %v657_v5 = vld [vmem:[%s654_s23 + $0x8] sm:$0xff]  ;;  %v658_v7 = vld [vmem:[%s654_s23 + $0x10] sm:$0xff]  ;;  %s13791_s0 = smov 96   ;;  %s13792_s4 = smov 112  }
  0x2c   : > { %v8821_v6 = vpack.c.bf16 %v657_v5, %v656_v4  ;;  %v659_v8 = vld [vmem:[%s654_s23 + $0x18] sm:$0xff]  ;;  %s13723_s29 = smov %s13722_s27  ;;  %v660_v13 = vld [vmem:[%s654_s23 + $0x20] sm:$0xff]  ;;  %v661_v14 = vld [vmem:[%s654_s23 + $0x28] sm:$0xff]  ;;  %s8641_s7 = smov 56  }
  0x2d   : > { %v8825_v9 = vpack.c.bf16 %v659_v8, %v658_v7  ;;  %v7750_v10 = vld [vmem:[%s13722_s27 + $0x18] sm:$0xff]  ;;  %v7749_v11 = vld [vmem:[%s13723_s29 + $0x10] sm:$0xff]  ;;  %v7748_v12 = vld [vmem:[%s13723_s29 + $0x8] sm:$0xff]  ;;  %v8841_v16 = vpack.c.bf16 %v661_v14, %v660_v13  ;;  %s13727_s27 = sld [smem:[#allocation105_spill]] }
  0x2e   : > { %722 = vmatpush.bf16.msra.mxu0 %v7744_v1  ;;  %1206 = vmatpush.bf16.msra.mxu2 %v7750_v10  ;;  %v7747_v15 = vld [vmem:[%s13723_s29] sm:$0xff]  ;;  %v662_v17 = vld [vmem:[%s654_s23 + $0x30] sm:$0xff]  ;;  %v663_v18 = vld [vmem:[%s654_s23 + $0x38] sm:$0xff]  ;;  %s13748_s23 = sld [smem:[#allocation107_spill]] }
  0x2f   : > { %13721 = vst [vmem:[#allocation12_spill] sm:$0xff] %v8825_v9  ;;  %v8847_v19 = vpack.c.bf16 %v663_v18, %v662_v17  ;;  %v8860_v20 = vld [vmem:[%s13726_s8] ss:$0 sm:$0xff]  ;;  %v8989_v7 = vld [vmem:[%s13591_s14 + $0x28] sm:$0xff]  ;;  %s14139_s9 = sld [smem:[#allocation111_spill]] }
  0x30   : > { %13724 = vst [vmem:[#allocation13_spill] sm:$0xff] %v8841_v16  ;;  %v9009_v17 = vld [vmem:[%s13591_s14 + $0x20] sm:$0xff]  ;;  %s14161_s10 = sld [smem:[#allocation112_spill]] }
  0x31   : > { %13725 = vst [vmem:[#allocation14_spill] sm:$0xff] %v8847_v19 }
  0x32   : > { %723 = vmatpush.bf16.msra.mxu0 %v7743_v2  ;;  %1207 = vmatpush.bf16.msra.mxu2 %v7749_v11 }
  0x33   : > { %s13728_s30 = smov %s13727_s27  ;;  %v7754_v24 = vld [vmem:[%s13727_s27 + $0x18] sm:$0xff]  ;;  %s13621_s27 = smov 80  }
  0x34   : > { %1271 = vmatpush.bf16.msra.mxu3 %v7754_v24  ;;  %v7753_v28 = vld [vmem:[%s13728_s30 + $0x10] sm:$0xff]  ;;  %v7752_v31 = vld [vmem:[%s13728_s30 + $0x8] sm:$0xff]  ;;  %v7751_v36 = vld [vmem:[%s13728_s30] sm:$0xff] }
  0x36   : > { %724 = vmatpush.bf16.msra.mxu0 %v7742_v3  ;;  %1208 = vmatpush.bf16.msra.mxu2 %v7748_v12 }
  0x38   : > { %1272 = vmatpush.bf16.msra.mxu3 %v7753_v28 }
  0x39   : > { %7019 = vmatmul.msk.bf16.vlgmr.msra.gmra.mxu0 %vm704_vm0, %v8821_v6 }
  0x3a   : > { %1209 = vmatpush.bf16.msra.mxu2 %v7747_v15  ;;  %1368 = vmatpush.bf16.msrb.mxu0 %v7754_v24 }
  0x3c   : > { %1273 = vmatpush.bf16.msra.mxu3 %v7752_v31 }
  0x3d   : > { %7044 = vmatmul.msk.bf16.vlgmr.msra.gmra.mxu2 %vm704_vm0, %v8821_v6 }
  0x3e   : > { %1369 = vmatpush.bf16.msrb.mxu0 %v7753_v28  ;;  %v9023_v28 = vld [vmem:[%s13591_s14 + $0x18] sm:$0xff] }
  0x40   : > { %1274 = vmatpush.bf16.msra.mxu3 %v7751_v36 }
  0x42   : > { %1370 = vmatpush.bf16.msrb.mxu0 %v7752_v31 }
  0x43   : > { %7064 = vmatmul.msk.bf16.vlgmr.msra.gmra.mxu3 %vm704_vm0, %v8821_v6 }
  0x44   : > { %7979 = vmatpush.msrb.mxu3 %v8965_v62 }
  0x46   : > { %1371 = vmatpush.bf16.msrb.mxu0 %v7751_v36  ;;  %7980 = vmatpush.msrb.mxu3 %v8970_v63 }
  0x48   : > { %7981 = vmatpush.msrb.mxu3 %v8989_v7 }
  0x49   : > { %7020 = vmatmul.msk.bf16.gmra.mxu0 %vm704_vm0, %v8825_v9 }
  0x4a   : > { %1440 = vmatpush.msra.mxu0 %v8965_v62  ;;  %7982 = vmatpush.msrb.mxu3 %v9009_v17 }
  0x4c   : > { %1441 = vmatpush.msra.mxu0 %v8970_v63  ;;  %7983 = vmatpush.msrb.mxu3 %v9023_v28 }
  0x4d   : > { %7045 = vmatmul.msk.bf16.gmra.mxu2 %vm704_vm0, %v8825_v9 }
  0x4e   : > { %1442 = vmatpush.msra.mxu0 %v8989_v7 }
  0x50   : > { %1443 = vmatpush.msra.mxu0 %v9009_v17 }
  0x52   : > { %1444 = vmatpush.msra.mxu0 %v9023_v28 }
  0x53   : > { %7065 = vmatmul.msk.bf16.gmra.mxu3 %vm704_vm0, %v8825_v9 }
  0x59   : > { %7021 = vmatmul.msk.bf16.gmra.mxu0 %vm704_vm0, %v8841_v16 }
  0x5d   : > { %7046 = vmatmul.msk.bf16.gmra.mxu2 %vm704_vm0, %v8841_v16 }
  0x63   : > { %7066 = vmatmul.msk.bf16.gmra.mxu3 %vm704_vm0, %v8841_v16 }
  0x69   : > { %7022 = vmatmul.msk.bf16.gmra.mxu0 %vm704_vm0, %v8847_v19 }
  0x6d   : > { %7047 = vmatmul.msk.bf16.gmra.mxu2 %vm704_vm0, %v8847_v19 }
  0x73   : > { %7067 = vmatmul.msk.bf16.gmra.mxu3 %vm704_vm0, %v8847_v19 }
  0xb6   : > { %v726_v21 = vpop.f32.mrf.mxu0 }
  0xb7   : > { %v8863_v22 = vadd.f32 %v8860_v20, %v726_v21 }
  0xb9   : > { %v8866_v23 = vmul.f32 0.70710677, %v8863_v22 }
  0xbb   : > { %v762_v25 = vsub.f32 0.0, %v8866_v23  ;;  %vm13608_vm1 = vcmp.ge.f32.partialorder %v8866_v23, 0.0 }
  0xbd   : > { %v8885_v30 = vsel %vm13608_vm1, %v8866_v23, %v762_v25 }
  0xbe   : > { %v728_v26 = vpop.f32.mrf.mxu0  ;;  %v778_v32 = vmul.f32 0.3275911, %v8885_v30  ;;  %v986_v10 = vsub.f32 0.0, %v8885_v30 }
  0xbf   : > { %v8874_v27 = vadd.f32 %v8860_v20, %v728_v26 }
  0xc0   : > { %v8899_v37 = vadd.f32 1.0, %v778_v32  ;;  %v9031_v32 = vmul.f32 %v986_v10, %v8885_v30  ;;  %v9047_v30 = vld [vmem:[%s13591_s14 + $0x10] sm:$0xff] }
  0xc1   : > { %v8880_v29 = vmul.f32 0.70710677, %v8874_v27  ;;  %13734 = vst [vmem:[#allocation16_spill] sm:$0xff] %v9047_v30  ;;  %7984 = vmatpush.msrb.mxu3 %v9047_v30  ;;  %1445 = vmatpush.msra.mxu0 %v9047_v30 }
  0xc2   : > { %8226 = vrcp.f32 %v8899_v37  ;;  %v803_v8 = vand.u32 2147483647, %v8899_v37  ;;  %v805_v14 = vand.u32 2147483648, %v8899_v37  ;;  %vm799_vm7 = vweird.f32 %v8899_v37 }
  0xc3   : > { %v763_v33 = vsub.f32 0.0, %v8880_v29  ;;  %vm755_vm2 = vcmp.ge.f32.partialorder %v8880_v29, 0.0 }
  0xc4   : > { %vm9026_vm9 = vcmp.eq.f32.partialorder %v803_v8, 8.507059e+37 }
  0xc5   : > { %v8907_v39 = vsel %vm755_vm2, %v8880_v29, %v763_v33  ;;  %v1051_v29 = vmul.f32 0.5, %v8874_v27 }
  0xc6   : > { %v731_v34 = vpop.f32.mrf.mxu0  ;;  %v779_v41 = vmul.f32 0.3275911, %v8907_v39  ;;  %v9376_v27 = vpop.f32.mrf.mxu3 }
  0xc7   : > { %v8894_v35 = vadd.f32 %v8860_v20, %v731_v34 }
  0xc8   : > { %v8924_v46 = vadd.f32 1.0, %v779_v41  ;;  %v8929_v48 = vpop.eup %8226  ;;  %v9042_v41 = vpop.f32.mrf.mxu2 }
  0xc9   : > { %v8902_v38 = vmul.f32 0.70710677, %v8894_v35  ;;  %v795_v52 = vmul.f32 %v8929_v48, %v8899_v37  ;;  %vm800_vm6 = vweird.f32 %v8929_v48  ;;  %13733 = vst [vmem:[#allocation15_spill] sm:$0xff] %v9042_v41 }
  0xca   : > { %8228 = vrcp.f32 %v8924_v46  ;;  %v820_v25 = vand.u32 2147483648, %v8924_v46  ;;  %vm9037_vm10 = vmor %vm799_vm7, %vm800_vm6  ;;  %vm814_vm11 = vweird.f32 %v8924_v46 }
  0xcb   : > { %v764_v40 = vsub.f32 0.0, %v8902_v38  ;;  %vm756_vm3 = vcmp.ge.f32.partialorder %v8902_v38, 0.0  ;;  %v796_v58 = vsub.f32 1.0, %v795_v52  ;;  %v818_v52 = vand.u32 2147483647, %v8924_v46 }
  0xcd   : > { %v8918_v42 = vsel %vm756_vm3, %v8902_v38, %v764_v40  ;;  %v797_v1 = vmul.f32 %v8929_v48, %v796_v58  ;;  %v806_v40 = vor.u32 1.1754944e-38, %v805_v14  ;;  %vm9088_vm14 = vcmp.eq.f32.partialorder %v818_v52, 8.507059e+37 }
  0xce   : > { %v733_v43 = vpop.f32.mrf.mxu0  ;;  %v780_v45 = vmul.f32 0.3275911, %v8918_v42  ;;  %v1052_v38 = vmul.f32 0.5, %v8894_v35  ;;  %v1050_v35 = vmul.f32 0.5, %v8863_v22  ;;  %v13750_v22 = vld [vmem:[#allocation16_spill] sm:$0xff] }
  0xcf   : > { %v8921_v44 = vadd.f32 %v8860_v20, %v733_v43  ;;  %v798_v21 = vadd.f32 %v8929_v48, %v797_v1 }
  0xd0   : > { %v8933_v50 = vadd.f32 1.0, %v780_v45  ;;  %v8953_v59 = vpop.eup %8228 }
  0xd1   : > { %v8927_v47 = vmul.f32 0.70710677, %v8921_v44  ;;  %v810_v2 = vmul.f32 %v8953_v59, %v8924_v46  ;;  %v802_v45 = vsel %vm9037_vm10, %v8929_v48, %v798_v21  ;;  %vm815_vm13 = vweird.f32 %v8953_v59 }
  0xd2   : > { %8230 = vrcp.f32 %v8933_v50  ;;  %v835_v34 = vand.u32 2147483648, %v8933_v50  ;;  %vm829_vm12 = vweird.f32 %v8933_v50  ;;  %v9079_v14 = vsel %vm9026_vm9, %v806_v40, %v802_v45 }
  0xd3   : > { %v765_v49 = vsub.f32 0.0, %v8927_v47  ;;  %vm757_vm4 = vcmp.ge.f32.partialorder %v8927_v47, 0.0  ;;  %v811_v24 = vsub.f32 1.0, %v810_v2  ;;  %v833_v2 = vand.u32 2147483647, %v8933_v50 }
  0xd5   : > { %v8939_v51 = vsel %vm757_vm4, %v8927_v47, %v765_v49  ;;  %v812_v49 = vmul.f32 %v8953_v59, %v811_v24 }
  0xd6   : > { %v736_v53 = vpop.f32.mrf.mxu0  ;;  %v781_v54 = vmul.f32 0.3275911, %v8939_v51 }
  0xd7   : > { %v8945_v55 = vadd.f32 %v8860_v20, %v736_v53  ;;  %v813_v24 = vadd.f32 %v8953_v59, %v812_v49 }
  0xd8   : > { %v8948_v56 = vadd.f32 1.0, %v781_v54  ;;  %v8958_v61 = vpop.eup %8230 }
  0xd9   : > { %v8951_v57 = vmul.f32 0.70710677, %v8945_v55  ;;  %v825_v13 = vmul.f32 %v8958_v61, %v8933_v50  ;;  %vm830_vm7 = vweird.f32 %v8958_v61 }
  0xda   : > { %8232 = vrcp.f32 %v8948_v56  ;;  %v850_v31 = vand.u32 2147483648, %v8948_v56  ;;  %vm844_vm9 = vweird.f32 %v8948_v56  ;;  %v848_v40 = vand.u32 2147483647, %v8948_v56 }
  0xdb   : > { %v766_v60 = vsub.f32 0.0, %v8951_v57  ;;  %vm758_vm5 = vcmp.ge.f32.partialorder %v8951_v57, 0.0  ;;  %v826_v33 = vsub.f32 1.0, %v825_v13  ;;  %v836_v13 = vor.u32 1.1754944e-38, %v835_v34 }
  0xdd   : > { %v8975_v0 = vsel %vm758_vm5, %v8951_v57, %v766_v60  ;;  %v9063_v60 = vor.u32 1.1754944e-38, %v820_v25  ;;  %v827_v10 = vmul.f32 %v8958_v61, %v826_v33  ;;  %v7755_v57 = vld [vmem:[%s13748_s23] sm:$0xff] }
  0xde   : > { %v738_v3 = vpop.f32.mrf.mxu0  ;;  %v782_v4 = vmul.f32 0.3275911, %v8975_v0 }
  0xdf   : > { %v8984_v5 = vadd.f32 %v8860_v20, %v738_v3  ;;  %v828_v37 = vadd.f32 %v8958_v61, %v827_v10  ;;  %v9131_v3 = vpop.f32.mrf.mxu2 }
  0xe0   : > { %v8993_v11 = vpop.eup %8232  ;;  %v8996_v12 = vadd.f32 1.0, %v782_v4  ;;  %13741 = vst [vmem:[#allocation17_spill] sm:$0xff] %v9131_v3 }
  0xe1   : > { %v9004_v15 = vmul.f32 0.70710677, %v8984_v5  ;;  %v840_v18 = vmul.f32 %v8993_v11, %v8948_v56  ;;  %vm845_vm15 = vweird.f32 %v8993_v11 }
  0xe2   : > { %8234 = vrcp.f32 %v8996_v12  ;;  %vm9110_vm1 = vmor %vm844_vm9, %vm845_vm15  ;;  %v863_v56 = vand.u32 2147483647, %v8996_v12  ;;  %vm859_vm9 = vweird.f32 %v8996_v12 }
  0xe3   : > { %v767_v26 = vsub.f32 0.0, %v9004_v15  ;;  %vm759_vm8 = vcmp.ge.f32.partialorder %v9004_v15, 0.0  ;;  %v841_v36 = vsub.f32 1.0, %v840_v18  ;;  %vm9124_vm15 = vmor %vm814_vm11, %vm815_vm13  ;;  %vm849_vm13 = vcmp.eq.f32.partialorder %v848_v40, 8.507059e+37 }
  0xe4   : > { %v817_v46 = vsel %vm9124_vm15, %v8953_v59, %v813_v24 }
  0xe5   : > { %v9052_v43 = vsel %vm759_vm8, %v9004_v15, %v767_v26  ;;  %v842_v58 = vmul.f32 %v8993_v11, %v841_v36  ;;  %v865_v36 = vand.u32 2147483648, %v8996_v12  ;;  %v9161_v59 = vsel %vm9088_vm14, %v9063_v60, %v817_v46 }
  0xe6   : > { %v741_v53 = vpop.f32.mrf.mxu0  ;;  %v783_v54 = vmul.f32 0.3275911, %v9052_v43 }
  0xe7   : > { %v9068_v48 = vadd.f32 %v8860_v20, %v741_v53  ;;  %v843_v26 = vadd.f32 %v8993_v11, %v842_v58  ;;  %v914_v53 = vmul.f32 1.0614054, %v9079_v14 }
  0xe8   : > { %v8235_v4 = vpop.eup %8234  ;;  %v9074_v8 = vadd.f32 1.0, %v783_v54 }
  0xe9   : > { %v9083_v18 = vmul.f32 0.70710677, %v9068_v48  ;;  %v855_v21 = vmul.f32 %v8235_v4, %v8996_v12  ;;  %vm860_vm10 = vweird.f32 %v8235_v4  ;;  %v847_v10 = vsel %vm9110_vm1, %v8993_v11, %v843_v26  ;;  %vm9138_vm1 = vmor %vm829_vm12, %vm830_vm7 }
  0xea   : > { %8236 = vrcp.f32 %v9074_v8  ;;  %vm861_vm11 = vmor %vm859_vm9, %vm860_vm10  ;;  %v832_v12 = vsel %vm9138_vm1, %v8958_v61, %v828_v37  ;;  %vm864_vm12 = vcmp.eq.f32.partialorder %v863_v56, 8.507059e+37  ;;  %vm834_vm7 = vcmp.eq.f32.partialorder %v833_v2, 8.507059e+37 }
  0xeb   : > { %v768_v33 = vsub.f32 0.0, %v9083_v18  ;;  %vm760_vm6 = vcmp.ge.f32.partialorder %v9083_v18, 0.0  ;;  %v856_v34 = vsub.f32 1.0, %v855_v21  ;;  %v851_v21 = vor.u32 1.1754944e-38, %v850_v31 }
  0xec   : > { %v866_v31 = vor.u32 1.1754944e-38, %v865_v36  ;;  %v922_v37 = vadd.f32 -1.4531521, %v914_v53  ;;  %v13744_v2 = vsub.f32 0.0, %v8907_v39  ;;  %v880_v53 = vand.u32 2147483648, %v9074_v8 }
  0xed   : > { %v9108_v45 = vsel %vm760_vm6, %v9083_v18, %v768_v33  ;;  %v857_v49 = vmul.f32 %v8235_v4, %v856_v34  ;;  %v13745_v11 = vsub.f32 0.0, %v8918_v42  ;;  %vm874_vm15 = vweird.f32 %v9074_v8 }
  0xee   : > { %v743_v54 = vpop.f32.mrf.mxu0  ;;  %v784_v58 = vmul.f32 0.3275911, %v9108_v45  ;;  %v9173_v40 = vmul.f32 %v13744_v2, %v8907_v39  ;;  %v878_v39 = vand.u32 2147483647, %v9074_v8 }
  0xef   : > { %v9129_v34 = vadd.f32 %v8860_v20, %v743_v54  ;;  %v858_v1 = vadd.f32 %v8235_v4, %v857_v49  ;;  %v9155_v54 = vsel %vm849_vm13, %v851_v21, %v847_v10  ;;  %v9190_v46 = vmul.f32 %v13745_v11, %v8918_v42 }
  0xf0   : > { %v8237_v26 = vpop.eup %8236  ;;  %v9145_v20 = vadd.f32 1.0, %v784_v58  ;;  %v917_v36 = vmul.f32 1.0614054, %v9155_v54  ;;  %v989_v58 = vsub.f32 0.0, %v8939_v51  ;;  %v881_v42 = vor.u32 1.1754944e-38, %v880_v53 }
  0xf1   : > { %v9152_v50 = vmul.f32 0.70710677, %v9129_v34  ;;  %v862_v49 = vsel %vm861_vm11, %v8235_v4, %v858_v1  ;;  %v870_v52 = vmul.f32 %v8237_v26, %v9074_v8  ;;  %v9167_v1 = vsel %vm834_vm7, %v836_v13, %v832_v12 }
  0xf2   : > { %8238 = vrcp.f32 %v9145_v20  ;;  %v9165_v24 = vsel %vm864_vm12, %v866_v31, %v862_v49  ;;  %v915_v13 = vmul.f32 1.0614054, %v9161_v59  ;;  %v916_v21 = vmul.f32 1.0614054, %v9167_v1 }
  0xf3   : > { %v769_v61 = vsub.f32 0.0, %v9152_v50  ;;  %vm761_vm10 = vcmp.ge.f32.partialorder %v9152_v50, 0.0  ;;  %v871_v4 = vsub.f32 1.0, %v870_v52  ;;  %v918_v25 = vmul.f32 1.0614054, %v9165_v24 }
  0xf4   : > { %vm875_vm14 = vweird.f32 %v8237_v26  ;;  %v925_v52 = vadd.f32 -1.4531521, %v917_v36  ;;  %v9201_v3 = vmul.f32 %v989_v58, %v8939_v51  ;;  %v923_v36 = vadd.f32 -1.4531521, %v915_v13 }
  0xf5   : > { %v9178_v60 = vsel %vm761_vm10, %v9152_v50, %v769_v61  ;;  %v872_v10 = vmul.f32 %v8237_v26, %v871_v4  ;;  %v926_v33 = vadd.f32 -1.4531521, %v918_v25  ;;  %v930_v61 = vmul.f32 %v922_v37, %v9079_v14  ;;  %v9195_v4 = vpop.f32.mrf.mxu2  ;;  %vm876_vm9 = vmor %vm874_vm15, %vm875_vm14 }
  0xf6   : > { %v785_v56 = vmul.f32 0.3275911, %v9178_v60  ;;  %13746 = vst [vmem:[#allocation18_spill] sm:$0xff] %v9195_v4  ;;  %v990_v25 = vsub.f32 0.0, %v8975_v0  ;;  %vm879_vm1 = vcmp.eq.f32.partialorder %v878_v39, 8.507059e+37  ;;  %v895_v4 = vand.u32 2147483648, %v9145_v20 }
  0xf7   : > { %v873_v49 = vadd.f32 %v8237_v26, %v872_v10  ;;  %v934_v11 = vmul.f32 %v926_v33, %v9165_v24  ;;  %v933_v41 = vmul.f32 %v925_v52, %v9155_v54  ;;  %v938_v51 = vadd.f32 1.4214138, %v930_v61 }
  0xf8   : > { %v8239_v31 = vpop.eup %8238  ;;  %v9192_v12 = vadd.f32 1.0, %v785_v56  ;;  %v924_v56 = vadd.f32 -1.4531521, %v916_v21  ;;  %v893_v53 = vand.u32 2147483647, %v9145_v20  ;;  %v9216_v21 = vmul.f32 %v990_v25, %v8975_v0 }
  0xf9   : > { %v885_v2 = vmul.f32 %v8239_v31, %v9145_v20  ;;  %v877_v37 = vsel %vm876_vm9, %v8237_v26, %v873_v49  ;;  %vm890_vm11 = vweird.f32 %v8239_v31  ;;  %v991_v26 = vsub.f32 0.0, %v9052_v43 }
  0xfa   : > { %8240 = vrcp.f32 %v9192_v12  ;;  %v9207_v8 = vsel %vm879_vm1, %v881_v42, %v877_v37  ;;  %v932_v39 = vmul.f32 %v924_v56, %v9167_v1  ;;  %v931_v33 = vmul.f32 %v923_v36, %v9161_v59 }
  0xfb   : > { %v886_v10 = vsub.f32 1.0, %v885_v2  ;;  %v919_v13 = vmul.f32 1.0614054, %v9207_v8  ;;  %vm889_vm13 = vweird.f32 %v9145_v20  ;;  %v942_v61 = vadd.f32 1.4214138, %v934_v11 }
  0xfc   : > { %vm891_vm12 = vmor %vm889_vm13, %vm890_vm11  ;;  %v896_v42 = vor.u32 1.1754944e-38, %v895_v4  ;;  %v941_v37 = vadd.f32 1.4214138, %v933_v41  ;;  %v9223_v19 = vmul.f32 %v938_v51, %v9079_v14  ;;  %vm894_vm7 = vcmp.eq.f32.partialorder %v893_v53, 8.507059e+37  ;;  %v9230_v20 = vld [vmem:[%s13747_s22] ss:$0 sm:$0xff] }
  0xfd   : > { %v887_v58 = vmul.f32 %v8239_v31, %v886_v10  ;;  %v927_v52 = vadd.f32 -1.4531521, %v919_v13  ;;  %v992_v10 = vsub.f32 0.0, %v9108_v45  ;;  %v999_v4 = vmul.f32 %v991_v26, %v9052_v43  ;;  %s13613_s22 = smov 72  }
  0xfe   : > { %v940_v11 = vadd.f32 1.4214138, %v932_v39  ;;  %v939_v41 = vadd.f32 1.4214138, %v931_v33  ;;  %v950_v13 = vmul.f32 %v942_v61, %v9165_v24  ;;  %vm904_vm15 = vweird.f32 %v9192_v12 }
  0xff   : > { %v888_v49 = vadd.f32 %v8239_v31, %v887_v58  ;;  %v935_v56 = vmul.f32 %v927_v52, %v9207_v8  ;;  %v1218_v58 = vpop.f32.mrf.mxu2  ;;  %v910_v52 = vand.u32 2147483648, %v9192_v12  ;;  %v1000_v16 = vmul.f32 %v992_v10, %v9108_v45 }
 0x100   : > { %v8241_v2 = vpop.eup %8240  ;;  %v9243_v39 = vadd.f32 %v9230_v20, %v1218_v58  ;;  %v1012_v33 = vmul.f32 1.442695, %v999_v4  ;;  %v948_v61 = vmul.f32 %v940_v11, %v9167_v1  ;;  %v958_v9 = vadd.f32 -0.28449672, %v950_v13  ;;  %v9258_v13 = vld [vmem:[%s13591_s14 + $0x8] sm:$0xff] }
 0x101   : > { %v892_v0 = vsel %vm891_vm12, %v8239_v31, %v888_v49  ;;  %v900_v25 = vmul.f32 %v8241_v2, %v9192_v12  ;;  %v943_v53 = vadd.f32 1.4214138, %v935_v56  ;;  %v908_v49 = vand.u32 2147483647, %v9192_v12  ;;  %7985 = vmatpush.msrb.mxu3 %v9258_v13  ;;  %1446 = vmatpush.msra.mxu0 %v9258_v13 }
 0x102   : > { %v9232_v36 = vsel %vm894_vm7, %v896_v42, %v892_v0  ;;  %v949_v42 = vmul.f32 %v941_v37, %v9155_v54  ;;  %vm905_vm14 = vweird.f32 %v8241_v2  ;;  %v911_v10 = vor.u32 1.1754944e-38, %v910_v52 }
 0x103   : > { %v901_v51 = vsub.f32 1.0, %v900_v25  ;;  %v920_v31 = vmul.f32 1.0614054, %v9232_v36  ;;  %v951_v26 = vmul.f32 %v943_v53, %v9207_v8  ;;  %vm906_vm9 = vmor %vm904_vm15, %vm905_vm14  ;;  %v1014_v37 = vmul.f32 1.442695, %v1000_v16  ;;  %v9263_v16 = vld [vmem:[%s13591_s14] sm:$0xff] }
 0x104   : > { %vm909_vm1 = vcmp.eq.f32.partialorder %v908_v49, 8.507059e+37  ;;  %v1403_v12 = vmul.f32 %v9243_v39, %v9243_v39  ;;  %v993_v11 = vsub.f32 0.0, %v9178_v60  ;;  %v966_v52 = vmul.f32 %v958_v9, %v9165_v24  ;;  %7986 = vmatpush.msrb.mxu3 %v9263_v16  ;;  %1447 = vmatpush.msra.mxu0 %v9263_v16 }
 0x105   : > { %v902_v0 = vmul.f32 %v8241_v2, %v901_v51  ;;  %v928_v43 = vadd.f32 -1.4531521, %v920_v31  ;;  %v959_v45 = vadd.f32 -0.28449672, %v951_v26  ;;  %v957_v51 = vadd.f32 -0.28449672, %v949_v42 }
 0x106   : > { %v947_v31 = vmul.f32 %v939_v41, %v9161_v59  ;;  %v1008_v42 = vmul.f32 1.442695, %v9201_v3  ;;  %v1006_v26 = vmul.f32 1.442695, %v9190_v46  ;;  %8242 = vpow2.f32 %v1012_v33  ;;  %7093 = vmatmul.msk.f32.vlgmr.msrb.gmra.mxu3 %vm704_vm0, %v1403_v12 }
 0x107   : > { %v903_v25 = vadd.f32 %v8241_v2, %v902_v0  ;;  %v936_v56 = vmul.f32 %v928_v43, %v9232_v36  ;;  %v967_v30 = vmul.f32 %v959_v45, %v9207_v8  ;;  %v1010_v0 = vmul.f32 1.442695, %v9216_v21  ;;  %v1221_v3 = vpop.f32.mrf.mxu2 }
 0x108   : > { %v965_v43 = vmul.f32 %v957_v51, %v9155_v54  ;;  %v1001_v9 = vmul.f32 %v993_v11, %v9178_v60  ;;  %8244 = vpow2.f32 %v1014_v37  ;;  %v1004_v60 = vmul.f32 1.442695, %v9173_v40 }
 0x109   : > { %v907_v53 = vsel %vm906_vm9, %v8241_v2, %v903_v25  ;;  %v944_v58 = vadd.f32 1.4214138, %v936_v56  ;;  %v956_v2 = vadd.f32 -0.28449672, %v948_v61  ;;  %v955_v25 = vadd.f32 -0.28449672, %v947_v31 }
 0x10a   : > { %v9252_v4 = vsel %vm909_vm1, %v911_v10, %v907_v53  ;;  %v975_v45 = vadd.f32 0.2548296, %v967_v30  ;;  %v954_v10 = vadd.f32 -0.28449672, %v9223_v19  ;;  %v974_v31 = vadd.f32 0.2548296, %v966_v52 }
 0x10b   : > { %v921_v41 = vmul.f32 1.0614054, %v9252_v4  ;;  %v952_v49 = vmul.f32 %v944_v58, %v9232_v36  ;;  %v964_v21 = vmul.f32 %v956_v2, %v9167_v1  ;;  %8246 = vpow2.f32 %v1008_v42 }
 0x10c   : > { %8248 = vpow2.f32 %v1010_v0  ;;  %v9283_v30 = vadd.f32 %v9230_v20, %v1221_v3  ;;  %v973_v33 = vadd.f32 0.2548296, %v965_v43  ;;  %v983_v58 = vmul.f32 %v975_v45, %v9207_v8 }
 0x10d   : > { %v929_v61 = vadd.f32 -1.4531521, %v921_v41  ;;  %v960_v56 = vadd.f32 -0.28449672, %v952_v49  ;;  %v963_v12 = vmul.f32 %v955_v25, %v9161_v59  ;;  %v1016_v19 = vmul.f32 1.442695, %v1001_v9  ;;  %v8243_v49 = vpop.eup %8242 }
 0x10e   : > { %v1404_v11 = vmul.f32 %v9283_v30, %v9283_v30  ;;  %v972_v2 = vadd.f32 0.2548296, %v964_v21  ;;  %v962_v41 = vmul.f32 %v954_v10, %v9079_v14  ;;  %v982_v40 = vmul.f32 %v974_v31, %v9165_v24  ;;  %v8245_v0 = vpop.eup %8244 }
 0x10f   : > { %v937_v46 = vmul.f32 %v929_v61, %v9252_v4  ;;  %v968_v51 = vmul.f32 %v960_v56, %v9232_v36  ;;  %8250 = vpow2.f32 %v1006_v26  ;;  %v981_v8 = vmul.f32 %v973_v33, %v9155_v54  ;;  %v1223_v24 = vpop.f32.mrf.mxu2 }
 0x110   : > { %v1002_v43 = vmul.f32 1.442695, %v9031_v32  ;;  %8252 = vpow2.f32 %v1004_v60  ;;  %v1023_v45 = vmul.f32 %v8243_v49, %v983_v58  ;;  %v971_v9 = vadd.f32 0.2548296, %v963_v12  ;;  %7094 = vmatmul.msk.f32.gmra.mxu3 %vm704_vm0, %v1404_v11 }
 0x111   : > { %v945_v37 = vadd.f32 1.4214138, %v937_v46  ;;  %v976_v53 = vadd.f32 0.2548296, %v968_v51  ;;  %v8247_v25 = vpop.eup %8246  ;;  %8254 = vpow2.f32 %v1016_v19  ;;  %v980_v21 = vmul.f32 %v972_v2, %v9167_v1  ;;  %v9306_v1 = vld [vmem:[%s13748_s23 + $0x18] sm:$0xff] }
 0x112   : > { %v8249_v3 = vpop.eup %8248  ;;  %v9300_v32 = vadd.f32 %v9230_v20, %v1223_v24  ;;  %8256 = vpow2.f32 %v1002_v43  ;;  %v1031_v31 = vsub.f32 1.0, %v1023_v45  ;;  %v1021_v33 = vmul.f32 %v8247_v25, %v981_v8  ;;  %1382 = vmatpush.bf16.msrb.mxu2 %v9306_v1 }
 0x113   : > { %v953_v52 = vmul.f32 %v945_v37, %v9252_v4  ;;  %v984_v42 = vmul.f32 %v976_v53, %v9232_v36  ;;  %v970_v36 = vadd.f32 0.2548296, %v962_v41  ;;  %v1022_v54 = vmul.f32 %v8249_v3, %v982_v40  ;;  %v9316_v40 = vld [vmem:[%s13748_s23 + $0x10] sm:$0xff]  ;;  %v7756_v3 = vld [vmem:[%s13748_s23 + $0x8] sm:$0xff] }
 0x114   : > { %v979_v60 = vmul.f32 %v971_v9, %v9161_v59  ;;  %v1405_v58 = vmul.f32 %v9300_v32, %v9300_v32  ;;  %v1039_v49 = vsub.f32 0.0, %v1031_v31  ;;  %v1057_v15 = vmul.f32 0.5, %v9129_v34 }
 0x115   : > { %v961_v61 = vadd.f32 -0.28449672, %v953_v52  ;;  %v1024_v56 = vmul.f32 %v8245_v0, %v984_v42  ;;  %v8251_v46 = vpop.eup %8250  ;;  %v1030_v11 = vsub.f32 1.0, %v1022_v54  ;;  %v978_v2 = vmul.f32 %v970_v36, %v9079_v14 }
 0x116   : > { %v8253_v37 = vpop.eup %8252  ;;  %v1020_v53 = vmul.f32 %v8251_v46, %v980_v21  ;;  %v1029_v52 = vsub.f32 1.0, %v1021_v33  ;;  %1383 = vmatpush.bf16.msrb.mxu2 %v9316_v40  ;;  %v1056_v21 = vmul.f32 0.5, %v9068_v48  ;;  %v1055_v48 = vmul.f32 0.5, %v8984_v5 }
 0x117   : > { %v969_v26 = vmul.f32 %v961_v61, %v9252_v4  ;;  %v1032_v10 = vsub.f32 1.0, %v1024_v56  ;;  %v8255_v41 = vpop.eup %8254  ;;  %v1019_v42 = vmul.f32 %v8253_v37, %v979_v60  ;;  %v1038_v43 = vsub.f32 0.0, %v1030_v11  ;;  %v1226_v54 = vpop.f32.mrf.mxu2 }
 0x118   : > { %v8257_v0 = vpop.eup %8256  ;;  %v1028_v8 = vsub.f32 1.0, %v1020_v53  ;;  %7095 = vmatmul.msk.f32.gmra.mxu3 %vm704_vm0, %v1405_v58  ;;  %v1047_v56 = vsel %vm759_vm8, %v1031_v31, %v1039_v49  ;;  %v1037_v45 = vsub.f32 0.0, %v1029_v52  ;;  %v9334_v31 = vadd.f32 %v9230_v20, %v1226_v54 }
 0x119   : > { %v977_v51 = vadd.f32 0.2548296, %v969_v26  ;;  %v1040_v19 = vsub.f32 0.0, %v1032_v10  ;;  %v1018_v25 = vmul.f32 %v8257_v0, %v978_v2  ;;  %v1027_v9 = vsub.f32 1.0, %v1019_v42 }
 0x11a   : > { %v1046_v24 = vsel %vm758_vm5, %v1030_v11, %v1038_v43  ;;  %v1036_v26 = vsub.f32 0.0, %v1028_v8  ;;  %1384 = vmatpush.bf16.msrb.mxu2 %v7756_v3  ;;  %v1045_v50 = vsel %vm757_vm4, %v1029_v52, %v1037_v45  ;;  %v1406_v34 = vmul.f32 %v9334_v31, %v9334_v31  ;;  %v7746_v45 = vld [vmem:[%s13590_s13] sm:$0xff] }
 0x11b   : > { %v985_v12 = vmul.f32 %v977_v51, %v9252_v4  ;;  %v1048_v14 = vsel %vm760_vm6, %v1032_v10, %v1040_v19  ;;  %v1026_v10 = vsub.f32 1.0, %v1018_v25  ;;  %v1063_v51 = vadd.f32 1.0, %v1047_v56 }
 0x11c   : > { %v1064_v36 = vadd.f32 1.0, %v1048_v14  ;;  %v1035_v33 = vsub.f32 0.0, %v1027_v9  ;;  %v1062_v53 = vadd.f32 1.0, %v1046_v24  ;;  %v1044_v58 = vsel %vm756_vm3, %v1028_v8, %v1036_v26 }
 0x11d   : > { %v1025_v59 = vmul.f32 %v8255_v41, %v985_v12  ;;  %v1034_v12 = vsub.f32 0.0, %v1026_v10  ;;  %v1054_v5 = vmul.f32 0.5, %v8945_v55  ;;  %v1071_v19 = vmul.f32 %v1063_v51, %v1055_v48 }
 0x11e   : > { %v1072_v60 = vmul.f32 %v1064_v36, %v1056_v21  ;;  %1385 = vmatpush.bf16.msrb.mxu2 %v7755_v57  ;;  %v1061_v11 = vadd.f32 1.0, %v1045_v50  ;;  %v1043_v2 = vsel %vm755_vm2, %v1027_v9, %v1035_v33  ;;  %v1053_v41 = vmul.f32 0.5, %v8921_v44  ;;  %v9403_v50 = vld [vmem:[%s13593_s16] ss:$0 sm:$0xff] }
 0x11f   : > { %v1033_v4 = vsub.f32 1.0, %v1025_v59  ;;  %v1070_v59 = vmul.f32 %v1062_v53, %v1054_v5  ;;  %v1060_v49 = vadd.f32 1.0, %v1044_v58  ;;  %vm13749_vm3 = vcmp.ge.f32.partialorder %v8866_v23, 0.0  ;;  %v1228_v42 = vpop.f32.mrf.mxu2 }
 0x120   : > { %7096 = vmatmul.msk.f32.gmra.mxu3 %vm704_vm0, %v1406_v34  ;;  %v1042_v52 = vsel %vm13749_vm3, %v1026_v10, %v1034_v12  ;;  %v1069_v0 = vmul.f32 %v1061_v11, %v1053_v41  ;;  %v1059_v8 = vadd.f32 1.0, %v1043_v2 }
 0x121   : > { %v1041_v61 = vsub.f32 0.0, %v1033_v4  ;;  %v1078_v55 = vpack.c.bf16 %v1071_v19, %v1070_v59  ;;  %v1068_v14 = vmul.f32 %v1060_v49, %v1052_v38  ;;  %v1058_v44 = vadd.f32 1.0, %v1042_v52 }
 0x122   : > { %v1067_v23 = vmul.f32 %v1059_v8, %v1051_v29 }
 0x123   : > { %v1049_v18 = vsel %vm761_vm10, %v1033_v4, %v1041_v61  ;;  %v9355_v4 = vadd.f32 %v9230_v20, %v1228_v42  ;;  %v1077_v25 = vpack.c.bf16 %v1069_v0, %v1068_v14  ;;  %v1066_v61 = vmul.f32 %v1058_v44, %v1050_v35 }
 0x124   : > { %v1065_v46 = vadd.f32 1.0, %v1049_v18 }
 0x125   : > { %v1407_v43 = vmul.f32 %v9355_v4, %v9355_v4  ;;  %v1076_v56 = vpack.c.bf16 %v1067_v23, %v1066_v61 }
 0x126   : > { %v1073_v37 = vmul.f32 %v1065_v46, %v1057_v15 }
 0x128   : > { %v1079_v47 = vpack.c.bf16 %v1073_v37, %v1072_v60  ;;  %7097 = vmatmul.msk.f32.gmra.mxu3 %vm704_vm0, %v1407_v43  ;;  %v1808_v37 = vld [vmem:[%s13592_s15 + $0x18] sm:$0xff] }
 0x12a   : > { %1092 = vmatpush.bf16.msra.mxu1 %v1079_v47 }
 0x12e   : > { %1093 = vmatpush.bf16.msra.mxu1 %v1078_v55  ;;  %v1810_v55 = vld [vmem:[%s13592_s15 + $0x28] sm:$0xff] }
 0x132   : > { %1094 = vmatpush.bf16.msra.mxu1 %v1077_v25 }
 0x136   : > { %1095 = vmatpush.bf16.msra.mxu1 %v1076_v56 }
 0x139   : > { %7027 = vmatmul.msk.bf16.vlgmr.msra.gmra.mxu1 %vm704_vm0, %v7746_v45 }
 0x13a   : > { %1336 = vmatpush.bf16.msrb.mxu1 %v9306_v1 }
 0x13e   : > { %1337 = vmatpush.bf16.msrb.mxu1 %v9316_v40  ;;  %v13753_v40 = vld [vmem:[#allocation14_spill] sm:$0xff] }
 0x142   : > { %1338 = vmatpush.bf16.msrb.mxu1 %v7756_v3 }
 0x146   : > { %1339 = vmatpush.bf16.msrb.mxu1 %v7755_v57 }
 0x149   : > { %7084 = vmatmul.msk.bf16.vlgmr.msrb.gmra.mxu1 %vm704_vm0, %v8821_v6 }
 0x14a   : > { %1754 = vmatpush.msra.mxu1 %v8965_v62  ;;  %v9380_v62 = vpop.f32.mrf.mxu3 }
 0x14c   : > { %1755 = vmatpush.msra.mxu1 %v8970_v63  ;;  %v13751_v63 = vld [vmem:[#allocation12_spill] sm:$0xff] }
 0x14e   : > { %1756 = vmatpush.msra.mxu1 %v8989_v7 }
 0x150   : > { %1757 = vmatpush.msra.mxu1 %v9009_v17  ;;  %v13752_v17 = vld [vmem:[#allocation13_spill] sm:$0xff] }
 0x152   : > { %1758 = vmatpush.msra.mxu1 %v9023_v28  ;;  %v9384_v7 = vpop.f32.mrf.mxu3 }
 0x154   : > { %1759 = vmatpush.msra.mxu1 %v13750_v22 }
 0x156   : > { %1760 = vmatpush.msra.mxu1 %v9258_v13 }
 0x158   : > { %1761 = vmatpush.msra.mxu1 %v9263_v16 }
 0x159   : > { %7085 = vmatmul.msk.bf16.gmra.mxu1 %vm704_vm0, %v13751_v63 }
 0x15a   : > { %v9386_v6 = vpop.f32.mrf.mxu3 }
 0x162   : > { %v9390_v28 = vpop.f32.mrf.mxu3 }
 0x169   : > { %7086 = vmatmul.msk.bf16.gmra.mxu1 %vm704_vm0, %v13752_v17 }
 0x16a   : > { %v9392_v1 = vpop.f32.mrf.mxu3 }
 0x172   : > { %v9396_v9 = vpop.f32.mrf.mxu3 }
 0x179   : > { %7087 = vmatmul.msk.bf16.gmra.mxu1 %vm704_vm0, %v13753_v40 }
 0x17a   : > { %v9398_v3 = vpop.f32.mrf.mxu3 }
 0x189   : > { %v1458_v21 = vpop.f32.mrf.mxu3 }
 0x18a   : > { %v1476_v36 = vmax.f32 %v1458_v21, 1e-24 }
 0x18c   : > { %8258 = vrsqrt.f32 %v1476_v36  ;;  %vm1517_vm2 = vweird.f32 %v1476_v36 }
 0x192   : > { %v8259_v24 = vpop.eup %8258 }
 0x193   : > { %v1461_v18 = vpop.f32.mrf.mxu3  ;;  %v1512_v26 = vmul.f32 %v8259_v24, %v1476_v36  ;;  %vm1518_vm4 = vweird.f32 %v8259_v24 }
 0x194   : > { %vm1519_vm5 = vmor %vm1517_vm2, %vm1518_vm4  ;;  %v1477_v33 = vmax.f32 %v1461_v18, 1e-24 }
 0x195   : > { %v1513_v10 = vmul.f32 %v8259_v24, %v1512_v26  ;;  %v1809_v26 = vld [vmem:[%s13592_s15 + $0x20] sm:$0xff] }
 0x196   : > { %vm1527_vm11 = vweird.f32 %v1477_v33 }
 0x197   : > { %v1514_v54 = vmul.f32 0.5, %v1513_v10 }
 0x199   : > { %v1515_v15 = vsub.f32 1.5, %v1514_v54 }
 0x19b   : > { %v1464_v46 = vpop.f32.mrf.mxu3  ;;  %v1516_v48 = vmul.f32 %v8259_v24, %v1515_v15 }
 0x19c   : > { %v1478_v51 = vmax.f32 %v1464_v46, 1e-24 }
 0x19d   : > { %v1520_v57 = vsel %vm1519_vm5, %v8259_v24, %v1516_v48 }
 0x19e   : > { %8260 = vrsqrt.f32 %v1478_v51  ;;  %v9406_v60 = vmul.f32 %v1520_v57, %v9243_v39  ;;  %vm1537_vm8 = vweird.f32 %v1478_v51 }
 0x19f   : > { %8262 = vrsqrt.f32 %v1477_v33 }
 0x1a0   : > { %13754 = vst [vmem:[#allocation16_spill] sm:$0xff] %v9406_v60  ;;  %v1800_v53 = vadd.f32 %v9403_v50, %v9406_v60 }
 0x1a2   : > { %v9413_v58 = vmul.f32 %v1808_v37, %v1800_v53 }
 0x1a3   : > { %v1467_v19 = vpop.f32.mrf.mxu3 }
 0x1a4   : > { %v8261_v34 = vpop.eup %8260  ;;  %2230 = vrot.lane.b32.xlu2 %v9413_v58, %s13617_s24  ;;  %v1479_v56 = vmax.f32 %v1467_v19, 1e-24 }
 0x1a5   : > { %v1532_v12 = vmul.f32 %v8261_v34, %v1478_v51  ;;  %v8263_v47 = vpop.eup %8262  ;;  %vm1538_vm6 = vweird.f32 %v8261_v34 }
 0x1a6   : > { %v1522_v11 = vmul.f32 %v8263_v47, %v1477_v33  ;;  %vm1539_vm10 = vmor %vm1537_vm8, %vm1538_vm6  ;;  %vm1528_vm13 = vweird.f32 %v8263_v47  ;;  %v1812_v33 = vld [vmem:[%s13592_s15 + $0x38] sm:$0xff]  ;;  %vm1547_vm9 = vweird.f32 %v1479_v56 }
 0x1a7   : > { %v1533_v5 = vmul.f32 %v8261_v34, %v1532_v12  ;;  %vm1529_vm12 = vmor %vm1527_vm11, %vm1528_vm13 }
 0x1a8   : > { %v1523_v59 = vmul.f32 %v8263_v47, %v1522_v11 }
 0x1a9   : > { %v1534_v39 = vmul.f32 0.5, %v1533_v5 }
 0x1aa   : > { %v1524_v14 = vmul.f32 0.5, %v1523_v59 }
 0x1ab   : > { %v1535_v2 = vsub.f32 1.5, %v1534_v39  ;;  %v1470_v0 = vpop.f32.mrf.mxu3 }
 0x1ac   : > { %v1480_v29 = vmax.f32 %v1470_v0, 1e-24  ;;  %v1811_v0 = vld [vmem:[%s13592_s15 + $0x30] sm:$0xff] }
 0x1ad   : > { %v1536_v41 = vmul.f32 %v8261_v34, %v1535_v2 }
 0x1ae   : > { %8264 = vrsqrt.f32 %v1480_v29  ;;  %vm1557_vm7 = vweird.f32 %v1480_v29 }
 0x1af   : > { %v1540_v49 = vsel %vm1539_vm10, %v8261_v34, %v1536_v41  ;;  %8266 = vrsqrt.f32 %v1479_v56 }
 0x1b0   : > { %v9420_v52 = vmul.f32 %v1540_v49, %v9300_v32  ;;  %v1525_v32 = vsub.f32 1.5, %v1524_v14 }
 0x1b2   : > { %13755 = vst [vmem:[#allocation12_spill] sm:$0xff] %v9420_v52  ;;  %v1802_v8 = vadd.f32 %v9403_v50, %v9420_v52  ;;  %v1526_v23 = vmul.f32 %v8263_v47, %v1525_v32 }
 0x1b4   : > { %v9429_v44 = vmul.f32 %v1810_v55, %v1802_v8  ;;  %v8265_v25 = vpop.eup %8264  ;;  %v1530_v22 = vsel %vm1529_vm12, %v8263_v47, %v1526_v23 }
 0x1b5   : > { %v1552_v61 = vmul.f32 %v8265_v25, %v1480_v29  ;;  %vm1558_vm14 = vweird.f32 %v8265_v25  ;;  %v9438_v21 = vmul.f32 %v1530_v22, %v9283_v30  ;;  %v8267_v24 = vpop.eup %8266 }
 0x1b6   : > { %v9417_v38 = vpop.f32.mrf.mxu1  ;;  %2234 = vrot.lane.b32.xlu2 %v9429_v44, %s13617_s24  ;;  %vm1559_vm15 = vmor %vm1557_vm7, %vm1558_vm14  ;;  %v1542_v46 = vmul.f32 %v8267_v24, %v1479_v56  ;;  %vm1548_vm1 = vweird.f32 %v8267_v24 }
 0x1b7   : > { %v1102_v42 = vsel %vm704_vm0, %v9417_v38, 0.0  ;;  %v1553_v45 = vmul.f32 %v8265_v25, %v1552_v61  ;;  %13756 = vst [vmem:[#allocation13_spill] sm:$0xff] %v9438_v21  ;;  %v1801_v18 = vadd.f32 %v9403_v50, %v9438_v21  ;;  %vm1549_vm3 = vmor %vm1547_vm9, %vm1548_vm1 }
 0x1b8   : > { %1103 = vadd.xlane.f32.xlu0 %v1102_v42  ;;  %v1543_v30 = vmul.f32 %v8267_v24, %v1542_v46 }
 0x1b9   : > { %v1554_v63 = vmul.f32 0.5, %v1553_v45  ;;  %v9445_v15 = vmul.f32 %v1809_v26, %v1801_v18  ;;  %v8633_v45 = vmov 64.0  }
 0x1ba   : > { %v1544_v37 = vmul.f32 0.5, %v1543_v30  ;;  %8268 = vrcp.f32 %v8633_v45 }
 0x1bb   : > { %v1555_v40 = vsub.f32 1.5, %v1554_v63 }
 0x1bc   : > { %v1545_v5 = vsub.f32 1.5, %v1544_v37 }
 0x1bd   : > { %v1556_v36 = vmul.f32 %v8265_v25, %v1555_v40 }
 0x1be   : > { %v9433_v43 = vpop.f32.mrf.mxu1  ;;  %v1546_v11 = vmul.f32 %v8267_v24, %v1545_v5 }
 0x1bf   : > { %v1105_v35 = vsel %vm704_vm0, %v9433_v43, 0.0  ;;  %v1560_v10 = vsel %vm1559_vm15, %v8265_v25, %v1556_v36 }
 0x1c0   : > { %1106 = vadd.xlane.f32.xlu0 %v1105_v35  ;;  %v9448_v51 = vmul.f32 %v1560_v10, %v9355_v4  ;;  %v9462_v4 = vld [vmem:[%s13758_s6] ss:$0 sm:$0xff]  ;;  %v1550_v59 = vsel %vm1549_vm3, %v8267_v24, %v1546_v11  ;;  %v8269_v22 = vpop.eup %8268  ;;  %s8642_s6 = smov 16  }
 0x1c1   : > { %v9488_v42 = vmul.f32 %v1550_v59, %v9334_v31  ;;  %v1109_v63 = vmul.f32 64.0, %v8269_v22  ;;  %vm1113_vm2 = vweird.f32 %v8269_v22 }
 0x1c2   : > { %13757 = vst [vmem:[#allocation14_spill] sm:$0xff] %v9448_v51  ;;  %v1804_v48 = vadd.f32 %v9403_v50, %v9448_v51 }
 0x1c3   : > { %13763 = vst [vmem:[#allocation23_spill] sm:$0xff] %v9488_v42  ;;  %v1803_v55 = vadd.f32 %v9403_v50, %v9488_v42 }
 0x1c4   : > { %v9457_v53 = vmul.f32 %v1812_v33, %v1804_v48 }
 0x1c5   : > { %v9497_v29 = vmul.f32 %v1811_v0, %v1803_v55 }
 0x1c6   : > { %v1341_v17 = vpop.f32.mrf.mxu1 }
 0x1c7   : > { %v9465_v34 = vadd.f32 %v9462_v4, %v1341_v17  ;;  %v1110_v17 = vsub.f32 1.0, %v1109_v63 }
 0x1c9   : > { %13759 = vst [vmem:[#allocation19_spill] sm:$0xff] %v9465_v34  ;;  %v1111_v40 = vmul.f32 %v8269_v22, %v1110_v17 }
 0x1cb   : > { %v1112_v36 = vadd.f32 %v8269_v22, %v1111_v40 }
 0x1cd   : > { %v1114_v18 = vsel %vm1113_vm2, %v8269_v22, %v1112_v36 }
 0x1ce   : > { %v1343_v54 = vpop.f32.mrf.mxu1 }
 0x1cf   : > { %v9468_v12 = vadd.f32 %v9462_v4, %v1343_v54 }
 0x1d1   : > { %13760 = vst [vmem:[#allocation20_spill] sm:$0xff] %v9468_v12  ;;  %v8043_v2 = vpack.i.bf16 %v9468_v12, %v9465_v34 }
 0x1d4   : > { %2232 = vrot.lane.b32.xlu0 %v9445_v15, %s13617_s24 }
 0x1d6   : > { %v1346_v57 = vpop.f32.mrf.mxu1 }
 0x1d7   : > { %v9473_v47 = vadd.f32 %v9462_v4, %v1346_v57 }
 0x1d9   : > { %13761 = vst [vmem:[#allocation21_spill] sm:$0xff] %v9473_v47 }
 0x1dc   : > { %2238 = vrot.lane.b32.xlu0 %v9457_v53, %s13617_s24 }
 0x1de   : > { %v1348_v39 = vpop.f32.mrf.mxu1 }
 0x1df   : > { %v9476_v19 = vadd.f32 %v9462_v4, %v1348_v39 }
 0x1e1   : > { %13762 = vst [vmem:[#allocation22_spill] sm:$0xff] %v9476_v19  ;;  %v9482_v41 = vpack.i.bf16 %v9476_v19, %v9473_v47 }
 0x1e3   : > { %8049 = vrot.lane.b32.xlu2 %v9482_v41, %s13617_s24 }
 0x1e4   : > { %8044 = vrot.lane.b32.xlu0 %v8043_v2, %s13617_s24 }
 0x1e6   : > { %v1351_v49 = vpop.f32.mrf.mxu1 }
 0x1e7   : > { %v9500_v14 = vadd.f32 %v9462_v4, %v1351_v49 }
 0x1e9   : > { %13764 = vst [vmem:[#allocation24_spill] sm:$0xff] %v9500_v14 }
 0x1eb   : > { %2706 = vrot.lane.b32.xlu2 %v9413_v58, %s13619_s28 }
 0x1ee   : > { %v1353_v8 = vpop.f32.mrf.mxu1 }
 0x1ef   : > { %v9503_v31 = vadd.f32 %v9462_v4, %v1353_v8 }
 0x1f1   : > { %13765 = vst [vmem:[#allocation25_spill] sm:$0xff] %v9503_v31  ;;  %v8073_v35 = vpack.i.bf16 %v9503_v31, %v9500_v14  ;;  %v9600_v37 = vpack.i.bf16 %v9500_v14, %v9503_v31 }
 0x1f3   : > { %2712 = vrot.lane.b32.xlu2 %v9497_v29, %s13619_s28  ;;  %13769 = vst [vmem:[#allocation29_spill] sm:$0xff] %v9600_v37 }
 0x1f6   : > { %v1356_v32 = vpop.f32.mrf.mxu1 }
 0x1f7   : > { %v9511_v25 = vadd.f32 %v9462_v4, %v1356_v32 }
 0x1f9   : > { %13766 = vst [vmem:[#allocation26_spill] sm:$0xff] %v9511_v25 }
 0x1fb   : > { %8074 = vrot.lane.b32.xlu2 %v8073_v35, %s13619_s28 }
 0x1fe   : > { %v1358_v23 = vpop.f32.mrf.mxu1 }
 0x1ff   : > { %v9514_v61 = vadd.f32 %v9462_v4, %v1358_v23 }
 0x201   : > { %13767 = vst [vmem:[#allocation27_spill] sm:$0xff] %v9514_v61  ;;  %v8058_v56 = vpack.i.bf16 %v9514_v61, %v9511_v25 }
 0x203   : > { %3176 = vrot.lane.b32.xlu2 %v9429_v44, %s13615_s1  ;;  %8059 = vrot.lane.b32.xlu0 %v8058_v56, %s13617_s24 }
 0x20b   : > { %3638 = vrot.lane.b32.xlu2 %v9413_v58, %s13623_s2  ;;  %2708 = vrot.lane.b32.xlu0 %v9445_v15, %s13619_s28 }
 0x213   : > { %3644 = vrot.lane.b32.xlu2 %v9497_v29, %s13623_s2  ;;  %2714 = vrot.lane.b32.xlu0 %v9457_v53, %s13619_s28 }
 0x21b   : > { %4104 = vrot.lane.b32.xlu2 %v9413_v58, %s13625_s26  ;;  %8064 = vrot.lane.b32.xlu0 %v8043_v2, %s13619_s28  ;;  %v9608_v2 = vpack.i.bf16 %v9465_v34, %v9468_v12 }
 0x21d   : > { %13770 = vst [vmem:[#allocation30_spill] sm:$0xff] %v9608_v2 }
 0x223   : > { %4572 = vrot.lane.b32.xlu2 %v9445_v15, %s13621_s27  ;;  %8079 = vrot.lane.b32.xlu0 %v8058_v56, %s13619_s28 }
 0x22b   : > { %v1104_v24 = vpop.xlane.xlu0 %1103  ;;  %4110 = vrot.lane.b32.xlu2 %v9497_v29, %s13625_s26  ;;  %3174 = vrot.lane.b32.xlu0 %v9445_v15, %s13615_s1 }
 0x22c   : > { %v1115_v26 = vmul.f32 %v1114_v18, %v1104_v24  ;;  %v8223_v24 = vld [vmem:[%s13588_s11] ss:$0 sm:$0xff] }
 0x22e   : > { %v9540_v10 = vsub.f32 %v9417_v38, %v1115_v26 }
 0x230   : > { %v1119_v54 = vmul.f32 %v9540_v10, %v9540_v10 }
 0x232   : > { %v1121_v46 = vsel %vm704_vm0, %v1119_v54, 0.0 }
 0x233   : > { %1122 = vadd.xlane.f32.xlu1 %v1121_v46  ;;  %4578 = vrot.lane.b32.xlu2 %v9457_v53, %s13621_s27  ;;  %v1107_v30 = vpop.xlane.xlu0 %1106 }
 0x234   : > { %3180 = vrot.lane.b32.xlu0 %v9457_v53, %s13615_s1  ;;  %v1116_v48 = vmul.f32 %v1114_v18, %v1107_v30 }
 0x236   : > { %v9550_v33 = vsub.f32 %v9433_v43, %v1116_v48  ;;  %v9592_v43 = vpack.i.bf16 %v9511_v25, %v9514_v61  ;;  %v8224_v48 = vld [vmem:[%s13589_s12] ss:$0 sm:$0xff] }
 0x238   : > { %v1120_v38 = vmul.f32 %v9550_v33, %v9550_v33  ;;  %13768 = vst [vmem:[#allocation28_spill] sm:$0xff] %v9592_v43 }
 0x23a   : > { %v1124_v57 = vsel %vm704_vm0, %v1120_v38, 0.0 }
 0x23b   : > { %5038 = vrot.lane.b32.xlu2 %v9445_v15, %s13613_s22  ;;  %1125 = vadd.xlane.f32.xlu1 %v1124_v57 }
 0x23c   : > { %3642 = vrot.lane.b32.xlu0 %v9429_v44, %s13623_s2 }
 0x243   : > { %5042 = vrot.lane.b32.xlu2 %v9497_v29, %s13613_s22 }
 0x244   : > { %4106 = vrot.lane.b32.xlu0 %v9445_v15, %s13625_s26 }
 0x24b   : > { %5044 = vrot.lane.b32.xlu2 %v9457_v53, %s13613_s22 }
 0x24c   : > { %4574 = vrot.lane.b32.xlu0 %v9429_v44, %s13621_s27 }
 0x253   : > { %8084 = vrot.lane.b32.xlu2 %v9592_v43, %s13623_s2 }
 0x254   : > { %4112 = vrot.lane.b32.xlu0 %v9457_v53, %s13625_s26  ;;  %2236 = vrot.lane.b32.xlu1 %v9497_v29, %s13617_s24 }
 0x25b   : > { %8094 = vrot.lane.b32.xlu2 %v9600_v37, %s13623_s2 }
 0x25c   : > { %5040 = vrot.lane.b32.xlu0 %v9429_v44, %s13613_s22  ;;  %8054 = vrot.lane.b32.xlu1 %v8073_v35, %s13617_s24  ;;  %s13798_s24 = smov 80  }
 0x263   : > { %8119 = vrot.lane.b32.xlu2 %v9608_v2, %s13615_s1 }
 0x264   : > { %2710 = vrot.lane.b32.xlu1 %v9429_v44, %s13619_s28  ;;  %8099 = vrot.lane.b32.xlu0 %v9600_v37, %s13615_s1 }
 0x26c   : > { %8069 = vrot.lane.b32.xlu1 %v9482_v41, %s13619_s28  ;;  %v9612_v41 = vpack.i.bf16 %v9473_v47, %v9476_v19  ;;  %s13812_s28 = smov 72  }
 0x26e   : > { %13771 = vst [vmem:[#allocation31_spill] sm:$0xff] %v9612_v41  ;;  %8104 = vrot.lane.b32.xlu0 %v9612_v41, %s13623_s2 }
 0x274   : > { %3172 = vrot.lane.b32.xlu1 %v9413_v58, %s13615_s1 }
 0x276   : > { %8109 = vrot.lane.b32.xlu0 %v9612_v41, %s13615_s1 }
 0x27c   : > { %3178 = vrot.lane.b32.xlu1 %v9497_v29, %s13615_s1 }
 0x27e   : > { %8124 = vrot.lane.b32.xlu0 %v9592_v43, %s13621_s27 }
 0x284   : > { %3640 = vrot.lane.b32.xlu1 %v9445_v15, %s13623_s2 }
 0x286   : > { %8134 = vrot.lane.b32.xlu0 %v9600_v37, %s13621_s27 }
 0x28c   : > { %3646 = vrot.lane.b32.xlu1 %v9457_v53, %s13623_s2 }
 0x294   : > { %4570 = vrot.lane.b32.xlu1 %v9413_v58, %s13621_s27 }
 0x29c   : > { %4108 = vrot.lane.b32.xlu1 %v9429_v44, %s13625_s26 }
 0x2a4   : > { %4576 = vrot.lane.b32.xlu1 %v9497_v29, %s13621_s27  ;;  %s13776_s27 = smov 88  }
 0x2a5   : > { %8129 = vrot.lane.b32.xlu2 %v9592_v43, %s13776_s27 }
 0x2a6   : > { %v1123_v5 = vpop.xlane.xlu1 %1122 }
 0x2a7   : > { %v1127_v39 = vmul.f32 %v1123_v5, %v1114_v18 }
 0x2a9   : > { %v1129_v11 = vadd.f32 1e-05, %v1127_v39  ;;  %v8557_v39 = vld [vmem:[%s13591_s14 + $0x30] sm:$0xff] }
 0x2ab   : > { %8270 = vrsqrt.f32 %v1129_v11  ;;  %vm1137_vm5 = vweird.f32 %v1129_v11 }
 0x2ac   : > { %5036 = vrot.lane.b32.xlu1 %v9413_v58, %s13613_s22  ;;  %s13796_s22 = smov 104  }
 0x2ae   : > { %v1126_v59 = vpop.xlane.xlu1 %1125 }
 0x2af   : > { %v1128_v49 = vmul.f32 %v1126_v59, %v1114_v18  ;;  %v8559_v59 = vld [vmem:[%s13591_s14 + $0x20] sm:$0xff] }
 0x2b1   : > { %v8271_v55 = vpop.eup %8270  ;;  %v1130_v0 = vadd.f32 1e-05, %v1128_v49  ;;  %v8560_v49 = vld [vmem:[%s13591_s14 + $0x18] sm:$0xff] }
 0x2b2   : > { %v1132_v8 = vmul.f32 %v8271_v55, %v1129_v11  ;;  %vm1138_vm4 = vweird.f32 %v8271_v55  ;;  %v8558_v11 = vld [vmem:[%s13591_s14 + $0x28] sm:$0xff] }
 0x2b3   : > { %8272 = vrsqrt.f32 %v1130_v0  ;;  %vm1139_vm8 = vmor %vm1137_vm5, %vm1138_vm4  ;;  %vm1147_vm10 = vweird.f32 %v1130_v0 }
 0x2b4   : > { %v1133_v32 = vmul.f32 %v8271_v55, %v1132_v8  ;;  %8089 = vrot.lane.b32.xlu1 %v9592_v43, %s13615_s1  ;;  %v8561_v8 = vld [vmem:[%s13591_s14 + $0x10] sm:$0xff]  ;;  %s13793_s1 = smov 120  }
 0x2b6   : > { %v1134_v35 = vmul.f32 0.5, %v1133_v32 }
 0x2b8   : > { %v1135_v23 = vsub.f32 1.5, %v1134_v35  ;;  %v13773_v35 = vld [vmem:[#allocation17_spill] sm:$0xff] }
 0x2b9   : > { %v8273_v56 = vpop.eup %8272 }
 0x2ba   : > { %v1136_v45 = vmul.f32 %v8271_v55, %v1135_v23  ;;  %v1142_v22 = vmul.f32 %v8273_v56, %v1130_v0  ;;  %vm1148_vm6 = vweird.f32 %v8273_v56  ;;  %v9671_v23 = vadd.f32 %v9230_v20, %v13773_v35 }
 0x2bb   : > { %vm1149_vm11 = vmor %vm1147_vm10, %vm1148_vm6 }
 0x2bc   : > { %v1143_v63 = vmul.f32 %v8273_v56, %v1142_v22  ;;  %8114 = vrot.lane.b32.xlu1 %v9608_v2, %s13623_s2  ;;  %v1140_v17 = vsel %vm1139_vm8, %v8271_v55, %v1136_v45  ;;  %v13772_v55 = vld [vmem:[#allocation15_spill] sm:$0xff]  ;;  %v13774_v45 = vld [vmem:[#allocation18_spill] sm:$0xff]  ;;  %s8640_s2 = smov 40  }
 0x2bd   : > { %v1151_v18 = vmul.f32 %v1140_v17, %v9540_v10  ;;  %v9659_v0 = vadd.f32 %v9230_v20, %v13772_v55  ;;  %v9678_v22 = vadd.f32 %v9230_v20, %v13774_v45 }
 0x2be   : > { %v1144_v40 = vmul.f32 0.5, %v1143_v63 }
 0x2bf   : > { %v1157_v30 = vmul.f32 %v8223_v24, %v1151_v18  ;;  %v1400_v32 = vmul.f32 %v9659_v0, %v9659_v0 }
 0x2c0   : > { %v1145_v36 = vsub.f32 1.5, %v1144_v40  ;;  %v9692_v40 = vpop.permute.xlu2 %2230 }
 0x2c1   : > { %v1163_v10 = vadd.f32 %v8224_v48, %v1157_v30 }
 0x2c2   : > { %v1146_v26 = vmul.f32 %v8273_v56, %v1145_v36 }
 0x2c4   : > { %v1150_v54 = vsel %vm1149_vm11, %v8273_v56, %v1146_v26  ;;  %8139 = vrot.lane.b32.xlu1 %v9600_v37, %s13625_s26  ;;  %v1401_v56 = vmul.f32 %v9671_v23, %v9671_v23  ;;  %s13775_s26 = sld [smem:[#allocation106_spill]] }
 0x2c5   : > { %v1152_v46 = vmul.f32 %v1150_v54, %v9550_v33  ;;  %v8556_v33 = vld [vmem:[%s13591_s14 + $0x38] sm:$0xff] }
 0x2c6   : > { %v9760_v55 = vpop.permute.xlu1 %2236 }
 0x2c7   : > { %v1158_v38 = vmul.f32 %v8223_v24, %v1152_v46  ;;  %13783 = vst [vmem:[#allocation35_spill] sm:$0xff] %v9760_v55 }
 0x2c8   : > { %v9705_v18 = vpop.permute.xlu2 %2234 }
 0x2c9   : > { %v1164_v57 = vadd.f32 %v8224_v48, %v1158_v38  ;;  %13777 = vst [vmem:[#allocation15_spill] sm:$0xff] %v9705_v18  ;;  %v9731_v38 = vpop.permute.xlu0 %2232 }
 0x2cb   : > { %v1165_v5 = vpack.c.bf16 %v1164_v57, %v1163_v10 }
 0x2cd   : > { %7088 = vmatmul.msk.bf16.vlgmr.msrb.gmra.mxu0 %vm704_vm0, %v1165_v5  ;;  %7089 = vmatmul.msk.bf16.vlgmr.msrb.gmra.mxu2 %vm704_vm0, %v1165_v5 }
 0x2ce   : > { %1609 = vmatpush.msrb.mxu0 %v8556_v33 }
 0x2d0   : > { %1610 = vmatpush.msrb.mxu0 %v8557_v39  ;;  %v9713_v26 = vpop.permute.xlu2 %8049 }
 0x2d1   : > { %v9745_v5 = vpop.permute.xlu0 %2238 }
 0x2d2   : > { %1611 = vmatpush.msrb.mxu0 %v8558_v11  ;;  %13780 = vst [vmem:[#allocation32_spill] sm:$0xff] %v9745_v5 }
 0x2d4   : > { %1612 = vmatpush.msrb.mxu0 %v8559_v59 }
 0x2d6   : > { %1613 = vmatpush.msrb.mxu0 %v8560_v49 }
 0x2d8   : > { %1614 = vmatpush.msrb.mxu0 %v8561_v8  ;;  %v9723_v30 = vpop.permute.xlu2 %2706 }
 0x2d9   : > { %13778 = vst [vmem:[#allocation17_spill] sm:$0xff] %v9723_v30  ;;  %v9752_v11 = vpop.permute.xlu0 %8044 }
 0x2da   : > { %1615 = vmatpush.msrb.mxu0 %v9258_v13  ;;  %v1402_v13 = vmul.f32 %v9678_v22, %v9678_v22 }
 0x2dc   : > { %1616 = vmatpush.msrb.mxu0 %v9263_v16  ;;  %v8220_v16 = vld [vmem:[%s13775_s26] ss:$0 sm:$0xff]  ;;  %s8643_s26 = smov 32  }
 0x2dd   : > { %7090 = vmatmul.msk.f32.vlgmr.msra.gmra.mxu0 %vm704_vm0, %v1400_v32  ;;  %v9687_v63 = vadd.f32 %v8220_v16, %v9376_v27  ;;  %v9695_v20 = vadd.f32 %v8220_v16, %v9380_v62  ;;  %v9703_v27 = vadd.f32 %v8220_v16, %v9384_v7  ;;  %v9711_v62 = vadd.f32 %v8220_v16, %v9386_v6  ;;  %v9766_v32 = vpop.permute.xlu1 %8054 }
 0x2de   : > { %v9719_v7 = vadd.f32 %v8220_v16, %v9390_v28  ;;  %v9727_v6 = vadd.f32 %v8220_v16, %v9392_v1  ;;  %v9737_v28 = vadd.f32 %v8220_v16, %v9396_v9  ;;  %v9743_v1 = vadd.f32 %v8220_v16, %v9398_v3 }
 0x2df   : > { %v1569_v17 = vmul.f32 %v9687_v63, %v9687_v63  ;;  %v1570_v36 = vmul.f32 %v9695_v20, %v9695_v20  ;;  %v1571_v24 = vmul.f32 %v9703_v27, %v9703_v27  ;;  %v1572_v54 = vmul.f32 %v9711_v62, %v9711_v62 }
 0x2e0   : > { %v1573_v46 = vmul.f32 %v9719_v7, %v9719_v7  ;;  %v1574_v48 = vmul.f32 %v9727_v6, %v9727_v6  ;;  %v9734_v10 = vpop.permute.xlu2 %2712  ;;  %v1575_v57 = vmul.f32 %v9737_v28, %v9737_v28  ;;  %v1576_v39 = vmul.f32 %v9743_v1, %v9743_v1 }
 0x2e1   : > { %13779 = vst [vmem:[#allocation18_spill] sm:$0xff] %v9734_v10  ;;  %v9756_v59 = vpop.permute.xlu0 %8059 }
 0x2e5   : > { %7091 = vmatmul.msk.f32.gmra.mxu0 %vm704_vm0, %v1401_v56 }
 0x2e8   : > { %v9747_v33 = vpop.permute.xlu2 %8074 }
 0x2e9   : > { %v9762_v3 = vpop.permute.xlu0 %2708 }
 0x2ea   : > { %13784 = vst [vmem:[#allocation36_spill] sm:$0xff] %v9762_v3 }
 0x2ed   : > { %7092 = vmatmul.msk.f32.gmra.mxu0 %vm704_vm0, %v1402_v13 }
 0x2f0   : > { %v9754_v9 = vpop.permute.xlu2 %3176 }
 0x2f1   : > { %13781 = vst [vmem:[#allocation33_spill] sm:$0xff] %v9754_v9  ;;  %v9772_v13 = vpop.permute.xlu0 %2714 }
 0x2f2   : > { %13786 = vst [vmem:[#allocation38_spill] sm:$0xff] %v9772_v13 }
 0x2f5   : > { %7098 = vmatmul.msk.f32.vlgmr.msrb.gmra.mxu0 %vm704_vm0, %v1569_v17 }
 0x2f8   : > { %v9758_v49 = vpop.permute.xlu2 %3638 }
 0x2f9   : > { %13782 = vst [vmem:[#allocation34_spill] sm:$0xff] %v9758_v49 }
 0x2fd   : > { %7099 = vmatmul.msk.f32.gmra.mxu0 %vm704_vm0, %v1570_v36 }
 0x300   : > { %v9764_v8 = vpop.permute.xlu2 %3644 }
 0x301   : > { %13785 = vst [vmem:[#allocation37_spill] sm:$0xff] %v9764_v8 }
 0x305   : > { %7100 = vmatmul.msk.f32.gmra.mxu0 %vm704_vm0, %v1571_v24  ;;  %v9777_v24 = vpop.permute.xlu1 %2710 }
 0x306   : > { %13788 = vst [vmem:[#allocation40_spill] sm:$0xff] %v9777_v24 }
 0x308   : > { %v9775_v17 = vpop.permute.xlu2 %4104 }
 0x309   : > { %13787 = vst [vmem:[#allocation39_spill] sm:$0xff] %v9775_v17 }
 0x30d   : > { %7101 = vmatmul.msk.f32.gmra.mxu0 %vm704_vm0, %v1572_v54  ;;  %v9790_v2 = vpop.permute.xlu1 %8069 }
 0x310   : > { %v9788_v37 = vpop.permute.xlu2 %4572 }
 0x311   : > { %13789 = vst [vmem:[#allocation41_spill] sm:$0xff] %v9788_v37 }
 0x315   : > { %7102 = vmatmul.msk.f32.gmra.mxu0 %vm704_vm0, %v1573_v46  ;;  %v9805_v37 = vpop.permute.xlu1 %3172 }
 0x316   : > { %13795 = vst [vmem:[#allocation44_spill] sm:$0xff] %v9805_v37 }
 0x31d   : > { %7103 = vmatmul.msk.f32.gmra.mxu0 %vm704_vm0, %v1574_v48  ;;  %v9822_v51 = vpop.permute.xlu1 %3178 }
 0x31e   : > { %13800 = vst [vmem:[#allocation47_spill] sm:$0xff] %v9822_v51 }
 0x325   : > { %7104 = vmatmul.msk.f32.gmra.mxu0 %vm704_vm0, %v1575_v57 }
 0x32d   : > { %7105 = vmatmul.msk.f32.gmra.mxu0 %vm704_vm0, %v1576_v39  ;;  %v9784_v39 = vpop.permute.xlu0 %8064 }
 0x34a   : > { %v1373_v35 = vpop.f32.mrf.mxu0 }
 0x34b   : > { %v9768_v56 = vadd.f32 %v8220_v16, %v1373_v35 }
 0x34d   : > { %v1738_v45 = vmul.f32 %v9768_v56, %v9768_v56 }
 0x34f   : > { %7106 = vmatmul.msk.f32.vlgmr.msra.gmra.mxu1 %vm704_vm0, %v1738_v45 }
 0x350   : > { %v1387_v36 = vpop.f32.mrf.mxu2 }
 0x351   : > { %v1388_v35 = vadd.f32 %v9462_v4, %v1387_v36 }
 0x352   : > { %v1375_v54 = vpop.f32.mrf.mxu0 }
 0x353   : > { %v9779_v46 = vadd.f32 %v8220_v16, %v1375_v54 }
 0x355   : > { %v1739_v48 = vmul.f32 %v9779_v46, %v9779_v46 }
 0x357   : > { %7107 = vmatmul.msk.f32.gmra.mxu1 %vm704_vm0, %v1739_v48 }
 0x358   : > { %v1389_v57 = vpop.f32.mrf.mxu2 }
 0x359   : > { %v1390_v45 = vadd.f32 %v9462_v4, %v1389_v57  ;;  %v9802_v57 = vpop.permute.xlu2 %4110 }
 0x35a   : > { %v1449_v43 = vpop.f32.mrf.mxu0  ;;  %13794 = vst [vmem:[#allocation43_spill] sm:$0xff] %v9802_v57 }
 0x35b   : > { %v1473_v8 = vmax.f32 %v1449_v43, 1e-24  ;;  %2164 = vmatpush.msrb.mxu1 %v1390_v45  ;;  %v9792_v16 = vpack.i.bf16 %v1388_v35, %v1390_v45  ;;  %v8148_v54 = vpack.i.bf16 %v1390_v45, %v1388_v35  ;;  %v9800_v43 = vpop.permute.xlu0 %8079 }
 0x35d   : > { %13790 = vst [vmem:[#allocation42_spill] sm:$0xff] %v9792_v16  ;;  %8274 = vrsqrt.f32 %v1473_v8  ;;  %8154 = vrot.lane.b32.xlu0 %v9792_v16, %s13791_s0  ;;  %8149 = vrot.lane.b32.xlu1 %v8148_v54, %s13792_s4  ;;  %vm1487_vm12 = vweird.f32 %v1473_v8 }
 0x35e   : > { %8144 = vrot.lane.b32.xlu2 %v8148_v54, %s13793_s1  ;;  %2165 = vmatpush.msrb.mxu1 %v1388_v35 }
 0x360   : > { %2166 = vmatpush.msrb.mxu1 %v9514_v61 }
 0x362   : > { %2167 = vmatpush.msrb.mxu1 %v9511_v25  ;;  %v1452_v4 = vpop.f32.mrf.mxu0 }
 0x363   : > { %v8275_v36 = vpop.eup %8274  ;;  %v1474_v48 = vmax.f32 %v1452_v4, 1e-24 }
 0x364   : > { %v1482_v45 = vmul.f32 %v8275_v36, %v1473_v8  ;;  %2168 = vmatpush.msrb.mxu1 %v9503_v31  ;;  %vm1488_vm13 = vweird.f32 %v8275_v36  ;;  %v1805_v8 = vld [vmem:[%s13592_s15] sm:$0xff] }
 0x365   : > { %8276 = vrsqrt.f32 %v1474_v48  ;;  %8159 = vrot.lane.b32.xlu1 %v9792_v16, %s13796_s22  ;;  %vm1489_vm7 = vmor %vm1487_vm12, %vm1488_vm13  ;;  %vm1497_vm15 = vweird.f32 %v1474_v48 }
 0x366   : > { %v1483_v35 = vmul.f32 %v8275_v36, %v1482_v45  ;;  %8169 = vrot.lane.b32.xlu2 %v9792_v16, %s13776_s27  ;;  %2169 = vmatpush.msrb.mxu1 %v9500_v14  ;;  %v9815_v45 = vpop.permute.xlu0 %3174 }
 0x367   : > { %13797 = vst [vmem:[#allocation45_spill] sm:$0xff] %v9815_v45 }
 0x368   : > { %v1484_v54 = vmul.f32 0.5, %v1483_v35  ;;  %2170 = vmatpush.msrb.mxu1 %v9476_v19  ;;  %v9819_v35 = vpop.permute.xlu2 %4578 }
 0x369   : > { %13799 = vst [vmem:[#allocation46_spill] sm:$0xff] %v9819_v35 }
 0x36a   : > { %v1485_v4 = vsub.f32 1.5, %v1484_v54  ;;  %2171 = vmatpush.msrb.mxu1 %v9473_v47  ;;  %v1455_v49 = vpop.f32.mrf.mxu0 }
 0x36b   : > { %v8277_v13 = vpop.eup %8276  ;;  %v1475_v10 = vmax.f32 %v1455_v49, 1e-24 }
 0x36c   : > { %v1486_v24 = vmul.f32 %v8275_v36, %v1485_v4  ;;  %v1492_v3 = vmul.f32 %v8277_v13, %v1474_v48  ;;  %2172 = vmatpush.msrb.mxu1 %v9468_v12  ;;  %vm1498_vm14 = vweird.f32 %v8277_v13 }
 0x36d   : > { %8278 = vrsqrt.f32 %v1475_v10  ;;  %8164 = vrot.lane.b32.xlu1 %v9792_v16, %s13798_s24  ;;  %vm1499_vm9 = vmor %vm1497_vm15, %vm1498_vm14  ;;  %vm1507_vm3 = vweird.f32 %v1475_v10 }
 0x36e   : > { %v1490_v54 = vsel %vm1489_vm7, %v8275_v36, %v1486_v24  ;;  %v1493_v30 = vmul.f32 %v8277_v13, %v1492_v3  ;;  %2173 = vmatpush.msrb.mxu1 %v9465_v34 }
 0x36f   : > { %v1561_v49 = vmul.f32 %v1490_v54, %v9659_v0  ;;  %v9845_v54 = vpop.permute.xlu1 %3640 }
 0x370   : > { %v1494_v4 = vmul.f32 0.5, %v1493_v30  ;;  %v9837_v30 = vpop.permute.xlu0 %3180  ;;  %13803 = vst [vmem:[#allocation50_spill] sm:$0xff] %v9845_v54 }
 0x371   : > { %v1797_v42 = vadd.f32 %v9403_v50, %v1561_v49  ;;  %13801 = vst [vmem:[#allocation48_spill] sm:$0xff] %v9837_v30 }
 0x372   : > { %v1495_v52 = vsub.f32 1.5, %v1494_v4  ;;  %v1618_v35 = vpop.f32.mrf.mxu0 }
 0x373   : > { %v8279_v16 = vpop.eup %8278  ;;  %v9829_v21 = vmul.f32 %v1805_v8, %v1797_v42  ;;  %v9840_v42 = vpop.permute.xlu2 %5038 }
 0x374   : > { %v1496_v24 = vmul.f32 %v8277_v13, %v1495_v52  ;;  %v1502_v3 = vmul.f32 %v8279_v16, %v1475_v10  ;;  %13802 = vst [vmem:[#allocation49_spill] sm:$0xff] %v9840_v42  ;;  %v1806_v52 = vld [vmem:[%s13592_s15 + $0x8] sm:$0xff]  ;;  %vm1508_vm1 = vweird.f32 %v8279_v16 }
 0x375   : > { %4564 = vrot.lane.b32.xlu0 %v9829_v21, %s13798_s24  ;;  %3166 = vrot.lane.b32.xlu1 %v9829_v21, %s13796_s22  ;;  %vm1509_vm2 = vmor %vm1507_vm3, %vm1508_vm1 }
 0x376   : > { %v1500_v0 = vsel %vm1499_vm9, %v8277_v13, %v1496_v24  ;;  %2224 = vrot.lane.b32.xlu2 %v9829_v21, %s13793_s1  ;;  %v1503_v48 = vmul.f32 %v8279_v16, %v1502_v3  ;;  %v1642_v3 = vmax.f32 %v1618_v35, 1e-24 }
 0x377   : > { %v1562_v36 = vmul.f32 %v1500_v0, %v9671_v23 }
 0x378   : > { %v1504_v24 = vmul.f32 0.5, %v1503_v48  ;;  %v9858_v0 = vpop.permute.xlu0 %3642  ;;  %8280 = vrsqrt.f32 %v1642_v3  ;;  %vm1656_vm5 = vweird.f32 %v1642_v3 }
 0x379   : > { %v1798_v8 = vadd.f32 %v9403_v50, %v1562_v36  ;;  %v9848_v4 = vpack.c.bf16 %v1562_v36, %v1561_v49  ;;  %13805 = vst [vmem:[#allocation52_spill] sm:$0xff] %v9858_v0  ;;  %v9862_v49 = vpop.permute.xlu1 %3646 }
 0x37a   : > { %v1505_v23 = vsub.f32 1.5, %v1504_v24  ;;  %13807 = vst [vmem:[#allocation54_spill] sm:$0xff] %v9862_v49  ;;  %v1621_v48 = vpop.f32.mrf.mxu0 }
 0x37b   : > { %13804 = vst [vmem:[#allocation51_spill] sm:$0xff] %v9848_v4  ;;  %v9850_v13 = vmul.f32 %v1806_v52, %v1798_v8  ;;  %v9860_v54 = vpop.permute.xlu2 %5042 }
 0x37c   : > { %13806 = vst [vmem:[#allocation53_spill] sm:$0xff] %v9860_v54  ;;  %v1506_v36 = vmul.f32 %v8279_v16, %v1505_v23 }
 0x37d   : > { %3632 = vrot.lane.b32.xlu1 %v9829_v21, %s13791_s0  ;;  %2226 = vrot.lane.b32.xlu0 %v9850_v13, %s13793_s1 }
 0x37e   : > { %2700 = vrot.lane.b32.xlu2 %v9829_v21, %s13792_s4  ;;  %v1510_v35 = vsel %vm1509_vm2, %v8279_v16, %v1506_v36  ;;  %v8281_v52 = vpop.eup %8280  ;;  %v1643_v16 = vmax.f32 %v1621_v48, 1e-24 }
 0x37f   : > { %v9873_v24 = vmul.f32 %v1510_v35, %v9678_v22  ;;  %v1651_v0 = vmul.f32 %v8281_v52, %v1642_v3  ;;  %v1807_v22 = vld [vmem:[%s13592_s15 + $0x10] sm:$0xff]  ;;  %vm1657_vm4 = vweird.f32 %v8281_v52 }
 0x380   : > { %v9870_v8 = vpop.permute.xlu0 %4106  ;;  %8282 = vrsqrt.f32 %v1643_v16  ;;  %vm1658_vm8 = vmor %vm1656_vm5, %vm1657_vm4  ;;  %vm1666_vm10 = vweird.f32 %v1643_v16 }
 0x381   : > { %13808 = vst [vmem:[#allocation55_spill] sm:$0xff] %v9870_v8  ;;  %v9877_v49 = vpop.permute.xlu1 %4570  ;;  %v1799_v10 = vadd.f32 %v9403_v50, %v9873_v24  ;;  %v1652_v36 = vmul.f32 %v8281_v52, %v1651_v0 }
 0x382   : > { %13809 = vst [vmem:[#allocation56_spill] sm:$0xff] %v9873_v24  ;;  %v1624_v60 = vpop.f32.mrf.mxu0 }
 0x383   : > { %v9875_v23 = vpop.permute.xlu2 %5044  ;;  %13811 = vst [vmem:[#allocation58_spill] sm:$0xff] %v9877_v49  ;;  %v9890_v35 = vmul.f32 %v1807_v22, %v1799_v10  ;;  %v1644_v0 = vmax.f32 %v1624_v60, 1e-24 }
 0x384   : > { %13810 = vst [vmem:[#allocation57_spill] sm:$0xff] %v9875_v23  ;;  %v1653_v23 = vmul.f32 0.5, %v1652_v36 }
 0x385   : > { %4098 = vrot.lane.b32.xlu1 %v9829_v21, %s13776_s27  ;;  %2702 = vrot.lane.b32.xlu0 %v9850_v13, %s13792_s4  ;;  %8284 = vrsqrt.f32 %v1644_v0  ;;  %vm1676_vm12 = vweird.f32 %v1644_v0 }
 0x386   : > { %3634 = vrot.lane.b32.xlu2 %v9850_v13, %s13791_s0  ;;  %v8283_v48 = vpop.eup %8282  ;;  %v1654_v10 = vsub.f32 1.5, %v1653_v23 }
 0x387   : > { %v1661_v22 = vmul.f32 %v8283_v48, %v1643_v16  ;;  %vm1667_vm6 = vweird.f32 %v8283_v48 }
 0x388   : > { %v9894_v4 = vpop.permute.xlu0 %4574  ;;  %v1655_v24 = vmul.f32 %v8281_v52, %v1654_v10  ;;  %vm1668_vm11 = vmor %vm1666_vm10, %vm1667_vm6 }
 0x389   : > { %13813 = vst [vmem:[#allocation59_spill] sm:$0xff] %v9894_v4  ;;  %v9902_v50 = vpop.permute.xlu1 %4108  ;;  %v1662_v60 = vmul.f32 %v8283_v48, %v1661_v22 }
 0x38a   : > { %13814 = vst [vmem:[#allocation60_spill] sm:$0xff] %v9902_v50  ;;  %v1659_v10 = vsel %vm1658_vm8, %v8281_v52, %v1655_v24  ;;  %v1627_v42 = vpop.f32.mrf.mxu0 }
 0x38b   : > { %v9892_v49 = vpop.permute.xlu2 %8084  ;;  %v8285_v23 = vpop.eup %8284  ;;  %v9917_v12 = vmul.f32 %v1659_v10, %v9687_v63  ;;  %v1663_v34 = vmul.f32 0.5, %v1662_v60 }
 0x38c   : > { %v1671_v19 = vmul.f32 %v8285_v23, %v1644_v0  ;;  %vm1677_vm13 = vweird.f32 %v8285_v23 }
 0x38d   : > { %5030 = vrot.lane.b32.xlu1 %v9829_v21, %s13812_s28  ;;  %3168 = vrot.lane.b32.xlu0 %v9850_v13, %s13796_s22  ;;  %v1664_v22 = vsub.f32 1.5, %v1663_v34  ;;  %vm1678_vm7 = vmor %vm1676_vm12, %vm1677_vm13 }
 0x38e   : > { %4566 = vrot.lane.b32.xlu2 %v9850_v13, %s13798_s24 }
 0x38f   : > { %v1665_v60 = vmul.f32 %v8283_v48, %v1664_v22 }
 0x390   : > { %v9912_v4 = vpop.permute.xlu0 %4112 }
 0x391   : > { %13815 = vst [vmem:[#allocation61_spill] sm:$0xff] %v9912_v4  ;;  %v9914_v54 = vpop.permute.xlu1 %4576 }
 0x392   : > { %13816 = vst [vmem:[#allocation62_spill] sm:$0xff] %v9914_v54  ;;  %v1672_v54 = vmul.f32 %v8285_v23, %v1671_v19  ;;  %v1630_v63 = vpop.f32.mrf.mxu0  ;;  %v1669_v19 = vsel %vm1668_vm11, %v8283_v48, %v1665_v60  ;;  %vm1837_vm11 = vcmask 64512  }
 0x393   : > { %v9908_v36 = vpop.permute.xlu2 %8094 }
 0x394   : > { %v1673_v10 = vmul.f32 0.5, %v1672_v54  ;;  %v9944_v54 = vmul.f32 %v1669_v19, %v9695_v20 }
 0x395   : > { %4100 = vrot.lane.b32.xlu1 %v9850_v13, %s13776_s27  ;;  %3636 = vrot.lane.b32.xlu0 %v9890_v35, %s13791_s0 }
 0x396   : > { %5032 = vrot.lane.b32.xlu2 %v9850_v13, %s13812_s28 }
 0x398   : > { %v9927_v52 = vpop.permute.xlu0 %5040 }
 0x399   : > { %13817 = vst [vmem:[#allocation63_spill] sm:$0xff] %v9927_v52  ;;  %v9929_v24 = vpop.permute.xlu1 %5036  ;;  %v1674_v52 = vsub.f32 1.5, %v1673_v10 }
 0x39a   : > { %13818 = vst [vmem:[#allocation64_spill] sm:$0xff] %v9929_v24  ;;  %v9939_v24 = vmax.f32 %v1627_v42, 1e-24  ;;  %v9949_v31 = vpop.f32.mrf.mxu0 }
 0x39b   : > { %v9925_v3 = vpop.permute.xlu2 %8119  ;;  %v1675_v47 = vmul.f32 %v8285_v23, %v1674_v52 }
 0x39c   : > { %8286 = vrsqrt.f32 %v9939_v24  ;;  %vm1686_vm15 = vweird.f32 %v9939_v24 }
 0x39d   : > { %4102 = vrot.lane.b32.xlu0 %v9890_v35, %s13776_s27  ;;  %2228 = vrot.lane.b32.xlu1 %v9890_v35, %s13793_s1  ;;  %v1679_v20 = vsel %vm1678_vm7, %v8285_v23, %v1675_v47  ;;  %v8061_v47 = vunpack.i.l.bf16 %v9756_v59  ;;  %v9973_v23 = vmax.f32 %v1630_v63, 1e-24 }
 0x39e   : > { %3170 = vrot.lane.b32.xlu2 %v9890_v35, %s13796_s22  ;;  %v9960_v10 = vmul.f32 %v1679_v20, %v9703_v27  ;;  %v8057_v20 = vunpack.i.h.bf16 %v9766_v32 }
 0x39f   : > { %8288 = vrsqrt.f32 %v9973_v23  ;;  %vm1696_vm3 = vweird.f32 %v9973_v23 }
 0x3a0   : > { %v9941_v22 = vpop.permute.xlu0 %8099 }
 0x3a1   : > { %v9947_v16 = vpop.permute.xlu1 %8089 }
 0x3a2   : > { %v8287_v52 = vpop.eup %8286  ;;  %v1636_v0 = vpop.f32.mrf.mxu0 }
 0x3a3   : > { %v9937_v34 = vpop.permute.xlu2 %8129  ;;  %v1681_v14 = vmul.f32 %v8287_v52, %v9939_v24  ;;  %vm1687_vm14 = vweird.f32 %v8287_v52 }
 0x3a4   : > { %13819 = vst [vmem:[#allocation65_spill] sm:$0xff] %v9937_v34  ;;  %v8062_v34 = vunpack.i.h.bf16 %v9756_v59  ;;  %vm1688_vm9 = vmor %vm1686_vm15, %vm1687_vm14 }
 0x3a5   : > { %5034 = vrot.lane.b32.xlu0 %v9890_v35, %s13812_s28  ;;  %2704 = vrot.lane.b32.xlu1 %v9890_v35, %s13792_s4 }
 0x3a6   : > { %2240 = vrot.lane.b32.xlu2 %v9917_v12, %s13793_s1 }
 0x3a8   : > { %v9957_v60 = vpop.permute.xlu0 %8104 }
 0x3a9   : > { %v9971_v27 = vpop.permute.xlu1 %8114 }
 0x3ad   : > { %5046 = vrot.lane.b32.xlu0 %v9917_v12, %s13812_s28  ;;  %4568 = vrot.lane.b32.xlu1 %v9890_v35, %s13798_s24 }
 0x3ae   : > { %3182 = vrot.lane.b32.xlu2 %v9917_v12, %s13796_s22 }
 0x3b0   : > { %v9979_v61 = vpop.permute.xlu0 %8109 }
 0x3b5   : > { %4582 = vrot.lane.b32.xlu0 %v9944_v54, %s13798_s24  ;;  %2716 = vrot.lane.b32.xlu1 %v9917_v12, %s13792_s4 }
 0x3b6   : > { %3648 = vrot.lane.b32.xlu2 %v9917_v12, %s13791_s0 }
 0x3b8   : > { %v8145_v42 = vpop.permute.xlu2 %8144  ;;  %v9998_v57 = vpop.permute.xlu0 %8124 }
 0x3b9   : > { %v8147_v48 = vunpack.i.h.bf16 %v8145_v42  ;;  %v8146_v19 = vunpack.i.l.bf16 %v8145_v42  ;;  %v1682_v42 = vmul.f32 %v8287_v52, %v1681_v14  ;;  %v8051_v14 = vunpack.i.l.bf16 %v9713_v26  ;;  %13822 = vst [vmem:[#allocation68_spill] sm:$0xff] %v9998_v57 }
 0x3bb   : > { %2607 = vmatpush.msra.mxu0 %v8147_v48  ;;  %v8056_v48 = vunpack.i.l.bf16 %v9766_v32  ;;  %v1683_v59 = vmul.f32 0.5, %v1682_v42  ;;  %v9988_v32 = vpop.permute.xlu1 %8139  ;;  %v9993_v42 = vpop.eup %8288 }
 0x3bc   : > { %13820 = vst [vmem:[#allocation66_spill] sm:$0xff] %v9988_v32  ;;  %vm1697_vm1 = vweird.f32 %v9993_v42 }
 0x3bd   : > { %2608 = vmatpush.msra.mxu0 %v8146_v19  ;;  %2244 = vrot.lane.b32.xlu0 %v9960_v10, %s13793_s1  ;;  %v8052_v19 = vunpack.i.h.bf16 %v9713_v26  ;;  %vm1698_vm2 = vmor %vm1696_vm3, %vm1697_vm1 }
 0x3be   : > { %4114 = vrot.lane.b32.xlu2 %v9917_v12, %s13776_s27  ;;  %2242 = vrot.lane.b32.xlu1 %v9944_v54, %s13793_s1 }
 0x3bf   : > { %2609 = vmatpush.msra.mxu0 %v8062_v34  ;;  %v8047_v34 = vunpack.i.h.bf16 %v9752_v11 }
 0x3c0   : > { %v9990_v63 = vpop.permute.xlu2 %8169 }
 0x3c1   : > { %2610 = vmatpush.msra.mxu0 %v8061_v47  ;;  %13821 = vst [vmem:[#allocation67_spill] sm:$0xff] %v9990_v63  ;;  %v1684_v47 = vsub.f32 1.5, %v1683_v59  ;;  %v10014_v59 = vmax.f32 %v1636_v0, 1e-24 }
 0x3c3   : > { %2611 = vmatpush.msra.mxu0 %v8057_v20  ;;  %v1639_v20 = vpop.f32.mrf.mxu0  ;;  %v1685_v26 = vmul.f32 %v8287_v52, %v1684_v47 }
 0x3c4   : > { %v9996_v25 = vmax.f32 %v1639_v20, 1e-24  ;;  %v10024_v20 = vmax.f32 %v9949_v31, 1e-24  ;;  %v10041_v31 = vpop.permute.xlu0 %8134 }
 0x3c5   : > { %2612 = vmatpush.msra.mxu0 %v8056_v48  ;;  %2720 = vrot.lane.b32.xlu0 %v9960_v10, %s13792_s4  ;;  %v8046_v48 = vunpack.i.l.bf16 %v9752_v11  ;;  %13823 = vst [vmem:[#allocation69_spill] sm:$0xff] %v10041_v31  ;;  %v8091_v31 = vunpack.i.l.bf16 %v9947_v16 }
 0x3c6   : > { %4580 = vrot.lane.b32.xlu2 %v9917_v12, %s13798_s24  ;;  %3184 = vrot.lane.b32.xlu1 %v9944_v54, %s13796_s22  ;;  %vm1726_vm7 = vweird.f32 %v9996_v25 }
 0x3c7   : > { %2613 = vmatpush.msra.mxu0 %v8052_v19  ;;  %v1691_v19 = vmul.f32 %v9993_v42, %v9973_v23 }
 0x3c9   : > { %2614 = vmatpush.msra.mxu0 %v8051_v14  ;;  %v1689_v14 = vsel %vm1688_vm9, %v8287_v52, %v1685_v26  ;;  %vm1716_vm9 = vweird.f32 %v10014_v59 }
 0x3ca   : > { %v10021_v47 = vmul.f32 %v1689_v14, %v9711_v62 }
 0x3cb   : > { %2615 = vmatpush.msra.mxu0 %v8047_v34  ;;  %v1692_v34 = vmul.f32 %v9993_v42, %v1691_v19 }
 0x3cc   : > { %v1763_v4 = vpop.f32.mrf.mxu1 }
 0x3cd   : > { %v10002_v32 = vmax.f32 %v1763_v4, 1e-24  ;;  %2616 = vmatpush.msra.mxu0 %v8046_v48  ;;  %3186 = vrot.lane.b32.xlu0 %v9960_v10, %s13796_s22  ;;  %v1693_v0 = vmul.f32 0.5, %v1692_v34 }
 0x3ce   : > { %2718 = vrot.lane.b32.xlu2 %v9944_v54, %s13792_s4  ;;  %5048 = vrot.lane.b32.xlu1 %v9944_v54, %s13812_s28 }
 0x3cf   : > { %8290 = vrsqrt.f32 %v10002_v32  ;;  %v10012_v11 = vpop.permute.xlu1 %8149  ;;  %v1694_v34 = vsub.f32 1.5, %v1693_v0  ;;  %vm1777_vm10 = vweird.f32 %v10002_v32 }
 0x3d0   : > { %8292 = vrsqrt.f32 %v9996_v25  ;;  %v10017_v4 = vpop.permute.xlu2 %2224 }
 0x3d1   : > { %8294 = vrsqrt.f32 %v10014_v59  ;;  %v1695_v30 = vmul.f32 %v9993_v42, %v1694_v34 }
 0x3d3   : > { %v1699_v45 = vsel %vm1698_vm2, %v9993_v42, %v1695_v30  ;;  %vm1706_vm2 = vweird.f32 %v10024_v20 }
 0x3d4   : > { %v1766_v24 = vpop.f32.mrf.mxu1  ;;  %v10084_v55 = vmul.f32 %v1699_v45, %v9719_v7  ;;  %v8112_v7 = vunpack.i.h.bf16 %v9979_v61 }
 0x3d5   : > { %v10027_v48 = vpop.eup %8290  ;;  %v10029_v57 = vmax.f32 %v1766_v24, 1e-24  ;;  %3652 = vrot.lane.b32.xlu0 %v9960_v10, %s13791_s0 }
 0x3d6   : > { %v10033_v52 = vpop.eup %8292  ;;  %v1772_v62 = vmul.f32 %v10027_v48, %v10002_v32  ;;  %3650 = vrot.lane.b32.xlu2 %v9944_v54, %s13791_s0  ;;  %2722 = vrot.lane.b32.xlu1 %v10021_v47, %s13792_s4  ;;  %vm1778_vm5 = vweird.f32 %v10027_v48  ;;  %v8122_v32 = vunpack.i.h.bf16 %v9925_v3 }
 0x3d7   : > { %8296 = vrsqrt.f32 %v10029_v57  ;;  %v8160_v26 = vpop.permute.xlu1 %8159  ;;  %v1721_v24 = vmul.f32 %v10033_v52, %v9996_v25  ;;  %v10049_v63 = vpop.eup %8294  ;;  %vm1787_vm8 = vweird.f32 %v10029_v57  ;;  %vm1779_vm13 = vmor %vm1777_vm10, %vm1778_vm5  ;;  %vm1727_vm12 = vweird.f32 %v10033_v52 }
 0x3d8   : > { %8298 = vrsqrt.f32 %v10024_v20  ;;  %v10045_v19 = vpop.permute.xlu2 %2700  ;;  %v8161_v14 = vunpack.i.l.bf16 %v8160_v26  ;;  %v1773_v50 = vmul.f32 %v10027_v48, %v1772_v62  ;;  %v8162_v8 = vunpack.i.h.bf16 %v8160_v26  ;;  %vm10118_vm14 = vmor %vm1726_vm7, %vm1727_vm12 }
 0x3d9   : > { %13824 = vst [vmem:[#allocation70_spill] sm:$0xff] %v10045_v19  ;;  %v1711_v0 = vmul.f32 %v10049_v63, %v10014_v59  ;;  %v1722_v19 = vmul.f32 %v10033_v52, %v1721_v24  ;;  %v8101_v24 = vunpack.i.l.bf16 %v9941_v22  ;;  %vm1717_vm15 = vweird.f32 %v10049_v63 }
 0x3da   : > { %3539 = vmatpush.msrb.mxu0 %v8161_v14  ;;  %v1774_v62 = vmul.f32 0.5, %v1773_v50  ;;  %v10069_v14 = vpop.permute.xlu0 %8154  ;;  %vm1718_vm1 = vmor %vm1716_vm9, %vm1717_vm15  ;;  %vm1933_vm5 = vcmask 654336  }
 0x3db   : > { %v1712_v23 = vmul.f32 %v10049_v63, %v1711_v0  ;;  %v1723_v37 = vmul.f32 0.5, %v1722_v19 }
 0x3dc   : > { %3540 = vmatpush.msrb.mxu0 %v8162_v8  ;;  %v8092_v8 = vunpack.i.h.bf16 %v9947_v16 }
 0x3dd   : > { %v8297_v17 = vpop.eup %8296  ;;  %4118 = vrot.lane.b32.xlu0 %v9960_v10, %s13776_s27  ;;  %v1713_v42 = vmul.f32 0.5, %v1712_v23  ;;  %v1724_v18 = vsub.f32 1.5, %v1723_v37 }
 0x3de   : > { %v10060_v51 = vpop.eup %8298  ;;  %v1782_v26 = vmul.f32 %v8297_v17, %v10029_v57  ;;  %4116 = vrot.lane.b32.xlu2 %v9944_v54, %s13776_s27  ;;  %4586 = vrot.lane.b32.xlu1 %v10021_v47, %s13798_s24  ;;  %vm1788_vm4 = vweird.f32 %v8297_v17  ;;  %v8121_v57 = vunpack.i.l.bf16 %v9925_v3 }
 0x3df   : > { %3541 = vmatpush.msrb.mxu0 %v8091_v31  ;;  %v10071_v34 = vpop.permute.xlu1 %8164  ;;  %v1701_v16 = vmul.f32 %v10060_v51, %v10024_v20  ;;  %v1775_v31 = vsub.f32 1.5, %v1774_v62  ;;  %vm1789_vm6 = vmor %vm1787_vm8, %vm1788_vm4  ;;  %vm1707_vm3 = vweird.f32 %v10060_v51 }
 0x3e0   : > { %13825 = vst [vmem:[#allocation71_spill] sm:$0xff] %v10071_v34  ;;  %v1783_v50 = vmul.f32 %v8297_v17, %v1782_v26  ;;  %v10076_v9 = vpop.permute.xlu2 %3634  ;;  %v8102_v34 = vunpack.i.h.bf16 %v9941_v22  ;;  %vm1708_vm4 = vmor %vm1706_vm2, %vm1707_vm3 }
 0x3e1   : > { %13826 = vst [vmem:[#allocation72_spill] sm:$0xff] %v10076_v9  ;;  %3542 = vmatpush.msrb.mxu0 %v8092_v8  ;;  %v8111_v9 = vunpack.i.l.bf16 %v9979_v61  ;;  %v1702_v30 = vmul.f32 %v10060_v51, %v1701_v16  ;;  %v1776_v19 = vmul.f32 %v10027_v48, %v1775_v31  ;;  %v1725_v8 = vmul.f32 %v10033_v52, %v1724_v18 }
 0x3e2   : > { %v1784_v5 = vmul.f32 0.5, %v1783_v50 }
 0x3e3   : > { %3543 = vmatpush.msrb.mxu0 %v8101_v24  ;;  %v1703_v62 = vmul.f32 0.5, %v1702_v30  ;;  %v1729_v25 = vsel %vm10118_vm14, %v10033_v52, %v1725_v8 }
 0x3e4   : > { %v1785_v26 = vsub.f32 1.5, %v1784_v5  ;;  %v10146_v52 = vmul.f32 %v1729_v25, %v9743_v1  ;;  %v8097_v25 = vunpack.i.h.bf16 %v9908_v36 }
 0x3e5   : > { %3544 = vmatpush.msrb.mxu0 %v8102_v34  ;;  %4584 = vrot.lane.b32.xlu0 %v9960_v10, %s13798_s24  ;;  %v1704_v18 = vsub.f32 1.5, %v1703_v62  ;;  %v8071_v62 = vunpack.i.l.bf16 %v9790_v2 }
 0x3e6   : > { %v1786_v22 = vmul.f32 %v8297_v17, %v1785_v26  ;;  %5050 = vrot.lane.b32.xlu2 %v9960_v10, %s13812_s28  ;;  %2248 = vrot.lane.b32.xlu1 %v10084_v55, %s13793_s1 }
 0x3e7   : > { %3545 = vmatpush.msrb.mxu0 %v8111_v9  ;;  %v10098_v37 = vpop.permute.xlu1 %3166  ;;  %v10100_v5 = vpop.permute.xlu0 %4564  ;;  %v1714_v9 = vsub.f32 1.5, %v1713_v42  ;;  %v1705_v50 = vmul.f32 %v10060_v51, %v1704_v18 }
 0x3e8   : > { %13827 = vst [vmem:[#allocation73_spill] sm:$0xff] %v10100_v5  ;;  %v1790_v45 = vsel %vm1789_vm6, %v8297_v17, %v1786_v22  ;;  %v10103_v0 = vpop.permute.xlu2 %4566  ;;  %v1780_v17 = vsel %vm1779_vm13, %v10027_v48, %v1776_v19 }
 0x3e9   : > { %13828 = vst [vmem:[#allocation74_spill] sm:$0xff] %v10103_v0  ;;  %v10109_v61 = vmul.f32 %v1790_v45, %v9779_v46  ;;  %3546 = vmatpush.msrb.mxu0 %v8112_v7  ;;  %v10123_v46 = vmul.f32 %v1780_v17, %v9768_v56  ;;  %v1715_v3 = vmul.f32 %v10049_v63, %v1714_v9  ;;  %v8082_v7 = vunpack.i.h.bf16 %v9800_v43 }
 0x3ea   : > { %v1709_v1 = vsel %vm1708_vm4, %v10060_v51, %v1705_v50  ;;  %v8156_v17 = vunpack.i.l.bf16 %v10069_v14 }
 0x3eb   : > { %3547 = vmatpush.msrb.mxu0 %v8121_v57  ;;  %7108 = vmatpush.xpose.msk.msra.mxu2 %vm1837_vm11, %v10109_v61  ;;  %v1719_v16 = vsel %vm1718_vm1, %v10049_v63, %v1715_v3  ;;  %v1735_v23 = vmul.f32 %v1709_v1, %v9727_v6  ;;  %v8076_v57 = vunpack.i.l.bf16 %v9747_v33  ;;  %v8096_v3 = vunpack.i.l.bf16 %v9908_v36 }
 0x3ec   : > { %v10155_v59 = vmul.f32 %v1719_v16, %v9737_v28  ;;  %v8107_v36 = vunpack.i.h.bf16 %v9957_v60  ;;  %v8116_v1 = vunpack.i.l.bf16 %v9971_v27 }
 0x3ed   : > { %3548 = vmatpush.msrb.mxu0 %v8122_v32  ;;  %4120 = vrot.lane.b32.xlu0 %v10021_v47, %s13776_s27  ;;  %v8157_v32 = vunpack.i.h.bf16 %v10069_v14  ;;  %v8087_v14 = vunpack.i.h.bf16 %v9892_v49 }
 0x3ee   : > { %2246 = vrot.lane.b32.xlu2 %v10021_v47, %s13793_s1  ;;  %3190 = vrot.lane.b32.xlu1 %v10084_v55, %s13796_s22 }
 0x3ef   : > { %7109 = vmatpush.xpose.msk.msra.mxu2 %vm1837_vm11, %v10123_v46  ;;  %v10138_v56 = vpop.permute.xlu1 %3632  ;;  %v10140_v48 = vpop.permute.xlu0 %2226 }
 0x3f0   : > { %13831 = vst [vmem:[#allocation75_spill] sm:$0xff] %v10138_v56  ;;  %v10143_v24 = vpop.permute.xlu2 %5032 }
 0x3f1   : > { %13832 = vst [vmem:[#allocation76_spill] sm:$0xff] %v10143_v24 }
 0x3f3   : > { %7110 = vmatpush.xpose.msk.msra.mxu2 %vm1837_vm11, %v10146_v52 }
 0x3f5   : > { %5052 = vrot.lane.b32.xlu0 %v10021_v47, %s13812_s28 }
 0x3f6   : > { %3188 = vrot.lane.b32.xlu2 %v10021_v47, %s13796_s22  ;;  %3656 = vrot.lane.b32.xlu1 %v10084_v55, %s13791_s0 }
 0x3f7   : > { %7111 = vmatpush.xpose.msk.msra.mxu2 %vm1837_vm11, %v10155_v59  ;;  %v10166_v63 = vpop.permute.xlu1 %4098  ;;  %v10168_v20 = vpop.permute.xlu0 %2702 }
 0x3f8   : > { %13833 = vst [vmem:[#allocation77_spill] sm:$0xff] %v10166_v63  ;;  %v10170_v28 = vpop.permute.xlu2 %3170 }
 0x3f9   : > { %13834 = vst [vmem:[#allocation78_spill] sm:$0xff] %v10168_v20 }
 0x3fb   : > { %7112 = vmatpush.xpose.msk.msra.mxu2 %vm1837_vm11, %v1735_v23 }
 0x3fd   : > { %2250 = vrot.lane.b32.xlu0 %v1735_v23, %s13793_s1 }
 0x3fe   : > { %3654 = vrot.lane.b32.xlu2 %v10021_v47, %s13791_s0  ;;  %4122 = vrot.lane.b32.xlu1 %v10084_v55, %s13776_s27 }
 0x3ff   : > { %7113 = vmatpush.xpose.msk.msra.mxu2 %vm1837_vm11, %v10084_v55  ;;  %v10181_v51 = vpop.permute.xlu1 %5030  ;;  %v10183_v31 = vpop.permute.xlu0 %3168 }
 0x400   : > { %13835 = vst [vmem:[#allocation79_spill] sm:$0xff] %v10181_v51  ;;  %v10185_v26 = vpop.permute.xlu2 %2240 }
 0x403   : > { %7114 = vmatpush.xpose.msk.msra.mxu2 %vm1837_vm11, %v10021_v47  ;;  %v8152_v47 = vunpack.i.h.bf16 %v10012_v11 }
 0x405   : > { %2726 = vrot.lane.b32.xlu0 %v1735_v23, %s13792_s4 }
 0x406   : > { %2724 = vrot.lane.b32.xlu2 %v10084_v55, %s13792_s4  ;;  %4588 = vrot.lane.b32.xlu1 %v10084_v55, %s13798_s24 }
 0x407   : > { %7115 = vmatpush.xpose.msk.msra.mxu2 %vm1837_vm11, %v9960_v10  ;;  %v10196_v6 = vpop.permute.xlu1 %4100  ;;  %v10198_v30 = vpop.permute.xlu0 %3636 }
 0x408   : > { %13836 = vst [vmem:[#allocation80_spill] sm:$0xff] %v10196_v6  ;;  %v10200_v42 = vpop.permute.xlu2 %3182 }
 0x409   : > { %13837 = vst [vmem:[#allocation81_spill] sm:$0xff] %v10198_v30 }
 0x40b   : > { %7116 = vmatpush.xpose.msk.msra.mxu2 %vm1837_vm11, %v9944_v54  ;;  %v8151_v54 = vunpack.i.l.bf16 %v10012_v11 }
 0x40d   : > { %3192 = vrot.lane.b32.xlu0 %v1735_v23, %s13796_s22 }
 0x40e   : > { %3658 = vrot.lane.b32.xlu2 %v1735_v23, %s13791_s0  ;;  %5054 = vrot.lane.b32.xlu1 %v10084_v55, %s13812_s28  ;;  %v8081_v55 = vunpack.i.l.bf16 %v9800_v43  ;;  %v8072_v43 = vunpack.i.h.bf16 %v9790_v2  ;;  %v8066_v2 = vunpack.i.l.bf16 %v9784_v39 }
 0x40f   : > { %7117 = vmatpush.xpose.msk.msra.mxu2 %vm1837_vm11, %v9917_v12  ;;  %v10211_v10 = vpop.permute.xlu1 %2228  ;;  %v10213_v19 = vpop.permute.xlu0 %4102  ;;  %v8077_v12 = vunpack.i.h.bf16 %v9747_v33  ;;  %v8067_v33 = vunpack.i.h.bf16 %v9784_v39  ;;  %v8086_v39 = vunpack.i.l.bf16 %v9892_v49  ;;  %v8106_v49 = vunpack.i.l.bf16 %v9957_v60 }
 0x410   : > { %13838 = vst [vmem:[#allocation82_spill] sm:$0xff] %v10213_v19  ;;  %v10215_v22 = vpop.permute.xlu2 %3648 }
 0x411   : > { %13839 = vst [vmem:[#allocation83_spill] sm:$0xff] %v10215_v22 }
 0x412   : > { %7118 = vmatmul.msk.f32.vlgmr.msra.gmra.mxu2 %vm1837_vm11, %v9829_v21 }
 0x413   : > { %3073 = vmatpush.msrb.mxu2 %v8152_v47 }
 0x415   : > { %3074 = vmatpush.msrb.mxu2 %v8151_v54  ;;  %5058 = vrot.lane.b32.xlu0 %v10155_v59, %s13812_s28 }
 0x416   : > { %4590 = vrot.lane.b32.xlu2 %v1735_v23, %s13798_s24  ;;  %4124 = vrot.lane.b32.xlu1 %v1735_v23, %s13776_s27 }
 0x417   : > { %3075 = vmatpush.msrb.mxu2 %v8082_v7  ;;  %v10227_v11 = vpop.permute.xlu1 %2704  ;;  %v10229_v45 = vpop.permute.xlu0 %5034 }
 0x418   : > { %13840 = vst [vmem:[#allocation84_spill] sm:$0xff] %v10227_v11  ;;  %v10231_v21 = vpop.permute.xlu2 %4114 }
 0x419   : > { %3076 = vmatpush.msrb.mxu2 %v8081_v55  ;;  %13841 = vst [vmem:[#allocation85_spill] sm:$0xff] %v10229_v45 }
 0x41a   : > { %7119 = vmatmul.msk.f32.gmra.mxu2 %vm1837_vm11, %v9850_v13 }
 0x41b   : > { %3077 = vmatpush.msrb.mxu2 %v8077_v12 }
 0x41d   : > { %3078 = vmatpush.msrb.mxu2 %v8076_v57  ;;  %4594 = vrot.lane.b32.xlu0 %v10146_v52, %s13798_s24 }
 0x41e   : > { %5056 = vrot.lane.b32.xlu2 %v1735_v23, %s13812_s28  ;;  %2728 = vrot.lane.b32.xlu1 %v10155_v59, %s13792_s4  ;;  %v8117_v23 = vunpack.i.h.bf16 %v9971_v27 }
 0x41f   : > { %3079 = vmatpush.msrb.mxu2 %v8072_v43  ;;  %v10244_v9 = vpop.permute.xlu1 %4568  ;;  %v10246_v13 = vpop.permute.xlu0 %5046 }
 0x420   : > { %13842 = vst [vmem:[#allocation86_spill] sm:$0xff] %v10244_v9  ;;  %v10248_v8 = vpop.permute.xlu2 %4580 }
 0x421   : > { %3080 = vmatpush.msrb.mxu2 %v8071_v62  ;;  %13843 = vst [vmem:[#allocation87_spill] sm:$0xff] %v10246_v13 }
 0x422   : > { %13844 = vst [vmem:[#allocation88_spill] sm:$0xff] %v10248_v8  ;;  %7120 = vmatmul.msk.f32.gmra.mxu2 %vm1837_vm11, %v9890_v35 }
 0x423   : > { %3081 = vmatpush.msrb.mxu2 %v8067_v33 }
 0x425   : > { %3082 = vmatpush.msrb.mxu2 %v8066_v2  ;;  %2256 = vrot.lane.b32.xlu0 %v10123_v46, %s13793_s1 }
 0x426   : > { %2252 = vrot.lane.b32.xlu2 %v10155_v59, %s13793_s1  ;;  %2254 = vrot.lane.b32.xlu1 %v10146_v52, %s13793_s1 }
 0x427   : > { %4005 = vmatpush.msra.mxu2 %v8156_v17  ;;  %v10262_v34 = vpop.permute.xlu1 %2716  ;;  %v10264_v18 = vpop.permute.xlu0 %4582 }
 0x428   : > { %13845 = vst [vmem:[#allocation89_spill] sm:$0xff] %v10264_v18  ;;  %v10266_v35 = vpop.permute.xlu2 %2718 }
 0x429   : > { %4006 = vmatpush.msra.mxu2 %v8157_v32 }
 0x42a   : > { %7121 = vmatmul.msk.f32.gmra.mxu2 %vm1837_vm11, %v9413_v58 }
 0x42b   : > { %4007 = vmatpush.msra.mxu2 %v8086_v39 }
 0x42d   : > { %4008 = vmatpush.msra.mxu2 %v8087_v14  ;;  %2732 = vrot.lane.b32.xlu0 %v10123_v46, %s13792_s4 }
 0x42e   : > { %3194 = vrot.lane.b32.xlu2 %v10155_v59, %s13796_s22  ;;  %3196 = vrot.lane.b32.xlu1 %v10146_v52, %s13796_s22 }
 0x42f   : > { %4009 = vmatpush.msra.mxu2 %v8096_v3  ;;  %v10280_v50 = vpop.permute.xlu0 %2244 }
 0x430   : > { %v10282_v58 = vpop.permute.xlu2 %3650  ;;  %v10284_v16 = vpop.permute.xlu1 %2242 }
 0x431   : > { %4010 = vmatpush.msra.mxu2 %v8097_v25  ;;  %13846 = vst [vmem:[#allocation90_spill] sm:$0xff] %v10282_v58  ;;  %v7821_v58 = vld [vmem:[%s13594_s17] sm:$0xff]  }
 0x432   : > { %7122 = vmatmul.msk.f32.gmra.mxu2 %vm1837_vm11, %v9445_v15  ;;  %v7823_v19 = vunpack.c.h.bf16 %v7821_v58 }
 0x433   : > { %4011 = vmatpush.msra.mxu2 %v8106_v49 }
 0x435   : > { %4012 = vmatpush.msra.mxu2 %v8107_v36  ;;  %3198 = vrot.lane.b32.xlu0 %v10123_v46, %s13796_s22 }
 0x436   : > { %3660 = vrot.lane.b32.xlu2 %v10155_v59, %s13791_s0  ;;  %5060 = vrot.lane.b32.xlu1 %v10146_v52, %s13812_s28 }
 0x437   : > { %4013 = vmatpush.msra.mxu2 %v8116_v1  ;;  %v10297_v60 = vpop.permute.xlu0 %2720 }
 0x438   : > { %v10299_v47 = vpop.permute.xlu2 %4116  ;;  %v10301_v15 = vpop.permute.xlu1 %3184 }
 0x439   : > { %4014 = vmatpush.msra.mxu2 %v8117_v23 }
 0x43a   : > { %7123 = vmatmul.msk.f32.gmra.mxu2 %vm1837_vm11, %v9429_v44 }
 0x43d   : > { %4130 = vrot.lane.b32.xlu0 %v10123_v46, %s13776_s27 }
 0x43e   : > { %4126 = vrot.lane.b32.xlu2 %v10155_v59, %s13776_s27  ;;  %2734 = vrot.lane.b32.xlu1 %v10109_v61, %s13792_s4 }
 0x43f   : > { %v10311_v27 = vpop.permute.xlu0 %3186 }
 0x440   : > { %v10313_v54 = vpop.permute.xlu2 %5050  ;;  %v10315_v7 = vpop.permute.xlu1 %5048 }
 0x442   : > { %7124 = vmatmul.msk.f32.gmra.mxu2 %vm1837_vm11, %v9497_v29 }
 0x445   : > { %4596 = vrot.lane.b32.xlu0 %v10123_v46, %s13798_s24 }
 0x446   : > { %4592 = vrot.lane.b32.xlu2 %v10155_v59, %s13798_s24  ;;  %4132 = vrot.lane.b32.xlu1 %v10109_v61, %s13776_s27 }
 0x447   : > { %v10325_v44 = vpop.permute.xlu0 %3652 }
 0x448   : > { %13847 = vst [vmem:[#allocation91_spill] sm:$0xff] %v10325_v44  ;;  %v10327_v55 = vpop.permute.xlu2 %2246  ;;  %v10329_v12 = vpop.permute.xlu1 %2722 }
 0x44a   : > { %7125 = vmatmul.msk.f32.gmra.mxu2 %vm1837_vm11, %v9457_v53 }
 0x44d   : > { %5064 = vrot.lane.b32.xlu0 %v10109_v61, %s13812_s28 }
 0x44e   : > { %2730 = vrot.lane.b32.xlu2 %v10146_v52, %s13792_s4  ;;  %4598 = vrot.lane.b32.xlu1 %v10109_v61, %s13798_s24 }
 0x44f   : > { %v10339_v29 = vpop.permute.xlu0 %4118 }
 0x450   : > { %v10341_v59 = vpop.permute.xlu2 %3188  ;;  %v10343_v57 = vpop.permute.xlu1 %4586 }
 0x451   : > { %13848 = vst [vmem:[#allocation92_spill] sm:$0xff] %v10343_v57 }
 0x456   : > { %3662 = vrot.lane.b32.xlu2 %v10146_v52, %s13791_s0 }
 0x457   : > { %v10351_v62 = vpop.permute.xlu0 %4584 }
 0x458   : > { %v10347_v43 = vpop.permute.xlu2 %3654  ;;  %v10349_v53 = vpop.permute.xlu1 %2248  ;;  %13850 = vst [vmem:[#allocation94_spill] sm:$0xff] %v10351_v62 }
 0x459   : > { %13849 = vst [vmem:[#allocation93_spill] sm:$0xff] %v10347_v43  ;;  %v7822_v43 = vunpack.c.l.bf16 %v7821_v58 }
 0x45e   : > { %4128 = vrot.lane.b32.xlu2 %v10146_v52, %s13776_s27 }
 0x45f   : > { %v10359_v17 = vpop.permute.xlu0 %4120 }
 0x460   : > { %v10355_v33 = vpop.permute.xlu2 %2724  ;;  %v10357_v2 = vpop.permute.xlu1 %3190 }
 0x466   : > { %3664 = vrot.lane.b32.xlu2 %v10123_v46, %s13791_s0 }
 0x467   : > { %v10367_v14 = vpop.permute.xlu0 %5052 }
 0x468   : > { %v10363_v32 = vpop.permute.xlu2 %3658  ;;  %v10365_v39 = vpop.permute.xlu1 %3656 }
 0x469   : > { %13851 = vst [vmem:[#allocation95_spill] sm:$0xff] %v10363_v32 }
 0x46a   : > { %13852 = vst [vmem:[#allocation96_spill] sm:$0xff] %v10365_v39 }
 0x46e   : > { %5062 = vrot.lane.b32.xlu2 %v10123_v46, %s13812_s28 }
 0x46f   : > { %v10377_v25 = vpop.permute.xlu0 %2250 }
 0x470   : > { %v10371_v3 = vpop.permute.xlu2 %4590  ;;  %v10373_v52 = vpop.permute.xlu1 %4122 }
 0x471   : > { %13853 = vst [vmem:[#allocation97_spill] sm:$0xff] %v10371_v3 }
 0x476   : > { %2258 = vrot.lane.b32.xlu2 %v10109_v61, %s13793_s1  ;;  %s647_s1 = sand.u32 1, %s8619_s25  }
 0x477   : > { %v2727_v46 = vpop.permute.xlu0 %2726 }
 0x478   : > { %v10379_v49 = vpop.permute.xlu2 %5056  ;;  %v10381_v36 = vpop.permute.xlu1 %4588 }
 0x479   : > { %13854 = vst [vmem:[#allocation98_spill] sm:$0xff] %v10381_v36 }
 0x47e   : > { %3200 = vrot.lane.b32.xlu2 %v10109_v61, %s13796_s22  ;;  %s13699_s22 = smov 8  }
 0x47f   : > { %v10395_v5 = vpop.permute.xlu0 %3192 }
 0x480   : > { %v10385_v1 = vpop.permute.xlu2 %2252  ;;  %v10387_v23 = vpop.permute.xlu1 %5054 }
 0x486   : > { %3666 = vrot.lane.b32.xlu2 %v10109_v61, %s13791_s0  ;;  %v7948_v61 = vld [vmem:[%s13594_s17 + $0x8] sm:$0xff]  }
 0x487   : > { %v10399_v8 = vpop.permute.xlu0 %5058  ;;  %v7826_v22 = vunpack.c.l.bf16 %v7948_v61  ;;  %v7827_v24 = vunpack.c.h.bf16 %v7948_v61 }
 0x488   : > { %v10391_v9 = vpop.permute.xlu2 %3194  ;;  %v10393_v0 = vpop.permute.xlu1 %4124 }
 0x48f   : > { %v10403_v3 = vpop.permute.xlu0 %4594 }
 0x490   : > { %v10397_v30 = vpop.permute.xlu2 %3660  ;;  %v2729_v56 = vpop.permute.xlu1 %2728  ;;  %13856 = vst [vmem:[#allocation100_spill] sm:$0xff] %v10403_v3 }
 0x491   : > { %13855 = vst [vmem:[#allocation99_spill] sm:$0xff] %v10397_v30 }
 0x495   : > { %v1909_v18 = vpop.f32.mrf.mxu2 }
 0x497   : > { %v2257_v45 = vpop.permute.xlu0 %2256 }
 0x498   : > { %v10401_v62 = vpop.permute.xlu2 %4126  ;;  %v2255_v57 = vpop.permute.xlu1 %2254 }
 0x49d   : > { %v1912_v36 = vpop.f32.mrf.mxu2 }
 0x4a0   : > { %v10408_v11 = vpop.permute.xlu2 %4592  ;;  %v10410_v20 = vpop.permute.xlu1 %3196 }
 0x4a1   : > { %13857 = vst [vmem:[#allocation101_spill] sm:$0xff] %v10408_v11  ;;  %v10421_v11 = vadd.f32 %v7822_v43, %v1909_v18 }
 0x4a5   : > { %v1915_v44 = vpop.f32.mrf.mxu2 }
 0x4a6   : > { %v10415_v39 = vadd.f32 %v7826_v22, %v1915_v44  ;;  %v1934_v22 = vsel %vm1933_vm5, %v10421_v11, -inf }
 0x4a8   : > { %v2731_v32 = vpop.permute.xlu2 %2730  ;;  %v10417_v3 = vpop.permute.xlu1 %5060  ;;  %v1940_v30 = vsel %vm1933_vm5, %v10415_v39, -inf }
 0x4a9   : > { %1941 = vmax.xlane.f32.xlu0 %v1940_v30  ;;  %v10432_v30 = vadd.f32 %v7823_v19, %v1912_v36 }
 0x4ab   : > { %v1937_v43 = vsel %vm1933_vm5, %v10432_v30, -inf }
 0x4ad   : > { %v1918_v51 = vpop.f32.mrf.mxu2 }
 0x4ae   : > { %v10423_v6 = vadd.f32 %v7827_v24, %v1918_v51  ;;  %v7949_v24 = vld [vmem:[%s13594_s17 + $0x10] sm:$0xff]   ;;  %v2733_v51 = vpop.permute.xlu0 %2732 }
 0x4af   : > { %1935 = vmax.xlane.f32.xlu2 %v1934_v22  ;;  %v7830_v58 = vunpack.c.l.bf16 %v7949_v24  ;;  %v7831_v19 = vunpack.c.h.bf16 %v7949_v24  ;;  %v13869_v24 = vld [vmem:[#allocation82_spill] sm:$0xff] }
 0x4b0   : > { %v10427_v44 = vpop.permute.xlu2 %3662  ;;  %v2735_v63 = vpop.permute.xlu1 %2734  ;;  %v1943_v13 = vsel %vm1933_vm5, %v10423_v6, -inf }
 0x4b1   : > { %7176 = vmatpush.xpose.msk.msra.mxu1 %vm1837_vm11, %v2735_v63  ;;  %1944 = vmax.xlane.f32.xlu1 %v1943_v13 }
 0x4b5   : > { %7177 = vmatpush.xpose.msk.msra.mxu1 %vm1837_vm11, %v2733_v51  ;;  %v1921_v18 = vpop.f32.mrf.mxu2 }
 0x4b6   : > { %v10443_v63 = vadd.f32 %v7830_v58, %v1921_v18 }
 0x4b7   : > { %1938 = vmax.xlane.f32.xlu2 %v1937_v43 }
 0x4b8   : > { %v10440_v61 = vpop.permute.xlu2 %4128  ;;  %v1946_v22 = vsel %vm1933_vm5, %v10443_v63, -inf }
 0x4b9   : > { %7178 = vmatpush.xpose.msk.msra.mxu1 %vm1837_vm11, %v2731_v32 }
 0x4bd   : > { %7179 = vmatpush.xpose.msk.msra.mxu1 %vm1837_vm11, %v2729_v56  ;;  %v1924_v13 = vpop.f32.mrf.mxu2 }
 0x4be   : > { %v10446_v36 = vadd.f32 %v7831_v19, %v1924_v13 }
 0x4bf   : > { %1947 = vmax.xlane.f32.xlu2 %v1946_v22 }
 0x4c0   : > { %v10450_v51 = vpop.permute.xlu2 %3664  ;;  %v1949_v43 = vsel %vm1933_vm5, %v10446_v36, -inf }
 0x4c1   : > { %7180 = vmatpush.xpose.msk.msra.mxu1 %vm1837_vm11, %v2727_v46  ;;  %1950 = vmax.xlane.f32.xlu0 %v1949_v43  ;;  %v7442_v43 = vld [vmem:[%s13596_s19 + $0x80] sm:$0xf] }
 0x4c5   : > { %7181 = vmatpush.xpose.msk.msra.mxu1 %vm1837_vm11, %v10355_v33 }
 0x4c8   : > { %v10457_v32 = vpop.permute.xlu2 %5062 }
 0x4c9   : > { %7182 = vmatpush.xpose.msk.msra.mxu1 %vm1837_vm11, %v10329_v12 }
 0x4ca   : > { %8179 = vrot.lane.b32.xlu1 %v9612_v41, %s13776_s27 }
 0x4cd   : > { %7183 = vmatpush.xpose.msk.msra.mxu1 %vm1837_vm11, %v10297_v60 }
 0x4d0   : > { %v2259_v56 = vpop.permute.xlu2 %2258 }
 0x4d1   : > { %7142 = vmatpush.xpose.msk.msra.mxu3 %vm1837_vm11, %v2259_v56  ;;  %7184 = vmatpush.xpose.msk.msra.mxu1 %vm1837_vm11, %v10266_v35  ;;  %v1927_v35 = vpop.f32.mrf.mxu2 }
 0x4d5   : > { %7143 = vmatpush.xpose.msk.msra.mxu3 %vm1837_vm11, %v2257_v45  ;;  %7185 = vmatpush.xpose.msk.msra.mxu1 %vm1837_vm11, %v10262_v34  ;;  %v7950_v45 = vld [vmem:[%s13594_s17 + $0x18] sm:$0xff]  }
 0x4d6   : > { %v7834_v34 = vunpack.c.l.bf16 %v7950_v45 }
 0x4d7   : > { %8174 = vrot.lane.b32.xlu2 %v9612_v41, %s13798_s24 }
 0x4d8   : > { %v10487_v60 = vadd.f32 %v7834_v34, %v1927_v35 }
 0x4d9   : > { %7144 = vmatpush.xpose.msk.msra.mxu3 %vm1837_vm11, %v2255_v57  ;;  %v3201_v57 = vpop.permute.xlu2 %3200 }
 0x4da   : > { %v1952_v12 = vsel %vm1933_vm5, %v10487_v60, -inf }
 0x4dd   : > { %7145 = vmatpush.xpose.msk.msra.mxu3 %vm1837_vm11, %v10385_v1 }
 0x4e1   : > { %7146 = vmatpush.xpose.msk.msra.mxu3 %vm1837_vm11, %v10377_v25 }
 0x4e5   : > { %7147 = vmatpush.xpose.msk.msra.mxu3 %vm1837_vm11, %v10349_v53  ;;  %v1930_v53 = vpop.f32.mrf.mxu2 }
 0x4e9   : > { %7148 = vmatpush.xpose.msk.msra.mxu3 %vm1837_vm11, %v10327_v55  ;;  %v7835_v55 = vunpack.c.h.bf16 %v7950_v45 }
 0x4eb   : > { %v10499_v33 = vadd.f32 %v7835_v55, %v1930_v53  ;;  %v13870_v55 = vld [vmem:[#allocation39_spill] sm:$0xff] }
 0x4ed   : > { %7149 = vmatpush.xpose.msk.msra.mxu3 %vm1837_vm11, %v10280_v50  ;;  %v3199_v50 = vpop.permute.xlu0 %3198 }
 0x4f1   : > { %7150 = vmatpush.xpose.msk.msra.mxu3 %vm1837_vm11, %v10284_v16  ;;  %v1955_v16 = vsel %vm1933_vm5, %v10499_v33, -inf }
 0x4f4   : > { %1953 = vmax.xlane.f32.xlu1 %v1952_v12  ;;  %v7422_v12 = vld [vmem:[%s13596_s19 + $0x58] sm:$0xf] }
 0x4f5   : > { %7151 = vmatpush.xpose.msk.msra.mxu3 %vm1837_vm11, %v10185_v26  ;;  %v13863_v26 = vld [vmem:[#allocation33_spill] sm:$0xff] }
 0x4f8   : > { %7152 = vmatmul.msk.f32.vlgmr.msra.gmra.mxu3 %vm1837_vm11, %v10017_v4  ;;  %v4133_v4 = vpop.permute.xlu1 %4132 }
 0x4f9   : > { %7210 = vmatpush.xpose.msk.msrb.mxu3 %vm1837_vm11, %v3201_v57  ;;  %v7772_v57 = vld [vmem:[%s13596_s19 + $0x68] sm:$0xf0] }
 0x4fd   : > { %7211 = vmatpush.xpose.msk.msrb.mxu3 %vm1837_vm11, %v3199_v50  ;;  %v7423_v50 = vor.u32 %v7772_v57, %v7422_v12 }
 0x500   : > { %1956 = vmax.xlane.f32.xlu2 %v1955_v16  ;;  %7153 = vmatmul.msk.f32.gmra.mxu3 %vm1837_vm11, %v10140_v48  ;;  %v13858_v48 = vld [vmem:[#allocation15_spill] sm:$0xff] }
 0x501   : > { %7212 = vmatpush.xpose.msk.msrb.mxu3 %vm1837_vm11, %v10410_v20 }
 0x505   : > { %7213 = vmatpush.xpose.msk.msrb.mxu3 %vm1837_vm11, %v10391_v9  ;;  %v13866_v9 = vld [vmem:[#allocation48_spill] sm:$0xff] }
 0x508   : > { %7154 = vmatmul.msk.f32.gmra.mxu3 %vm1837_vm11, %v10211_v10 }
 0x509   : > { %7214 = vmatpush.xpose.msk.msrb.mxu3 %vm1837_vm11, %v10395_v5  ;;  %v4131_v5 = vpop.permute.xlu0 %4130 }
 0x50d   : > { %7215 = vmatpush.xpose.msk.msrb.mxu3 %vm1837_vm11, %v10357_v2 }
 0x510   : > { %7155 = vmatmul.msk.f32.gmra.mxu3 %vm1837_vm11, %v9692_v40  ;;  %v13859_v40 = vld [vmem:[#allocation35_spill] sm:$0xff] }
 0x511   : > { %7216 = vmatpush.xpose.msk.msrb.mxu3 %vm1837_vm11, %v10341_v59  ;;  %v10545_v20 = vpop.permute.xlu0 %4596 }
 0x515   : > { %7217 = vmatpush.xpose.msk.msrb.mxu3 %vm1837_vm11, %v10311_v27  ;;  %v13867_v27 = vld [vmem:[#allocation77_spill] sm:$0xff] }
 0x518   : > { %7156 = vmatmul.msk.f32.gmra.mxu3 %vm1837_vm11, %v9731_v38  ;;  %v13860_v38 = vld [vmem:[#allocation32_spill] sm:$0xff] }
 0x519   : > { %7218 = vmatpush.xpose.msk.msrb.mxu3 %vm1837_vm11, %v10301_v15  ;;  %v7951_v15 = vld [vmem:[%s13594_s17 + $0x20] sm:$0xff]  }
 0x51d   : > { %7219 = vmatpush.xpose.msk.msrb.mxu3 %vm1837_vm11, %v10200_v42  ;;  %v13864_v42 = vld [vmem:[#allocation87_spill] sm:$0xff] }
 0x520   : > { %7157 = vmatmul.msk.f32.gmra.mxu3 %vm1837_vm11, %v13858_v48 }
 0x521   : > { %7278 = vmatpush.xpose.msk.msra.mxu3 %vm1837_vm11, %v4133_v4 }
 0x525   : > { %7279 = vmatpush.xpose.msk.msra.mxu3 %vm1837_vm11, %v4131_v5 }
 0x528   : > { %7158 = vmatmul.msk.f32.gmra.mxu3 %vm1837_vm11, %v13859_v40  ;;  %v7402_v40 = vld [vmem:[%s13596_s19 + $0x30] sm:$0xf] }
 0x529   : > { %7280 = vmatpush.xpose.msk.msra.mxu3 %vm1837_vm11, %v10440_v61  ;;  %v10617_v61 = vpop.permute.xlu1 %4598 }
 0x52d   : > { %7281 = vmatpush.xpose.msk.msra.mxu3 %vm1837_vm11, %v10401_v62 }
 0x530   : > { %7159 = vmatmul.msk.f32.gmra.mxu3 %vm1837_vm11, %v13860_v38  ;;  %v7767_v38 = vld [vmem:[%s13596_s19 + $0x40] sm:$0xf0] }
 0x531   : > { %7282 = vmatpush.xpose.msk.msra.mxu3 %vm1837_vm11, %v10393_v0  ;;  %v5065_v0 = vpop.permute.xlu0 %5064  ;;  %v1945_v16 = vpop.xlane.xlu1 %1944 }
 0x535   : > { %7283 = vmatpush.xpose.msk.msra.mxu3 %vm1837_vm11, %v10373_v52 }
 0x538   : > { %7220 = vmatmul.msk.f32.vlgmr.msrb.gmra.mxu3 %vm1837_vm11, %v10098_v37  ;;  %v13861_v37 = vld [vmem:[#allocation44_spill] sm:$0xff] }
 0x539   : > { %7284 = vmatpush.xpose.msk.msra.mxu3 %vm1837_vm11, %v10359_v17  ;;  %v13868_v17 = vld [vmem:[#allocation80_spill] sm:$0xff]  ;;  %v1942_v52 = vpop.xlane.xlu0 %1941 }
 0x53d   : > { %7285 = vmatpush.xpose.msk.msra.mxu3 %vm1837_vm11, %v10339_v29 }
 0x540   : > { %7221 = vmatmul.msk.f32.gmra.mxu3 %vm1837_vm11, %v10183_v31  ;;  %v13862_v31 = vld [vmem:[#allocation45_spill] sm:$0xff] }
 0x541   : > { %7286 = vmatpush.xpose.msk.msra.mxu3 %vm1837_vm11, %v10299_v47 }
 0x545   : > { %7287 = vmatpush.xpose.msk.msra.mxu3 %vm1837_vm11, %v10231_v21  ;;  %v13865_v21 = vld [vmem:[#allocation47_spill] sm:$0xff] }
 0x548   : > { %7222 = vmatmul.msk.f32.gmra.mxu3 %vm1837_vm11, %v10170_v28  ;;  %v10578_v28 = vpop.permute.xlu2 %3666 }
 0x549   : > { %7346 = vmatpush.xpose.msk.msrb.mxu3 %vm1837_vm11, %v5065_v0  ;;  %v1961_v0 = vsub.f32 %v10423_v6, %v1945_v16  ;;  %v7762_v6 = vld [vmem:[%s13596_s19 + $0x18] sm:$0xf0] }
 0x54d   : > { %7347 = vmatpush.xpose.msk.msrb.mxu3 %vm1837_vm11, %v10457_v32  ;;  %v7777_v32 = vld [vmem:[%s13596_s19 + $0x90] sm:$0xf0] }
 0x54e   : > { %v7443_v45 = vor.u32 %v7777_v32, %v7442_v43 }
 0x550   : > { %7223 = vmatmul.msk.f32.gmra.mxu3 %vm1837_vm11, %v13861_v37  ;;  %v1936_v10 = vpop.xlane.xlu2 %1935  ;;  %v7953_v37 = vld [vmem:[%s13594_s17 + $0x30] sm:$0xff]  }
 0x551   : > { %7348 = vmatpush.xpose.msk.msrb.mxu3 %vm1837_vm11, %v10417_v3  ;;  %v1958_v62 = vsub.f32 %v10421_v11, %v1936_v10  ;;  %v7952_v11 = vld [vmem:[%s13594_s17 + $0x28] sm:$0xff]  }
 0x552   : > { %v7842_v18 = vunpack.c.l.bf16 %v7952_v11  ;;  %v7382_v10 = vld [vmem:[%s13596_s19 + $0x8] sm:$0xf] }
 0x553   : > { %v1966_v3 = vmul.f32 1.442695, %v1958_v62 }
 0x555   : > { %7349 = vmatpush.xpose.msk.msrb.mxu3 %vm1837_vm11, %v10399_v8 }
 0x558   : > { %7224 = vmatmul.msk.f32.gmra.mxu3 %vm1837_vm11, %v13862_v31  ;;  %v1939_v8 = vpop.xlane.xlu2 %1938  ;;  %v7403_v31 = vor.u32 %v7767_v38, %v7402_v40  ;;  %v13876_v40 = vld [vmem:[#allocation27_spill] sm:$0xff] }
 0x559   : > { %7350 = vmatpush.xpose.msk.msrb.mxu3 %vm1837_vm11, %v10379_v49  ;;  %v1959_v47 = vsub.f32 %v10432_v30, %v1939_v8  ;;  %v1972_v8 = vmul.f32 1.442695, %v1961_v0  ;;  %v13878_v0 = vld [vmem:[#allocation79_spill] sm:$0xff] }
 0x55d   : > { %7351 = vmatpush.xpose.msk.msrb.mxu3 %vm1837_vm11, %v10387_v23  ;;  %v1960_v23 = vsub.f32 %v10415_v39, %v1942_v52  ;;  %v10679_v52 = vpop.permute.xlu1 %8179 }
 0x55f   : > { %v1970_v58 = vmul.f32 1.442695, %v1960_v23 }
 0x560   : > { %7225 = vmatmul.msk.f32.gmra.mxu3 %vm1837_vm11, %v13863_v26  ;;  %v1948_v39 = vpop.xlane.xlu2 %1947 }
 0x561   : > { %7352 = vmatpush.xpose.msk.msrb.mxu3 %vm1837_vm11, %v10367_v14  ;;  %v7839_v14 = vunpack.c.h.bf16 %v7951_v15  ;;  %v1962_v56 = vsub.f32 %v10443_v63, %v1948_v39  ;;  %v7843_v63 = vunpack.c.h.bf16 %v7952_v11  ;;  %v7954_v11 = vld [vmem:[%s13594_s17 + $0x38] sm:$0xff]  }
 0x562   : > { %v7851_v12 = vunpack.c.h.bf16 %v7954_v11 }
 0x563   : > { %v1974_v53 = vmul.f32 1.442695, %v1962_v56 }
 0x565   : > { %7353 = vmatpush.xpose.msk.msrb.mxu3 %vm1837_vm11, %v10313_v54  ;;  %v7838_v54 = vunpack.c.l.bf16 %v7951_v15  ;;  %v1951_v15 = vpop.xlane.xlu0 %1950 }
 0x567   : > { %v1954_v39 = vpop.xlane.xlu1 %1953 }
 0x568   : > { %7226 = vmatmul.msk.f32.gmra.mxu3 %vm1837_vm11, %v13865_v21  ;;  %v13871_v21 = vld [vmem:[#allocation55_spill] sm:$0xff]  ;;  %v1964_v56 = vsub.f32 %v10487_v60, %v1954_v39 }
 0x569   : > { %7354 = vmatpush.xpose.msk.msrb.mxu3 %vm1837_vm11, %v10315_v7  ;;  %v1968_v7 = vmul.f32 1.442695, %v1959_v47  ;;  %v7383_v47 = vor.u32 %v7762_v6, %v7382_v10  ;;  %v13880_v10 = vld [vmem:[#allocation25_spill] sm:$0xff] }
 0x56a   : > { %v1978_v57 = vmul.f32 1.442695, %v1964_v56 }
 0x56b   : > { %8300 = vpow2.f32 %v1968_v7 }
 0x56c   : > { %8302 = vpow2.f32 %v1966_v3 }
 0x56d   : > { %7355 = vmatpush.xpose.msk.msrb.mxu3 %vm1837_vm11, %v13864_v42  ;;  %8304 = vpow2.f32 %v1970_v58  ;;  %v10694_v58 = vpop.permute.xlu2 %8174 }
 0x56e   : > { %8306 = vpow2.f32 %v1974_v53 }
 0x56f   : > { %8308 = vpow2.f32 %v1972_v8 }
 0x570   : > { %7227 = vmatmul.msk.f32.gmra.mxu3 %vm1837_vm11, %v13866_v9  ;;  %v7846_v9 = vunpack.c.l.bf16 %v7953_v37 }
 0x571   : > { %v10603_v25 = vpop.eup %8300 }
 0x572   : > { %v1985_v30 = vsel %vm1933_vm5, %v10603_v25, 0.0  ;;  %v10619_v19 = vpop.eup %8302 }
 0x573   : > { %v1982_v35 = vsel %vm1933_vm5, %v10619_v19, 0.0  ;;  %v10642_v4 = vpop.eup %8304 }
 0x574   : > { %v1988_v42 = vsel %vm1933_vm5, %v10642_v4, 0.0 }
 0x578   : > { %7288 = vmatmul.msk.f32.vlgmr.msra.gmra.mxu3 %vm1837_vm11, %v13867_v27  ;;  %v10668_v27 = vpop.eup %8306 }
 0x579   : > { %5697 = vmatpush.bf16.msra.mxu3 %v7443_v45 }
 0x57b   : > { %v2313_v29 = vpop.f32.mrf.mxu3 }
 0x57c   : > { %v10596_v59 = vadd.f32 %v7838_v54, %v2313_v29  ;;  %v1963_v29 = vsub.f32 %v10446_v36, %v1951_v15  ;;  %v13883_v15 = vld [vmem:[#allocation22_spill] sm:$0xff] }
 0x57d   : > { %5698 = vmatpush.bf16.msra.mxu3 %v7423_v50  ;;  %v7959_v50 = vld [vmem:[%s13594_s17 + $0x60] sm:$0xff]  }
 0x57e   : > { %v2337_v2 = vsel %vm1933_vm5, %v10596_v59, -inf  ;;  %v1976_v3 = vmul.f32 1.442695, %v1963_v29  ;;  %v13885_v29 = vld [vmem:[#allocation76_spill] sm:$0xff] }
 0x57f   : > { %2338 = vmax.xlane.f32.xlu1 %v2337_v2  ;;  %v1994_v2 = vsel %vm1933_vm5, %v10668_v27, 0.0 }
 0x580   : > { %7289 = vmatmul.msk.f32.gmra.mxu3 %vm1837_vm11, %v13868_v17  ;;  %v13872_v17 = vld [vmem:[#allocation60_spill] sm:$0xff]  ;;  %8310 = vpow2.f32 %v1976_v3 }
 0x581   : > { %5699 = vmatpush.bf16.msra.mxu3 %v7403_v31  ;;  %8312 = vpow2.f32 %v1978_v57  ;;  %v13887_v3 = vld [vmem:[#allocation20_spill] sm:$0xff] }
 0x583   : > { %v2316_v49 = vpop.f32.mrf.mxu3 }
 0x584   : > { %v10605_v1 = vadd.f32 %v7839_v14, %v2316_v49  ;;  %v7847_v14 = vunpack.c.h.bf16 %v7953_v37  ;;  %v10681_v49 = vpop.eup %8308  ;;  %v7870_v37 = vunpack.c.l.bf16 %v7959_v50 }
 0x585   : > { %5700 = vmatpush.bf16.msra.mxu3 %v7383_v47  ;;  %v13882_v47 = vld [vmem:[#allocation21_spill] sm:$0xff] }
 0x586   : > { %v2340_v46 = vsel %vm1933_vm5, %v10605_v1, -inf }
 0x587   : > { %2341 = vmax.xlane.f32.xlu0 %v2340_v46  ;;  %1986 = vadd.xlane.f32.xlu1 %v1985_v30  ;;  %v1991_v46 = vsel %vm1933_vm5, %v10681_v49, 0.0 }
 0x588   : > { %7290 = vmatmul.msk.f32.gmra.mxu3 %vm1837_vm11, %v13869_v24  ;;  %v13873_v24 = vld [vmem:[#allocation43_spill] sm:$0xff] }
 0x58b   : > { %v2319_v13 = vpop.f32.mrf.mxu3 }
 0x58c   : > { %v10621_v22 = vadd.f32 %v7842_v18, %v2319_v13  ;;  %v7850_v18 = vunpack.c.l.bf16 %v7954_v11  ;;  %v10696_v13 = vpop.eup %8310 }
 0x58e   : > { %v2343_v34 = vsel %vm1933_vm5, %v10621_v22, -inf }
 0x58f   : > { %2344 = vmax.xlane.f32.xlu2 %v2343_v34  ;;  %1983 = vadd.xlane.f32.xlu0 %v1982_v35  ;;  %v1997_v34 = vsel %vm1933_vm5, %v10696_v13, 0.0  ;;  %v13874_v35 = vld [vmem:[#allocation61_spill] sm:$0xff] }
 0x590   : > { %7291 = vmatmul.msk.f32.gmra.mxu3 %vm1837_vm11, %v13870_v55  ;;  %v1957_v55 = vpop.xlane.xlu2 %1956 }
 0x591   : > { %v1965_v60 = vsub.f32 %v10499_v33, %v1957_v55  ;;  %v10722_v33 = vpop.eup %8312  ;;  %v7961_v55 = vld [vmem:[%s13594_s17 + $0x70] sm:$0xff]  }
 0x593   : > { %v2322_v5 = vpop.f32.mrf.mxu3  ;;  %v1980_v31 = vmul.f32 1.442695, %v1965_v60  ;;  %v13891_v60 = vld [vmem:[#allocation49_spill] sm:$0xff] }
 0x594   : > { %v10644_v48 = vadd.f32 %v7843_v63, %v2322_v5  ;;  %v13875_v5 = vld [vmem:[#allocation26_spill] sm:$0xff] }
 0x595   : > { %v10717_v38 = vpack.c.bf16 %v13876_v40, %v13875_v5  ;;  %8314 = vpow2.f32 %v1980_v31 }
 0x596   : > { %v2346_v26 = vsel %vm1933_vm5, %v10644_v48, -inf }
 0x597   : > { %2347 = vmax.xlane.f32.xlu1 %v2346_v26  ;;  %1989 = vadd.xlane.f32.xlu2 %v1988_v42  ;;  %13877 = vst [vmem:[#allocation15_spill] sm:$0xff] %v10717_v38  ;;  %v13879_v42 = vld [vmem:[#allocation24_spill] sm:$0xff] }
 0x598   : > { %7292 = vmatmul.msk.f32.gmra.mxu3 %vm1837_vm11, %v13871_v21  ;;  %v10726_v6 = vpack.c.bf16 %v13880_v10, %v13879_v42  ;;  %v7962_v42 = vld [vmem:[%s13594_s17 + $0x78] sm:$0xff]  }
 0x59a   : > { %13881 = vst [vmem:[#allocation35_spill] sm:$0xff] %v10726_v6 }
 0x59b   : > { %v2325_v54 = vpop.f32.mrf.mxu3 }
 0x59c   : > { %v10670_v7 = vadd.f32 %v7846_v9, %v2325_v54  ;;  %v2000_v9 = vsel %vm1933_vm5, %v10722_v33, 0.0  ;;  %v10737_v54 = vpack.c.bf16 %v13883_v15, %v13882_v47 }
 0x59e   : > { %v2349_v62 = vsel %vm1933_vm5, %v10670_v7, -inf  ;;  %13884 = vst [vmem:[#allocation32_spill] sm:$0xff] %v10737_v54 }
 0x59f   : > { %2350 = vmax.xlane.f32.xlu0 %v2349_v62  ;;  %1995 = vadd.xlane.f32.xlu1 %v1994_v2  ;;  %v7871_v62 = vunpack.c.h.bf16 %v7959_v50  ;;  %v10742_v2 = vpop.eup %8314  ;;  %v7878_v50 = vunpack.c.l.bf16 %v7961_v55 }
 0x5a0   : > { %7293 = vmatmul.msk.f32.gmra.mxu3 %vm1837_vm11, %v13872_v17 }
 0x5a3   : > { %v2328_v23 = vpop.f32.mrf.mxu3 }
 0x5a4   : > { %v10683_v36 = vadd.f32 %v7847_v14, %v2328_v23  ;;  %v13886_v14 = vld [vmem:[#allocation19_spill] sm:$0xff] }
 0x5a5   : > { %v10746_v23 = vpack.c.bf16 %v13887_v3, %v13886_v14 }
 0x5a6   : > { %v2352_v30 = vsel %vm1933_vm5, %v10683_v36, -inf }
 0x5a7   : > { %1992 = vadd.xlane.f32.xlu0 %v1991_v46  ;;  %2353 = vmax.xlane.f32.xlu2 %v2352_v30  ;;  %13888 = vst [vmem:[#allocation44_spill] sm:$0xff] %v10746_v23  ;;  %v7960_v46 = vld [vmem:[%s13594_s17 + $0x68] sm:$0xff]  }
 0x5a8   : > { %7294 = vmatmul.msk.f32.gmra.mxu3 %vm1837_vm11, %v13873_v24  ;;  %v2003_v24 = vsel %vm1933_vm5, %v10742_v2, 0.0  ;;  %v7874_v39 = vunpack.c.l.bf16 %v7960_v46 }
 0x5ab   : > { %v2331_v43 = vpop.f32.mrf.mxu3 }
 0x5ac   : > { %v10698_v32 = vadd.f32 %v7850_v18, %v2331_v43  ;;  %v13889_v18 = vld [vmem:[#allocation85_spill] sm:$0xff] }
 0x5ae   : > { %v2355_v45 = vsel %vm1933_vm5, %v10698_v32, -inf }
 0x5af   : > { %2356 = vmax.xlane.f32.xlu1 %v2355_v45  ;;  %1998 = vadd.xlane.f32.xlu2 %v1997_v34  ;;  %v13890_v34 = vld [vmem:[#allocation64_spill] sm:$0xff] }
 0x5b0   : > { %7295 = vmatmul.msk.f32.gmra.mxu3 %vm1837_vm11, %v13874_v35  ;;  %v7875_v35 = vunpack.c.h.bf16 %v7960_v46 }
 0x5b3   : > { %v2334_v63 = vpop.f32.mrf.mxu3 }
 0x5b4   : > { %v10707_v53 = vadd.f32 %v7851_v12, %v2334_v63 }
 0x5b6   : > { %v2358_v16 = vsel %vm1933_vm5, %v10707_v53, -inf }
 0x5b7   : > { %2359 = vmax.xlane.f32.xlu0 %v2358_v16 }
 0x5b8   : > { %7356 = vmatmul.msk.f32.vlgmr.msrb.gmra.mxu3 %vm1837_vm11, %v13878_v0  ;;  %v13892_v0 = vld [vmem:[#allocation63_spill] sm:$0xff] }
 0x5b9   : > { %5914 = vmatpush.bf16.msrb.mxu3 %v10717_v38 }
 0x5bb   : > { %v3255_v26 = vpop.f32.mrf.mxu3 }
 0x5bc   : > { %v10728_v21 = vadd.f32 %v7870_v37, %v3255_v26  ;;  %v7879_v37 = vunpack.c.h.bf16 %v7961_v55 }
 0x5bd   : > { %5915 = vmatpush.bf16.msrb.mxu3 %v10726_v6 }
 0x5be   : > { %v3279_v8 = vsel %vm1933_vm5, %v10728_v21, -inf }
 0x5bf   : > { %2001 = vadd.xlane.f32.xlu0 %v2000_v9  ;;  %3280 = vmax.xlane.f32.xlu1 %v3279_v8  ;;  %v13893_v9 = vld [vmem:[#allocation53_spill] sm:$0xff]  ;;  %v7882_v8 = vunpack.c.l.bf16 %v7962_v42 }
 0x5c0   : > { %7357 = vmatmul.msk.f32.gmra.mxu3 %vm1837_vm11, %v13885_v29 }
 0x5c1   : > { %5916 = vmatpush.bf16.msrb.mxu3 %v10737_v54 }
 0x5c3   : > { %v3258_v17 = vpop.f32.mrf.mxu3 }
 0x5c4   : > { %v10748_v11 = vadd.f32 %v7871_v62, %v3258_v17  ;;  %v13894_v62 = vld [vmem:[#allocation57_spill] sm:$0xff]  ;;  %v7883_v17 = vunpack.c.h.bf16 %v7962_v42 }
 0x5c5   : > { %5917 = vmatpush.bf16.msrb.mxu3 %v10746_v23 }
 0x5c6   : > { %v3282_v30 = vsel %vm1933_vm5, %v10748_v11, -inf }
 0x5c7   : > { %3283 = vmax.xlane.f32.xlu0 %v3282_v30  ;;  %2004 = vadd.xlane.f32.xlu1 %v2003_v24 }
 0x5c8   : > { %7358 = vmatmul.msk.f32.gmra.mxu3 %vm1837_vm11, %v13889_v18  ;;  %v7967_v18 = vld [vmem:[%s13594_s17 + $0xa0] sm:$0xff]  }
 0x5cb   : > { %v3261_v43 = vpop.f32.mrf.mxu3 }
 0x5cc   : > { %v10760_v56 = vadd.f32 %v7874_v39, %v3261_v43  ;;  %v13895_v43 = vld [vmem:[#allocation51_spill] sm:$0xff] }
 0x5ce   : > { %v3285_v45 = vsel %vm1933_vm5, %v10760_v56, -inf }
 0x5cf   : > { %3286 = vmax.xlane.f32.xlu0 %v3285_v45  ;;  %v7902_v45 = vunpack.c.l.bf16 %v7967_v18 }
 0x5d0   : > { %7359 = vmatmul.msk.f32.gmra.mxu3 %vm1837_vm11, %v13890_v34 }
 0x5d3   : > { %v3264_v12 = vpop.f32.mrf.mxu3 }
 0x5d4   : > { %v10766_v57 = vadd.f32 %v7875_v35, %v3264_v12 }
 0x5d6   : > { %v3288_v63 = vsel %vm1933_vm5, %v10766_v57, -inf }
 0x5d7   : > { %3289 = vmax.xlane.f32.xlu0 %v3288_v63 }
 0x5d8   : > { %7360 = vmatmul.msk.f32.gmra.mxu3 %vm1837_vm11, %v13891_v60 }
 0x5db   : > { %v3267_v16 = vpop.f32.mrf.mxu3 }
 0x5dc   : > { %v10775_v5 = vadd.f32 %v7878_v50, %v3267_v16 }
 0x5de   : > { %v3291_v40 = vsel %vm1933_vm5, %v10775_v5, -inf }
 0x5df   : > { %3292 = vmax.xlane.f32.xlu0 %v3291_v40 }
 0x5e0   : > { %7361 = vmatmul.msk.f32.gmra.mxu3 %vm1837_vm11, %v13892_v0 }
 0x5e3   : > { %v3270_v31 = vpop.f32.mrf.mxu3 }
 0x5e4   : > { %v10781_v26 = vadd.f32 %v7879_v37, %v3270_v31 }
 0x5e6   : > { %v3294_v10 = vsel %vm1933_vm5, %v10781_v26, -inf }
 0x5e7   : > { %3295 = vmax.xlane.f32.xlu1 %v3294_v10 }
 0x5e8   : > { %7362 = vmatmul.msk.f32.gmra.mxu3 %vm1837_vm11, %v13893_v9 }
 0x5eb   : > { %v3273_v47 = vpop.f32.mrf.mxu3 }
 0x5ec   : > { %v10790_v15 = vadd.f32 %v7882_v8, %v3273_v47 }
 0x5ee   : > { %v3297_v29 = vsel %vm1933_vm5, %v10790_v15, -inf }
 0x5ef   : > { %3298 = vmax.xlane.f32.xlu2 %v3297_v29  ;;  %v7968_v29 = vld [vmem:[%s13594_s17 + $0xa8] sm:$0xff]  }
 0x5f0   : > { %7363 = vmatmul.msk.f32.gmra.mxu3 %vm1837_vm11, %v13894_v62 }
 0x5f2   : > { %v2339_v14 = vpop.xlane.xlu1 %2338 }
 0x5f3   : > { %v2361_v3 = vsub.f32 %v10596_v59, %v2339_v14  ;;  %v3276_v46 = vpop.f32.mrf.mxu3  ;;  %v13897_v14 = vld [vmem:[#allocation16_spill] sm:$0xff] }
 0x5f4   : > { %v10797_v30 = vadd.f32 %v7883_v17, %v3276_v46  ;;  %v13896_v17 = vld [vmem:[#allocation56_spill] sm:$0xff]  ;;  %v7906_v46 = vunpack.c.l.bf16 %v7968_v29 }
 0x5f5   : > { %v2369_v24 = vmul.f32 1.442695, %v2361_v3  ;;  %v10840_v3 = vpack.c.bf16 %v13897_v14, %v13896_v17 }
 0x5f6   : > { %v3300_v39 = vsel %vm1933_vm5, %v10797_v30, -inf }
 0x5f7   : > { %8316 = vpow2.f32 %v2369_v24  ;;  %3301 = vmax.xlane.f32.xlu0 %v3300_v39  ;;  %13898 = vst [vmem:[#allocation45_spill] sm:$0xff] %v10840_v3 }
 0x5f8   : > { %7460 = vmatmul.msk.bf16.vlgmr.msra.gmra.mxu3 %vm704_vm0, %v13895_v43 }
 0x5f9   : > { %6386 = vmatpush.bf16.msra.mxu3 %v10717_v38 }
 0x5fa   : > { %v10807_v59 = vpop.xlane.xlu1 %1986  ;;  %v2342_v34 = vpop.xlane.xlu0 %2341 }
 0x5fb   : > { %v2362_v35 = vsub.f32 %v10605_v1, %v2342_v34  ;;  %v4187_v12 = vpop.f32.mrf.mxu3  ;;  %8318 = vrcp.f32 %v10807_v59  ;;  %v7903_v1 = vunpack.c.h.bf16 %v7967_v18  ;;  %vm2026_vm13 = vweird.f32 %v10807_v59 }
 0x5fc   : > { %v10811_v55 = vadd.f32 %v7902_v45, %v4187_v12 }
 0x5fd   : > { %v10813_v63 = vpop.eup %8316  ;;  %v2371_v60 = vmul.f32 1.442695, %v2362_v35  ;;  %6387 = vmatpush.bf16.msra.mxu3 %v10726_v6 }
 0x5fe   : > { %v4211_v50 = vsel %vm1933_vm5, %v10811_v55, -inf  ;;  %v2385_v16 = vsel %vm1933_vm5, %v10813_v63, 0.0 }
 0x5ff   : > { %8320 = vpow2.f32 %v2371_v60  ;;  %4212 = vmax.xlane.f32.xlu1 %v4211_v50  ;;  %2386 = vadd.xlane.f32.xlu2 %v2385_v16 }
 0x601   : > { %6388 = vmatpush.bf16.msra.mxu3 %v10737_v54  ;;  %v10821_v40 = vpop.eup %8318 }
 0x602   : > { %v2345_v0 = vpop.xlane.xlu2 %2344  ;;  %v1984_v37 = vpop.xlane.xlu0 %1983  ;;  %v2022_v8 = vmul.f32 %v10821_v40, %v10807_v59  ;;  %vm2027_vm12 = vweird.f32 %v10821_v40 }
 0x603   : > { %v2363_v31 = vsub.f32 %v10621_v22, %v2345_v0  ;;  %8322 = vrcp.f32 %v1984_v37  ;;  %v4190_v42 = vpop.f32.mrf.mxu3  ;;  %v2017_v0 = vand.u32 2147483648, %v1984_v37  ;;  %vm2011_vm6 = vweird.f32 %v1984_v37  ;;  %vm2028_vm14 = vmor %vm2026_vm13, %vm2027_vm12 }
 0x604   : > { %v10824_v10 = vadd.f32 %v7903_v1, %v4190_v42  ;;  %v2023_v18 = vsub.f32 1.0, %v2022_v8  ;;  %v2015_v1 = vand.u32 2147483647, %v1984_v37 }
 0x605   : > { %v10826_v9 = vpop.eup %8320  ;;  %v2373_v47 = vmul.f32 1.442695, %v2363_v31  ;;  %6389 = vmatpush.bf16.msra.mxu3 %v10746_v23  ;;  %v2018_v14 = vor.u32 1.1754944e-38, %v2017_v0  ;;  %v2032_v0 = vand.u32 2147483648, %v10807_v59 }
 0x606   : > { %v4214_v62 = vsel %vm1933_vm5, %v10824_v10, -inf  ;;  %v2388_v22 = vsel %vm1933_vm5, %v10826_v9, 0.0  ;;  %v2024_v42 = vmul.f32 %v10821_v40, %v2023_v18  ;;  %vm2016_vm7 = vcmp.eq.f32.partialorder %v2015_v1, 8.507059e+37 }
 0x607   : > { %8324 = vpow2.f32 %v2373_v47  ;;  %4215 = vmax.xlane.f32.xlu2 %v4214_v62  ;;  %2389 = vadd.xlane.f32.xlu1 %v2388_v22  ;;  %v7907_v22 = vunpack.c.h.bf16 %v7968_v29 }
 0x608   : > { %7461 = vmatmul.msk.bf16.gmra.mxu3 %vm704_vm0, %v10840_v3 }
 0x609   : > { %v8323_v24 = vpop.eup %8322 }
 0x60a   : > { %v2007_v39 = vmul.f32 %v8323_v24, %v1984_v37  ;;  %v2348_v45 = vpop.xlane.xlu1 %2347  ;;  %v10844_v34 = vpop.xlane.xlu2 %1989  ;;  %vm2012_vm8 = vweird.f32 %v8323_v24 }
 0x60b   : > { %v2364_v35 = vsub.f32 %v10644_v48, %v2348_v45  ;;  %8326 = vrcp.f32 %v10844_v34  ;;  %v4193_v12 = vpop.f32.mrf.mxu3  ;;  %vm2013_vm10 = vmor %vm2011_vm6, %vm2012_vm8  ;;  %vm2041_vm1 = vweird.f32 %v10844_v34 }
 0x60c   : > { %v2008_v60 = vsub.f32 1.0, %v2007_v39  ;;  %v10848_v50 = vadd.f32 %v7906_v46, %v4193_v12 }
 0x60d   : > { %v10850_v16 = vpop.eup %8324  ;;  %v2375_v31 = vmul.f32 1.442695, %v2364_v35  ;;  %v2025_v35 = vadd.f32 %v10821_v40, %v2024_v42  ;;  %v13900_v42 = vld [vmem:[#allocation12_spill] sm:$0xff] }
 0x60e   : > { %v2009_v8 = vmul.f32 %v8323_v24, %v2008_v60  ;;  %v2391_v47 = vsel %vm1933_vm5, %v10850_v16, 0.0  ;;  %v4217_v48 = vsel %vm1933_vm5, %v10848_v50, -inf  ;;  %v2030_v60 = vand.u32 2147483647, %v10807_v59 }
 0x60f   : > { %8328 = vpow2.f32 %v2375_v31  ;;  %2392 = vadd.xlane.f32.xlu0 %v2391_v47  ;;  %4218 = vmax.xlane.f32.xlu1 %v4217_v48  ;;  %v13899_v48 = vld [vmem:[#allocation13_spill] sm:$0xff] }
 0x610   : > { %v2010_v62 = vadd.f32 %v8323_v24, %v2009_v8  ;;  %vm2031_vm15 = vcmp.eq.f32.partialorder %v2030_v60, 8.507059e+37  ;;  %v2047_v60 = vand.u32 2147483648, %v10844_v34 }
 0x611   : > { %v10857_v17 = vpop.eup %8326 }
 0x612   : > { %v2014_v46 = vsel %vm2013_vm10, %v8323_v24, %v2010_v62  ;;  %v2037_v18 = vmul.f32 %v10857_v17, %v10844_v34  ;;  %v10863_v39 = vpop.xlane.xlu1 %1995  ;;  %v2351_v45 = vpop.xlane.xlu0 %2350  ;;  %v10877_v62 = vpack.c.bf16 %v13900_v42, %v13899_v48  ;;  %vm2042_vm9 = vweird.f32 %v10857_v17 }
 0x613   : > { %v2365_v37 = vsub.f32 %v10670_v7, %v2351_v45  ;;  %v4196_v29 = vpop.f32.mrf.mxu3  ;;  %v2019_v12 = vsel %vm2016_vm7, %v2018_v14, %v2014_v46  ;;  %8330 = vrcp.f32 %v10863_v39  ;;  %v7969_v7 = vld [vmem:[%s13594_s17 + $0xb0] sm:$0xff]   ;;  %v2029_v14 = vsel %vm2028_vm14, %v10821_v40, %v2025_v35  ;;  %vm2043_vm3 = vmor %vm2041_vm1, %vm2042_vm9 }
 0x614   : > { %v2038_v31 = vsub.f32 1.0, %v2037_v18  ;;  %v10870_v24 = vadd.f32 %v7907_v22, %v4196_v29  ;;  %v2126_v1 = vmul.f32 %v10619_v19, %v2019_v12  ;;  %13901 = vst [vmem:[#allocation33_spill] sm:$0xff] %v10877_v62  ;;  %v2033_v18 = vor.u32 1.1754944e-38, %v2032_v0 }
 0x615   : > { %v10873_v8 = vpop.eup %8328  ;;  %v2377_v47 = vmul.f32 1.442695, %v2365_v37  ;;  %v7910_v59 = vunpack.c.l.bf16 %v7969_v7  ;;  %vm2071_vm12 = vweird.f32 %v10863_v39 }
 0x616   : > { %7126 = vmatmul.msk.f32.vlgmr.msrb.gmra.mxu1 %vm1933_vm5, %v2126_v1  ;;  %v4220_v19 = vsel %vm1933_vm5, %v10870_v24, -inf  ;;  %v2394_v22 = vsel %vm1933_vm5, %v10873_v8, 0.0  ;;  %v2039_v46 = vmul.f32 %v10857_v17, %v2038_v31  ;;  %v2034_v45 = vsel %vm2031_vm15, %v2033_v18, %v2029_v14 }
 0x617   : > { %8332 = vpow2.f32 %v2377_v47  ;;  %7244 = vmatpush.xpose.msk.msrb.mxu1 %vm1837_vm11, %v10578_v28  ;;  %4221 = vmax.xlane.f32.xlu0 %v4220_v19  ;;  %v2127_v31 = vmul.f32 %v10603_v25, %v2034_v45  ;;  %v2045_v1 = vand.u32 2147483647, %v10844_v34  ;;  %v2048_v34 = vor.u32 1.1754944e-38, %v2047_v60  ;;  %v13904_v60 = vld [vmem:[#allocation14_spill] sm:$0xff] }
 0x618   : > { %2395 = vadd.xlane.f32.xlu2 %v2394_v22  ;;  %7462 = vmatmul.msk.bf16.gmra.mxu3 %vm704_vm0, %v10877_v62  ;;  %v2040_v40 = vadd.f32 %v10857_v17, %v2039_v46  ;;  %v7911_v19 = vunpack.c.h.bf16 %v7969_v7 }
 0x619   : > { %v10897_v37 = vpop.eup %8330  ;;  %vm2046_vm2 = vcmp.eq.f32.partialorder %v2045_v1, 8.507059e+37 }
 0x61a   : > { %v2354_v29 = vpop.xlane.xlu2 %2353  ;;  %v10899_v12 = vpop.xlane.xlu0 %1992  ;;  %v2044_v25 = vsel %vm2043_vm3, %v10857_v17, %v2040_v40  ;;  %v13902_v17 = vld [vmem:[#allocation99_spill] sm:$0xff]  ;;  %vm2072_vm10 = vweird.f32 %v10897_v37 }
 0x61b   : > { %v2366_v28 = vsub.f32 %v10683_v36, %v2354_v29  ;;  %7245 = vmatpush.xpose.msk.msrb.mxu1 %vm1837_vm11, %v10450_v51  ;;  %8334 = vrcp.f32 %v10899_v12  ;;  %v4199_v35 = vpop.f32.mrf.mxu3  ;;  %v2067_v36 = vmul.f32 %v10897_v37, %v10863_v39  ;;  %v2049_v46 = vsel %vm2046_vm2, %v2048_v34, %v2044_v25  ;;  %vm2073_vm7 = vmor %vm2071_vm12, %vm2072_vm10 }
 0x61c   : > { %v10908_v0 = vadd.f32 %v7910_v59, %v4199_v35  ;;  %v2128_v7 = vmul.f32 %v10642_v4, %v2049_v46  ;;  %v13903_v35 = vld [vmem:[#allocation23_spill] sm:$0xff]  ;;  %vm2056_vm8 = vweird.f32 %v10899_v12 }
 0x61d   : > { %v10913_v47 = vpop.eup %8332  ;;  %v2379_v48 = vmul.f32 1.442695, %v2366_v28  ;;  %v2068_v14 = vsub.f32 1.0, %v2067_v36 }
 0x61e   : > { %7127 = vmatmul.msk.f32.gmra.mxu1 %vm1933_vm5, %v2127_v31  ;;  %v4223_v51 = vsel %vm1933_vm5, %v10908_v0, -inf  ;;  %v2397_v42 = vsel %vm1933_vm5, %v10913_v47, 0.0  ;;  %v10937_v31 = vpack.c.bf16 %v13904_v60, %v13903_v35 }
 0x61f   : > { %8336 = vpow2.f32 %v2379_v48  ;;  %7246 = vmatpush.xpose.msk.msrb.mxu1 %vm1837_vm11, %v10427_v44  ;;  %2398 = vadd.xlane.f32.xlu1 %v2397_v42  ;;  %v2060_v48 = vand.u32 2147483647, %v10899_v12  ;;  %v2069_v42 = vmul.f32 %v10897_v37, %v2068_v14 }
 0x620   : > { %4224 = vmax.xlane.f32.xlu2 %v4223_v51  ;;  %13905 = vst [vmem:[#allocation87_spill] sm:$0xff] %v10937_v31  ;;  %v2062_v51 = vand.u32 2147483648, %v10899_v12 }
 0x621   : > { %v8335_v22 = vpop.eup %8334  ;;  %vm2061_vm13 = vcmp.eq.f32.partialorder %v2060_v48, 8.507059e+37 }
 0x622   : > { %v2052_v18 = vmul.f32 %v8335_v22, %v10899_v12  ;;  %v2357_v59 = vpop.xlane.xlu1 %2356  ;;  %v10926_v45 = vpop.xlane.xlu2 %1998  ;;  %vm2057_vm4 = vweird.f32 %v8335_v22 }
 0x623   : > { %v2367_v29 = vsub.f32 %v10698_v32, %v2357_v59  ;;  %8338 = vrcp.f32 %v10926_v45  ;;  %7247 = vmatpush.xpose.msk.msrb.mxu1 %vm1837_vm11, %v13902_v17  ;;  %v4202_v44 = vpop.f32.mrf.mxu3  ;;  %v10944_v32 = vld [vmem:[%s13594_s17 + $0xb8] sm:$0xff]   ;;  %vm2058_vm6 = vmor %vm2056_vm8, %vm2057_vm4  ;;  %v2063_v59 = vor.u32 1.1754944e-38, %v2062_v51  ;;  %vm2086_vm9 = vweird.f32 %v10926_v45 }
 0x624   : > { %v2053_v40 = vsub.f32 1.0, %v2052_v18  ;;  %v10932_v28 = vadd.f32 %v7911_v19, %v4202_v44  ;;  %v13906_v19 = vld [vmem:[#allocation95_spill] sm:$0xff]  ;;  %v7914_v14 = vunpack.c.l.bf16 %v10944_v32 }
 0x625   : > { %v10939_v1 = vpop.eup %8336  ;;  %v2381_v36 = vmul.f32 1.442695, %v2367_v29 }
 0x626   : > { %7128 = vmatmul.msk.f32.gmra.mxu1 %vm1933_vm5, %v2128_v7  ;;  %v2400_v4 = vsel %vm1933_vm5, %v10939_v1, 0.0  ;;  %v4226_v25 = vsel %vm1933_vm5, %v10932_v28, -inf  ;;  %v2054_v34 = vmul.f32 %v8335_v22, %v2053_v40  ;;  %v2070_v40 = vadd.f32 %v10897_v37, %v2069_v42  ;;  %v13907_v7 = vld [vmem:[#allocation96_spill] sm:$0xff] }
 0x627   : > { %8340 = vpow2.f32 %v2381_v36  ;;  %7248 = vmatpush.xpose.msk.msrb.mxu1 %vm1837_vm11, %v13906_v19  ;;  %2401 = vadd.xlane.f32.xlu0 %v2400_v4  ;;  %v2077_v36 = vand.u32 2147483648, %v10863_v39 }
 0x628   : > { %4227 = vmax.xlane.f32.xlu1 %v4226_v25  ;;  %7463 = vmatmul.msk.bf16.gmra.mxu3 %vm704_vm0, %v10937_v31  ;;  %v2055_v46 = vadd.f32 %v8335_v22, %v2054_v34  ;;  %v2074_v19 = vsel %vm2073_vm7, %v10897_v37, %v2070_v40  ;;  %v13909_v37 = vld [vmem:[#allocation91_spill] sm:$0xff] }
 0x629   : > { %v10960_v18 = vpop.eup %8338 }
 0x62a   : > { %v2082_v29 = vmul.f32 %v10960_v18, %v10926_v45  ;;  %v2360_v17 = vpop.xlane.xlu0 %2359  ;;  %v2059_v44 = vsel %vm2058_vm6, %v8335_v22, %v2055_v46  ;;  %v2075_v22 = vand.u32 2147483647, %v10863_v39  ;;  %v13908_v39 = vld [vmem:[#allocation93_spill] sm:$0xff]  ;;  %vm2087_vm15 = vweird.f32 %v10960_v18 }
 0x62b   : > { %7249 = vmatpush.xpose.msk.msrb.mxu1 %vm1837_vm11, %v13907_v7  ;;  %v2368_v35 = vsub.f32 %v10707_v53, %v2360_v17  ;;  %v4205_v12 = vpop.f32.mrf.mxu3  ;;  %v2064_v60 = vsel %vm2061_vm13, %v2063_v59, %v2059_v44  ;;  %v2092_v7 = vand.u32 2147483648, %v10926_v45  ;;  %vm2088_vm1 = vmor %vm2086_vm9, %vm2087_vm15 }
 0x62c   : > { %v2083_v51 = vsub.f32 1.0, %v2082_v29  ;;  %v10971_v4 = vadd.f32 %v7914_v14, %v4205_v12  ;;  %v2129_v25 = vmul.f32 %v10681_v49, %v2064_v60  ;;  %v2078_v14 = vor.u32 1.1754944e-38, %v2077_v36 }
 0x62d   : > { %v10975_v48 = vpop.eup %8340  ;;  %v2383_v42 = vmul.f32 1.442695, %v2368_v35  ;;  %vm2076_vm14 = vcmp.eq.f32.partialorder %v2075_v22, 8.507059e+37  ;;  %v2090_v12 = vand.u32 2147483647, %v10926_v45  ;;  %v13910_v22 = vld [vmem:[#allocation90_spill] sm:$0xff] }
 0x62e   : > { %7129 = vmatmul.msk.f32.gmra.mxu1 %vm1933_vm5, %v2129_v25  ;;  %v4229_v53 = vsel %vm1933_vm5, %v10971_v4, -inf  ;;  %v2403_v34 = vsel %vm1933_vm5, %v10975_v48, 0.0  ;;  %v2084_v49 = vmul.f32 %v10960_v18, %v2083_v51  ;;  %v2079_v46 = vsel %vm2076_vm14, %v2078_v14, %v2074_v19 }
 0x62f   : > { %8342 = vpow2.f32 %v2383_v42  ;;  %7250 = vmatpush.xpose.msk.msrb.mxu1 %vm1837_vm11, %v13908_v39  ;;  %4230 = vmax.xlane.f32.xlu0 %v4229_v53  ;;  %v2130_v35 = vmul.f32 %v10668_v27, %v2079_v46  ;;  %v7915_v27 = vunpack.c.h.bf16 %v10944_v32  ;;  %v2093_v45 = vor.u32 1.1754944e-38, %v2092_v7  ;;  %v13911_v46 = vld [vmem:[#allocation83_spill] sm:$0xff] }
 0x630   : > { %2404 = vadd.xlane.f32.xlu2 %v2403_v34  ;;  %v2085_v17 = vadd.f32 %v10960_v18, %v2084_v49  ;;  %vm2091_vm3 = vcmp.eq.f32.partialorder %v2090_v12, 8.507059e+37 }
 0x632   : > { %v3281_v59 = vpop.xlane.xlu1 %3280  ;;  %v2002_v29 = vpop.xlane.xlu0 %2001  ;;  %v2089_v25 = vsel %vm2088_vm1, %v10960_v18, %v2085_v17 }
 0x633   : > { %v3303_v44 = vsub.f32 %v10728_v21, %v3281_v59  ;;  %7251 = vmatpush.xpose.msk.msrb.mxu1 %vm1837_vm11, %v13909_v37  ;;  %8344 = vrcp.f32 %v2002_v29  ;;  %v4208_v40 = vpop.f32.mrf.mxu3  ;;  %v7975_v21 = vld [vmem:[%s13594_s17 + $0xe0] sm:$0xff]   ;;  %v2094_v34 = vsel %vm2091_vm3, %v2093_v45, %v2089_v25  ;;  %v2107_v12 = vand.u32 2147483648, %v2002_v29 }
 0x634   : > { %v7934_v42 = vunpack.c.l.bf16 %v7975_v21  ;;  %v11009_v14 = vadd.f32 %v7915_v27, %v4208_v40  ;;  %vm2101_vm4 = vweird.f32 %v2002_v29 }
 0x635   : > { %v10997_v60 = vpop.eup %8342  ;;  %v3311_v36 = vmul.f32 1.442695, %v3303_v44  ;;  %v2131_v44 = vmul.f32 %v10696_v13, %v2094_v34  ;;  %v2108_v25 = vor.u32 1.1754944e-38, %v2107_v12 }
 0x636   : > { %7130 = vmatmul.msk.f32.gmra.mxu1 %vm1933_vm5, %v2130_v35  ;;  %v2406_v51 = vsel %vm1933_vm5, %v10997_v60, 0.0  ;;  %v2105_v35 = vand.u32 2147483647, %v2002_v29  ;;  %v4232_v13 = vsel %vm1933_vm5, %v11009_v14, -inf }
 0x637   : > { %8346 = vpow2.f32 %v3311_v36  ;;  %7252 = vmatpush.xpose.msk.msrb.mxu1 %vm1837_vm11, %v13910_v22  ;;  %2407 = vadd.xlane.f32.xlu1 %v2406_v51 }
 0x638   : > { %vm2106_vm6 = vcmp.eq.f32.partialorder %v2105_v35, 8.507059e+37 }
 0x639   : > { %v8345_v53 = vpop.eup %8344 }
 0x63a   : > { %v2097_v19 = vmul.f32 %v8345_v53, %v2002_v29  ;;  %v2005_v49 = vpop.xlane.xlu1 %2004  ;;  %v3284_v39 = vpop.xlane.xlu0 %3283  ;;  %vm2102_vm2 = vweird.f32 %v8345_v53 }
 0x63b   : > { %8348 = vrcp.f32 %v2005_v49  ;;  %7253 = vmatpush.xpose.msk.msrb.mxu1 %vm1837_vm11, %v13911_v46  ;;  %v3304_v32 = vsub.f32 %v10748_v11, %v3284_v39  ;;  %v5119_v18 = vpop.f32.mrf.mxu3  ;;  %vm2103_vm8 = vmor %vm2101_vm4, %vm2102_vm2  ;;  %vm2116_vm13 = vweird.f32 %v2005_v49 }
 0x63c   : > { %v2098_v59 = vsub.f32 1.0, %v2097_v19  ;;  %v11014_v17 = vadd.f32 %v7934_v42, %v5119_v18 }
 0x63d   : > { %v11017_v37 = vpop.eup %8346  ;;  %v3313_v7 = vmul.f32 1.442695, %v3304_v32 }
 0x63e   : > { %7131 = vmatmul.msk.f32.gmra.mxu1 %vm1933_vm5, %v2131_v44  ;;  %v5143_v40 = vsel %vm1933_vm5, %v11014_v17, -inf  ;;  %v3327_v36 = vsel %vm1933_vm5, %v11017_v37, 0.0  ;;  %v2099_v11 = vmul.f32 %v8345_v53, %v2098_v59  ;;  %v2122_v59 = vand.u32 2147483648, %v2005_v49 }
 0x63f   : > { %8350 = vpow2.f32 %v3313_v7  ;;  %5144 = vmax.xlane.f32.xlu0 %v5143_v40  ;;  %3328 = vadd.xlane.f32.xlu2 %v3327_v36 }
 0x640   : > { %4233 = vmax.xlane.f32.xlu1 %v4232_v13  ;;  %v2100_v21 = vadd.f32 %v8345_v53, %v2099_v11  ;;  %v2123_v7 = vor.u32 1.1754944e-38, %v2122_v59 }
 0x641   : > { %v8349_v51 = vpop.eup %8348 }
 0x642   : > { %v2112_v27 = vmul.f32 %v8349_v51, %v2005_v49  ;;  %v3287_v22 = vpop.xlane.xlu0 %3286  ;;  %v2104_v45 = vsel %vm2103_vm8, %v8345_v53, %v2100_v21  ;;  %vm2117_vm10 = vweird.f32 %v8349_v51  ;;  %v2120_v53 = vand.u32 2147483647, %v2005_v49 }
 0x643   : > { %v3305_v42 = vsub.f32 %v10760_v56, %v3287_v22  ;;  %v11027_v34 = vpop.f32.mrf.mxu3  ;;  %v2109_v19 = vsel %vm2106_vm6, %v2108_v25, %v2104_v45  ;;  %vm2118_vm12 = vmor %vm2116_vm13, %vm2117_vm10  ;;  %v13912_v45 = vld [vmem:[#allocation70_spill] sm:$0xff] }
 0x644   : > { %v2113_v39 = vsub.f32 1.0, %v2112_v27  ;;  %v2132_v46 = vmul.f32 %v10722_v33, %v2109_v19  ;;  %vm2121_vm7 = vcmp.eq.f32.partialorder %v2120_v53, 8.507059e+37 }
 0x645   : > { %v11030_v32 = vpop.eup %8350  ;;  %v3315_v18 = vmul.f32 1.442695, %v3305_v42 }
 0x646   : > { %7132 = vmatmul.msk.f32.gmra.mxu1 %vm1933_vm5, %v2132_v46  ;;  %v3330_v29 = vsel %vm1933_vm5, %v11030_v32, 0.0  ;;  %v2114_v44 = vmul.f32 %v8349_v51, %v2113_v39 }
 0x647   : > { %8352 = vpow2.f32 %v3315_v18  ;;  %3331 = vadd.xlane.f32.xlu2 %v3330_v29  ;;  %v13913_v18 = vld [vmem:[#allocation78_spill] sm:$0xff] }
 0x648   : > { %v2115_v56 = vadd.f32 %v8349_v51, %v2114_v44 }
 0x64a   : > { %v3290_v35 = vpop.xlane.xlu0 %3289  ;;  %v2119_v33 = vsel %vm2118_vm12, %v8349_v51, %v2115_v56 }
 0x64b   : > { %v3306_v12 = vsub.f32 %v10766_v57, %v3290_v35  ;;  %v11036_v40 = vpop.f32.mrf.mxu3  ;;  %v2124_v36 = vsel %vm2121_vm7, %v2123_v7, %v2119_v33  ;;  %v13916_v7 = vld [vmem:[#allocation84_spill] sm:$0xff]  ;;  %v13917_v33 = vld [vmem:[#allocation97_spill] sm:$0xff] }
 0x64c   : > { %v2133_v11 = vmul.f32 %v10742_v2, %v2124_v36 }
 0x64d   : > { %v11039_v13 = vpop.eup %8352  ;;  %v3317_v21 = vmul.f32 1.442695, %v3306_v12  ;;  %v13918_v12 = vld [vmem:[#allocation98_spill] sm:$0xff] }
 0x64e   : > { %7133 = vmatmul.msk.f32.gmra.mxu1 %vm1933_vm5, %v2133_v11  ;;  %v3333_v49 = vsel %vm1933_vm5, %v11039_v13, 0.0 }
 0x64f   : > { %8354 = vpow2.f32 %v3317_v21  ;;  %3334 = vadd.xlane.f32.xlu0 %v3333_v49 }
 0x652   : > { %v3293_v25 = vpop.xlane.xlu0 %3292 }
 0x653   : > { %v3307_v51 = vsub.f32 %v10775_v5, %v3293_v25  ;;  %v11045_v27 = vpop.f32.mrf.mxu3  ;;  %v13920_v25 = vld [vmem:[#allocation17_spill] sm:$0xff] }
 0x655   : > { %v11047_v57 = vpop.eup %8354  ;;  %v3319_v22 = vmul.f32 1.442695, %v3307_v51 }
 0x656   : > { %7186 = vmatmul.msk.f32.vlgmr.msra.gmra.mxu1 %vm1837_vm11, %v13912_v45  ;;  %v3336_v2 = vsel %vm1933_vm5, %v11047_v57, 0.0 }
 0x657   : > { %8356 = vpow2.f32 %v3319_v22  ;;  %7312 = vmatpush.xpose.msk.msra.mxu1 %vm1837_vm11, %v10617_v61  ;;  %3337 = vadd.xlane.f32.xlu0 %v3336_v2  ;;  %v13914_v61 = vld [vmem:[#allocation100_spill] sm:$0xff] }
 0x658   : > { %v13921_v22 = vld [vmem:[#allocation92_spill] sm:$0xff] }
 0x65a   : > { %v3296_v42 = vpop.xlane.xlu1 %3295 }
 0x65b   : > { %v3308_v19 = vsub.f32 %v10781_v26, %v3296_v42  ;;  %7313 = vmatpush.xpose.msk.msra.mxu1 %vm1837_vm11, %v10545_v20  ;;  %v11058_v5 = vpop.f32.mrf.mxu3  ;;  %v13915_v20 = vld [vmem:[#allocation101_spill] sm:$0xff]  ;;  %v13922_v42 = vld [vmem:[#allocation94_spill] sm:$0xff] }
 0x65d   : > { %v11060_v39 = vpop.eup %8356  ;;  %v3321_v46 = vmul.f32 1.442695, %v3308_v19 }
 0x65e   : > { %7187 = vmatmul.msk.f32.gmra.mxu1 %vm1837_vm11, %v13913_v18  ;;  %v3339_v59 = vsel %vm1933_vm5, %v11060_v39, 0.0 }
 0x65f   : > { %8358 = vpow2.f32 %v3321_v46  ;;  %7314 = vmatpush.xpose.msk.msra.mxu1 %vm1837_vm11, %v13914_v61  ;;  %3340 = vadd.xlane.f32.xlu2 %v3339_v59  ;;  %v13924_v59 = vld [vmem:[#allocation36_spill] sm:$0xff] }
 0x662   : > { %v3299_v26 = vpop.xlane.xlu2 %3298 }
 0x663   : > { %v3309_v29 = vsub.f32 %v10790_v15, %v3299_v26  ;;  %7315 = vmatpush.xpose.msk.msra.mxu1 %vm1837_vm11, %v13915_v20  ;;  %v11071_v44 = vpop.f32.mrf.mxu3  ;;  %v13925_v26 = vld [vmem:[#allocation89_spill] sm:$0xff] }
 0x665   : > { %v11073_v53 = vpop.eup %8358  ;;  %v3323_v56 = vmul.f32 1.442695, %v3309_v29 }
 0x666   : > { %7188 = vmatmul.msk.f32.gmra.mxu1 %vm1837_vm11, %v13916_v7  ;;  %v3342_v35 = vsel %vm1933_vm5, %v11073_v53, 0.0 }
 0x667   : > { %8360 = vpow2.f32 %v3323_v56  ;;  %7316 = vmatpush.xpose.msk.msra.mxu1 %vm1837_vm11, %v13917_v33  ;;  %3343 = vadd.xlane.f32.xlu1 %v3342_v35  ;;  %v13926_v35 = vld [vmem:[#allocation88_spill] sm:$0xff] }
 0x66a   : > { %v3302_v15 = vpop.xlane.xlu0 %3301 }
 0x66b   : > { %7317 = vmatpush.xpose.msk.msra.mxu1 %vm1837_vm11, %v13918_v12  ;;  %v3310_v36 = vsub.f32 %v10797_v30, %v3302_v15  ;;  %v11084_v11 = vpop.f32.mrf.mxu3 }
 0x66c   : > { %13919 = vst [vmem:[#allocation47_spill] sm:$0xff] %v11084_v11 }
 0x66d   : > { %v11086_v21 = vpop.eup %8360  ;;  %v3325_v49 = vmul.f32 1.442695, %v3310_v36 }
 0x66e   : > { %7189 = vmatmul.msk.f32.gmra.mxu1 %vm1837_vm11, %v13920_v25  ;;  %v3345_v51 = vsel %vm1933_vm5, %v11086_v21, 0.0 }
 0x66f   : > { %8362 = vpow2.f32 %v3325_v49  ;;  %7318 = vmatpush.xpose.msk.msra.mxu1 %vm1837_vm11, %v13921_v22  ;;  %3346 = vadd.xlane.f32.xlu0 %v3345_v51  ;;  %v13929_v22 = vld [vmem:[#allocation40_spill] sm:$0xff] }
 0x672   : > { %v4213_v45 = vpop.xlane.xlu1 %4212  ;;  %v2387_v2 = vpop.xlane.xlu2 %2386 }
 0x673   : > { %v4235_v30 = vsub.f32 %v10811_v55, %v4213_v45  ;;  %8364 = vrcp.f32 %v2387_v2  ;;  %7319 = vmatpush.xpose.msk.msra.mxu1 %vm1837_vm11, %v13922_v42  ;;  %v11097_v19 = vpop.f32.mrf.mxu3  ;;  %v2420_v36 = vand.u32 2147483648, %v2387_v2  ;;  %v2418_v51 = vand.u32 2147483647, %v2387_v2 }
 0x674   : > { %13923 = vst [vmem:[#allocation48_spill] sm:$0xff] %v11097_v19  ;;  %vm2414_vm15 = vweird.f32 %v2387_v2 }
 0x675   : > { %v11099_v46 = vpop.eup %8362  ;;  %v4243_v18 = vmul.f32 1.442695, %v4235_v30  ;;  %v2421_v42 = vor.u32 1.1754944e-38, %v2420_v36  ;;  %vm2419_vm1 = vcmp.eq.f32.partialorder %v2418_v51, 8.507059e+37 }
 0x676   : > { %7190 = vmatmul.msk.f32.gmra.mxu1 %vm1837_vm11, %v13924_v59  ;;  %v3348_v61 = vsel %vm1933_vm5, %v11099_v46, 0.0 }
 0x677   : > { %8366 = vpow2.f32 %v4243_v18  ;;  %7320 = vmatpush.xpose.msk.msra.mxu1 %vm1837_vm11, %v13925_v26  ;;  %3349 = vadd.xlane.f32.xlu2 %v3348_v61 }
 0x679   : > { %v8365_v55 = vpop.eup %8364 }
 0x67a   : > { %v2410_v29 = vmul.f32 %v8365_v55, %v2387_v2  ;;  %v4216_v20 = vpop.xlane.xlu2 %4215  ;;  %v2390_v56 = vpop.xlane.xlu1 %2389  ;;  %vm2415_vm14 = vweird.f32 %v8365_v55  ;;  %v13933_v2 = vld [vmem:[#allocation18_spill] sm:$0xff] }
 0x67b   : > { %v4236_v7 = vsub.f32 %v10824_v10, %v4216_v20  ;;  %8368 = vrcp.f32 %v2390_v56  ;;  %7321 = vmatpush.xpose.msk.msra.mxu1 %vm1837_vm11, %v13926_v35  ;;  %v11110_v33 = vpop.f32.mrf.mxu3  ;;  %vm2416_vm9 = vmor %vm2414_vm15, %vm2415_vm14  ;;  %v2433_v51 = vand.u32 2147483647, %v2390_v56  ;;  %vm2429_vm2 = vweird.f32 %v2390_v56 }
 0x67c   : > { %13927 = vst [vmem:[#allocation77_spill] sm:$0xff] %v11110_v33  ;;  %v2411_v15 = vsub.f32 1.0, %v2410_v29  ;;  %v7430_v33 = vld [vmem:[%s13596_s19 + $0x60] sm:$0xf] }
 0x67d   : > { %v11112_v12 = vpop.eup %8366  ;;  %v4245_v49 = vmul.f32 1.442695, %v4236_v7  ;;  %vm2434_vm8 = vcmp.eq.f32.partialorder %v2433_v51, 8.507059e+37 }
 0x67e   : > { %13928 = vst [vmem:[#allocation80_spill] sm:$0xff] %v11112_v12  ;;  %v2412_v25 = vmul.f32 %v8365_v55, %v2411_v15  ;;  %7191 = vmatmul.msk.f32.gmra.mxu1 %vm1837_vm11, %v13929_v22  ;;  %v4259_v10 = vsel %vm1933_vm5, %v11112_v12, 0.0  ;;  %v13932_v15 = vld [vmem:[#allocation67_spill] sm:$0xff] }
 0x67f   : > { %8370 = vpow2.f32 %v4245_v49  ;;  %4260 = vadd.xlane.f32.xlu0 %v4259_v10  ;;  %v8171_v49 = vunpack.i.l.bf16 %v13932_v15  ;;  %v8172_v22 = vunpack.i.h.bf16 %v13932_v15 }
 0x680   : > { %v2413_v45 = vadd.f32 %v8365_v55, %v2412_v25  ;;  %v2435_v25 = vand.u32 2147483648, %v2390_v56 }
 0x681   : > { %v8369_v30 = vpop.eup %8368 }
 0x682   : > { %v2417_v18 = vsel %vm2416_vm9, %v8365_v55, %v2413_v45  ;;  %v2425_v59 = vmul.f32 %v8369_v30, %v2390_v56  ;;  %v2393_v61 = vpop.xlane.xlu0 %2392  ;;  %vm2430_vm3 = vweird.f32 %v8369_v30  ;;  %v13934_v45 = vld [vmem:[#allocation65_spill] sm:$0xff] }
 0x683   : > { %8372 = vrcp.f32 %v2393_v61  ;;  %v11118_v26 = vpop.f32.mrf.mxu3  ;;  %v2422_v29 = vsel %vm2419_vm1, %v2421_v42, %v2417_v18  ;;  %v8131_v42 = vunpack.i.l.bf16 %v13934_v45  ;;  %vm2431_vm4 = vmor %vm2429_vm2, %vm2430_vm3  ;;  %v2436_v18 = vor.u32 1.1754944e-38, %v2435_v25  ;;  %v13937_v25 = vld [vmem:[#allocation38_spill] sm:$0xff] }
 0x684   : > { %13930 = vst [vmem:[#allocation82_spill] sm:$0xff] %v11118_v26  ;;  %v2426_v20 = vsub.f32 1.0, %v2425_v59  ;;  %v2529_v7 = vmul.f32 %v10813_v63, %v2422_v29  ;;  %v11131_v59 = vpop.xlane.xlu1 %4218  ;;  %v2448_v51 = vand.u32 2147483647, %v2393_v61  ;;  %vm2444_vm10 = vweird.f32 %v2393_v61 }
 0x685   : > { %v11121_v35 = vpop.eup %8370 }
 0x686   : > { %13931 = vst [vmem:[#allocation39_spill] sm:$0xff] %v11121_v35  ;;  %7160 = vmatmul.msk.f32.vlgmr.msra.gmra.mxu0 %vm1933_vm5, %v2529_v7  ;;  %7192 = vmatmul.msk.f32.gmra.mxu1 %vm1837_vm11, %v13933_v2  ;;  %v4262_v55 = vsel %vm1933_vm5, %v11121_v35, 0.0  ;;  %v2427_v36 = vmul.f32 %v8369_v30, %v2426_v20  ;;  %v8132_v20 = vunpack.i.h.bf16 %v13934_v45  ;;  %vm2449_vm12 = vcmp.eq.f32.partialorder %v2448_v51, 8.507059e+37 }
 0x687   : > { %4471 = vmatpush.msra.mxu0 %v8171_v49  ;;  %4263 = vadd.xlane.f32.xlu0 %v4262_v55 }
 0x688   : > { %v2428_v63 = vadd.f32 %v8369_v30, %v2427_v36  ;;  %v13936_v36 = vld [vmem:[#allocation66_spill] sm:$0xff] }
 0x689   : > { %v8373_v10 = vpop.eup %8372  ;;  %4472 = vmatpush.msra.mxu0 %v8172_v22  ;;  %v8141_v22 = vunpack.i.l.bf16 %v13936_v36 }
 0x68a   : > { %v2440_v29 = vmul.f32 %v8373_v10, %v2393_v61  ;;  %v2432_v7 = vsel %vm2431_vm4, %v8369_v30, %v2428_v63  ;;  %vm2445_vm6 = vweird.f32 %v8373_v10  ;;  %v2450_v30 = vand.u32 2147483648, %v2393_v61 }
 0x68b   : > { %v2396_v2 = vpop.xlane.xlu2 %2395  ;;  %4473 = vmatpush.msra.mxu0 %v8131_v42  ;;  %v11134_v15 = vpop.f32.mrf.mxu3  ;;  %v2437_v49 = vsel %vm2434_vm8, %v2436_v18, %v2432_v7  ;;  %v8142_v63 = vunpack.i.h.bf16 %v13936_v36  ;;  %vm11142_vm13 = vmor %vm2444_vm10, %vm2445_vm6  ;;  %v8181_v18 = vunpack.i.l.bf16 %v10679_v52  ;;  %v8182_v61 = vunpack.i.h.bf16 %v10679_v52  ;;  %v13941_v42 = vld [vmem:[#allocation75_spill] sm:$0xff]  ;;  %v11162_v52 = vld [vmem:[%s13597_s20] sm:$0x1f] }
 0x68c   : > { %13935 = vst [vmem:[#allocation55_spill] sm:$0xff] %v11134_v15  ;;  %v2441_v55 = vsub.f32 1.0, %v2440_v29  ;;  %8374 = vrcp.f32 %v2396_v2  ;;  %v2530_v56 = vmul.f32 %v10826_v9, %v2437_v49  ;;  %v11147_v29 = vpop.xlane.xlu0 %4221  ;;  %v2451_v49 = vor.u32 1.1754944e-38, %v2450_v30 }
 0x68d   : > { %4474 = vmatpush.msra.mxu0 %v8132_v20  ;;  %v2463_v30 = vand.u32 2147483647, %v2396_v2  ;;  %vm2459_vm14 = vweird.f32 %v2396_v2 }
 0x68e   : > { %7193 = vmatmul.msk.f32.gmra.mxu1 %vm1837_vm11, %v13937_v25  ;;  %v2442_v26 = vmul.f32 %v8373_v10, %v2441_v55  ;;  %7161 = vmatmul.msk.f32.gmra.mxu0 %vm1933_vm5, %v2530_v56 }
 0x68f   : > { %4475 = vmatpush.msra.mxu0 %v8141_v22  ;;  %vm2464_vm9 = vcmp.eq.f32.partialorder %v2463_v30, 8.507059e+37 }
 0x690   : > { %v2443_v45 = vadd.f32 %v8373_v10, %v2442_v26 }
 0x691   : > { %4476 = vmatpush.msra.mxu0 %v8142_v63  ;;  %v2465_v63 = vand.u32 2147483648, %v2396_v2 }
 0x692   : > { %v8375_v9 = vpop.eup %8374  ;;  %v2399_v7 = vpop.xlane.xlu1 %2398  ;;  %v2447_v20 = vsel %vm11142_vm13, %v8373_v10, %v2443_v45 }
 0x693   : > { %v2455_v55 = vmul.f32 %v8375_v9, %v2396_v2  ;;  %8376 = vrcp.f32 %v2399_v7  ;;  %v2175_v56 = vpop.f32.mrf.mxu1  ;;  %4477 = vmatpush.msra.mxu0 %v8181_v18  ;;  %v11153_v26 = vpop.f32.mrf.mxu3  ;;  %v2452_v36 = vsel %vm2449_vm12, %v2451_v49, %v2447_v20  ;;  %vm2460_vm7 = vweird.f32 %v8375_v9 }
 0x694   : > { %2199 = vst.msk [vmem:[#allocation2] sm:$0xff] %vm1837_vm11, %v2175_v56  ;;  %v2531_v25 = vmul.f32 %v10850_v16, %v2452_v36  ;;  %vm2461_vm15 = vmor %vm2459_vm14, %vm2460_vm7  ;;  %v2466_v16 = vor.u32 1.1754944e-38, %v2465_v63  ;;  %v11165_v49 = vperm.slane %v11162_v52, 2  ;;  %v2480_v2 = vand.u32 2147483648, %v2399_v7 }
 0x695   : > { %13940 = vst [vmem:[#allocation60_spill] sm:$0xff] %v11153_v26  ;;  %v2456_v22 = vsub.f32 1.0, %v2455_v55  ;;  %4478 = vmatpush.msra.mxu0 %v8182_v61  ;;  %v11167_v55 = vpop.xlane.xlu2 %4224  ;;  %v13944_v26 = vld [vmem:[#allocation72_spill] sm:$0xff]  ;;  %v2478_v15 = vand.u32 2147483647, %v2399_v7  ;;  %vm2474_vm3 = vweird.f32 %v2399_v7 }
 0x696   : > { %7254 = vmatmul.msk.f32.vlgmr.msrb.gmra.mxu1 %vm1837_vm11, %v13941_v42  ;;  %7162 = vmatmul.msk.f32.gmra.mxu0 %vm1933_vm5, %v2531_v25  ;;  %13942 = vst [vmem:[#allocation43_spill] sm:$0xff] %v11165_v49 }
 0x697   : > { %v2457_v10 = vmul.f32 %v8375_v9, %v2456_v22  ;;  %vm2479_vm4 = vcmp.eq.f32.partialorder %v2478_v15, 8.507059e+37 }
 0x699   : > { %v8377_v51 = vpop.eup %8376  ;;  %v2458_v45 = vadd.f32 %v8375_v9, %v2457_v10 }
 0x69a   : > { %v2470_v18 = vmul.f32 %v8377_v51, %v2399_v7  ;;  %v2402_v20 = vpop.xlane.xlu0 %2401  ;;  %vm2475_vm1 = vweird.f32 %v8377_v51 }
 0x69b   : > { %8378 = vrcp.f32 %v2402_v20  ;;  %v2178_v56 = vpop.f32.mrf.mxu1  ;;  %v2462_v61 = vsel %vm2461_vm15, %v8375_v9, %v2458_v45  ;;  %v5712_v22 = vpop.f32.mrf.mxu3  ;;  %vm2476_vm2 = vmor %vm2474_vm3, %vm2475_vm1  ;;  %v2481_v45 = vor.u32 1.1754944e-38, %v2480_v2  ;;  %v13946_v2 = vld [vmem:[#allocation81_spill] sm:$0xff]  ;;  %v2493_v15 = vand.u32 2147483647, %v2402_v20 }
 0x69c   : > { %v2471_v36 = vsub.f32 1.0, %v2470_v18  ;;  %2200 = vst.msk [vmem:[#allocation2 + $0x8] sm:$0xff] %vm1837_vm11, %v2178_v56  ;;  %v2467_v25 = vsel %vm2464_vm9, %v2466_v16, %v2462_v61  ;;  %v11171_v42 = vadd.f32 %v5712_v22, %v11165_v49  ;;  %v11177_v16 = vpop.xlane.xlu1 %4227  ;;  %vm2489_vm6 = vweird.f32 %v2402_v20 }
 0x69d   : > { %v2532_v63 = vmul.f32 %v10873_v8, %v2467_v25  ;;  %vm2494_vm13 = vcmp.eq.f32.partialorder %v2493_v15, 8.507059e+37 }
 0x69e   : > { %13943 = vst [vmem:[#allocation61_spill] sm:$0xff] %v11171_v42  ;;  %v2472_v10 = vmul.f32 %v8377_v51, %v2471_v36  ;;  %7255 = vmatmul.msk.f32.gmra.mxu1 %vm1837_vm11, %v13944_v26 }
 0x69f   : > { %7163 = vmatmul.msk.f32.gmra.mxu0 %vm1933_vm5, %v2532_v63  ;;  %v2495_v63 = vand.u32 2147483648, %v2402_v20 }
 0x6a0   : > { %v2473_v9 = vadd.f32 %v8377_v51, %v2472_v10 }
 0x6a1   : > { %v8379_v30 = vpop.eup %8378 }
 0x6a2   : > { %v2485_v18 = vmul.f32 %v8379_v30, %v2402_v20  ;;  %v2477_v56 = vsel %vm2476_vm2, %v8377_v51, %v2473_v9  ;;  %vm2490_vm8 = vweird.f32 %v8379_v30  ;;  %v2496_v9 = vor.u32 1.1754944e-38, %v2495_v63 }
 0x6a3   : > { %v2405_v61 = vpop.xlane.xlu2 %2404  ;;  %v2181_v8 = vpop.f32.mrf.mxu1  ;;  %v2482_v36 = vsel %vm2479_vm4, %v2481_v45, %v2477_v56  ;;  %vm2491_vm10 = vmor %vm2489_vm6, %vm2490_vm8 }
 0x6a4   : > { %v2486_v22 = vsub.f32 1.0, %v2485_v18  ;;  %8380 = vrcp.f32 %v2405_v61  ;;  %2201 = vst.msk [vmem:[#allocation2 + $0x10] sm:$0xff] %vm1837_vm11, %v2181_v8  ;;  %v11180_v26 = vpop.f32.mrf.mxu3  ;;  %v2533_v7 = vmul.f32 %v10913_v47, %v2482_v36  ;;  %v2510_v63 = vand.u32 2147483648, %v2405_v61 }
 0x6a5   : > { %13945 = vst [vmem:[#allocation26_spill] sm:$0xff] %v11180_v26  ;;  %vm2504_vm7 = vweird.f32 %v2405_v61 }
 0x6a6   : > { %v2487_v25 = vmul.f32 %v8379_v30, %v2486_v22  ;;  %7256 = vmatmul.msk.f32.gmra.mxu1 %vm1837_vm11, %v13946_v2 }
 0x6a7   : > { %7164 = vmatmul.msk.f32.gmra.mxu0 %vm1933_vm5, %v2533_v7  ;;  %v13948_v7 = vld [vmem:[#allocation34_spill] sm:$0xff] }
 0x6a8   : > { %v2488_v51 = vadd.f32 %v8379_v30, %v2487_v25 }
 0x6aa   : > { %v8381_v10 = vpop.eup %8380  ;;  %v2408_v45 = vpop.xlane.xlu1 %2407  ;;  %v2492_v18 = vsel %vm2491_vm10, %v8379_v30, %v2488_v51  ;;  %v2508_v30 = vand.u32 2147483647, %v2405_v61 }
 0x6ab   : > { %v2500_v56 = vmul.f32 %v8381_v10, %v2405_v61  ;;  %8382 = vrcp.f32 %v2408_v45  ;;  %v2184_v8 = vpop.f32.mrf.mxu1  ;;  %v2497_v36 = vsel %vm2494_vm13, %v2496_v9, %v2492_v18  ;;  %vm2505_vm12 = vweird.f32 %v8381_v10  ;;  %v13949_v61 = vld [vmem:[#allocation50_spill] sm:$0xff] }
 0x6ac   : > { %2202 = vst.msk [vmem:[#allocation2 + $0x18] sm:$0xff] %vm1837_vm11, %v2184_v8  ;;  %v5717_v47 = vpop.f32.mrf.mxu3  ;;  %v2534_v20 = vmul.f32 %v10939_v1, %v2497_v36  ;;  %v11194_v8 = vpop.xlane.xlu0 %4230  ;;  %vm2506_vm14 = vmor %vm2504_vm7, %vm2505_vm12  ;;  %vm2509_vm15 = vcmp.eq.f32.partialorder %v2508_v30, 8.507059e+37  ;;  %vm2519_vm1 = vweird.f32 %v2408_v45 }
 0x6ad   : > { %v2501_v22 = vsub.f32 1.0, %v2500_v56  ;;  %v11188_v2 = vadd.f32 %v5717_v47, %v11165_v49  ;;  %v2511_v56 = vor.u32 1.1754944e-38, %v2510_v63 }
 0x6ae   : > { %7257 = vmatmul.msk.f32.gmra.mxu1 %vm1837_vm11, %v13948_v7 }
 0x6af   : > { %13947 = vst [vmem:[#allocation27_spill] sm:$0xff] %v11188_v2  ;;  %v2502_v25 = vmul.f32 %v8381_v10, %v2501_v22  ;;  %7165 = vmatmul.msk.f32.gmra.mxu0 %vm1933_vm5, %v2534_v20  ;;  %v2525_v22 = vand.u32 2147483648, %v2408_v45  ;;  %v2523_v2 = vand.u32 2147483647, %v2408_v45 }
 0x6b1   : > { %v8383_v15 = vpop.eup %8382  ;;  %v2503_v51 = vadd.f32 %v8381_v10, %v2502_v25  ;;  %vm2524_vm2 = vcmp.eq.f32.partialorder %v2523_v2, 8.507059e+37 }
 0x6b2   : > { %v2515_v9 = vmul.f32 %v8383_v15, %v2408_v45  ;;  %v3329_v18 = vpop.xlane.xlu2 %3328  ;;  %vm2520_vm9 = vweird.f32 %v8383_v15 }
 0x6b3   : > { %8384 = vrcp.f32 %v3329_v18  ;;  %v2187_v1 = vpop.f32.mrf.mxu1  ;;  %v2507_v36 = vsel %vm2506_vm14, %v8381_v10, %v2503_v51  ;;  %vm2521_vm3 = vmor %vm2519_vm1, %vm2520_vm9  ;;  %vm3356_vm8 = vweird.f32 %v3329_v18 }
 0x6b4   : > { %v2516_v47 = vsub.f32 1.0, %v2515_v9  ;;  %2203 = vst.msk [vmem:[#allocation2 + $0x20] sm:$0xff] %vm1837_vm11, %v2187_v1  ;;  %v2512_v20 = vsel %vm2509_vm15, %v2511_v56, %v2507_v36  ;;  %v2526_v9 = vor.u32 1.1754944e-38, %v2525_v22  ;;  %v11201_v10 = vpop.xlane.xlu0 %5144  ;;  %v3362_v36 = vand.u32 2147483648, %v3329_v18 }
 0x6b5   : > { %v2535_v25 = vmul.f32 %v10975_v48, %v2512_v20 }
 0x6b6   : > { %v2517_v7 = vmul.f32 %v8383_v15, %v2516_v47  ;;  %7258 = vmatmul.msk.f32.gmra.mxu1 %vm1837_vm11, %v13949_v61 }
 0x6b7   : > { %7166 = vmatmul.msk.f32.gmra.mxu0 %vm1933_vm5, %v2535_v25  ;;  %v13950_v25 = vld [vmem:[#allocation52_spill] sm:$0xff] }
 0x6b8   : > { %v2518_v63 = vadd.f32 %v8383_v15, %v2517_v7  ;;  %v3360_v7 = vand.u32 2147483647, %v3329_v18 }
 0x6b9   : > { %v8385_v26 = vpop.eup %8384 }
 0x6ba   : > { %v3352_v1 = vmul.f32 %v8385_v26, %v3329_v18  ;;  %v3332_v30 = vpop.xlane.xlu2 %3331  ;;  %v2522_v51 = vsel %vm2521_vm3, %v8383_v15, %v2518_v63  ;;  %vm3357_vm4 = vweird.f32 %v8385_v26  ;;  %v3363_v15 = vor.u32 1.1754944e-38, %v3362_v36  ;;  %v13951_v18 = vld [vmem:[#allocation37_spill] sm:$0xff] }
 0x6bb   : > { %8386 = vrcp.f32 %v3332_v30  ;;  %v2190_v56 = vpop.f32.mrf.mxu1  ;;  %v2527_v48 = vsel %vm2524_vm2, %v2526_v9, %v2522_v51  ;;  %vm3358_vm6 = vmor %vm3356_vm8, %vm3357_vm4  ;;  %vm3361_vm10 = vcmp.eq.f32.partialorder %v3360_v7, 8.507059e+37  ;;  %vm3371_vm12 = vweird.f32 %v3332_v30 }
 0x6bc   : > { %v3353_v47 = vsub.f32 1.0, %v3352_v1  ;;  %2204 = vst.msk [vmem:[#allocation2 + $0x28] sm:$0xff] %vm1837_vm11, %v2190_v56  ;;  %v2536_v45 = vmul.f32 %v10997_v60, %v2527_v48  ;;  %v3377_v48 = vand.u32 2147483648, %v3332_v30 }
 0x6be   : > { %v3354_v20 = vmul.f32 %v8385_v26, %v3353_v47  ;;  %7259 = vmatmul.msk.f32.gmra.mxu1 %vm1837_vm11, %v13950_v25 }
 0x6bf   : > { %7167 = vmatmul.msk.f32.gmra.mxu0 %vm1933_vm5, %v2536_v45  ;;  %v3375_v45 = vand.u32 2147483647, %v3332_v30 }
 0x6c0   : > { %v3355_v22 = vadd.f32 %v8385_v26, %v3354_v20  ;;  %v3378_v20 = vor.u32 1.1754944e-38, %v3377_v48 }
 0x6c1   : > { %v8387_v2 = vpop.eup %8386  ;;  %vm3376_vm14 = vcmp.eq.f32.partialorder %v3375_v45, 8.507059e+37 }
 0x6c2   : > { %v3359_v61 = vsel %vm3358_vm6, %v8385_v26, %v3355_v22  ;;  %v3367_v63 = vmul.f32 %v8387_v2, %v3332_v30  ;;  %v3335_v9 = vpop.xlane.xlu0 %3334  ;;  %vm3372_vm13 = vweird.f32 %v8387_v2  ;;  %v7955_v30 = vld [vmem:[%s13594_s17 + $0x40] sm:$0xff]  }
 0x6c3   : > { %v3364_v1 = vsel %vm3361_vm10, %v3363_v15, %v3359_v61  ;;  %8388 = vrcp.f32 %v3335_v9  ;;  %v2193_v60 = vpop.f32.mrf.mxu1  ;;  %vm3373_vm7 = vmor %vm3371_vm12, %vm3372_vm13  ;;  %vm3386_vm9 = vweird.f32 %v3335_v9 }
 0x6c4   : > { %v3471_v51 = vmul.f32 %v11017_v37, %v3364_v1  ;;  %v3368_v56 = vsub.f32 1.0, %v3367_v63  ;;  %2205 = vst.msk [vmem:[#allocation2 + $0x30] sm:$0xff] %vm1837_vm11, %v2193_v60  ;;  %v3392_v1 = vand.u32 2147483648, %v3335_v9 }
 0x6c6   : > { %v3369_v47 = vmul.f32 %v8387_v2, %v3368_v56  ;;  %7260 = vmatmul.msk.f32.gmra.mxu1 %vm1837_vm11, %v13951_v18  ;;  %v7854_v56 = vunpack.c.l.bf16 %v7955_v30  ;;  %v3393_v18 = vor.u32 1.1754944e-38, %v3392_v1 }
 0x6c7   : > { %7228 = vmatmul.msk.f32.vlgmr.msrb.gmra.mxu0 %vm1933_vm5, %v3471_v51  ;;  %v13952_v51 = vld [vmem:[#allocation54_spill] sm:$0xff] }
 0x6c8   : > { %v3370_v26 = vadd.f32 %v8387_v2, %v3369_v47 }
 0x6c9   : > { %v8389_v36 = vpop.eup %8388 }
 0x6ca   : > { %v3382_v7 = vmul.f32 %v8389_v36, %v3335_v9  ;;  %v3338_v25 = vpop.xlane.xlu0 %3337  ;;  %v3374_v37 = vsel %vm3373_vm7, %v8387_v2, %v3370_v26  ;;  %vm3387_vm15 = vweird.f32 %v8389_v36  ;;  %v3390_v2 = vand.u32 2147483647, %v3335_v9 }
 0x6cb   : > { %8390 = vrcp.f32 %v3338_v25  ;;  %v2196_v22 = vpop.f32.mrf.mxu1  ;;  %v3379_v15 = vsel %vm3376_vm14, %v3378_v20, %v3374_v37  ;;  %vm3388_vm1 = vmor %vm3386_vm9, %vm3387_vm15  ;;  %vm3401_vm4 = vweird.f32 %v3338_v25 }
 0x6cc   : > { %v3383_v61 = vsub.f32 1.0, %v3382_v7  ;;  %2206 = vst.msk [vmem:[#allocation2 + $0x38] sm:$0xff] %vm1837_vm11, %v2196_v22  ;;  %v3472_v63 = vmul.f32 %v11030_v32, %v3379_v15  ;;  %v11221_v32 = vpop.xlane.xlu1 %4233  ;;  %vm3391_vm3 = vcmp.eq.f32.partialorder %v3390_v2, 8.507059e+37 }
 0x6ce   : > { %v3384_v60 = vmul.f32 %v8389_v36, %v3383_v61  ;;  %7261 = vmatmul.msk.f32.gmra.mxu1 %vm1837_vm11, %v13952_v51  ;;  %v3407_v61 = vand.u32 2147483648, %v3338_v25  ;;  %v3405_v51 = vand.u32 2147483647, %v3338_v25 }
 0x6cf   : > { %7229 = vmatmul.msk.f32.gmra.mxu0 %vm1933_vm5, %v3472_v63 }
 0x6d0   : > { %v3385_v48 = vadd.f32 %v8389_v36, %v3384_v60  ;;  %v13953_v60 = vld [vmem:[#allocation73_spill] sm:$0xff]  ;;  %vm3406_vm6 = vcmp.eq.f32.partialorder %v3405_v51, 8.507059e+37 }
 0x6d1   : > { %v8391_v47 = vpop.eup %8390 }
 0x6d2   : > { %v3397_v45 = vmul.f32 %v8391_v47, %v3338_v25  ;;  %v3341_v26 = vpop.xlane.xlu2 %3340  ;;  %v3389_v20 = vsel %vm3388_vm1, %v8389_v36, %v3385_v48  ;;  %vm3402_vm2 = vweird.f32 %v8391_v47  ;;  %v7855_v36 = vunpack.c.h.bf16 %v7955_v30  ;;  %v7956_v30 = vld [vmem:[%s13594_s17 + $0x48] sm:$0xff]  }
 0x6d3   : > { %8392 = vrcp.f32 %v3341_v26  ;;  %v2789_v7 = vpop.f32.mrf.mxu1  ;;  %v3394_v37 = vsel %vm3391_vm3, %v3393_v18, %v3389_v20  ;;  %vm3403_vm8 = vmor %vm3401_vm4, %vm3402_vm2  ;;  %v3408_v48 = vor.u32 1.1754944e-38, %v3407_v61  ;;  %v3422_v25 = vand.u32 2147483648, %v3341_v26  ;;  %v13954_v61 = vld [vmem:[#allocation74_spill] sm:$0xff] }
 0x6d4   : > { %v3398_v22 = vsub.f32 1.0, %v3397_v45  ;;  %v11223_v15 = vadd.f32 %v7854_v56, %v2789_v7  ;;  %v3473_v9 = vmul.f32 %v11039_v13, %v3394_v37  ;;  %vm3416_vm13 = vweird.f32 %v3341_v26 }
 0x6d6   : > { %v3399_v63 = vmul.f32 %v8391_v47, %v3398_v22  ;;  %7322 = vmatmul.msk.f32.vlgmr.msra.gmra.mxu1 %vm1837_vm11, %v13953_v60  ;;  %v2813_v1 = vsel %vm1933_vm5, %v11223_v15, -inf }
 0x6d7   : > { %2814 = vmax.xlane.f32.xlu2 %v2813_v1  ;;  %7230 = vmatmul.msk.f32.gmra.mxu0 %vm1933_vm5, %v3473_v9  ;;  %v7858_v1 = vunpack.c.l.bf16 %v7956_v30 }
 0x6d8   : > { %v3400_v2 = vadd.f32 %v8391_v47, %v3399_v63  ;;  %v3420_v63 = vand.u32 2147483647, %v3341_v26 }
 0x6d9   : > { %v8393_v56 = vpop.eup %8392 }
 0x6da   : > { %v3412_v13 = vmul.f32 %v8393_v56, %v3341_v26  ;;  %v3344_v18 = vpop.xlane.xlu1 %3343  ;;  %v3404_v45 = vsel %vm3403_vm8, %v8391_v47, %v3400_v2  ;;  %vm3417_vm10 = vweird.f32 %v8393_v56  ;;  %vm3421_vm7 = vcmp.eq.f32.partialorder %v3420_v63, 8.507059e+37  ;;  %v7776_v63 = vld [vmem:[%s13596_s19 + $0x88] sm:$0xf0] }
 0x6db   : > { %8394 = vrcp.f32 %v3344_v18  ;;  %v2792_v20 = vpop.f32.mrf.mxu1  ;;  %v3409_v7 = vsel %vm3406_vm6, %v3408_v48, %v3404_v45  ;;  %vm3418_vm12 = vmor %vm3416_vm13, %vm3417_vm10  ;;  %vm3431_vm15 = vweird.f32 %v3344_v18 }
 0x6dc   : > { %v3413_v37 = vsub.f32 1.0, %v3412_v13  ;;  %v11231_v22 = vadd.f32 %v7855_v36, %v2792_v20  ;;  %v3474_v60 = vmul.f32 %v11047_v57, %v3409_v7  ;;  %v3423_v36 = vor.u32 1.1754944e-38, %v3422_v25  ;;  %v7434_v25 = vld [vmem:[%s13596_s19 + $0x78] sm:$0xf] }
 0x6de   : > { %v3414_v9 = vmul.f32 %v8393_v56, %v3413_v37  ;;  %7323 = vmatmul.msk.f32.gmra.mxu1 %vm1837_vm11, %v13954_v61  ;;  %v2816_v47 = vsel %vm1933_vm5, %v11231_v22, -inf  ;;  %v3435_v61 = vand.u32 2147483647, %v3344_v18 }
 0x6df   : > { %2817 = vmax.xlane.f32.xlu0 %v2816_v47  ;;  %7231 = vmatmul.msk.f32.gmra.mxu0 %vm1933_vm5, %v3474_v60  ;;  %v3437_v60 = vand.u32 2147483648, %v3344_v18  ;;  %v13955_v47 = vld [vmem:[#allocation86_spill] sm:$0xff] }
 0x6e0   : > { %v3415_v57 = vadd.f32 %v8393_v56, %v3414_v9  ;;  %vm3436_vm1 = vcmp.eq.f32.partialorder %v3435_v61, 8.507059e+37 }
 0x6e1   : > { %v8395_v51 = vpop.eup %8394 }
 0x6e2   : > { %v3427_v2 = vmul.f32 %v8395_v51, %v3344_v18  ;;  %v11242_v48 = vpop.xlane.xlu0 %3346  ;;  %v3419_v13 = vsel %vm3418_vm12, %v8393_v56, %v3415_v57  ;;  %vm3432_vm14 = vweird.f32 %v8395_v51  ;;  %v7771_v57 = vld [vmem:[%s13596_s19 + $0x60] sm:$0xf0]  ;;  %v7766_v18 = vld [vmem:[%s13596_s19 + $0x38] sm:$0xf0] }
 0x6e3   : > { %8396 = vrcp.f32 %v11242_v48  ;;  %v2795_v45 = vpop.f32.mrf.mxu1  ;;  %v3424_v20 = vsel %vm3421_vm7, %v3423_v36, %v3419_v13  ;;  %v7859_v36 = vunpack.c.h.bf16 %v7956_v30  ;;  %vm3433_vm9 = vmor %vm3431_vm15, %vm3432_vm14  ;;  %vm3446_vm2 = vweird.f32 %v11242_v48 }
 0x6e4   : > { %v3428_v7 = vsub.f32 1.0, %v3427_v2  ;;  %v11245_v37 = vadd.f32 %v7858_v1, %v2795_v45  ;;  %v3475_v26 = vmul.f32 %v11060_v39, %v3424_v20  ;;  %v7435_v39 = vor.u32 %v7776_v63, %v7434_v25  ;;  %v7414_v1 = vld [vmem:[%s13596_s19 + $0x50] sm:$0xf]  ;;  %v7394_v25 = vld [vmem:[%s13596_s19 + $0x28] sm:$0xf] }
 0x6e5   : > { %v3438_v45 = vor.u32 1.1754944e-38, %v3437_v60  ;;  %v7415_v20 = vor.u32 %v7771_v57, %v7414_v1  ;;  %v7395_v61 = vor.u32 %v7766_v18, %v7394_v25  ;;  %v3452_v1 = vand.u32 2147483648, %v11242_v48  ;;  %v13956_v57 = vld [vmem:[#allocation58_spill] sm:$0xff]  ;;  %v7778_v25 = vld [vmem:[%s13596_s19 + $0x98] sm:$0xf0] }
 0x6e6   : > { %v3429_v9 = vmul.f32 %v8395_v51, %v3428_v7  ;;  %7324 = vmatmul.msk.f32.gmra.mxu1 %vm1837_vm11, %v13955_v47  ;;  %v2819_v56 = vsel %vm1933_vm5, %v11245_v37, -inf }
 0x6e7   : > { %2820 = vmax.xlane.f32.xlu1 %v2819_v56  ;;  %7232 = vmatmul.msk.f32.gmra.mxu0 %vm1933_vm5, %v3475_v26 }
 0x6e8   : > { %v3430_v2 = vadd.f32 %v8395_v51, %v3429_v9  ;;  %5639 = vmatpush.bf16.msrb.mxu1 %v7435_v39 }
 0x6e9   : > { %v8397_v13 = vpop.eup %8396 }
 0x6ea   : > { %v3442_v7 = vmul.f32 %v8397_v13, %v11242_v48  ;;  %v11266_v47 = vpop.xlane.xlu2 %3349  ;;  %v3434_v56 = vsel %vm3433_vm9, %v8395_v51, %v3430_v2  ;;  %v7957_v51 = vld [vmem:[%s13594_s17 + $0x50] sm:$0xff]   ;;  %vm3447_vm3 = vweird.f32 %v8397_v13 }
 0x6eb   : > { %8398 = vrcp.f32 %v11266_v47  ;;  %v2798_v30 = vpop.f32.mrf.mxu1  ;;  %v3439_v26 = vsel %vm3436_vm1, %v3438_v45, %v3434_v56  ;;  %v3450_v45 = vand.u32 2147483647, %v11242_v48  ;;  %v7450_v56 = vld [vmem:[%s13596_s19 + $0x88] sm:$0xf]  ;;  %vm3448_vm4 = vmor %vm3446_vm2, %vm3447_vm3  ;;  %vm3461_vm10 = vweird.f32 %v11266_v47 }
 0x6ec   : > { %v3443_v60 = vsub.f32 1.0, %v3442_v7  ;;  %v11275_v9 = vadd.f32 %v7859_v36, %v2798_v30  ;;  %v3476_v63 = vmul.f32 %v11073_v53, %v3439_v26  ;;  %5640 = vmatpush.bf16.msrb.mxu1 %v7415_v20  ;;  %v7374_v53 = vld [vmem:[%s13596_s19] sm:$0xf]  ;;  %v7761_v36 = vld [vmem:[%s13596_s19 + $0x10] sm:$0xf0]  ;;  %v7862_v20 = vunpack.c.l.bf16 %v7957_v51 }
 0x6ed   : > { %v7375_v30 = vor.u32 %v7761_v36, %v7374_v53  ;;  %v3453_v26 = vor.u32 1.1754944e-38, %v3452_v1  ;;  %vm3451_vm8 = vcmp.eq.f32.partialorder %v3450_v45, 8.507059e+37  ;;  %v3467_v1 = vand.u32 2147483648, %v11266_v47  ;;  %v13957_v36 = vld [vmem:[#allocation41_spill] sm:$0xff] }
 0x6ee   : > { %v3444_v39 = vmul.f32 %v8397_v13, %v3443_v60  ;;  %7325 = vmatmul.msk.f32.gmra.mxu1 %vm1837_vm11, %v13956_v57  ;;  %v2822_v2 = vsel %vm1933_vm5, %v11275_v9, -inf }
 0x6ef   : > { %2823 = vmax.xlane.f32.xlu2 %v2822_v2  ;;  %7233 = vmatmul.msk.f32.gmra.mxu0 %vm1933_vm5, %v3476_v63 }
 0x6f0   : > { %v3445_v7 = vadd.f32 %v8397_v13, %v3444_v39  ;;  %5641 = vmatpush.bf16.msrb.mxu1 %v7395_v61  ;;  %v7451_v39 = vor.u32 %v7778_v25, %v7450_v56  ;;  %v7773_v61 = vld [vmem:[%s13596_s19 + $0x70] sm:$0xf0]  ;;  %v7863_v56 = vunpack.c.h.bf16 %v7957_v51  ;;  %v7768_v25 = vld [vmem:[%s13596_s19 + $0x48] sm:$0xf0] }
 0x6f1   : > { %v8399_v18 = vpop.eup %8398 }
 0x6f2   : > { %v3457_v48 = vmul.f32 %v8399_v18, %v11266_v47  ;;  %v3449_v60 = vsel %vm3448_vm4, %v8397_v13, %v3445_v7  ;;  %vm3462_vm6 = vweird.f32 %v8399_v18  ;;  %v7431_v7 = vor.u32 %v7773_v61, %v7430_v33 }
 0x6f3   : > { %v2801_v63 = vpop.f32.mrf.mxu1  ;;  %v3454_v42 = vsel %vm3451_vm8, %v3453_v26, %v3449_v60  ;;  %vm3463_vm13 = vmor %vm3461_vm10, %vm3462_vm6 }
 0x6f4   : > { %v3458_v57 = vsub.f32 1.0, %v3457_v48  ;;  %v11303_v2 = vadd.f32 %v7862_v20, %v2801_v63  ;;  %v3477_v53 = vmul.f32 %v11086_v21, %v3454_v42  ;;  %5642 = vmatpush.bf16.msrb.mxu1 %v7375_v30  ;;  %v3465_v20 = vand.u32 2147483647, %v11266_v47  ;;  %v7410_v42 = vld [vmem:[%s13596_s19 + $0x38] sm:$0xf] }
 0x6f5   : > { %v3468_v30 = vor.u32 1.1754944e-38, %v3467_v1  ;;  %v7411_v47 = vor.u32 %v7768_v25, %v7410_v42  ;;  %v7390_v63 = vld [vmem:[%s13596_s19 + $0x10] sm:$0xf] }
 0x6f6   : > { %v3459_v13 = vmul.f32 %v8399_v18, %v3458_v57  ;;  %7326 = vmatmul.msk.f32.gmra.mxu1 %vm1837_vm11, %v13957_v36  ;;  %v2825_v45 = vsel %vm1933_vm5, %v11303_v2, -inf  ;;  %vm3466_vm12 = vcmp.eq.f32.partialorder %v3465_v20, 8.507059e+37  ;;  %v13958_v57 = vld [vmem:[#allocation59_spill] sm:$0xff]  ;;  %v13959_v36 = vld [vmem:[#allocation62_spill] sm:$0xff] }
 0x6f7   : > { %2826 = vmax.xlane.f32.xlu0 %v2825_v45  ;;  %7234 = vmatmul.msk.f32.gmra.mxu0 %vm1933_vm5, %v3477_v53 }
 0x6f8   : > { %5755 = vmatpush.bf16.msra.mxu1 %v7451_v39  ;;  %v3460_v21 = vadd.f32 %v8399_v18, %v3459_v13  ;;  %v7763_v39 = vld [vmem:[%s13596_s19 + $0x20] sm:$0xf0] }
 0x6fa   : > { %v3464_v26 = vsel %vm3463_vm13, %v8399_v18, %v3460_v21  ;;  %v7958_v18 = vld [vmem:[%s13594_s17 + $0x58] sm:$0xff]  }
 0x6fb   : > { %v2804_v48 = vpop.f32.mrf.mxu1  ;;  %v3469_v33 = vsel %vm3466_vm12, %v3468_v30, %v3464_v26  ;;  %v7866_v1 = vunpack.c.l.bf16 %v7958_v18 }
 0x6fc   : > { %5756 = vmatpush.bf16.msra.mxu1 %v7431_v7  ;;  %v11326_v60 = vadd.f32 %v7863_v56, %v2804_v48  ;;  %v3478_v51 = vmul.f32 %v11099_v46, %v3469_v33  ;;  %v7391_v46 = vor.u32 %v7763_v39, %v7390_v63  ;;  %v13960_v56 = vld [vmem:[#allocation46_spill] sm:$0xff]  ;;  %v7867_v33 = vunpack.c.h.bf16 %v7958_v18  ;;  %v7963_v39 = vld [vmem:[%s13594_s17 + $0x80] sm:$0xff]   ;;  %v7964_v18 = vld [vmem:[%s13594_s17 + $0x88] sm:$0xff]  }
 0x6fe   : > { %7327 = vmatmul.msk.f32.gmra.mxu1 %vm1837_vm11, %v13958_v57  ;;  %v2828_v61 = vsel %vm1933_vm5, %v11326_v60, -inf  ;;  %v7886_v57 = vunpack.c.l.bf16 %v7963_v39 }
 0x6ff   : > { %2829 = vmax.xlane.f32.xlu1 %v2828_v61  ;;  %7235 = vmatmul.msk.f32.gmra.mxu0 %vm1933_vm5, %v3478_v51 }
 0x700   : > { %5757 = vmatpush.bf16.msra.mxu1 %v7411_v47 }
 0x703   : > { %v2807_v53 = vpop.f32.mrf.mxu1  ;;  %v2618_v20 = vpop.f32.mrf.mxu0 }
 0x704   : > { %5758 = vmatpush.bf16.msra.mxu1 %v7391_v46  ;;  %v11343_v13 = vadd.f32 %v7866_v1, %v2807_v53  ;;  %v7890_v1 = vunpack.c.l.bf16 %v7964_v18 }
 0x706   : > { %7328 = vmatmul.msk.f32.gmra.mxu1 %vm1837_vm11, %v13959_v36  ;;  %v2831_v45 = vsel %vm1933_vm5, %v11343_v13, -inf }
 0x707   : > { %2832 = vmax.xlane.f32.xlu2 %v2831_v45 }
 0x70b   : > { %v2810_v7 = vpop.f32.mrf.mxu1  ;;  %2650 = vrot.lane.b32.xlu0 %v2618_v20, %s13699_s22  ;;  %v2621_v42 = vpop.f32.mrf.mxu0 }
 0x70c   : > { %v11362_v47 = vadd.f32 %v7867_v33, %v2810_v7 }
 0x70e   : > { %7329 = vmatmul.msk.f32.gmra.mxu1 %vm1837_vm11, %v13960_v56  ;;  %v2834_v63 = vsel %vm1933_vm5, %v11362_v47, -inf  ;;  %vm2674_vm11 = vcmask 130112  }
 0x713   : > { %v3721_v21 = vpop.f32.mrf.mxu1  ;;  %v2624_v30 = vpop.f32.mrf.mxu0 }
 0x714   : > { %v11376_v46 = vadd.f32 %v7886_v57, %v3721_v21 }
 0x716   : > { %7452 = vmatmul.msk.bf16.vlgmr.msrb.gmra.mxu1 %vm704_vm0, %v13895_v43  ;;  %v3745_v53 = vsel %vm1933_vm5, %v11376_v46, -inf }
 0x717   : > { %6150 = vmatpush.bf16.msrb.mxu1 %v10717_v38 }
 0x718   : > { %2652 = vrot.lane.b32.xlu1 %v2621_v42, %s13699_s22 }
 0x71b   : > { %6151 = vmatpush.bf16.msrb.mxu1 %v10726_v6  ;;  %v3724_v25 = vpop.f32.mrf.mxu1 }
 0x71c   : > { %v2627_v7 = vpop.f32.mrf.mxu0 }
 0x71f   : > { %6152 = vmatpush.bf16.msrb.mxu1 %v10737_v54  ;;  %2654 = vrot.lane.b32.xlu2 %v2624_v30, %s13699_s22  ;;  %v11394_v30 = vpop.xlane.xlu0 %4260 }
 0x720   : > { %vm4288_vm14 = vweird.f32 %v11394_v30 }
 0x723   : > { %6153 = vmatpush.bf16.msrb.mxu1 %v10746_v23  ;;  %v3727_v26 = vpop.f32.mrf.mxu1 }
 0x724   : > { %v11380_v36 = vadd.f32 %v7890_v1, %v3727_v26  ;;  %v2630_v42 = vpop.f32.mrf.mxu0  ;;  %v7887_v1 = vunpack.c.h.bf16 %v7963_v39 }
 0x726   : > { %7453 = vmatmul.msk.bf16.gmra.mxu1 %vm704_vm0, %v10840_v3  ;;  %v3751_v20 = vsel %vm1933_vm5, %v11380_v36, -inf }
 0x727   : > { %v11405_v57 = vpop.xlane.xlu0 %4263 }
 0x728   : > { %vm4303_vm13 = vweird.f32 %v11405_v57 }
 0x72b   : > { %v3730_v48 = vpop.f32.mrf.mxu1 }
 0x72c   : > { %v2633_v33 = vpop.f32.mrf.mxu0 }
 0x733   : > { %v11364_v51 = vpop.f32.mrf.mxu1 }
 0x735   : > { %2835 = vmax.xlane.f32.xlu0 %v2834_v63 }
 0x736   : > { %7454 = vmatmul.msk.bf16.gmra.mxu1 %vm704_vm0, %v10877_v62 }
 0x73b   : > { %v3736_v61 = vpop.f32.mrf.mxu1 }
 0x742   : > { %3746 = vmax.xlane.f32.xlu1 %v3745_v53 }
 0x743   : > { %v11382_v45 = vpop.f32.mrf.mxu1 }
 0x746   : > { %7455 = vmatmul.msk.bf16.gmra.mxu1 %vm704_vm0, %v10937_v31 }
 0x748   : > { %3752 = vmax.xlane.f32.xlu2 %v3751_v20 }
 0x749   : > { %2656 = vrot.lane.b32.xlu0 %v2627_v7, %s13699_s22 }
 0x74a   : > { %v11409_v53 = vpop.xlane.xlu2 %2814 }
 0x74b   : > { %v3742_v56 = vpop.f32.mrf.mxu1 }
 0x752   : > { %v2818_v7 = vpop.xlane.xlu0 %2817 }
 0x753   : > { %v11389_v21 = vpop.f32.mrf.mxu1 }
 0x756   : > { %7468 = vmatmul.msk.bf16.vlgmr.msra.gmra.mxu1 %vm704_vm0, %v13895_v43 }
 0x757   : > { %6622 = vmatpush.bf16.msra.mxu1 %v10717_v38 }
 0x75a   : > { %v11423_v39 = vpop.xlane.xlu1 %2820 }
 0x75b   : > { %6623 = vmatpush.bf16.msra.mxu1 %v10726_v6  ;;  %v11397_v26 = vpop.f32.mrf.mxu1  ;;  %2658 = vrot.lane.b32.xlu1 %v2630_v42, %s13699_s22  ;;  %v11413_v42 = vadd.f32 %v7887_v1, %v3724_v25  ;;  %v7891_v25 = vunpack.c.h.bf16 %v7964_v18  ;;  %v7965_v6 = vld [vmem:[%s13594_s17 + $0x90] sm:$0xff]  }
 0x75c   : > { %v7894_v11 = vunpack.c.l.bf16 %v7965_v6 }
 0x75d   : > { %v11431_v38 = vadd.f32 %v7891_v25, %v3730_v48  ;;  %v7966_v48 = vld [vmem:[%s13594_s17 + $0x98] sm:$0xff]   ;;  %v2838_v25 = vsub.f32 %v11231_v22, %v2818_v7 }
 0x75f   : > { %6624 = vmatpush.bf16.msra.mxu1 %v10737_v54  ;;  %v3754_v18 = vsel %vm1933_vm5, %v11431_v38, -inf }
 0x760   : > { %2660 = vrot.lane.b32.xlu2 %v2633_v33, %s13699_s22  ;;  %v3748_v33 = vsel %vm1933_vm5, %v11413_v42, -inf }
 0x762   : > { %v11415_v49 = vpop.xlane.xlu2 %2823 }
 0x763   : > { %6625 = vmatpush.bf16.msra.mxu1 %v10746_v23  ;;  %v11403_v63 = vpop.f32.mrf.mxu1 }
 0x766   : > { %7469 = vmatmul.msk.bf16.gmra.mxu1 %vm704_vm0, %v10840_v3 }
 0x76a   : > { %v2827_v23 = vpop.xlane.xlu0 %2826 }
 0x76b   : > { %v11411_v20 = vpop.f32.mrf.mxu1 }
 0x772   : > { %v11433_v41 = vpop.xlane.xlu1 %2829 }
 0x773   : > { %v11419_v43 = vpop.f32.mrf.mxu1  ;;  %3749 = vmax.xlane.f32.xlu0 %v3748_v33  ;;  %v7895_v33 = vunpack.c.h.bf16 %v7965_v6  ;;  %v11450_v6 = vadd.f32 %v7894_v11, %v11364_v51  ;;  %v2841_v11 = vsub.f32 %v11303_v2, %v2827_v23  ;;  %v7973_v23 = vld [vmem:[%s13594_s17 + $0xd0] sm:$0xff]  }
 0x774   : > { %v7927_v2 = vunpack.c.h.bf16 %v7973_v23 }
 0x775   : > { %v11438_v35 = vadd.f32 %v7895_v33, %v3736_v61  ;;  %v3757_v22 = vsel %vm1933_vm5, %v11450_v6, -inf  ;;  %v2853_v7 = vmul.f32 1.442695, %v2841_v11 }
 0x776   : > { %7470 = vmatmul.msk.bf16.gmra.mxu1 %vm704_vm0, %v10877_v62 }
 0x777   : > { %v3760_v61 = vsel %vm1933_vm5, %v11438_v35, -inf }
 0x77a   : > { %v11425_v3 = vpop.xlane.xlu2 %2832 }
 0x77b   : > { %v4668_v54 = vpop.f32.mrf.mxu1 }
 0x77c   : > { %v11482_v11 = vadd.f32 %v7927_v2, %v4668_v54  ;;  %v4237_v54 = vsub.f32 %v10848_v50, %v11131_v59  ;;  %v4238_v50 = vsub.f32 %v10870_v24, %v11147_v29 }
 0x77d   : > { %v2651_v1 = vpop.permute.xlu0 %2650 }
 0x77e   : > { %2675 = vst.msk [vmem:[#allocation2] sm:$0xff] %vm2674_vm11, %v2651_v1  ;;  %v2636_v1 = vpop.f32.mrf.mxu0 }
 0x782   : > { %v2655_v62 = vpop.permute.xlu2 %2654 }
 0x783   : > { %2677 = vst.msk [vmem:[#allocation2 + $0x10] sm:$0xff] %vm2674_vm11, %v2655_v62  ;;  %v11436_v19 = vpop.f32.mrf.mxu1  ;;  %v7899_v62 = vunpack.c.h.bf16 %v7966_v48 }
 0x785   : > { %3755 = vmax.xlane.f32.xlu1 %v3754_v18  ;;  %v2847_v18 = vmul.f32 1.442695, %v2838_v25  ;;  %v11457_v12 = vadd.f32 %v7899_v62, %v3742_v56 }
 0x786   : > { %7471 = vmatmul.msk.bf16.gmra.mxu1 %vm704_vm0, %v10937_v31 }
 0x787   : > { %2662 = vrot.lane.b32.xlu0 %v2636_v1, %s13699_s22  ;;  %8400 = vpow2.f32 %v2847_v18  ;;  %v3766_v51 = vsel %vm1933_vm5, %v11457_v12, -inf  ;;  %v11480_v18 = vperm.slane %v11162_v52, 0 }
 0x788   : > { %8402 = vpow2.f32 %v2853_v7  ;;  %v2639_v7 = vpop.f32.mrf.mxu0 }
 0x789   : > { %3761 = vmax.xlane.f32.xlu2 %v3760_v61  ;;  %13963 = vst [vmem:[#allocation25_spill] sm:$0xff] %v11480_v18 }
 0x78a   : > { %v2653_v33 = vpop.permute.xlu1 %2652 }
 0x78b   : > { %2676 = vst.msk [vmem:[#allocation2 + $0x8] sm:$0xff] %vm2674_vm11, %v2653_v33  ;;  %v11455_v31 = vpop.f32.mrf.mxu1 }
 0x78d   : > { %3758 = vmax.xlane.f32.xlu1 %v3757_v22  ;;  %v11466_v25 = vpop.eup %8400 }
 0x78e   : > { %v2864_v56 = vsel %vm1933_vm5, %v11466_v25, 0.0  ;;  %v11472_v61 = vpop.eup %8402 }
 0x78f   : > { %v2873_v33 = vsel %vm1933_vm5, %v11472_v61, 0.0 }
 0x791   : > { %3767 = vmax.xlane.f32.xlu2 %v3766_v51 }
 0x793   : > { %v11464_v1 = vpop.f32.mrf.mxu1 }
 0x794   : > { %13961 = vst [vmem:[#allocation79_spill] sm:$0xff] %v11464_v1  ;;  %v7898_v1 = vunpack.c.l.bf16 %v7966_v48 }
 0x799   : > { %2865 = vadd.xlane.f32.xlu2 %v2864_v56  ;;  %v2839_v56 = vsub.f32 %v11245_v37, %v11423_v39  ;;  %v4247_v37 = vmul.f32 1.442695, %v4237_v54 }
 0x79b   : > { %v11470_v62 = vpop.f32.mrf.mxu1  ;;  %v2849_v2 = vmul.f32 1.442695, %v2839_v56  ;;  %v4249_v56 = vmul.f32 1.442695, %v4238_v50  ;;  %v2842_v50 = vsub.f32 %v11326_v60, %v11433_v41 }
 0x79c   : > { %13962 = vst [vmem:[#allocation24_spill] sm:$0xff] %v11470_v62 }
 0x7a1   : > { %2874 = vadd.xlane.f32.xlu2 %v2873_v33  ;;  %v4692_v33 = vsel %vm1933_vm5, %v11482_v11, -inf }
 0x7a3   : > { %v5649_v22 = vpop.f32.mrf.mxu1 }
 0x7a4   : > { %v11485_v51 = vadd.f32 %v5649_v22, %v11480_v18 }
 0x7a6   : > { %13964 = vst [vmem:[#allocation21_spill] sm:$0xff] %v11485_v51  ;;  %2664 = vrot.lane.b32.xlu1 %v2639_v7, %s13699_s22  ;;  %v11498_v7 = vadd.f32 %v7898_v1, %v11382_v45 }
 0x7a8   : > { %v2836_v62 = vpop.xlane.xlu0 %2835  ;;  %v3763_v39 = vsel %vm1933_vm5, %v11498_v7, -inf }
 0x7a9   : > { %v2844_v52 = vsub.f32 %v11362_v47, %v2836_v62  ;;  %4693 = vmax.xlane.f32.xlu2 %v4692_v33  ;;  %v11516_v62 = vld [vmem:[%s13594_s17 + $0xc8] sm:$0xff]  }
 0x7aa   : > { %v7922_v33 = vunpack.c.l.bf16 %v11516_v62 }
 0x7ab   : > { %v2859_v22 = vmul.f32 1.442695, %v2844_v52  ;;  %v11495_v51 = vpop.f32.mrf.mxu1 }
 0x7ac   : > { %13965 = vst [vmem:[#allocation22_spill] sm:$0xff] %v11495_v51 }
 0x7ad   : > { %8404 = vpow2.f32 %v2859_v22 }
 0x7ae   : > { %8406 = vpow2.f32 %v2849_v2  ;;  %v11526_v2 = vadd.f32 %v7922_v33, %v11403_v63  ;;  %v11542_v63 = vld [vmem:[%s13594_s17 + $0xe8] sm:$0xff]  }
 0x7af   : > { %8408 = vpow2.f32 %v4247_v37  ;;  %v7938_v41 = vunpack.c.l.bf16 %v11542_v63 }
 0x7b0   : > { %8410 = vpow2.f32 %v4249_v56 }
 0x7b1   : > { %3764 = vmax.xlane.f32.xlu0 %v3763_v39  ;;  %v2837_v39 = vsub.f32 %v11223_v15, %v11409_v53  ;;  %v2855_v15 = vmul.f32 1.442695, %v2842_v50 }
 0x7b3   : > { %v11502_v48 = vpop.eup %8404  ;;  %v5654_v59 = vpop.f32.mrf.mxu1  ;;  %v2845_v33 = vmul.f32 1.442695, %v2837_v39 }
 0x7b4   : > { %v11507_v47 = vadd.f32 %v5654_v59, %v11480_v18  ;;  %v2882_v45 = vsel %vm1933_vm5, %v11502_v48, 0.0  ;;  %v11511_v1 = vpop.eup %8406  ;;  %v7926_v59 = vunpack.c.l.bf16 %v7973_v23 }
 0x7b5   : > { %2883 = vadd.xlane.f32.xlu2 %v2882_v45  ;;  %v2867_v24 = vsel %vm1933_vm5, %v11511_v1, 0.0  ;;  %v11521_v29 = vpop.eup %8408  ;;  %v4683_v45 = vsel %vm1933_vm5, %v11526_v2, -inf  ;;  %v11556_v39 = vpop.xlane.xlu1 %3746  ;;  %8412 = vpow2.f32 %v2845_v33  ;;  %v7971_v33 = vld [vmem:[%s13594_s17 + $0xc0] sm:$0xff]  }
 0x7b6   : > { %13966 = vst [vmem:[#allocation76_spill] sm:$0xff] %v11507_v47  ;;  %v4265_v37 = vsel %vm1933_vm5, %v11521_v29, 0.0  ;;  %v11537_v56 = vpop.eup %8410  ;;  %v11548_v60 = vadd.f32 %v7926_v59, %v11419_v43  ;;  %8414 = vpow2.f32 %v2855_v15  ;;  %v13993_v47 = vld [vmem:[#allocation68_spill] sm:$0xff] }
 0x7b8   : > { %13968 = vst [vmem:[#allocation20_spill] sm:$0xff] %v11548_v60  ;;  %v4689_v43 = vsel %vm1933_vm5, %v11548_v60, -inf }
 0x7b9   : > { %2868 = vadd.xlane.f32.xlu0 %v2867_v24  ;;  %v4239_v24 = vsub.f32 %v10908_v0, %v11167_v55  ;;  %v11559_v55 = vadd.f32 %v7938_v41, %v11036_v40 }
 0x7bb   : > { %v11523_v52 = vpop.f32.mrf.mxu1  ;;  %v3753_v54 = vpop.xlane.xlu2 %3752  ;;  %v4251_v0 = vmul.f32 1.442695, %v4239_v24  ;;  %13970 = vst [vmem:[#allocation64_spill] sm:$0xff] %v11559_v55  ;;  %v5149_v24 = vsel %vm1933_vm5, %v11559_v55, -inf }
 0x7bc   : > { %13967 = vst [vmem:[#allocation19_spill] sm:$0xff] %v11523_v52  ;;  %v2657_v22 = vpop.permute.xlu0 %2656  ;;  %v3771_v50 = vsub.f32 %v11380_v36, %v3753_v54  ;;  %v7974_v36 = vld [vmem:[%s13594_s17 + $0xd8] sm:$0xff]  }
 0x7bd   : > { %2678 = vst.msk [vmem:[#allocation2 + $0x18] sm:$0xff] %vm2674_vm11, %v2657_v22  ;;  %4266 = vadd.xlane.f32.xlu2 %v4265_v37  ;;  %v4268_v37 = vsel %vm1933_vm5, %v11537_v56, 0.0  ;;  %8416 = vpow2.f32 %v4251_v0  ;;  %v7931_v41 = vunpack.c.h.bf16 %v7974_v36 }
 0x7be   : > { %v3781_v54 = vmul.f32 1.442695, %v3771_v50 }
 0x7c0   : > { %8418 = vpow2.f32 %v3781_v54 }
 0x7c1   : > { %4684 = vmax.xlane.f32.xlu0 %v4683_v45  ;;  %v11566_v45 = vpop.eup %8412 }
 0x7c2   : > { %v11573_v40 = vpop.eup %8414 }
 0x7c3   : > { %v5659_v53 = vpop.f32.mrf.mxu1  ;;  %v2661_v22 = vpop.permute.xlu2 %2660 }
 0x7c4   : > { %v11551_v23 = vadd.f32 %v5659_v53, %v11480_v18  ;;  %2680 = vst.msk [vmem:[#allocation2 + $0x28] sm:$0xff] %vm2674_vm11, %v2661_v22  ;;  %v7918_v53 = vunpack.c.l.bf16 %v7971_v33  ;;  %v2861_v22 = vsel %vm1933_vm5, %v11566_v45, 0.0  ;;  %v11583_v0 = vpop.eup %8416 }
 0x7c5   : > { %4269 = vadd.xlane.f32.xlu2 %v4268_v37  ;;  %v2876_v37 = vsel %vm1933_vm5, %v11573_v40, 0.0  ;;  %v4271_v50 = vsel %vm1933_vm5, %v11583_v0, 0.0 }
 0x7c6   : > { %13969 = vst [vmem:[#allocation85_spill] sm:$0xff] %v11551_v23  ;;  %v7919_v23 = vunpack.c.h.bf16 %v7971_v33 }
 0x7c8   : > { %v11604_v54 = vadd.f32 %v7919_v23, %v11397_v26  ;;  %v7923_v26 = vunpack.c.h.bf16 %v11516_v62 }
 0x7c9   : > { %4690 = vmax.xlane.f32.xlu0 %v4689_v43  ;;  %v11586_v43 = vadd.f32 %v7918_v53, %v11389_v21  ;;  %v11601_v53 = vpop.eup %8418 }
 0x7ca   : > { %13973 = vst [vmem:[#allocation53_spill] sm:$0xff] %v11601_v53 }
 0x7cb   : > { %v11564_v59 = vpop.f32.mrf.mxu1 }
 0x7cc   : > { %13971 = vst [vmem:[#allocation49_spill] sm:$0xff] %v11564_v59 }
 0x7cd   : > { %v2659_v15 = vpop.permute.xlu1 %2658  ;;  %5150 = vmax.xlane.f32.xlu2 %v5149_v24 }
 0x7ce   : > { %2679 = vst.msk [vmem:[#allocation2 + $0x20] sm:$0xff] %vm2674_vm11, %v2659_v15  ;;  %v11591_v15 = vadd.f32 %v7931_v41, %v11455_v31 }
 0x7d0   : > { %2862 = vadd.xlane.f32.xlu1 %v2861_v22  ;;  %v2840_v22 = vsub.f32 %v11275_v9, %v11415_v49  ;;  %v4698_v21 = vsel %vm1933_vm5, %v11591_v15, -inf  ;;  %v3799_v49 = vsel %vm1933_vm5, %v11601_v53, 0.0  ;;  %v4680_v9 = vsel %vm1933_vm5, %v11604_v54, -inf }
 0x7d1   : > { %2877 = vadd.xlane.f32.xlu0 %v2876_v37  ;;  %v4677_v37 = vsel %vm1933_vm5, %v11586_v43, -inf }
 0x7d2   : > { %v2851_v31 = vmul.f32 1.442695, %v2840_v22  ;;  %v2843_v22 = vsub.f32 %v11343_v13, %v11425_v3 }
 0x7d3   : > { %v11588_v24 = vpop.f32.mrf.mxu1 }
 0x7d4   : > { %13972 = vst [vmem:[#allocation63_spill] sm:$0xff] %v11588_v24  ;;  %8420 = vpow2.f32 %v2851_v31 }
 0x7d5   : > { %4272 = vadd.xlane.f32.xlu2 %v4271_v50 }
 0x7d8   : > { %4678 = vmax.xlane.f32.xlu1 %v4677_v37  ;;  %v2857_v37 = vmul.f32 1.442695, %v2843_v22  ;;  %v3769_v22 = vsub.f32 %v11376_v46, %v11556_v39  ;;  %v5167_v39 = vsub.f32 %v11014_v17, %v11201_v10  ;;  %v4240_v17 = vsub.f32 %v10932_v28, %v11177_v16 }
 0x7d9   : > { %4699 = vmax.xlane.f32.xlu0 %v4698_v21  ;;  %v11622_v21 = vadd.f32 %v7923_v26, %v11411_v20  ;;  %v7930_v20 = vunpack.c.l.bf16 %v7974_v36 }
 0x7da   : > { %v11614_v50 = vpop.eup %8420  ;;  %8422 = vpow2.f32 %v2857_v37 }
 0x7db   : > { %v11606_v41 = vpop.f32.mrf.mxu1  ;;  %v2870_v23 = vsel %vm1933_vm5, %v11614_v50, 0.0  ;;  %v11640_v37 = vadd.f32 %v7930_v20, %v11436_v19  ;;  %v8562_v19 = vld [vmem:[%s13597_s20] sm:$0x1f] }
 0x7dc   : > { %13974 = vst [vmem:[#allocation57_spill] sm:$0xff] %v11606_v41  ;;  %v11653_v20 = vperm.slane %v8562_v19, 4 }
 0x7dd   : > { %3800 = vadd.xlane.f32.xlu2 %v3799_v49  ;;  %v13977_v49 = vld [vmem:[#allocation30_spill] sm:$0xff] }
 0x7de   : > { %13980 = vst [vmem:[#allocation99_spill] sm:$0xff] %v11653_v20 }
 0x7e0   : > { %4681 = vmax.xlane.f32.xlu1 %v4680_v9  ;;  %v4686_v9 = vsel %vm1933_vm5, %v11622_v21, -inf  ;;  %v11632_v62 = vpop.eup %8422 }
 0x7e1   : > { %v2879_v26 = vsel %vm1933_vm5, %v11632_v62, 0.0 }
 0x7e3   : > { %v11612_v33 = vpop.f32.mrf.mxu1 }
 0x7e4   : > { %13975 = vst [vmem:[#allocation56_spill] sm:$0xff] %v11612_v33 }
 0x7e6   : > { %v3750_v3 = vpop.xlane.xlu0 %3749 }
 0x7e7   : > { %v3770_v46 = vsub.f32 %v11413_v42, %v3750_v3 }
 0x7e8   : > { %2871 = vadd.xlane.f32.xlu1 %v2870_v23 }
 0x7eb   : > { %v11624_v31 = vpop.f32.mrf.mxu1 }
 0x7ec   : > { %13976 = vst [vmem:[#allocation16_spill] sm:$0xff] %v11624_v31  ;;  %v3777_v31 = vmul.f32 1.442695, %v3769_v22  ;;  %v4695_v22 = vsel %vm1933_vm5, %v11640_v37, -inf }
 0x7ed   : > { %8189 = vrot.lane.b32.xlu0 %v13977_v49, %s13776_s27 }
 0x7ee   : > { %8424 = vpow2.f32 %v3777_v31 }
 0x7f0   : > { %4687 = vmax.xlane.f32.xlu1 %v4686_v9 }
 0x7f3   : > { %v11630_v13 = vpop.f32.mrf.mxu1 }
 0x7f4   : > { %13978 = vst [vmem:[#allocation13_spill] sm:$0xff] %v11630_v13 }
 0x7f8   : > { %2880 = vadd.xlane.f32.xlu1 %v2879_v26  ;;  %v3779_v26 = vmul.f32 1.442695, %v3770_v46  ;;  %v3756_v10 = vpop.xlane.xlu1 %3755  ;;  %v4253_v46 = vmul.f32 1.442695, %v4240_v17 }
 0x7f9   : > { %v2663_v23 = vpop.permute.xlu0 %2662  ;;  %v3772_v28 = vsub.f32 %v11431_v38, %v3756_v10 }
 0x7fa   : > { %2681 = vst.msk [vmem:[#allocation2 + $0x30] sm:$0xff] %vm2674_vm11, %v2663_v23 }
 0x7fb   : > { %v11642_v9 = vpop.f32.mrf.mxu1 }
 0x7fc   : > { %13979 = vst [vmem:[#allocation12_spill] sm:$0xff] %v11642_v9  ;;  %v3762_v13 = vpop.xlane.xlu2 %3761 }
 0x7fd   : > { %v3774_v33 = vsub.f32 %v11438_v35, %v3762_v13  ;;  %v5175_v35 = vmul.f32 1.442695, %v5167_v39  ;;  %v11655_v13 = vpop.eup %8424 }
 0x7fe   : > { %v3793_v3 = vsel %vm1933_vm5, %v11655_v13, 0.0 }
 0x7ff   : > { %v3787_v36 = vmul.f32 1.442695, %v3774_v33 }
 0x800   : > { %4696 = vmax.xlane.f32.xlu1 %v4695_v22  ;;  %v3759_v22 = vpop.xlane.xlu1 %3758 }
 0x801   : > { %8426 = vpow2.f32 %v3787_v36  ;;  %v3773_v17 = vsub.f32 %v11450_v6, %v3759_v22 }
 0x802   : > { %8428 = vpow2.f32 %v3779_v26  ;;  %v3783_v26 = vmul.f32 1.442695, %v3772_v28  ;;  %v4241_v28 = vsub.f32 %v10971_v4, %v11194_v8 }
 0x803   : > { %v5775_v31 = vpop.f32.mrf.mxu1  ;;  %8430 = vpow2.f32 %v5175_v35  ;;  %v3785_v10 = vmul.f32 1.442695, %v3773_v17  ;;  %v7783_v17 = vld [vmem:[%s13595_s18 + $0x20] sm:$0xff] }
 0x804   : > { %v11658_v42 = vadd.f32 %v5775_v31, %v11653_v20  ;;  %8432 = vpow2.f32 %v4253_v46  ;;  %v3768_v35 = vpop.xlane.xlu2 %3767  ;;  %v4255_v6 = vmul.f32 1.442695, %v4241_v28  ;;  %7516 = vmatmul.msk.bf16.vlgmr.msrb.gmra.mxu3 %vm704_vm0, %v7783_v17  ;;  %v7784_v17 = vld [vmem:[%s13595_s18 + $0x28] sm:$0xff]  ;;  %v11760_v20 = vld [vmem:[%s13594_s17 + $0xf0] sm:$0xff]  }
 0x805   : > { %8434 = vpow2.f32 %v3783_v26  ;;  %v7942_v51 = vunpack.c.l.bf16 %v11760_v20 }
 0x806   : > { %13981 = vst [vmem:[#allocation23_spill] sm:$0xff] %v11658_v42  ;;  %8436 = vpow2.f32 %v3785_v10  ;;  %v8563_v42 = vld [vmem:[%s13594_s17 + $0xe0] sm:$0xff]  }
 0x807   : > { %v11662_v33 = vpop.eup %8426  ;;  %8438 = vpow2.f32 %v4255_v6  ;;  %v7935_v9 = vunpack.c.h.bf16 %v8563_v42 }
 0x808   : > { %13982 = vst [vmem:[#allocation14_spill] sm:$0xff] %v11662_v33  ;;  %3794 = vadd.xlane.f32.xlu1 %v3793_v3  ;;  %v3808_v23 = vsel %vm1933_vm5, %v11662_v33, 0.0  ;;  %v11668_v39 = vpop.eup %8428 }
 0x809   : > { %3809 = vadd.xlane.f32.xlu2 %v3808_v23  ;;  %v11670_v36 = vpop.eup %8430  ;;  %v3796_v16 = vsel %vm1933_vm5, %v11668_v39, 0.0 }
 0x80a   : > { %13983 = vst [vmem:[#allocation95_spill] sm:$0xff] %v11670_v36  ;;  %v5191_v19 = vsel %vm1933_vm5, %v11670_v36, 0.0  ;;  %v11677_v31 = vpop.eup %8432 }
 0x80b   : > { %v4274_v3 = vsel %vm1933_vm5, %v11677_v31, 0.0  ;;  %v11683_v23 = vpop.eup %8434 }
 0x80c   : > { %13984 = vst [vmem:[#allocation96_spill] sm:$0xff] %v11683_v23  ;;  %v11685_v46 = vpop.xlane.xlu2 %2865  ;;  %v11691_v22 = vpop.eup %8436 }
 0x80d   : > { %13985 = vst [vmem:[#allocation93_spill] sm:$0xff] %v11691_v22  ;;  %v3805_v4 = vsel %vm1933_vm5, %v11691_v22, 0.0  ;;  %vm2905_vm4 = vweird.f32 %v11685_v46 }
 0x810   : > { %3797 = vadd.xlane.f32.xlu1 %v3796_v16  ;;  %v3802_v16 = vsel %vm1933_vm5, %v11683_v23, 0.0 }
 0x811   : > { %5192 = vadd.xlane.f32.xlu2 %v5191_v19  ;;  %v4242_v19 = vsub.f32 %v11009_v14, %v11221_v32  ;;  %v11709_v14 = vpop.eup %8438  ;;  %v3776_v32 = vsub.f32 %v11457_v12, %v3768_v35 }
 0x812   : > { %13987 = vst [vmem:[#allocation91_spill] sm:$0xff] %v11709_v14  ;;  %v4277_v10 = vsel %vm1933_vm5, %v11709_v14, 0.0 }
 0x813   : > { %v4257_v8 = vmul.f32 1.442695, %v4242_v19  ;;  %v3791_v6 = vmul.f32 1.442695, %v3776_v32 }
 0x814   : > { %7517 = vmatmul.msk.bf16.gmra.mxu3 %vm704_vm0, %v7784_v17 }
 0x815   : > { %8440 = vpow2.f32 %v4257_v8 }
 0x816   : > { %8442 = vpow2.f32 %v3791_v6 }
 0x817   : > { %4275 = vadd.xlane.f32.xlu0 %v4274_v3  ;;  %v11700_v3 = vpop.xlane.xlu2 %2874  ;;  %8444 = vrcp.f32 %v11685_v46 }
 0x818   : > { %v2665_v38 = vpop.permute.xlu1 %2664  ;;  %8446 = vrcp.f32 %v11394_v30 }
 0x819   : > { %2682 = vst.msk [vmem:[#allocation2 + $0x38] sm:$0xff] %vm2674_vm11, %v2665_v38  ;;  %v13986_v38 = vld [vmem:[#allocation28_spill] sm:$0xff]  ;;  %8448 = vrcp.f32 %v11405_v57 }
 0x81b   : > { %v11718_v19 = vpop.eup %8440 }
 0x81c   : > { %13988 = vst [vmem:[#allocation90_spill] sm:$0xff] %v11718_v19  ;;  %v11730_v8 = vpop.eup %8442 }
 0x81d   : > { %13989 = vst [vmem:[#allocation83_spill] sm:$0xff] %v11730_v8 }
 0x81f   : > { %3803 = vadd.xlane.f32.xlu0 %v3802_v16  ;;  %v11716_v16 = vpop.xlane.xlu2 %4693 }
 0x824   : > { %v11695_v26 = vpop.xlane.xlu0 %3764 }
 0x827   : > { %3806 = vadd.xlane.f32.xlu0 %v3805_v4  ;;  %v4280_v4 = vsel %vm1933_vm5, %v11718_v19, 0.0 }
 0x828   : > { %v11726_v12 = vpop.xlane.xlu2 %2883 }
 0x829   : > { %8199 = vrot.lane.b32.xlu2 %v13986_v38, %s13812_s28  ;;  %8184 = vrot.lane.b32.xlu1 %v13977_v49, %s13798_s24  ;;  %v3814_v38 = vsel %vm1933_vm5, %v11730_v8, 0.0  ;;  %s8639_s24 = smov 24  }
 0x82c   : > { %v11714_v28 = vpop.xlane.xlu0 %2868 }
 0x82f   : > { %4278 = vadd.xlane.f32.xlu0 %v4277_v10  ;;  %v11739_v10 = vpop.eup %8444 }
 0x830   : > { %v11737_v32 = vpop.xlane.xlu2 %4266  ;;  %v11753_v24 = vpop.eup %8446  ;;  %v2901_v59 = vmul.f32 %v11739_v10, %v11685_v46  ;;  %vm2906_vm3 = vweird.f32 %v11739_v10 }
 0x831   : > { %v11755_v41 = vpop.eup %8448  ;;  %v4284_v18 = vmul.f32 %v11753_v24, %v11394_v30  ;;  %vm4289_vm15 = vweird.f32 %v11753_v24  ;;  %vm11841_vm6 = vmor %vm2905_vm4, %vm2906_vm3  ;;  %vm2950_vm4 = vweird.f32 %v11700_v3 }
 0x832   : > { %v4299_v36 = vmul.f32 %v11755_v41, %v11405_v57  ;;  %vm4304_vm8 = vweird.f32 %v11755_v41  ;;  %vm11868_vm10 = vmor %vm4288_vm14, %vm4289_vm15  ;;  %vm2920_vm14 = vweird.f32 %v11714_v28 }
 0x833   : > { %v4285_v33 = vsub.f32 1.0, %v4284_v18  ;;  %vm11878_vm11 = vmor %vm4303_vm13, %vm4304_vm8 }
 0x834   : > { %v11728_v35 = vpop.xlane.xlu0 %4684 }
 0x837   : > { %4281 = vadd.xlane.f32.xlu0 %v4280_v4  ;;  %v7785_v4 = vld [vmem:[%s13595_s18 + $0x30] sm:$0xff] }
 0x838   : > { %7518 = vmatmul.msk.bf16.gmra.mxu3 %vm704_vm0, %v7785_v4  ;;  %v13994_v4 = vld [vmem:[#allocation69_spill] sm:$0xff]  ;;  %v11798_v52 = vpop.xlane.xlu2 %4269 }
 0x83c   : > { %v11741_v6 = vpop.xlane.xlu0 %4690 }
 0x83d   : > { %13990 = vst [vmem:[#allocation70_spill] sm:$0xff] %v11741_v6 }
 0x83f   : > { %3815 = vadd.xlane.f32.xlu0 %v3814_v38  ;;  %v7939_v38 = vunpack.c.h.bf16 %v11542_v63  ;;  %v11767_v63 = vadd.f32 %v7935_v9, %v11027_v34  ;;  %v2902_v9 = vsub.f32 1.0, %v2901_v59  ;;  %v11796_v34 = vadd.f32 %v7942_v51, %v11058_v5 }
 0x840   : > { %v4294_v51 = vand.u32 2147483648, %v11394_v30 }
 0x841   : > { %13991 = vst [vmem:[#allocation78_spill] sm:$0xff] %v11767_v63  ;;  %v11770_v42 = vadd.f32 %v7939_v38, %v11045_v27  ;;  %v13995_v27 = vld [vmem:[#allocation71_spill] sm:$0xff]  ;;  %v5146_v6 = vsel %vm1933_vm5, %v11767_v63, -inf  ;;  %v4300_v38 = vsub.f32 1.0, %v4299_v36  ;;  %v2903_v55 = vmul.f32 %v11739_v10, %v2902_v9 }
 0x842   : > { %v3775_v36 = vsub.f32 %v11498_v7, %v11695_v26  ;;  %v7786_v26 = vld [vmem:[%s13595_s18 + $0x38] sm:$0xff] }
 0x843   : > { %v11743_v17 = vpop.xlane.xlu1 %2862  ;;  %13992 = vst [vmem:[#allocation100_spill] sm:$0xff] %v11770_v42  ;;  %v11793_v59 = vsel %vm1933_vm5, %v11770_v42, -inf  ;;  %v2904_v49 = vadd.f32 %v11739_v10, %v2903_v55 }
 0x844   : > { %8450 = vrcp.f32 %v11743_v17  ;;  %v11800_v53 = vpop.xlane.xlu0 %2877  ;;  %v2894_v5 = vand.u32 2147483647, %v11743_v17  ;;  %vm2890_vm9 = vweird.f32 %v11743_v17 }
 0x845   : > { %8452 = vrcp.f32 %v11714_v28 }
 0x846   : > { %8454 = vrcp.f32 %v11700_v3  ;;  %vm2895_vm2 = vcmp.eq.f32.partialorder %v2894_v5, 8.507059e+37 }
 0x848   : > { %7519 = vmatmul.msk.bf16.gmra.mxu3 %vm704_vm0, %v7786_v26  ;;  %v14004_v26 = vunpack.i.h.bf16 %v13995_v27 }
 0x84a   : > { %v8451_v8 = vpop.eup %8450 }
 0x84b   : > { %v2886_v19 = vmul.f32 %v8451_v8, %v11743_v17  ;;  %v4679_v22 = vpop.xlane.xlu1 %4678  ;;  %v11785_v14 = vpop.eup %8452  ;;  %vm2891_vm7 = vweird.f32 %v8451_v8 }
 0x84c   : > { %v4701_v60 = vsub.f32 %v11586_v43, %v4679_v22  ;;  %v2896_v43 = vand.u32 2147483648, %v11743_v17  ;;  %v2916_v42 = vmul.f32 %v11785_v14, %v11714_v28  ;;  %vm2892_vm1 = vmor %vm2890_vm9, %vm2891_vm7  ;;  %v11825_v17 = vpop.eup %8454  ;;  %vm2921_vm7 = vweird.f32 %v11785_v14 }
 0x84d   : > { %v2887_v23 = vsub.f32 1.0, %v2886_v19  ;;  %vm11918_vm9 = vmor %vm2920_vm14, %vm2921_vm7 }
 0x84e   : > { %v4709_v22 = vmul.f32 1.442695, %v4701_v60  ;;  %v4286_v60 = vmul.f32 %v11753_v24, %v4285_v33  ;;  %v2897_v9 = vor.u32 1.1754944e-38, %v2896_v43  ;;  %v2917_v18 = vsub.f32 1.0, %v2916_v42  ;;  %v13996_v33 = vld [vmem:[#allocation42_spill] sm:$0xff] }
 0x84f   : > { %v2888_v63 = vmul.f32 %v8451_v8, %v2887_v23  ;;  %v4301_v23 = vmul.f32 %v11755_v41, %v4300_v38  ;;  %v2911_v42 = vand.u32 2147483648, %v11685_v46  ;;  %v3789_v38 = vmul.f32 1.442695, %v3775_v36 }
 0x850   : > { %8456 = vpow2.f32 %v4709_v22  ;;  %v2909_v43 = vand.u32 2147483647, %v11685_v46 }
 0x851   : > { %v2889_v19 = vadd.f32 %v8451_v8, %v2888_v63  ;;  %8458 = vrcp.f32 %v11737_v32  ;;  %v4302_v36 = vadd.f32 %v11755_v41, %v4301_v23 }
 0x852   : > { %vm2910_vm12 = vcmp.eq.f32.partialorder %v2909_v43, 8.507059e+37 }
 0x853   : > { %v2893_v22 = vsel %vm2892_vm1, %v8451_v8, %v2889_v19  ;;  %8194 = vrot.lane.b32.xlu0 %v13996_v33, %s13812_s28  ;;  %5147 = vmax.xlane.f32.xlu1 %v5146_v6  ;;  %v4682_v7 = vpop.xlane.xlu1 %4681  ;;  %v4706_v8 = vsub.f32 %v11482_v11, %v11716_v16  ;;  %v4287_v19 = vadd.f32 %v11753_v24, %v4286_v60  ;;  %v11845_v11 = vpop.xlane.xlu2 %5150  ;;  %v4295_v33 = vor.u32 1.1754944e-38, %v4294_v51 }
 0x854   : > { %v4702_v55 = vsub.f32 %v11604_v54, %v4682_v7  ;;  %v2898_v63 = vsel %vm2895_vm2, %v2897_v9, %v2893_v22  ;;  %v4309_v54 = vand.u32 2147483648, %v11405_v57  ;;  %v2908_v16 = vsel %vm11841_vm6, %v11739_v10, %v2904_v49 }
 0x855   : > { %v3005_v6 = vmul.f32 %v11566_v45, %v2898_v63  ;;  %v11847_v45 = vpop.xlane.xlu0 %4699  ;;  %v2918_v60 = vmul.f32 %v11785_v14, %v2917_v18  ;;  %v2946_v7 = vmul.f32 %v11825_v17, %v11700_v3  ;;  %v2912_v63 = vor.u32 1.1754944e-38, %v2911_v42 }
 0x856   : > { %v11834_v5 = vpop.eup %8456  ;;  %v4711_v9 = vmul.f32 1.442695, %v4702_v55  ;;  %v13999_v55 = vunpack.i.l.bf16 %v13995_v27  ;;  %v4719_v10 = vmul.f32 1.442695, %v4706_v8  ;;  %v4291_v18 = vsel %vm11868_vm10, %v11753_v24, %v4287_v19 }
 0x857   : > { %7194 = vmatmul.msk.f32.vlgmr.msrb.gmra.mxu2 %vm1933_vm5, %v3005_v6  ;;  %v4725_v46 = vsel %vm1933_vm5, %v11834_v5, 0.0  ;;  %v11862_v6 = vpop.eup %8458  ;;  %v4310_v23 = vor.u32 1.1754944e-38, %v4309_v54  ;;  %v2913_v42 = vsel %vm2910_vm12, %v2912_v63, %v2908_v16  ;;  %v2919_v24 = vadd.f32 %v11785_v14, %v2918_v60 }
 0x858   : > { %8460 = vpow2.f32 %v4711_v9  ;;  %4937 = vmatpush.msrb.mxu2 %v13999_v55  ;;  %4726 = vadd.xlane.f32.xlu2 %v4725_v46  ;;  %v4307_v9 = vand.u32 2147483647, %v11405_v57  ;;  %v2947_v43 = vsub.f32 1.0, %v2946_v7  ;;  %v4314_v27 = vmul.f32 %v11862_v6, %v11737_v32  ;;  %v11909_v46 = vld [vmem:[%s13594_s17 + $0xf8] sm:$0xff]  }
 0x859   : > { %8462 = vpow2.f32 %v3789_v38  ;;  %v4306_v38 = vsel %vm11878_vm11, %v11755_v41, %v4302_v36  ;;  %v14005_v57 = vunpack.i.l.bf16 %v13993_v47  ;;  %v3006_v19 = vmul.f32 %v11466_v25, %v2913_v42 }
 0x85a   : > { %4938 = vmatpush.msrb.mxu2 %v14004_v26  ;;  %8464 = vrcp.f32 %v11798_v52  ;;  %v2924_v54 = vand.u32 2147483647, %v11714_v28  ;;  %v7943_v41 = vunpack.c.h.bf16 %v11760_v20  ;;  %v14006_v16 = vand.u32 2147483647, %v11394_v30 }
 0x85b   : > { %5153 = vmax.xlane.f32.xlu1 %v11793_v59  ;;  %v11887_v8 = vpop.xlane.xlu1 %2871  ;;  %v2926_v59 = vand.u32 2147483648, %v11714_v28  ;;  %v14007_v25 = vunpack.i.h.bf16 %v13993_v47  ;;  %vm4308_vm1 = vcmp.eq.f32.partialorder %v4307_v9, 8.507059e+37  ;;  %v2923_v47 = vsel %vm11918_vm9, %v11785_v14, %v2919_v24  ;;  %v11936_v26 = vpop.xlane.xlu2 %4272 }
 0x85c   : > { %4939 = vmatpush.msrb.mxu2 %v14005_v57  ;;  %8466 = vrcp.f32 %v11887_v8  ;;  %vm4293_vm15 = vcmp.eq.f32.partialorder %v14006_v16, 8.507059e+37  ;;  %v4311_v7 = vsel %vm4308_vm1, %v4310_v23, %v4306_v38  ;;  %v4315_v55 = vsub.f32 1.0, %v4314_v27 }
 0x85d   : > { %8468 = vpow2.f32 %v4719_v10  ;;  %v4296_v60 = vsel %vm4293_vm15, %v4295_v33, %v4291_v18  ;;  %v14010_v49 = vunpack.i.l.bf16 %v13994_v4  ;;  %v2927_v10 = vor.u32 1.1754944e-38, %v2926_v59 }
 0x85e   : > { %v11903_v22 = vpop.eup %8460  ;;  %8470 = vrcp.f32 %v11800_v53  ;;  %4940 = vmatpush.msrb.mxu2 %v14007_v25  ;;  %v2948_v33 = vmul.f32 %v11825_v17, %v2947_v43  ;;  %v7946_v51 = vunpack.c.l.bf16 %v11909_v46  ;;  %vm2925_vm3 = vcmp.eq.f32.partialorder %v2924_v54, 8.507059e+37  ;;  %v14013_v25 = vld [vmem:[#allocation39_spill] sm:$0xff] }
 0x85f   : > { %v11922_v20 = vpop.eup %8462  ;;  %v8190_v36 = vpop.permute.xlu0 %8189  ;;  %7195 = vmatmul.msk.f32.gmra.mxu2 %vm1933_vm5, %v3006_v19  ;;  %v4728_v30 = vsel %vm1933_vm5, %v11903_v22, 0.0  ;;  %v5155_v14 = vsel %vm1933_vm5, %v11796_v34, -inf  ;;  %v2954_v23 = vand.u32 2147483647, %v11700_v3  ;;  %v14011_v24 = vunpack.i.h.bf16 %v13994_v4  ;;  %v14012_v19 = vld [vmem:[#allocation80_spill] sm:$0xff] }
 0x860   : > { %v8191_v63 = vunpack.i.l.bf16 %v8190_v36  ;;  %4941 = vmatpush.msrb.mxu2 %v14010_v49  ;;  %4729 = vadd.xlane.f32.xlu2 %v4728_v30  ;;  %v11933_v18 = vpop.eup %8464  ;;  %v8192_v9 = vunpack.i.h.bf16 %v8190_v36  ;;  %v3811_v38 = vsel %vm1933_vm5, %v11922_v20, 0.0  ;;  %v2928_v43 = vsel %vm2925_vm3, %v2927_v10, %v2923_v47  ;;  %v7799_v36 = vld [vmem:[%s13595_s18 + $0xa0] sm:$0xff] }
 0x861   : > { %v2956_v27 = vand.u32 2147483648, %v11700_v3  ;;  %v11951_v59 = vadd.f32 %v7943_v41, %v11071_v44  ;;  %v4403_v54 = vmul.f32 %v14012_v19, %v4296_v60  ;;  %v4404_v28 = vmul.f32 %v14013_v25, %v4311_v7  ;;  %7628 = vmatmul.msk.bf16.vlgmr.msra.gmra.mxu3 %vm704_vm0, %v7799_v36 }
 0x862   : > { %v11941_v42 = vpop.eup %8466  ;;  %4942 = vmatpush.msrb.mxu2 %v14011_v24  ;;  %4479 = vmatpush.msra.mxu0 %v8191_v63  ;;  %v4316_v47 = vmul.f32 %v11862_v6, %v4315_v55  ;;  %8472 = vrcp.f32 %v11936_v26  ;;  %v14014_v44 = vunpack.i.l.bf16 %v10694_v58  ;;  %v2949_v41 = vadd.f32 %v11825_v17, %v2948_v33 }
 0x863   : > { %v11948_v57 = vpop.eup %8468  ;;  %v2931_v16 = vmul.f32 %v11941_v42, %v11887_v8  ;;  %3812 = vadd.xlane.f32.xlu1 %v3811_v38  ;;  %v11956_v4 = vpop.xlane.xlu1 %4687  ;;  %vm2951_vm2 = vweird.f32 %v11825_v17  ;;  %v4329_v60 = vmul.f32 %v11933_v18, %v11798_v52  ;;  %v3007_v63 = vmul.f32 %v11511_v1, %v2928_v43 }
 0x864   : > { %v11962_v30 = vpop.eup %8470  ;;  %4943 = vmatpush.msrb.mxu2 %v14014_v44  ;;  %4480 = vmatpush.msra.mxu0 %v8192_v9  ;;  %v14015_v55 = vunpack.i.h.bf16 %v10694_v58  ;;  %v4740_v49 = vsel %vm1933_vm5, %v11948_v57, 0.0  ;;  %v2941_v10 = vand.u32 2147483648, %v11887_v8  ;;  %vm11980_vm8 = vcmp.eq.f32.partialorder %v2954_v23, 8.507059e+37  ;;  %vm11992_vm10 = vmor %vm2950_vm4, %vm2951_vm2 }
 0x865   : > { %v2932_v7 = vsub.f32 1.0, %v2931_v16  ;;  %7296 = vmatmul.msk.f32.vlgmr.msra.gmra.mxu0 %vm1933_vm5, %v4403_v54  ;;  %v2957_v9 = vor.u32 1.1754944e-38, %v2956_v27  ;;  %v2961_v24 = vmul.f32 %v11962_v30, %v11800_v53  ;;  %vm2936_vm6 = vweird.f32 %v11941_v42 }
 0x866   : > { %4944 = vmatpush.msrb.mxu2 %v14015_v55  ;;  %v2939_v58 = vand.u32 2147483647, %v11887_v8  ;;  %vm4319_vm13 = vweird.f32 %v11862_v6  ;;  %v4324_v23 = vand.u32 2147483648, %v11737_v32  ;;  %v4317_v38 = vadd.f32 %v11862_v6, %v4316_v47 }
 0x867   : > { %7196 = vmatmul.msk.f32.gmra.mxu2 %vm1933_vm5, %v3007_v63  ;;  %v2933_v1 = vmul.f32 %v11941_v42, %v2932_v7  ;;  %v2953_v43 = vsel %vm11992_vm10, %v11825_v17, %v2949_v41  ;;  %v4703_v27 = vsub.f32 %v11526_v2, %v11728_v35  ;;  %v4330_v19 = vsub.f32 1.0, %v4329_v60 }
 0x868   : > { %4741 = vadd.xlane.f32.xlu2 %v4740_v49  ;;  %vm2935_vm12 = vweird.f32 %v11887_v8  ;;  %v12007_v16 = vpop.eup %8472  ;;  %8474 = vrcp.f32 %v11726_v12  ;;  %vm4318_vm11 = vweird.f32 %v11737_v32  ;;  %v2942_v25 = vor.u32 1.1754944e-38, %v2941_v10  ;;  %v14022_v10 = vld [vmem:[#allocation47_spill] sm:$0xff] }
 0x869   : > { %v2934_v54 = vadd.f32 %v11941_v42, %v2933_v1  ;;  %vm2937_vm7 = vmor %vm2935_vm12, %vm2936_vm6  ;;  %v4322_v17 = vand.u32 2147483647, %v11737_v32  ;;  %v2962_v35 = vsub.f32 1.0, %v2961_v24  ;;  %vm2940_vm15 = vcmp.eq.f32.partialorder %v2939_v58, 8.507059e+37 }
 0x86a   : > { %vm12016_vm14 = vmor %vm4318_vm11, %vm4319_vm13  ;;  %v2958_v47 = vsel %vm11980_vm8, %v2957_v9, %v2953_v43  ;;  %v4325_v44 = vor.u32 1.1754944e-38, %v4324_v23  ;;  %v4713_v60 = vmul.f32 1.442695, %v4703_v27  ;;  %v4331_v7 = vmul.f32 %v11933_v18, %v4330_v19 }
 0x86b   : > { %5156 = vmax.xlane.f32.xlu1 %v5155_v14  ;;  %v12020_v8 = vpop.xlane.xlu1 %2880  ;;  %v2938_v36 = vsel %vm2937_vm7, %v11941_v42, %v2934_v54  ;;  %v4321_v41 = vsel %vm12016_vm14, %v11862_v6, %v4317_v38  ;;  %v4344_v14 = vmul.f32 %v12007_v16, %v11936_v26  ;;  %vm4323_vm9 = vcmp.eq.f32.partialorder %v4322_v17, 8.507059e+37 }
 0x86c   : > { %8476 = vrcp.f32 %v12020_v8  ;;  %v2943_v32 = vsel %vm2940_vm15, %v2942_v25, %v2938_v36  ;;  %v4326_v63 = vsel %vm4323_vm9, %v4325_v44, %v4321_v41  ;;  %v2963_v55 = vmul.f32 %v11962_v30, %v2962_v35 }
 0x86d   : > { %7297 = vmatmul.msk.f32.gmra.mxu0 %vm1933_vm5, %v4404_v28  ;;  %v3008_v42 = vmul.f32 %v11614_v50, %v2943_v32  ;;  %v12041_v6 = vadd.f32 %v7946_v51, %v14022_v10  ;;  %v7947_v33 = vunpack.c.h.bf16 %v11909_v46  ;;  %v5158_v28 = vsel %vm1933_vm5, %v11951_v59, -inf }
 0x86e   : > { %v12036_v49 = vpop.eup %8474  ;;  %v3009_v50 = vmul.f32 %v11472_v61, %v2958_v47  ;;  %8478 = vpow2.f32 %v4713_v60  ;;  %vm4334_vm1 = vweird.f32 %v11933_v18  ;;  %v4345_v9 = vsub.f32 1.0, %v4344_v14 }
 0x86f   : > { %7197 = vmatmul.msk.f32.gmra.mxu2 %vm1933_vm5, %v3008_v42  ;;  %v4332_v24 = vadd.f32 %v11933_v18, %v4331_v7  ;;  %vm4333_vm3 = vweird.f32 %v11798_v52  ;;  %v4339_v51 = vand.u32 2147483648, %v11798_v52  ;;  %v4405_v58 = vmul.f32 %v11521_v29, %v4326_v63  ;;  %v12143_v29 = vpop.xlane.xlu2 %3800 }
 0x870   : > { %v4337_v3 = vand.u32 2147483647, %v11798_v52  ;;  %v4704_v23 = vsub.f32 %v11622_v21, %v11956_v4  ;;  %v2964_v43 = vadd.f32 %v11962_v30, %v2963_v55  ;;  %vm2966_vm2 = vweird.f32 %v11962_v30  ;;  %vm12065_vm4 = vmor %vm4333_vm3, %vm4334_vm1 }
 0x871   : > { %v2991_v27 = vmul.f32 %v12036_v49, %v11726_v12  ;;  %vm2965_vm8 = vweird.f32 %v11800_v53  ;;  %v2971_v21 = vand.u32 2147483648, %v11800_v53  ;;  %v4346_v4 = vmul.f32 %v12007_v16, %v4345_v9 }
 0x872   : > { %v12049_v1 = vpop.eup %8476  ;;  %v4336_v54 = vsel %vm12065_vm4, %v11933_v18, %v4332_v24  ;;  %v2969_v25 = vand.u32 2147483647, %v11800_v53  ;;  %v4340_v17 = vor.u32 1.1754944e-38, %v4339_v51  ;;  %v4708_v2 = vsub.f32 %v11591_v15, %v11847_v45  ;;  %vm12084_vm6 = vmor %vm2965_vm8, %vm2966_vm2  ;;  %v7800_v18 = vld [vmem:[%s13595_s18 + $0xa8] sm:$0xff] }
 0x873   : > { %v2976_v61 = vmul.f32 %v12049_v1, %v12020_v8  ;;  %5159 = vmax.xlane.f32.xlu1 %v5158_v28  ;;  %v4697_v38 = vpop.xlane.xlu1 %4696  ;;  %v5161_v35 = vsel %vm1933_vm5, %v12041_v6, -inf  ;;  %v4715_v53 = vmul.f32 1.442695, %v4704_v23  ;;  %vm4338_vm10 = vcmp.eq.f32.partialorder %v4337_v3, 8.507059e+37  ;;  %7629 = vmatmul.msk.bf16.gmra.mxu3 %vm704_vm0, %v7800_v18 }
 0x874   : > { %v4707_v52 = vsub.f32 %v11640_v37, %v4697_v38  ;;  %v12091_v47 = vpop.eup %8478  ;;  %v2968_v15 = vsel %vm12084_vm6, %v11962_v30, %v2964_v43  ;;  %v2992_v45 = vsub.f32 1.0, %v2991_v27  ;;  %v4341_v32 = vsel %vm4338_vm10, %v4340_v17, %v4336_v54 }
 0x875   : > { %v2977_v19 = vsub.f32 1.0, %v2976_v61  ;;  %7298 = vmatmul.msk.f32.gmra.mxu0 %vm1933_vm5, %v4405_v58  ;;  %v2972_v41 = vor.u32 1.1754944e-38, %v2971_v21  ;;  %vm4348_vm13 = vweird.f32 %v11936_v26  ;;  %vm4349_vm12 = vweird.f32 %v12007_v16  ;;  %v14029_v58 = vld [vmem:[#allocation48_spill] sm:$0xff] }
 0x876   : > { %v4721_v37 = vmul.f32 1.442695, %v4707_v52  ;;  %vm2970_vm11 = vcmp.eq.f32.partialorder %v2969_v25, 8.507059e+37  ;;  %v4347_v60 = vadd.f32 %v12007_v16, %v4346_v4  ;;  %v4354_v7 = vand.u32 2147483648, %v11936_v26  ;;  %vm12109_vm14 = vmor %vm4348_vm13, %vm4349_vm12 }
 0x877   : > { %v2978_v44 = vmul.f32 %v12049_v1, %v2977_v19  ;;  %7198 = vmatmul.msk.f32.gmra.mxu2 %vm1933_vm5, %v3009_v50  ;;  %v4723_v14 = vmul.f32 1.442695, %v4708_v2  ;;  %v2973_v42 = vsel %vm2970_vm11, %v2972_v41, %v2968_v15  ;;  %v4352_v63 = vand.u32 2147483647, %v11936_v26 }
 0x878   : > { %8480 = vpow2.f32 %v4721_v37  ;;  %vm2981_vm7 = vweird.f32 %v12049_v1  ;;  %v4406_v55 = vmul.f32 %v11537_v56, %v4341_v32  ;;  %v2986_v50 = vand.u32 2147483648, %v12020_v8 }
 0x879   : > { %8482 = vpow2.f32 %v4715_v53  ;;  %v2979_v10 = vadd.f32 %v12049_v1, %v2978_v44  ;;  %v4731_v26 = vsel %vm1933_vm5, %v12091_v47, 0.0  ;;  %vm2980_vm15 = vweird.f32 %v12020_v8 }
 0x87a   : > { %v3010_v56 = vmul.f32 %v11573_v40, %v2973_v42  ;;  %v4351_v9 = vsel %vm12109_vm14, %v12007_v16, %v4347_v60  ;;  %v2984_v24 = vand.u32 2147483647, %v12020_v8  ;;  %v12129_v3 = vadd.f32 %v7947_v33, %v14029_v58  ;;  %vm2982_vm9 = vmor %vm2980_vm15, %vm2981_vm7 }
 0x87b   : > { %5162 = vmax.xlane.f32.xlu1 %v5161_v35  ;;  %v12105_v30 = vpop.xlane.xlu1 %3794  ;;  %v4355_v23 = vor.u32 1.1754944e-38, %v4354_v7  ;;  %v2993_v40 = vmul.f32 %v12036_v49, %v2992_v45  ;;  %vm4353_vm1 = vcmp.eq.f32.partialorder %v4352_v63, 8.507059e+37  ;;  %v2983_v8 = vsel %vm2982_vm9, %v12049_v1, %v2979_v10 }
 0x87c   : > { %8484 = vrcp.f32 %v12105_v30  ;;  %v2987_v61 = vor.u32 1.1754944e-38, %v2986_v50  ;;  %vm2985_vm3 = vcmp.eq.f32.partialorder %v2984_v24, 8.507059e+37  ;;  %v5164_v43 = vsel %vm1933_vm5, %v12129_v3, -inf }
 0x87d   : > { %4732 = vadd.xlane.f32.xlu0 %v4731_v26  ;;  %7299 = vmatmul.msk.f32.gmra.mxu0 %vm1933_vm5, %v4406_v55  ;;  %8486 = vpow2.f32 %v4723_v14  ;;  %v4356_v46 = vsel %vm4353_vm1, %v4355_v23, %v4351_v9  ;;  %vm2996_vm2 = vweird.f32 %v12036_v49  ;;  %v2994_v4 = vadd.f32 %v12036_v49, %v2993_v40 }
 0x87e   : > { %v12124_v51 = vpop.eup %8480  ;;  %v2988_v27 = vsel %vm2985_vm3, %v2987_v61, %v2983_v8  ;;  %v4407_v1 = vmul.f32 %v11583_v0, %v4356_v46  ;;  %v3001_v54 = vand.u32 2147483648, %v11726_v12  ;;  %vm2995_vm4 = vweird.f32 %v11726_v12 }
 0x87f   : > { %7199 = vmatmul.msk.f32.gmra.mxu2 %vm1933_vm5, %v3010_v56  ;;  %v4743_v16 = vsel %vm1933_vm5, %v12124_v51, 0.0  ;;  %v12138_v33 = vpop.eup %8482  ;;  %v3011_v2 = vmul.f32 %v11632_v62, %v2988_v27  ;;  %v2999_v0 = vand.u32 2147483647, %v11726_v12  ;;  %vm2997_vm8 = vmor %vm2995_vm4, %vm2996_vm2  ;;  %v7801_v62 = vld [vmem:[%s13595_s18 + $0xb0] sm:$0xff]  ;;  %vm3822_vm13 = vweird.f32 %v12105_v30 }
 0x880   : > { %4744 = vadd.xlane.f32.xlu2 %v4743_v16  ;;  %v4734_v25 = vsel %vm1933_vm5, %v12138_v33, 0.0  ;;  %v2998_v36 = vsel %vm2997_vm8, %v12036_v49, %v2994_v4  ;;  %v3002_v18 = vor.u32 1.1754944e-38, %v3001_v54  ;;  %v3828_v49 = vand.u32 2147483648, %v12105_v30 }
 0x881   : > { %vm3000_vm6 = vcmp.eq.f32.partialorder %v2999_v0, 8.507059e+37  ;;  %v3826_v41 = vand.u32 2147483647, %v12105_v30 }
 0x882   : > { %v8485_v38 = vpop.eup %8484  ;;  %v3003_v44 = vsel %vm3000_vm6, %v3002_v18, %v2998_v36  ;;  %v3829_v55 = vor.u32 1.1754944e-38, %v3828_v49  ;;  %vm3852_vm6 = vweird.f32 %v12143_v29 }
 0x883   : > { %v3818_v52 = vmul.f32 %v8485_v38, %v12105_v30  ;;  %5165 = vmax.xlane.f32.xlu1 %v5164_v43  ;;  %v12146_v21 = vpop.xlane.xlu1 %3797  ;;  %v12150_v19 = vpop.eup %8486  ;;  %7630 = vmatmul.msk.bf16.gmra.mxu3 %vm704_vm0, %v7801_v62  ;;  %vm3823_vm10 = vweird.f32 %v8485_v38  ;;  %v3012_v7 = vmul.f32 %v11502_v48, %v3003_v44  ;;  %vm3827_vm11 = vcmp.eq.f32.partialorder %v3826_v41, 8.507059e+37 }
 0x884   : > { %8488 = vrcp.f32 %v12146_v21  ;;  %v4746_v35 = vsel %vm1933_vm5, %v12150_v19, 0.0  ;;  %vm3824_vm12 = vmor %vm3822_vm13, %vm3823_vm10  ;;  %v3843_v30 = vand.u32 2147483648, %v12146_v21  ;;  %vm3837_vm14 = vweird.f32 %v12146_v21  ;;  %v12229_v41 = vpop.f32.mrf.mxu3 }
 0x885   : > { %v3819_v17 = vsub.f32 1.0, %v3818_v52  ;;  %7300 = vmatmul.msk.f32.gmra.mxu0 %vm1933_vm5, %v4407_v1  ;;  %4735 = vadd.xlane.f32.xlu0 %v4734_v25  ;;  %8490 = vrcp.f32 %v12143_v29  ;;  %v3841_v58 = vand.u32 2147483647, %v12146_v21  ;;  %v14034_v52 = vld [vmem:[#allocation31_spill] sm:$0xff]  ;;  %v3856_v62 = vand.u32 2147483647, %v12143_v29 }
 0x886   : > { %14038 = vst [vmem:[#allocation101_spill] sm:$0xff] %v12229_v41 }
 0x887   : > { %v3820_v37 = vmul.f32 %v8485_v38, %v3819_v17  ;;  %7200 = vmatmul.msk.f32.gmra.mxu2 %vm1933_vm5, %v3011_v2  ;;  %vm3842_vm2 = vcmp.eq.f32.partialorder %v3841_v58, 8.507059e+37  ;;  %v12209_v2 = vpop.xlane.xlu2 %3809  ;;  %vm3857_vm13 = vcmp.eq.f32.partialorder %v3856_v62, 8.507059e+37 }
 0x888   : > { %4747 = vadd.xlane.f32.xlu2 %v4746_v35 }
 0x889   : > { %v3821_v15 = vadd.f32 %v8485_v38, %v3820_v37  ;;  %v3858_v37 = vand.u32 2147483648, %v12143_v29 }
 0x88a   : > { %v8489_v12 = vpop.eup %8488  ;;  %v4276_v53 = vpop.xlane.xlu0 %4275 }
 0x88b   : > { %v3833_v45 = vmul.f32 %v8489_v12, %v12146_v21  ;;  %8492 = vrcp.f32 %v4276_v53  ;;  %v12172_v32 = vpop.eup %8490  ;;  %v3825_v42 = vsel %vm3824_vm12, %v8485_v38, %v3821_v15  ;;  %vm3838_vm7 = vweird.f32 %v8489_v12 }
 0x88c   : > { %v3848_v14 = vmul.f32 %v12172_v32, %v12143_v29  ;;  %v3830_v28 = vsel %vm3827_vm11, %v3829_v55, %v3825_v42  ;;  %vm12188_vm15 = vmor %vm3837_vm14, %vm3838_vm7  ;;  %v4369_v16 = vand.u32 2147483648, %v4276_v53  ;;  %v4367_v61 = vand.u32 2147483647, %v4276_v53 }
 0x88d   : > { %v3834_v60 = vsub.f32 1.0, %v3833_v45  ;;  %v3937_v24 = vmul.f32 %v11655_v13, %v3830_v28  ;;  %v3844_v13 = vor.u32 1.1754944e-38, %v3843_v30  ;;  %vm4363_vm1 = vweird.f32 %v4276_v53 }
 0x88e   : > { %v3849_v56 = vsub.f32 1.0, %v3848_v14  ;;  %v4370_v21 = vor.u32 1.1754944e-38, %v4369_v16  ;;  %vm3853_vm4 = vweird.f32 %v12172_v32  ;;  %vm4368_vm8 = vcmp.eq.f32.partialorder %v4367_v61, 8.507059e+37  ;;  %v12241_v16 = vpop.f32.mrf.mxu3 }
 0x88f   : > { %v3835_v63 = vmul.f32 %v8489_v12, %v3834_v60  ;;  %7201 = vmatmul.msk.f32.gmra.mxu2 %vm1933_vm5, %v3012_v7  ;;  %vm12217_vm10 = vmor %vm3852_vm6, %vm3853_vm4 }
 0x890   : > { %v3850_v8 = vmul.f32 %v12172_v32, %v3849_v56 }
 0x891   : > { %v8493_v10 = vpop.eup %8492  ;;  %v3836_v48 = vadd.f32 %v8489_v12, %v3835_v63 }
 0x892   : > { %v4359_v50 = vmul.f32 %v8493_v10, %v4276_v53  ;;  %v12181_v26 = vpop.xlane.xlu0 %3803  ;;  %vm4364_vm9 = vweird.f32 %v8493_v10  ;;  %v3851_v17 = vadd.f32 %v12172_v32, %v3850_v8 }
 0x893   : > { %8494 = vrcp.f32 %v12181_v26  ;;  %v3840_v46 = vsel %vm12188_vm15, %v8489_v12, %v3836_v48  ;;  %vm12196_vm3 = vmor %vm4363_vm1, %vm4364_vm9  ;;  %vm3867_vm11 = vweird.f32 %v12181_v26 }
 0x894   : > { %v4360_v9 = vsub.f32 1.0, %v4359_v50  ;;  %v3845_v25 = vsel %vm3842_vm2, %v3844_v13, %v3840_v46  ;;  %v3855_v29 = vsel %vm12217_vm10, %v12172_v32, %v3851_v17  ;;  %v3873_v32 = vand.u32 2147483648, %v12181_v26 }
 0x895   : > { %v3938_v53 = vmul.f32 %v11668_v39, %v3845_v25  ;;  %v14037_v39 = vld [vmem:[#allocation30_spill] sm:$0xff]  ;;  %v3871_v50 = vand.u32 2147483647, %v12181_v26 }
 0x896   : > { %v4361_v40 = vmul.f32 %v8493_v10, %v4360_v9  ;;  %v3874_v9 = vor.u32 1.1754944e-38, %v3873_v32  ;;  %v12259_v44 = vpop.f32.mrf.mxu3 }
 0x897   : > { %7262 = vmatmul.msk.f32.vlgmr.msra.gmra.mxu2 %vm1933_vm5, %v3937_v24  ;;  %vm3872_vm14 = vcmp.eq.f32.partialorder %v3871_v50, 8.507059e+37 }
 0x898   : > { %v4362_v38 = vadd.f32 %v8493_v10, %v4361_v40 }
 0x899   : > { %v8495_v43 = vpop.eup %8494  ;;  %8209 = vrot.lane.b32.xlu0 %v14034_v52, %s13812_s28 }
 0x89a   : > { %v3863_v1 = vmul.f32 %v8495_v43, %v12181_v26  ;;  %v12203_v4 = vpop.xlane.xlu0 %3806  ;;  %v4366_v54 = vsel %vm12196_vm3, %v8493_v10, %v4362_v38  ;;  %vm3868_vm12 = vweird.f32 %v8495_v43  ;;  %v14039_v10 = vld [vmem:[#allocation53_spill] sm:$0xff]  ;;  %v14040_v38 = vld [vmem:[#allocation96_spill] sm:$0xff] }
 0x89b   : > { %8496 = vrcp.f32 %v12203_v4  ;;  %v8185_v0 = vpop.permute.xlu1 %8184  ;;  %v4371_v18 = vsel %vm4368_vm8, %v4370_v21, %v4366_v54  ;;  %vm3869_vm7 = vmor %vm3867_vm11, %vm3868_vm12  ;;  %v3888_v26 = vand.u32 2147483648, %v12203_v4  ;;  %vm3882_vm9 = vweird.f32 %v12203_v4 }
 0x89c   : > { %v3864_v35 = vsub.f32 1.0, %v3863_v1  ;;  %v8186_v36 = vunpack.i.l.bf16 %v8185_v0  ;;  %v4408_v12 = vmul.f32 %v11677_v31, %v4371_v18  ;;  %8498 = vrcp.f32 %v12209_v2  ;;  %v14043_v1 = vld [vmem:[#allocation64_spill] sm:$0xff] }
 0x89d   : > { %v8187_v15 = vunpack.i.h.bf16 %v8185_v0  ;;  %v3859_v31 = vor.u32 1.1754944e-38, %v3858_v37  ;;  %v3886_v13 = vand.u32 2147483647, %v12203_v4  ;;  %v5169_v54 = vsub.f32 %v14043_v1, %v11845_v11 }
 0x89e   : > { %4945 = vmatpush.msrb.mxu2 %v8186_v36  ;;  %v3865_v45 = vmul.f32 %v8495_v43, %v3864_v35  ;;  %7301 = vmatmul.msk.f32.gmra.mxu0 %vm1933_vm5, %v4408_v12  ;;  %v3889_v0 = vor.u32 1.1754944e-38, %v3888_v26 }
 0x89f   : > { %7263 = vmatmul.msk.f32.gmra.mxu2 %vm1933_vm5, %v3938_v53  ;;  %v3860_v14 = vsel %vm3857_vm13, %v3859_v31, %v3855_v29  ;;  %vm3887_vm4 = vcmp.eq.f32.partialorder %v3886_v13, 8.507059e+37  ;;  %v5179_v53 = vmul.f32 1.442695, %v5169_v54  ;;  %vm3897_vm13 = vweird.f32 %v12209_v2  ;;  %v14051_v54 = vld [vmem:[#allocation70_spill] sm:$0xff] }
 0x8a0   : > { %8214 = vrot.lane.b32.xlu2 %v14037_v39, %s13812_s28  ;;  %4946 = vmatpush.msrb.mxu2 %v8187_v15  ;;  %v3866_v42 = vadd.f32 %v8495_v43, %v3865_v45  ;;  %v3939_v28 = vmul.f32 %v14039_v10, %v3860_v14  ;;  %v3903_v15 = vand.u32 2147483648, %v12209_v2  ;;  %v3901_v31 = vand.u32 2147483647, %v12209_v2 }
 0x8a1   : > { %v8497_v49 = vpop.eup %8496 }
 0x8a2   : > { %v3878_v60 = vmul.f32 %v8497_v49, %v12203_v4  ;;  %v4279_v7 = vpop.xlane.xlu0 %4278  ;;  %v12232_v63 = vpop.eup %8498  ;;  %v3870_v30 = vsel %vm3869_vm7, %v8495_v43, %v3866_v42  ;;  %vm3883_vm15 = vweird.f32 %v8497_v49  ;;  %v3904_v10 = vor.u32 1.1754944e-38, %v3903_v15 }
 0x8a3   : > { %8500 = vrcp.f32 %v4279_v7  ;;  %v3893_v56 = vmul.f32 %v12232_v63, %v12209_v2  ;;  %v3875_v40 = vsel %vm3872_vm14, %v3874_v9, %v3870_v30  ;;  %vm12247_vm1 = vmor %vm3882_vm9, %vm3883_vm15  ;;  %v4384_v21 = vand.u32 2147483648, %v4279_v7  ;;  %v12275_v9 = vpop.xlane.xlu2 %5192 }
 0x8a4   : > { %v3879_v55 = vsub.f32 1.0, %v3878_v60  ;;  %v3940_v43 = vmul.f32 %v14040_v38, %v3875_v40  ;;  %v4382_v17 = vand.u32 2147483647, %v4279_v7  ;;  %vm4378_vm2 = vweird.f32 %v4279_v7 }
 0x8a5   : > { %v3894_v8 = vsub.f32 1.0, %v3893_v56  ;;  %v4385_v36 = vor.u32 1.1754944e-38, %v4384_v21  ;;  %vm3898_vm6 = vweird.f32 %v12232_v63  ;;  %vm3902_vm14 = vcmp.eq.f32.partialorder %v3901_v31, 8.507059e+37 }
 0x8a6   : > { %v3880_v48 = vmul.f32 %v8497_v49, %v3879_v55  ;;  %vm4383_vm10 = vcmp.eq.f32.partialorder %v4382_v17, 8.507059e+37  ;;  %vm12266_vm12 = vmor %vm3897_vm13, %vm3898_vm6 }
 0x8a7   : > { %7264 = vmatmul.msk.f32.gmra.mxu2 %vm1933_vm5, %v3939_v28  ;;  %v3895_v25 = vmul.f32 %v12232_v63, %v3894_v8  ;;  %v14049_v8 = vld [vmem:[#allocation14_spill] sm:$0xff] }
 0x8a8   : > { %v3881_v61 = vadd.f32 %v8497_v49, %v3880_v48 }
 0x8a9   : > { %v8501_v24 = vpop.eup %8500  ;;  %v3896_v11 = vadd.f32 %v12232_v63, %v3895_v25  ;;  %v14052_v25 = vld [vmem:[#allocation20_spill] sm:$0xff] }
 0x8aa   : > { %v4374_v58 = vmul.f32 %v8501_v24, %v4279_v7  ;;  %v4282_v23 = vpop.xlane.xlu0 %4281  ;;  %vm4379_vm3 = vweird.f32 %v8501_v24  ;;  %v3885_v4 = vsel %vm12247_vm1, %v8497_v49, %v3881_v61  ;;  %v14044_v49 = vld [vmem:[#allocation91_spill] sm:$0xff]  ;;  %v14045_v7 = vld [vmem:[#allocation93_spill] sm:$0xff]  ;;  %v4705_v17 = vsub.f32 %v14052_v25, %v14051_v54 }
 0x8ab   : > { %8502 = vrcp.f32 %v4282_v23  ;;  %vm4380_vm8 = vmor %vm4378_vm2, %vm4379_vm3  ;;  %v3890_v12 = vsel %vm3887_vm4, %v3889_v0, %v3885_v4  ;;  %v4399_v39 = vand.u32 2147483648, %v4282_v23  ;;  %v4397_v55 = vand.u32 2147483647, %v4282_v23  ;;  %v8200_v27 = vpop.permute.xlu2 %8199 }
 0x8ac   : > { %v4375_v46 = vsub.f32 1.0, %v4374_v58  ;;  %v3941_v14 = vmul.f32 %v14045_v7, %v3890_v12  ;;  %v3900_v2 = vsel %vm12266_vm12, %v12232_v63, %v3896_v11  ;;  %vm4393_vm7 = vweird.f32 %v4282_v23  ;;  %v12281_v63 = vpop.f32.mrf.mxu3  ;;  %v14053_v11 = vld [vmem:[#allocation100_spill] sm:$0xff] }
 0x8ad   : > { %8504 = vpow2.f32 %v5179_v53  ;;  %v4400_v50 = vor.u32 1.1754944e-38, %v4399_v39  ;;  %vm4398_vm9 = vcmp.eq.f32.partialorder %v4397_v55, 8.507059e+37  ;;  %v3905_v48 = vsel %vm3902_vm14, %v3904_v10, %v3900_v2 }
 0x8ae   : > { %v4376_v52 = vmul.f32 %v8501_v24, %v4375_v46  ;;  %v3942_v61 = vmul.f32 %v14049_v8, %v3905_v48  ;;  %v8201_v0 = vunpack.i.l.bf16 %v8200_v27  ;;  %v7769_v8 = vld [vmem:[%s13596_s19 + $0x54] sm:$0xf] }
 0x8af   : > { %7265 = vmatmul.msk.f32.gmra.mxu2 %vm1933_vm5, %v3940_v43 }
 0x8b0   : > { %v4377_v37 = vadd.f32 %v8501_v24, %v4376_v52  ;;  %v14050_v52 = vld [vmem:[#allocation78_spill] sm:$0xff] }
 0x8b1   : > { %v8503_v35 = vpop.eup %8502 }
 0x8b2   : > { %v4389_v18 = vmul.f32 %v8503_v35, %v4282_v23  ;;  %v4381_v62 = vsel %vm4380_vm8, %v8501_v24, %v4377_v37  ;;  %vm4394_vm11 = vweird.f32 %v8503_v35  ;;  %v14048_v24 = vld [vmem:[#allocation90_spill] sm:$0xff]  ;;  %v12278_v40 = vpop.xlane.xlu0 %3815  ;;  %v7774_v37 = vld [vmem:[%s13596_s19 + $0x7c] sm:$0xf] }
 0x8b3   : > { %v4386_v29 = vsel %vm4383_vm10, %v4385_v36, %v4381_v62  ;;  %vm4395_vm15 = vmor %vm4393_vm7, %vm4394_vm11  ;;  %v12283_v26 = vpop.eup %8504  ;;  %v8202_v36 = vunpack.i.h.bf16 %v8200_v27  ;;  %vm3927_vm6 = vweird.f32 %v12278_v40 }
 0x8b4   : > { %v4390_v45 = vsub.f32 1.0, %v4389_v18  ;;  %v4409_v60 = vmul.f32 %v14044_v49, %v4386_v29  ;;  %v5197_v23 = vsel %vm1933_vm5, %v12283_v26, 0.0  ;;  %v12289_v13 = vpop.f32.mrf.mxu3  ;;  %v4717_v18 = vmul.f32 1.442695, %v4705_v17 }
 0x8b6   : > { %v4391_v32 = vmul.f32 %v8503_v35, %v4390_v45  ;;  %7302 = vmatmul.msk.f32.gmra.mxu0 %vm1933_vm5, %v4409_v60 }
 0x8b7   : > { %7266 = vmatmul.msk.f32.gmra.mxu2 %vm1933_vm5, %v3941_v14 }
 0x8b8   : > { %v4392_v28 = vadd.f32 %v8503_v35, %v4391_v32 }
 0x8ba   : > { %v4396_v56 = vsel %vm4395_vm15, %v8503_v35, %v4392_v28  ;;  %v7436_v35 = vld [vmem:[%s13596_s19 + $0x8c] sm:$0xf0]  ;;  %v12325_v28 = vpop.f32.mrf.mxu0 }
 0x8bb   : > { %v4401_v30 = vsel %vm4398_vm9, %v4400_v50, %v4396_v56  ;;  %v7439_v12 = vor.u32 %v7774_v37, %v7436_v35 }
 0x8bc   : > { %v4410_v58 = vmul.f32 %v14048_v24, %v4401_v30  ;;  %v12300_v62 = vpop.f32.mrf.mxu3 }
 0x8bd   : > { %5668 = vmatpush.bf16.msra.mxu2 %v7439_v12  ;;  %v7376_v12 = vld [vmem:[%s13596_s19 + $0x14] sm:$0xf0] }
 0x8be   : > { %7303 = vmatmul.msk.f32.gmra.mxu0 %vm1933_vm5, %v4410_v58 }
 0x8bf   : > { %7267 = vmatmul.msk.f32.gmra.mxu2 %vm1933_vm5, %v3942_v61  ;;  %v7416_v61 = vld [vmem:[%s13596_s19 + $0x64] sm:$0xf0] }
 0x8c3   : > { %5198 = vadd.xlane.f32.xlu0 %v5197_v23  ;;  %v7419_v23 = vor.u32 %v7769_v8, %v7416_v61 }
 0x8c4   : > { %v12310_v49 = vpop.f32.mrf.mxu3 }
 0x8c5   : > { %v8195_v46 = vpop.permute.xlu0 %8194  ;;  %5669 = vmatpush.bf16.msra.mxu2 %v7419_v23 }
 0x8c6   : > { %v8196_v38 = vunpack.i.l.bf16 %v8195_v46  ;;  %v5148_v43 = vpop.xlane.xlu1 %5147  ;;  %v8197_v1 = vunpack.i.h.bf16 %v8195_v46 }
 0x8c7   : > { %v5168_v21 = vsub.f32 %v14050_v52, %v5148_v43  ;;  %v7764_v52 = vld [vmem:[%s13596_s19 + $0x2c] sm:$0xf] }
 0x8c8   : > { %5403 = vmatpush.msrb.mxu0 %v8196_v38 }
 0x8c9   : > { %v5177_v4 = vmul.f32 1.442695, %v5168_v21  ;;  %v7396_v21 = vld [vmem:[%s13596_s19 + $0x3c] sm:$0xf0] }
 0x8ca   : > { %5404 = vmatpush.msrb.mxu0 %v8197_v1  ;;  %v7399_v25 = vor.u32 %v7764_v52, %v7396_v21 }
 0x8cb   : > { %8506 = vpow2.f32 %v5177_v4  ;;  %v12308_v39 = vpop.xlane.xlu2 %4726 }
 0x8cc   : > { %5405 = vmatpush.msrb.mxu0 %v8201_v0  ;;  %8508 = vrcp.f32 %v12278_v40  ;;  %v12333_v58 = vpop.f32.mrf.mxu3  ;;  %5670 = vmatpush.bf16.msra.mxu2 %v7399_v25  ;;  %vm4754_vm11 = vweird.f32 %v12308_v39 }
 0x8cd   : > { %8510 = vpow2.f32 %v4717_v18  ;;  %v7759_v18 = vld [vmem:[%s13596_s19 + $0x4] sm:$0xf] }
 0x8ce   : > { %5406 = vmatpush.msrb.mxu0 %v8202_v36  ;;  %v5154_v53 = vpop.xlane.xlu1 %5153 }
 0x8cf   : > { %v5170_v15 = vsub.f32 %v14053_v11, %v5154_v53  ;;  %v3933_v11 = vand.u32 2147483648, %v12278_v40 }
 0x8d1   : > { %v12304_v45 = vpop.eup %8506  ;;  %v5181_v29 = vmul.f32 1.442695, %v5170_v15  ;;  %v3934_v8 = vor.u32 1.1754944e-38, %v3933_v11 }
 0x8d2   : > { %v5194_v31 = vsel %vm1933_vm5, %v12304_v45, 0.0  ;;  %v12312_v60 = vpop.eup %8508 }
 0x8d3   : > { %8512 = vpow2.f32 %v5181_v29  ;;  %5195 = vadd.xlane.f32.xlu1 %v5194_v31  ;;  %v12314_v14 = vpop.eup %8510  ;;  %v3923_v32 = vmul.f32 %v12312_v60, %v12278_v40  ;;  %v12327_v56 = vpop.xlane.xlu2 %4729  ;;  %vm3928_vm2 = vweird.f32 %v12312_v60  ;;  %v7379_v31 = vor.u32 %v7759_v18, %v7376_v12 }
 0x8d4   : > { %v4737_v55 = vsel %vm1933_vm5, %v12314_v14, 0.0  ;;  %vm3929_vm10 = vmor %vm3927_vm6, %vm3928_vm2  ;;  %v4775_v18 = vand.u32 2147483648, %v12327_v56  ;;  %vm4769_vm9 = vweird.f32 %v12327_v56 }
 0x8d5   : > { %v3924_v50 = vsub.f32 1.0, %v3923_v32  ;;  %v3931_v32 = vand.u32 2147483647, %v12278_v40  ;;  %5671 = vmatpush.bf16.msra.mxu2 %v7379_v31 }
 0x8d6   : > { %v3813_v7 = vpop.xlane.xlu1 %3812 }
 0x8d7   : > { %8514 = vrcp.f32 %v3813_v7  ;;  %v3925_v38 = vmul.f32 %v12312_v60, %v3924_v50  ;;  %v3918_v27 = vand.u32 2147483648, %v3813_v7  ;;  %v3916_v54 = vand.u32 2147483647, %v3813_v7 }
 0x8d8   : > { %8516 = vrcp.f32 %v12308_v39  ;;  %vm3912_vm3 = vweird.f32 %v3813_v7  ;;  %vm3932_vm13 = vcmp.eq.f32.partialorder %v3931_v32, 8.507059e+37 }
 0x8d9   : > { %v12317_v42 = vpop.eup %8512  ;;  %8518 = vrcp.f32 %v12327_v56  ;;  %v3919_v4 = vor.u32 1.1754944e-38, %v3918_v27  ;;  %v3926_v0 = vadd.f32 %v12312_v60, %v3925_v38  ;;  %vm3917_vm8 = vcmp.eq.f32.partialorder %v3916_v54, 8.507059e+37 }
 0x8da   : > { %v5200_v2 = vsel %vm1933_vm5, %v12317_v42, 0.0 }
 0x8db   : > { %4738 = vadd.xlane.f32.xlu1 %v4737_v55  ;;  %5201 = vadd.xlane.f32.xlu2 %v5200_v2  ;;  %v12368_v2 = vpop.f32.mrf.mxu3 }
 0x8dd   : > { %v8515_v10 = vpop.eup %8514 }
 0x8de   : > { %v12329_v48 = vpop.eup %8516  ;;  %v3908_v30 = vmul.f32 %v8515_v10, %v3813_v7  ;;  %v12331_v24 = vpop.xlane.xlu1 %5156  ;;  %vm3913_vm1 = vweird.f32 %v8515_v10 }
 0x8df   : > { %v4750_v43 = vmul.f32 %v12329_v48, %v12308_v39  ;;  %vm3914_vm4 = vmor %vm3912_vm3, %vm3913_vm1  ;;  %v12359_v53 = vpop.eup %8518  ;;  %v12363_v7 = vpop.f32.mrf.mxu0  ;;  %vm4755_vm12 = vweird.f32 %v12329_v48 }
 0x8e0   : > { %v3909_v46 = vsub.f32 1.0, %v3908_v30  ;;  %v3930_v30 = vsel %vm3929_vm10, %v12312_v60, %v3926_v0  ;;  %v14054_v60 = vld [vmem:[#allocation83_spill] sm:$0xff]  ;;  %vm4756_vm7 = vmor %vm4754_vm11, %vm4755_vm12  ;;  %v14055_v0 = vld [vmem:[#allocation29_spill] sm:$0xff]  ;;  %vm4770_vm15 = vweird.f32 %v12359_v53 }
 0x8e1   : > { %v4751_v37 = vsub.f32 1.0, %v4750_v43  ;;  %v4758_v43 = vand.u32 2147483647, %v12308_v39  ;;  %vm12410_vm1 = vmor %vm4769_vm9, %vm4770_vm15 }
 0x8e2   : > { %v3910_v1 = vmul.f32 %v8515_v10, %v3909_v46  ;;  %v4760_v46 = vand.u32 2147483648, %v12308_v39 }
 0x8e3   : > { %v4752_v50 = vmul.f32 %v12329_v48, %v4751_v37  ;;  %vm4759_vm14 = vcmp.eq.f32.partialorder %v4758_v43, 8.507059e+37 }
 0x8e4   : > { %v3911_v17 = vadd.f32 %v8515_v10, %v3910_v1 }
 0x8e5   : > { %v4753_v40 = vadd.f32 %v12329_v48, %v4752_v50 }
 0x8e6   : > { %v5160_v35 = vpop.xlane.xlu1 %5159  ;;  %v3915_v36 = vsel %vm3914_vm4, %v8515_v10, %v3911_v17  ;;  %v12396_v17 = vpop.f32.mrf.mxu3 }
 0x8e7   : > { %v5172_v15 = vsub.f32 %v11951_v59, %v5160_v35  ;;  %v3920_v29 = vsel %vm3917_vm8, %v3919_v4, %v3915_v36  ;;  %v4765_v59 = vmul.f32 %v12359_v53, %v12327_v56  ;;  %v12389_v54 = vpop.f32.mrf.mxu0  ;;  %v4757_v25 = vsel %vm4756_vm7, %v12329_v48, %v4753_v40 }
 0x8e8   : > { %v3943_v55 = vmul.f32 %v11922_v20, %v3920_v29  ;;  %v3935_v20 = vsel %vm3932_vm13, %v3934_v8, %v3930_v30  ;;  %v4761_v4 = vor.u32 1.1754944e-38, %v4760_v46 }
 0x8e9   : > { %v5185_v10 = vmul.f32 1.442695, %v5172_v15  ;;  %v4766_v61 = vsub.f32 1.0, %v4765_v59  ;;  %v3944_v52 = vmul.f32 %v14054_v60, %v3935_v20  ;;  %v4773_v15 = vand.u32 2147483647, %v12327_v56  ;;  %v14058_v59 = vld [vmem:[#allocation15_spill] sm:$0xff] }
 0x8ea   : > { %7268 = vmatmul.msk.f32.gmra.mxu2 %vm1933_vm5, %v3943_v55  ;;  %v4762_v37 = vsel %vm4759_vm14, %v4761_v4, %v4757_v25  ;;  %v4776_v56 = vor.u32 1.1754944e-38, %v4775_v18  ;;  %v14060_v4 = vld [vmem:[#allocation32_spill] sm:$0xff] }
 0x8eb   : > { %8520 = vpow2.f32 %v5185_v10  ;;  %v4869_v11 = vmul.f32 %v11834_v5, %v4762_v37  ;;  %vm4774_vm3 = vcmp.eq.f32.partialorder %v4773_v15, 8.507059e+37  ;;  %v14061_v18 = vld [vmem:[#allocation44_spill] sm:$0xff] }
 0x8ee   : > { %v5163_v23 = vpop.xlane.xlu1 %5162  ;;  %v6393_v20 = vpop.f32.mrf.mxu3 }
 0x8ef   : > { %v5173_v38 = vsub.f32 %v12041_v6, %v5163_v23  ;;  %v4767_v6 = vmul.f32 %v12359_v53, %v4766_v61  ;;  %v12421_v30 = vpop.f32.mrf.mxu0 }
 0x8f0   : > { %v12383_v27 = vpop.xlane.xlu0 %4732 }
 0x8f1   : > { %v12386_v21 = vpop.eup %8520  ;;  %v5187_v1 = vmul.f32 1.442695, %v5173_v38  ;;  %8522 = vrcp.f32 %v12383_v27  ;;  %v4768_v35 = vadd.f32 %v12359_v53, %v4767_v6  ;;  %v4790_v46 = vand.u32 2147483648, %v12383_v27  ;;  %v14059_v38 = vld [vmem:[#allocation35_spill] sm:$0xff] }
 0x8f2   : > { %7269 = vmatmul.msk.f32.gmra.mxu2 %vm1933_vm5, %v3944_v52  ;;  %v5206_v39 = vsel %vm1933_vm5, %v12386_v21, 0.0  ;;  %vm4784_vm4 = vweird.f32 %v12383_v27 }
 0x8f3   : > { %8524 = vpow2.f32 %v5187_v1  ;;  %5207 = vadd.xlane.f32.xlu0 %v5206_v39  ;;  %v4791_v39 = vor.u32 1.1754944e-38, %v4790_v46 }
 0x8f4   : > { %8204 = vrot.lane.b32.xlu1 %v14055_v0, %s13812_s28  ;;  %s8638_s28 = smov 64  }
 0x8f6   : > { %v5166_v48 = vpop.xlane.xlu1 %5165 }
 0x8f7   : > { %v8523_v36 = vpop.eup %8522  ;;  %v5174_v12 = vsub.f32 %v12129_v3, %v5166_v48  ;;  %v4772_v3 = vsel %vm12410_vm1, %v12359_v53, %v4768_v35  ;;  %v4788_v53 = vand.u32 2147483647, %v12383_v27  ;;  %v12434_v37 = vpop.f32.mrf.mxu0 }
 0x8f8   : > { %v4780_v29 = vmul.f32 %v8523_v36, %v12383_v27  ;;  %v4736_v31 = vpop.xlane.xlu0 %4735  ;;  %v4777_v40 = vsel %vm4774_vm3, %v4776_v56, %v4772_v3  ;;  %vm4785_vm2 = vweird.f32 %v8523_v36  ;;  %v6396_v35 = vpop.f32.mrf.mxu3  ;;  %v7802_v56 = vld [vmem:[%s13595_s18 + $0xb8] sm:$0xff] }
 0x8f9   : > { %v12408_v32 = vpop.eup %8524  ;;  %v5189_v10 = vmul.f32 1.442695, %v5174_v12  ;;  %8526 = vrcp.f32 %v4736_v31  ;;  %v4870_v60 = vmul.f32 %v11903_v22, %v4777_v40  ;;  %vm4786_vm8 = vmor %vm4784_vm4, %vm4785_vm2  ;;  %vm4789_vm6 = vcmp.eq.f32.partialorder %v4788_v53, 8.507059e+37  ;;  %7631 = vmatmul.msk.bf16.gmra.mxu3 %vm704_vm0, %v7802_v56 }
 0x8fa   : > { %v4781_v50 = vsub.f32 1.0, %v4780_v29  ;;  %7330 = vmatmul.msk.f32.vlgmr.msrb.gmra.mxu2 %vm1933_vm5, %v4869_v11  ;;  %v5209_v5 = vsel %vm1933_vm5, %v12408_v32, 0.0  ;;  %v4805_v48 = vand.u32 2147483648, %v4736_v31  ;;  %vm4799_vm13 = vweird.f32 %v4736_v31 }
 0x8fb   : > { %8528 = vpow2.f32 %v5189_v10  ;;  %5828 = vmatpush.bf16.msrb.mxu2 %v14058_v59  ;;  %5210 = vadd.xlane.f32.xlu0 %v5209_v5  ;;  %v4803_v12 = vand.u32 2147483647, %v4736_v31  ;;  %v5171_v29 = vsub.f32 %v11796_v34, %v12331_v24 }
 0x8fc   : > { %v4782_v8 = vmul.f32 %v8523_v36, %v4781_v50  ;;  %v4806_v15 = vor.u32 1.1754944e-38, %v4805_v48 }
 0x8fd   : > { %vm4804_vm11 = vcmp.eq.f32.partialorder %v4803_v12, 8.507059e+37  ;;  %v5183_v50 = vmul.f32 1.442695, %v5171_v29 }
 0x8fe   : > { %v4783_v61 = vadd.f32 %v8523_v36, %v4782_v8  ;;  %v7791_v8 = vld [vmem:[%s13595_s18 + $0x60] sm:$0xff] }
 0x8ff   : > { %v8527_v23 = vpop.eup %8526  ;;  %5829 = vmatpush.bf16.msrb.mxu2 %v14059_v38  ;;  %v12443_v10 = vpop.f32.mrf.mxu0  ;;  %8530 = vpow2.f32 %v5183_v50  ;;  %7572 = vmatmul.msk.bf16.vlgmr.msrb.gmra.mxu1 %vm704_vm0, %v7791_v8 }
 0x900   : > { %v4795_v43 = vmul.f32 %v8527_v23, %v4736_v31  ;;  %v4787_v6 = vsel %vm4786_vm8, %v8523_v36, %v4783_v61  ;;  %vm4800_vm10 = vweird.f32 %v8527_v23 }
 0x901   : > { %v12428_v52 = vpop.eup %8528  ;;  %v4792_v27 = vsel %vm4789_vm6, %v4791_v39, %v4787_v6  ;;  %vm4801_vm12 = vmor %vm4799_vm13, %vm4800_vm10  ;;  %vm5220_vm13 = vweird.f32 %v12275_v9 }
 0x902   : > { %v4796_v1 = vsub.f32 1.0, %v4795_v43  ;;  %7331 = vmatmul.msk.f32.gmra.mxu2 %vm1933_vm5, %v4870_v60  ;;  %v5212_v25 = vsel %vm1933_vm5, %v12428_v52, 0.0  ;;  %v4871_v11 = vmul.f32 %v12091_v47, %v4792_v27  ;;  %v6398_v47 = vpop.f32.mrf.mxu3 }
 0x903   : > { %5830 = vmatpush.bf16.msrb.mxu2 %v14060_v4  ;;  %5213 = vadd.xlane.f32.xlu2 %v5212_v25 }
 0x904   : > { %v4797_v0 = vmul.f32 %v8527_v23, %v4796_v1 }
 0x905   : > { %v12449_v5 = vpop.eup %8530 }
 0x906   : > { %v4798_v22 = vadd.f32 %v8527_v23, %v4797_v0 }
 0x907   : > { %5831 = vmatpush.bf16.msrb.mxu2 %v14061_v18  ;;  %v12451_v34 = vpop.f32.mrf.mxu0 }
 0x908   : > { %v4802_v36 = vsel %vm4801_vm12, %v8527_v23, %v4798_v22  ;;  %14062 = vst [vmem:[#allocation84_spill] sm:$0xff] %v12451_v34  ;;  %v12496_v23 = vpop.xlane.xlu2 %4741 }
 0x909   : > { %v4807_v55 = vsel %vm4804_vm11, %v4806_v15, %v4802_v36  ;;  %8532 = vrcp.f32 %v12496_v23  ;;  %vm4829_vm3 = vweird.f32 %v12496_v23 }
 0x90a   : > { %7332 = vmatmul.msk.f32.gmra.mxu2 %vm1933_vm5, %v4871_v11  ;;  %v4872_v31 = vmul.f32 %v12138_v33, %v4807_v55  ;;  %v6401_v24 = vpop.f32.mrf.mxu3  ;;  %v12457_v33 = vpop.f32.mrf.mxu2  ;;  %v7794_v55 = vld [vmem:[%s13595_s18 + $0x78] sm:$0xff] }
 0x90f   : > { %5949 = vrot.lane.b32.xlu0 %v12259_v44, %s8638_s28  ;;  %v5203_v44 = vsel %vm1933_vm5, %v12449_v5, 0.0  ;;  %v12461_v3 = vpop.f32.mrf.mxu0  ;;  %v8533_v43 = vpop.eup %8532 }
 0x910   : > { %14063 = vst [vmem:[#allocation97_spill] sm:$0xff] %v12461_v3  ;;  %v12507_v53 = vpop.xlane.xlu2 %4744  ;;  %v4825_v60 = vmul.f32 %v8533_v43, %v12496_v23  ;;  %vm4830_vm15 = vweird.f32 %v8533_v43 }
 0x911   : > { %vm4831_vm2 = vmor %vm4829_vm3, %vm4830_vm15  ;;  %vm4844_vm10 = vweird.f32 %v12507_v53 }
 0x912   : > { %7333 = vmatmul.msk.f32.gmra.mxu2 %vm1933_vm5, %v4872_v31  ;;  %v4826_v6 = vsub.f32 1.0, %v4825_v60 }
 0x914   : > { %v4827_v48 = vmul.f32 %v8533_v43, %v4826_v6 }
 0x917   : > { %5953 = vrot.lane.b32.xlu0 %v12289_v13, %s8638_s28  ;;  %v6403_v13 = vpop.f32.mrf.mxu3 }
 0x918   : > { %v12517_v39 = vpop.xlane.xlu2 %4747 }
 0x91b   : > { %6421 = vrot.lane.b32.xlu2 %v6393_v20, %s8638_s28  ;;  %v12476_v20 = vpop.f32.mrf.mxu0 }
 0x91e   : > { %5204 = vadd.xlane.f32.xlu1 %v5203_v44 }
 0x91f   : > { %6423 = vrot.lane.b32.xlu0 %v6396_v35, %s8638_s28 }
 0x923   : > { %5951 = vrot.lane.b32.xlu2 %v12281_v63, %s8638_s28  ;;  %v12474_v63 = vpop.f32.mrf.mxu2  ;;  %v4485_v61 = vpop.f32.mrf.mxu0 }
 0x927   : > { %6429 = vrot.lane.b32.xlu0 %v6403_v13, %s8638_s28 }
 0x92b   : > { %5957 = vrot.lane.b32.xlu2 %v12310_v49, %s8638_s28  ;;  %v12481_v40 = vpop.f32.mrf.mxu2  ;;  %v7792_v49 = vld [vmem:[%s13595_s18 + $0x68] sm:$0xff] }
 0x92c   : > { %7573 = vmatmul.msk.bf16.gmra.mxu1 %vm704_vm0, %v7792_v49 }
 0x92f   : > { %3584 = vrot.lane.b32.xlu0 %v12363_v7, %s8639_s24 }
 0x933   : > { %6427 = vrot.lane.b32.xlu2 %v6401_v24, %s8638_s28  ;;  %v12493_v7 = vpop.f32.mrf.mxu2  ;;  %v4828_v24 = vadd.f32 %v8533_v43, %v4827_v48 }
 0x935   : > { %v4832_v48 = vsel %vm4831_vm2, %v8533_v43, %v4828_v24 }
 0x937   : > { %5947 = vrot.lane.b32.xlu1 %v12241_v16, %s8638_s28  ;;  %4516 = vrot.lane.b32.xlu0 %v4485_v61, %s8640_s2  ;;  %v4835_v61 = vand.u32 2147483648, %v12496_v23 }
 0x93b   : > { %v12502_v46 = vpop.f32.mrf.mxu2 }
 0x93f   : > { %6419 = vrot.lane.b32.xlu1 %v12396_v17, %s8638_s28  ;;  %5959 = vrot.lane.b32.xlu0 %v12333_v58, %s8638_s28  ;;  %v7793_v17 = vld [vmem:[%s13595_s18 + $0x70] sm:$0xff] }
 0x940   : > { %7574 = vmatmul.msk.bf16.gmra.mxu1 %vm704_vm0, %v7793_v17  ;;  %v4833_v17 = vand.u32 2147483647, %v12496_v23 }
 0x942   : > { %vm4834_vm4 = vcmp.eq.f32.partialorder %v4833_v17, 8.507059e+37  ;;  %v5224_v17 = vand.u32 2147483647, %v12275_v9 }
 0x943   : > { %v12515_v1 = vpop.f32.mrf.mxu2 }
 0x946   : > { %v12498_v16 = vpop.xlane.xlu1 %5195 }
 0x947   : > { %6425 = vrot.lane.b32.xlu1 %v6398_v47, %s8638_s28  ;;  %vm5235_vm2 = vweird.f32 %v12498_v16 }
 0x94b   : > { %v12534_v31 = vpop.f32.mrf.mxu2 }
 0x94e   : > { %v4739_v58 = vpop.xlane.xlu1 %4738 }
 0x94f   : > { %5955 = vrot.lane.b32.xlu1 %v12300_v62, %s8638_s28  ;;  %8534 = vrcp.f32 %v4739_v58  ;;  %v12523_v62 = vpop.permute.xlu0 %8209  ;;  %v4820_v12 = vand.u32 2147483648, %v4739_v58  ;;  %v4818_v15 = vand.u32 2147483647, %v4739_v58  ;;  %vm4814_vm14 = vweird.f32 %v4739_v58 }
 0x950   : > { %8536 = vrcp.f32 %v12507_v53  ;;  %7575 = vmatmul.msk.bf16.gmra.mxu1 %vm704_vm0, %v7794_v55 }
 0x951   : > { %8538 = vrcp.f32 %v12275_v9  ;;  %v4821_v47 = vor.u32 1.1754944e-38, %v4820_v12  ;;  %vm4819_vm1 = vcmp.eq.f32.partialorder %v4818_v15, 8.507059e+37  ;;  %v4836_v12 = vor.u32 1.1754944e-38, %v4835_v61 }
 0x952   : > { %8540 = vrcp.f32 %v12517_v39  ;;  %v5226_v15 = vand.u32 2147483648, %v12275_v9 }
 0x953   : > { %8542 = vrcp.f32 %v12498_v16 }
 0x955   : > { %v8535_v25 = vpop.eup %8534 }
 0x956   : > { %v4810_v0 = vmul.f32 %v8535_v25, %v4739_v58  ;;  %v12519_v27 = vpop.eup %8536  ;;  %vm4815_vm7 = vweird.f32 %v8535_v25  ;;  %v12542_v58 = vpop.permute.xlu2 %8214 }
 0x957   : > { %v12521_v22 = vpop.eup %8538  ;;  %v4840_v11 = vmul.f32 %v12519_v27, %v12507_v53  ;;  %vm4816_vm9 = vmor %vm4814_vm14, %vm4815_vm7  ;;  %v12544_v60 = vpop.xlane.xlu0 %5198  ;;  %vm4845_vm8 = vweird.f32 %v12519_v27  ;;  %vm5225_vm14 = vcmp.eq.f32.partialorder %v5224_v17, 8.507059e+37 }
 0x958   : > { %v4811_v35 = vsub.f32 1.0, %v4810_v0  ;;  %v5216_v29 = vmul.f32 %v12521_v22, %v12275_v9  ;;  %v12536_v56 = vpop.eup %8540  ;;  %8544 = vrcp.f32 %v12544_v60  ;;  %vm5221_vm6 = vweird.f32 %v12521_v22  ;;  %vm12577_vm12 = vmor %vm4844_vm10, %vm4845_vm8 }
 0x959   : > { %v4841_v44 = vsub.f32 1.0, %v4840_v11  ;;  %v12547_v0 = vpop.eup %8542  ;;  %vm12583_vm11 = vmor %vm5220_vm13, %vm5221_vm6  ;;  %vm4860_vm15 = vweird.f32 %v12536_v56  ;;  %vm5250_vm13 = vweird.f32 %v12544_v60 }
 0x95a   : > { %v4812_v36 = vmul.f32 %v8535_v25, %v4811_v35  ;;  %v5217_v8 = vsub.f32 1.0, %v5216_v29  ;;  %v4855_v35 = vmul.f32 %v12536_v56, %v12517_v39 }
 0x95c   : > { %v4813_v50 = vadd.f32 %v8535_v25, %v4812_v36  ;;  %v5218_v23 = vmul.f32 %v12521_v22, %v5217_v8  ;;  %v4837_v36 = vsel %vm4834_vm4, %v4836_v12, %v4832_v48  ;;  %v4856_v55 = vsub.f32 1.0, %v4855_v35  ;;  %v7807_v12 = vld [vmem:[%s13595_s18 + $0xe0] sm:$0xff] }
 0x95d   : > { %v4874_v61 = vmul.f32 %v11948_v57, %v4837_v36 }
 0x95e   : > { %v4817_v13 = vsel %vm4816_vm9, %v8535_v25, %v4813_v50  ;;  %v4842_v25 = vmul.f32 %v12519_v27, %v4841_v44  ;;  %v5219_v43 = vadd.f32 %v12521_v22, %v5218_v23  ;;  %v4850_v50 = vand.u32 2147483648, %v12507_v53  ;;  %v12568_v8 = vpop.xlane.xlu2 %5201 }
 0x95f   : > { %v4822_v49 = vsel %vm4819_vm1, %v4821_v47, %v4817_v13  ;;  %v12564_v47 = vpop.f32.mrf.mxu2  ;;  %v4848_v44 = vand.u32 2147483647, %v12507_v53  ;;  %v4857_v57 = vmul.f32 %v12536_v56, %v4856_v55  ;;  %v8211_v23 = vunpack.i.l.bf16 %v12523_v62 }
 0x960   : > { %v4873_v6 = vmul.f32 %v12314_v14, %v4822_v49  ;;  %v5231_v14 = vmul.f32 %v12547_v0, %v12498_v16  ;;  %v4843_v29 = vadd.f32 %v12519_v27, %v4842_v25  ;;  %v12571_v49 = vpop.eup %8544  ;;  %v5223_v35 = vsel %vm12583_vm11, %v12521_v22, %v5219_v43  ;;  %7684 = vmatmul.msk.bf16.vlgmr.msra.gmra.mxu1 %vm704_vm0, %v7807_v12 }
 0x961   : > { %v4851_v48 = vor.u32 1.1754944e-38, %v4850_v50  ;;  %8546 = vrcp.f32 %v12568_v8  ;;  %vm4849_vm7 = vcmp.eq.f32.partialorder %v4848_v44, 8.507059e+37  ;;  %v8212_v22 = vunpack.i.h.bf16 %v12523_v62  ;;  %v7444_v50 = vld [vmem:[%s13596_s19 + $0x94] sm:$0xf0] }
 0x962   : > { %7334 = vmatmul.msk.f32.gmra.mxu2 %vm1933_vm5, %v4873_v6  ;;  %v5232_v13 = vsub.f32 1.0, %v5231_v14  ;;  %v4847_v9 = vsel %vm12577_vm12, %v12519_v27, %v4843_v29  ;;  %v5227_v14 = vor.u32 1.1754944e-38, %v5226_v15  ;;  %v4858_v55 = vadd.f32 %v12536_v56, %v4857_v57  ;;  %v7775_v15 = vld [vmem:[%s13596_s19 + $0x84] sm:$0xf] }
 0x963   : > { %v4852_v36 = vsel %vm4849_vm7, %v4851_v48, %v4847_v9  ;;  %vm4859_vm9 = vweird.f32 %v12517_v39  ;;  %v4863_v62 = vand.u32 2147483647, %v12517_v39  ;;  %v8216_v44 = vunpack.i.l.bf16 %v12542_v58 }
 0x964   : > { %v5233_v27 = vmul.f32 %v12547_v0, %v5232_v13  ;;  %v5228_v29 = vsel %vm5225_vm14, %v5227_v14, %v5223_v35  ;;  %vm5236_vm1 = vweird.f32 %v12547_v0  ;;  %v4875_v17 = vmul.f32 %v12124_v51, %v4852_v36  ;;  %vm12626_vm3 = vmor %vm4859_vm9, %vm4860_vm15  ;;  %v14070_v35 = vld [vmem:[#allocation95_spill] sm:$0xff] }
 0x965   : > { %v5241_v57 = vand.u32 2147483648, %v12498_v16  ;;  %v7447_v9 = vor.u32 %v7775_v15, %v7444_v50  ;;  %v5335_v48 = vmul.f32 %v14070_v35, %v5228_v29  ;;  %v5239_v51 = vand.u32 2147483647, %v12498_v16  ;;  %vm5237_vm4 = vmor %vm5235_vm2, %vm5236_vm1  ;;  %v7808_v35 = vld [vmem:[%s13595_s18 + $0xe8] sm:$0xff] }
 0x966   : > { %v8205_v11 = vpop.permute.xlu1 %8204  ;;  %v12606_v43 = vpop.xlane.xlu0 %5207  ;;  %v4862_v12 = vsel %vm12626_vm3, %v12536_v56, %v4858_v55  ;;  %vm4864_vm8 = vcmp.eq.f32.partialorder %v4863_v62, 8.507059e+37  ;;  %v7765_v56 = vld [vmem:[%s13596_s19 + $0x34] sm:$0xf]  ;;  %v7404_v55 = vld [vmem:[%s13596_s19 + $0x44] sm:$0xf0]  ;;  %vm5251_vm10 = vweird.f32 %v12571_v49  ;;  %vm5265_vm14 = vweird.f32 %v12568_v8 }
 0x967   : > { %v8206_v24 = vunpack.i.l.bf16 %v8205_v11  ;;  %v8207_v25 = vunpack.i.h.bf16 %v8205_v11  ;;  %v5246_v11 = vmul.f32 %v12571_v49, %v12544_v60  ;;  %v12622_v6 = vpop.eup %8546  ;;  %v12631_v53 = vpop.f32.mrf.mxu2  ;;  %vm5240_vm6 = vcmp.eq.f32.partialorder %v5239_v51, 8.507059e+37  ;;  %vm5252_vm12 = vmor %vm5250_vm13, %vm5251_vm10  ;;  %v14072_v51 = vld [vmem:[#allocation24_spill] sm:$0xff] }
 0x968   : > { %vm5266_vm7 = vweird.f32 %v12622_v6  ;;  %8548 = vrcp.f32 %v12606_v43 }
 0x969   : > { %5407 = vmatpush.msrb.mxu0 %v8206_v24  ;;  %v4865_v24 = vand.u32 2147483648, %v12517_v39  ;;  %v5247_v13 = vsub.f32 1.0, %v5246_v11  ;;  %v8217_v39 = vunpack.i.h.bf16 %v12542_v58  ;;  %v7424_v58 = vld [vmem:[%s13596_s19 + $0x6c] sm:$0xf0]  ;;  %v5261_v11 = vmul.f32 %v12622_v6, %v12568_v8  ;;  %vm5267_vm15 = vmor %vm5265_vm14, %vm5266_vm7 }
 0x96a   : > { %7335 = vmatmul.msk.f32.gmra.mxu2 %vm1933_vm5, %v4874_v61  ;;  %v5234_v61 = vadd.f32 %v12547_v0, %v5233_v27 }
 0x96b   : > { %5408 = vmatpush.msrb.mxu0 %v8207_v25  ;;  %v4866_v14 = vor.u32 1.1754944e-38, %v4865_v24  ;;  %v5248_v16 = vmul.f32 %v12571_v49, %v5247_v13  ;;  %v5262_v62 = vsub.f32 1.0, %v5261_v11  ;;  %v7407_v13 = vor.u32 %v7765_v56, %v7404_v55  ;;  %v7760_v25 = vld [vmem:[%s13596_s19 + $0xc] sm:$0xf] }
 0x96c   : > { %v5238_v27 = vsel %vm5237_vm4, %v12547_v0, %v5234_v61  ;;  %v5254_v61 = vand.u32 2147483647, %v12544_v60  ;;  %v5269_v11 = vand.u32 2147483647, %v12568_v8 }
 0x96d   : > { %5409 = vmatpush.msrb.mxu0 %v8211_v23  ;;  %v7770_v23 = vld [vmem:[%s13596_s19 + $0x5c] sm:$0xf]  ;;  %v4867_v29 = vsel %vm4864_vm8, %v4866_v14, %v4862_v12  ;;  %v5249_v50 = vadd.f32 %v12571_v49, %v5248_v16 }
 0x96e   : > { %v7427_v36 = vor.u32 %v7770_v23, %v7424_v58  ;;  %v12662_v0 = vpop.xlane.xlu0 %5210  ;;  %v4876_v24 = vmul.f32 %v12150_v19, %v4867_v29  ;;  %v7384_v19 = vld [vmem:[%s13596_s19 + $0x1c] sm:$0xf0]  ;;  %vm5255_vm11 = vcmp.eq.f32.partialorder %v5254_v61, 8.507059e+37  ;;  %vm5270_vm9 = vcmp.eq.f32.partialorder %v5269_v11, 8.507059e+37 }
 0x96f   : > { %5410 = vmatpush.msrb.mxu0 %v8212_v22  ;;  %v5242_v22 = vor.u32 1.1754944e-38, %v5241_v57  ;;  %v5263_v57 = vmul.f32 %v12622_v6, %v5262_v62 }
 0x970   : > { %7685 = vmatmul.msk.bf16.gmra.mxu1 %vm704_vm0, %v7808_v35 }
 0x971   : > { %5411 = vmatpush.msrb.mxu0 %v8216_v44  ;;  %v5243_v15 = vsel %vm5240_vm6, %v5242_v22, %v5238_v27  ;;  %v5256_v44 = vand.u32 2147483648, %v12544_v60  ;;  %v5253_v60 = vsel %vm5252_vm12, %v12571_v49, %v5249_v50  ;;  %v5264_v12 = vadd.f32 %v12622_v6, %v5263_v57  ;;  %v14073_v27 = vld [vmem:[#allocation51_spill] sm:$0xff] }
 0x972   : > { %7336 = vmatmul.msk.f32.gmra.mxu2 %vm1933_vm5, %v4875_v17  ;;  %v5336_v17 = vmul.f32 %v12304_v45, %v5243_v15  ;;  %v7387_v45 = vor.u32 %v7760_v25, %v7384_v19  ;;  %v5271_v49 = vand.u32 2147483648, %v12568_v8  ;;  %v8549_v15 = vpop.eup %8548  ;;  %vm5295_vm6 = vweird.f32 %v12606_v43 }
 0x973   : > { %5412 = vmatpush.msrb.mxu0 %v8217_v39  ;;  %v12676_v39 = vpop.f32.mrf.mxu2  ;;  %vm5296_vm2 = vweird.f32 %v8549_v15 }
 0x974   : > { %7364 = vmatmul.msk.f32.vlgmr.msrb.gmra.mxu0 %vm1933_vm5, %v5335_v48  ;;  %v14071_v48 = vld [vmem:[#allocation25_spill] sm:$0xff]  ;;  %v5272_v56 = vor.u32 1.1754944e-38, %v5271_v49  ;;  %vm5297_vm10 = vmor %vm5295_vm6, %vm5296_vm2  ;;  %vm3606_vm2 = vcmask 261312   ;;  %vm5004_vm6 = vcmask 458112  }
 0x975   : > { %5726 = vmatpush.bf16.msra.mxu0 %v7447_v9  ;;  %v5257_v9 = vor.u32 1.1754944e-38, %v5256_v44  ;;  %v12686_v23 = vadd.f32 %v14072_v51, %v14071_v48  ;;  %v12734_v51 = vpop.f32.mrf.mxu1 }
 0x976   : > { %v12728_v44 = vpop.xlane.xlu2 %5213  ;;  %14075 = vst [vmem:[#allocation98_spill] sm:$0xff] %v12734_v51 }
 0x977   : > { %v5258_v58 = vsel %vm5255_vm11, %v5257_v9, %v5253_v60  ;;  %vm5310_vm11 = vweird.f32 %v12662_v0 }
 0x978   : > { %v5337_v22 = vmul.f32 %v12283_v26, %v5258_v58 }
 0x979   : > { %5727 = vmatpush.bf16.msra.mxu0 %v7427_v36  ;;  %v5268_v36 = vsel %vm5267_vm15, %v12622_v6, %v5264_v12  ;;  %v7809_v6 = vld [vmem:[%s13595_s18 + $0xf0] sm:$0xff] }
 0x97a   : > { %7337 = vmatmul.msk.f32.gmra.mxu2 %vm1933_vm5, %v4876_v24  ;;  %v5273_v8 = vsel %vm5270_vm9, %v5272_v56, %v5268_v36  ;;  %v14076_v36 = vld [vmem:[#allocation33_spill] sm:$0xff]  ;;  %vm5325_vm9 = vweird.f32 %v12728_v44 }
 0x97b   : > { %v12703_v29 = vpop.f32.mrf.mxu2  ;;  %v5338_v26 = vmul.f32 %v12317_v42, %v5273_v8  ;;  %v14074_v42 = vld [vmem:[#allocation45_spill] sm:$0xff] }
 0x97c   : > { %7365 = vmatmul.msk.f32.gmra.mxu0 %vm1933_vm5, %v5336_v17 }
 0x97d   : > { %5728 = vmatpush.bf16.msra.mxu0 %v7407_v13 }
 0x980   : > { %7686 = vmatmul.msk.bf16.gmra.mxu1 %vm704_vm0, %v7809_v6 }
 0x981   : > { %v5950_v14 = vpop.permute.xlu0 %5949  ;;  %5729 = vmatpush.bf16.msra.mxu0 %v7387_v45 }
 0x982   : > { %v5972_v16 = vmul.f32 %v5950_v14, %v12686_v23  ;;  %7456 = vmatmul.msk.bf16.vlgmr.msra.gmra.mxu2 %vm704_vm0, %v14073_v27 }
 0x983   : > { %6300 = vmatpush.bf16.msra.mxu2 %v14058_v59  ;;  %v12718_v55 = vpop.f32.mrf.mxu2 }
 0x984   : > { %5989 = vrot.lane.b32.xlu2 %v5972_v16, %s8638_s28  ;;  %7366 = vmatmul.msk.f32.gmra.mxu0 %vm1933_vm5, %v5337_v22  ;;  %v5301_v16 = vand.u32 2147483648, %v12606_v43  ;;  %v5299_v22 = vand.u32 2147483647, %v12606_v43 }
 0x985   : > { %6064 = vmatpush.bf16.msrb.mxu0 %v14058_v59 }
 0x986   : > { %vm5300_vm13 = vcmp.eq.f32.partialorder %v5299_v22, 8.507059e+37 }
 0x987   : > { %6301 = vmatpush.bf16.msra.mxu2 %v14059_v38 }
 0x989   : > { %6065 = vmatpush.bf16.msrb.mxu0 %v14059_v38 }
 0x98b   : > { %6302 = vmatpush.bf16.msra.mxu2 %v14060_v4  ;;  %v12730_v17 = vpop.f32.mrf.mxu2 }
 0x98c   : > { %3582 = vrot.lane.b32.xlu2 %v12325_v28, %s8639_s24  ;;  %7367 = vmatmul.msk.f32.gmra.mxu0 %vm1933_vm5, %v5338_v26  ;;  %v5291_v28 = vmul.f32 %v8549_v15, %v12606_v43 }
 0x98d   : > { %6066 = vmatpush.bf16.msrb.mxu0 %v14060_v4 }
 0x98e   : > { %v5292_v24 = vsub.f32 1.0, %v5291_v28  ;;  %v5302_v28 = vor.u32 1.1754944e-38, %v5301_v16  ;;  %v5331_v16 = vand.u32 2147483648, %v12728_v44 }
 0x98f   : > { %6303 = vmatpush.bf16.msra.mxu2 %v14061_v18 }
 0x990   : > { %v5293_v19 = vmul.f32 %v8549_v15, %v5292_v24 }
 0x991   : > { %6067 = vmatpush.bf16.msrb.mxu0 %v14061_v18  ;;  %v5205_v50 = vpop.xlane.xlu1 %5204 }
 0x992   : > { %8550 = vrcp.f32 %v5205_v50  ;;  %7457 = vmatmul.msk.bf16.gmra.mxu2 %vm704_vm0, %v14074_v42  ;;  %v5286_v57 = vand.u32 2147483648, %v5205_v50  ;;  %v5284_v45 = vand.u32 2147483647, %v5205_v50  ;;  %vm5280_vm3 = vweird.f32 %v5205_v50 }
 0x993   : > { %8552 = vrcp.f32 %v12662_v0  ;;  %v5294_v58 = vadd.f32 %v8549_v15, %v5293_v19  ;;  %v12742_v8 = vpop.f32.mrf.mxu2  ;;  %v12751_v19 = vpop.f32.mrf.mxu1 }
 0x994   : > { %4514 = vrot.lane.b32.xlu2 %v12476_v20, %s8640_s2  ;;  %8554 = vrcp.f32 %v12728_v44  ;;  %v5287_v20 = vor.u32 1.1754944e-38, %v5286_v57  ;;  %vm5285_vm8 = vcmp.eq.f32.partialorder %v5284_v45, 8.507059e+37  ;;  %v5316_v57 = vand.u32 2147483648, %v12662_v0 }
 0x998   : > { %v8551_v62 = vpop.eup %8550 }
 0x999   : > { %v5276_v13 = vmul.f32 %v8551_v62, %v5205_v50  ;;  %v8553_v61 = vpop.eup %8552  ;;  %vm5281_vm1 = vweird.f32 %v8551_v62  ;;  %v5298_v50 = vsel %vm5297_vm10, %v8549_v15, %v5294_v58  ;;  %v5314_v15 = vand.u32 2147483647, %v12662_v0 }
 0x99a   : > { %v5306_v60 = vmul.f32 %v8553_v61, %v12662_v0  ;;  %vm5282_vm4 = vmor %vm5280_vm3, %vm5281_vm1  ;;  %v8555_v49 = vpop.eup %8554  ;;  %v5303_v24 = vsel %vm5300_vm13, %v5302_v28, %v5298_v50  ;;  %vm5311_vm12 = vweird.f32 %v8553_v61  ;;  %v5317_v58 = vor.u32 1.1754944e-38, %v5316_v57  ;;  %v14079_v0 = vld [vmem:[#allocation87_spill] sm:$0xff]  ;;  %v14081_v50 = vld [vmem:[#allocation77_spill] sm:$0xff] }
 0x99b   : > { %v5277_v25 = vsub.f32 1.0, %v5276_v13  ;;  %v5321_v6 = vmul.f32 %v8555_v49, %v12728_v44  ;;  %v12758_v45 = vpop.f32.mrf.mxu2  ;;  %vm5312_vm7 = vmor %vm5310_vm11, %vm5311_vm12  ;;  %vm5315_vm14 = vcmp.eq.f32.partialorder %v5314_v15, 8.507059e+37  ;;  %vm5326_vm15 = vweird.f32 %v8555_v49  ;;  %v12768_v22 = vpop.f32.mrf.mxu1  ;;  %v14083_v15 = vld [vmem:[#allocation22_spill] sm:$0xff] }
 0x99c   : > { %v5307_v12 = vsub.f32 1.0, %v5306_v60  ;;  %14078 = vst [vmem:[#allocation17_spill] sm:$0xff] %v12758_v45  ;;  %vm5327_vm1 = vmor %vm5325_vm9, %vm5326_vm15  ;;  %vm5470_vm10 = vcmask 523712  }
 0x99d   : > { %v5278_v9 = vmul.f32 %v8551_v62, %v5277_v25 }
 0x99e   : > { %v5308_v26 = vmul.f32 %v8553_v61, %v5307_v12 }
 0x99f   : > { %v5279_v35 = vadd.f32 %v8551_v62, %v5278_v9  ;;  %v5340_v9 = vmul.f32 %v12386_v21, %v5303_v24  ;;  %v5329_v21 = vand.u32 2147483647, %v12728_v44  ;;  %v14080_v44 = vld [vmem:[#allocation43_spill] sm:$0xff] }
 0x9a0   : > { %v5309_v13 = vadd.f32 %v8553_v61, %v5308_v26  ;;  %v5332_v26 = vor.u32 1.1754944e-38, %v5331_v16  ;;  %v12777_v28 = vadd.f32 %v14081_v50, %v14080_v44 }
 0x9a1   : > { %v5283_v14 = vsel %vm5282_vm4, %v8551_v62, %v5279_v35  ;;  %v14077_v62 = vld [vmem:[#allocation79_spill] sm:$0xff]  ;;  %vm5330_vm3 = vcmp.eq.f32.partialorder %v5329_v21, 8.507059e+37  ;;  %vm4072_vm4 = vcmask 326912  }
 0x9a2   : > { %v5288_v11 = vsel %vm5285_vm8, %v5287_v20, %v5283_v14  ;;  %7458 = vmatmul.msk.bf16.gmra.mxu2 %vm704_vm0, %v14076_v36  ;;  %v12749_v43 = vadd.f32 %v14077_v62, %v14071_v48  ;;  %v5313_v20 = vsel %vm5312_vm7, %v8553_v61, %v5309_v13  ;;  %14082 = vst [vmem:[#allocation92_spill] sm:$0xff] %v12777_v28  ;;  %v4488_v13 = vpop.f32.mrf.mxu0  ;;  %vm4538_vm8 = vcmask 392512  }
 0x9a3   : > { %v5339_v56 = vmul.f32 %v12449_v5, %v5288_v11  ;;  %v5322_v5 = vsub.f32 1.0, %v5321_v6  ;;  %v5318_v12 = vsel %vm5315_vm14, %v5317_v58, %v5313_v20 }
 0x9a4   : > { %v5341_v11 = vmul.f32 %v12408_v32, %v5318_v12 }
 0x9a5   : > { %7368 = vmatmul.msk.f32.gmra.mxu0 %vm1933_vm5, %v5339_v56  ;;  %v5323_v35 = vmul.f32 %v8555_v49, %v5322_v5  ;;  %v12773_v56 = vpop.f32.mrf.mxu2 }
 0x9a7   : > { %v5324_v14 = vadd.f32 %v8555_v49, %v5323_v35 }
 0x9a9   : > { %v5948_v25 = vpop.permute.xlu1 %5947  ;;  %v5328_v61 = vsel %vm5327_vm1, %v8555_v49, %v5324_v14  ;;  %v7779_v49 = vld [vmem:[%s13595_s18] sm:$0xff]  ;;  %v6422_v14 = vpop.permute.xlu2 %6421 }
 0x9aa   : > { %v5971_v60 = vmul.f32 %v5948_v25, %v12749_v43  ;;  %v5333_v62 = vsel %vm5330_vm3, %v5332_v26, %v5328_v61  ;;  %v6406_v25 = vpop.f32.mrf.mxu3  ;;  %v12797_v57 = vpop.f32.mrf.mxu0  ;;  %v14084_v61 = vld [vmem:[#allocation55_spill] sm:$0xff] }
 0x9ab   : > { %v5342_v24 = vmul.f32 %v12428_v52, %v5333_v62  ;;  %v12840_v26 = vadd.f32 %v14084_v61, %v14080_v44 }
 0x9ac   : > { %5987 = vrot.lane.b32.xlu1 %v5971_v60, %s8638_s28  ;;  %v5954_v60 = vpop.permute.xlu0 %5953 }
 0x9ad   : > { %7369 = vmatmul.msk.f32.gmra.mxu0 %vm1933_vm5, %v5340_v9  ;;  %v12788_v5 = vpop.f32.mrf.mxu2  ;;  %v12802_v9 = vadd.f32 %v14083_v15, %v14071_v48  ;;  %14085 = vst [vmem:[#allocation94_spill] sm:$0xff] %v12840_v26 }
 0x9af   : > { %v5974_v20 = vmul.f32 %v5954_v60, %v12802_v9 }
 0x9b1   : > { %v6420_v6 = vpop.permute.xlu1 %6419 }
 0x9b2   : > { %7459 = vmatmul.msk.bf16.gmra.mxu2 %vm704_vm0, %v14079_v0  ;;  %v6443_v32 = vmul.f32 %v6420_v6, %v12777_v28  ;;  %v4494_v12 = vpop.f32.mrf.mxu0  ;;  %v5952_v6 = vpop.permute.xlu2 %5951 }
 0x9b4   : > { %5961 = vrot.lane.b32.xlu1 %v12368_v2, %s8638_s28  ;;  %v12783_v2 = vpop.f32.mrf.mxu1 }
 0x9b5   : > { %7370 = vmatmul.msk.f32.gmra.mxu0 %vm1933_vm5, %v5341_v11  ;;  %v12805_v35 = vpop.f32.mrf.mxu2  ;;  %v6424_v11 = vpop.permute.xlu0 %6423 }
 0x9bc   : > { %6459 = vrot.lane.b32.xlu1 %v6443_v32, %s8638_s28  ;;  %v12795_v52 = vpop.f32.mrf.mxu1 }
 0x9bd   : > { %7371 = vmatmul.msk.f32.gmra.mxu0 %vm1933_vm5, %v5342_v24  ;;  %v5958_v24 = vpop.permute.xlu2 %5957  ;;  %vm3140_vm5 = vcmask 195712  }
 0x9c2   : > { %7488 = vmatmul.msk.bf16.vlgmr.msrb.gmra.mxu2 %vm704_vm0, %v7779_v49 }
 0x9c3   : > { %6772 = vmatpush.bf16.msrb.mxu2 %v14058_v59 }
 0x9c4   : > { %6431 = vrot.lane.b32.xlu1 %v6406_v25, %s8638_s28  ;;  %v12818_v58 = vpop.f32.mrf.mxu1  ;;  %v7782_v25 = vld [vmem:[%s13595_s18 + $0x18] sm:$0xff] }
 0x9c5   : > { %7464 = vmatmul.msk.bf16.vlgmr.msra.gmra.mxu0 %vm704_vm0, %v14073_v27  ;;  %v7780_v27 = vld [vmem:[%s13595_s18 + $0x8] sm:$0xff] }
 0x9c6   : > { %6536 = vmatpush.bf16.msra.mxu0 %v14058_v59  ;;  %v7810_v59 = vld [vmem:[%s13595_s18 + $0xf8] sm:$0xff] }
 0x9c7   : > { %6773 = vmatpush.bf16.msrb.mxu2 %v14059_v38  ;;  %7687 = vmatmul.msk.bf16.gmra.mxu1 %vm704_vm0, %v7810_v59 }
 0x9ca   : > { %6537 = vmatpush.bf16.msra.mxu0 %v14059_v38  ;;  %v12824_v38 = vpop.f32.mrf.mxu2 }
 0x9cb   : > { %6774 = vmatpush.bf16.msrb.mxu2 %v14060_v4 }
 0x9cc   : > { %5993 = vrot.lane.b32.xlu1 %v5974_v20, %s8638_s28  ;;  %v6167_v16 = vpop.f32.mrf.mxu1  ;;  %v6428_v20 = vpop.permute.xlu2 %6427 }
 0x9ce   : > { %6538 = vmatpush.bf16.msra.mxu0 %v14060_v4  ;;  %v12830_v4 = vpop.f32.mrf.mxu0 }
 0x9cf   : > { %6775 = vmatpush.bf16.msrb.mxu2 %v14061_v18 }
 0x9d2   : > { %6539 = vmatpush.bf16.msra.mxu0 %v14061_v18  ;;  %7489 = vmatmul.msk.bf16.gmra.mxu2 %vm704_vm0, %v7780_v27  ;;  %v12833_v21 = vpop.f32.mrf.mxu2  ;;  %v7781_v18 = vld [vmem:[%s13595_s18 + $0x10] sm:$0xff] }
 0x9d4   : > { %3586 = vrot.lane.b32.xlu1 %v12389_v54, %s8639_s24  ;;  %v12846_v50 = vpop.f32.mrf.mxu1 }
 0x9d5   : > { %7465 = vmatmul.msk.bf16.gmra.mxu0 %vm704_vm0, %v14074_v42  ;;  %v6445_v42 = vmul.f32 %v6424_v11, %v12840_v26  ;;  %v14091_v11 = vld [vmem:[#allocation61_spill] sm:$0xff]  ;;  %v7789_v26 = vld [vmem:[%s13595_s18 + $0x50] sm:$0xff] }
 0x9d6   : > { %v12842_v54 = vpop.f32.mrf.mxu0 }
 0x9d7   : > { %14086 = vst [vmem:[#allocation36_spill] sm:$0xff] %v12842_v54 }
 0x9dc   : > { %4518 = vrot.lane.b32.xlu1 %v4488_v13, %s8640_s2  ;;  %v6172_v13 = vpop.f32.mrf.mxu1 }
 0x9de   : > { %v12853_v32 = vpop.f32.mrf.mxu0  ;;  %v12973_v54 = vpop.permute.xlu2 %5989 }
 0x9df   : > { %14087 = vst [vmem:[#allocation89_spill] sm:$0xff] %v12853_v32 }
 0x9e2   : > { %7490 = vmatmul.msk.bf16.gmra.mxu2 %vm704_vm0, %v7781_v18  ;;  %v6447_v18 = vmul.f32 %v6428_v20, %v14091_v11 }
 0x9e4   : > { %6463 = vrot.lane.b32.xlu1 %v6445_v42, %s8638_s28  ;;  %v12873_v59 = vpop.f32.mrf.mxu1  ;;  %v6408_v42 = vpop.f32.mrf.mxu3 }
 0x9e5   : > { %7466 = vmatmul.msk.bf16.gmra.mxu0 %vm704_vm0, %v14076_v36  ;;  %v12851_v62 = vpop.f32.mrf.mxu2  ;;  %v14089_v36 = vld [vmem:[#allocation82_spill] sm:$0xff] }
 0x9e6   : > { %v12871_v15 = vadd.f32 %v14089_v36, %v14080_v44 }
 0x9e8   : > { %14090 = vst [vmem:[#allocation40_spill] sm:$0xff] %v12871_v15  ;;  %v6444_v27 = vmul.f32 %v6422_v14, %v12871_v15  ;;  %v7787_v14 = vld [vmem:[%s13595_s18 + $0x40] sm:$0xff] }
 0x9ec   : > { %3590 = vrot.lane.b32.xlu1 %v12434_v37, %s8639_s24 }
 0x9ed   : > { %v12857_v49 = vpop.f32.mrf.mxu2 }
 0x9f1   : > { %v5414_v60 = vpop.f32.mrf.mxu0 }
 0x9f2   : > { %7491 = vmatmul.msk.bf16.gmra.mxu2 %vm704_vm0, %v7782_v25  ;;  %5446 = vrot.lane.b32.xlu2 %v5414_v60, %s8641_s7  ;;  %v6629_v25 = vpop.f32.mrf.mxu1  ;;  %v14093_v60 = vld [vmem:[#allocation21_spill] sm:$0xff] }
 0x9f3   : > { %v5973_v36 = vmul.f32 %v5952_v6, %v14093_v60  ;;  %v6426_v6 = vpop.permute.xlu1 %6425 }
 0x9f4   : > { %4522 = vrot.lane.b32.xlu1 %v4494_v12, %s8640_s2  ;;  %v7795_v12 = vld [vmem:[%s13595_s18 + $0x80] sm:$0xff] }
 0x9f5   : > { %7467 = vmatmul.msk.bf16.gmra.mxu0 %vm704_vm0, %v14079_v0  ;;  %v12867_v37 = vpop.f32.mrf.mxu2 }
 0x9f6   : > { %14088 = vst [vmem:[#allocation88_spill] sm:$0xff] %v12867_v37  ;;  %v7806_v37 = vld [vmem:[%s13595_s18 + $0xd8] sm:$0xff] }
 0x9f9   : > { %v5417_v61 = vpop.f32.mrf.mxu0 }
 0x9fa   : > { %6461 = vrot.lane.b32.xlu2 %v6444_v27, %s8638_s28  ;;  %5448 = vrot.lane.b32.xlu0 %v5417_v61, %s8641_s7  ;;  %v12899_v61 = vpop.f32.mrf.mxu1 }
 0x9fc   : > { %6467 = vrot.lane.b32.xlu1 %v6447_v18, %s8638_s28 }
 0x9fd   : > { %v12880_v0 = vpop.f32.mrf.mxu2 }
 0x9fe   : > { %14092 = vst [vmem:[#allocation67_spill] sm:$0xff] %v12880_v0 }
 0xa01   : > { %v5420_v20 = vpop.f32.mrf.mxu0 }
 0xa02   : > { %7600 = vmatmul.msk.bf16.vlgmr.msra.gmra.mxu2 %vm704_vm0, %v7795_v12  ;;  %6433 = vrot.lane.b32.xlu2 %v6408_v42, %s8638_s28  ;;  %v14094_v42 = vld [vmem:[#allocation19_spill] sm:$0xff] }
 0xa03   : > { %5991 = vrot.lane.b32.xlu0 %v5973_v36, %s8638_s28 }
 0xa04   : > { %6187 = vrot.lane.b32.xlu1 %v12783_v2, %s8638_s28  ;;  %v7796_v2 = vld [vmem:[%s13595_s18 + $0x88] sm:$0xff] }
 0xa05   : > { %7544 = vmatmul.msk.bf16.vlgmr.msrb.gmra.mxu0 %vm704_vm0, %v7787_v14  ;;  %v12895_v27 = vpop.f32.mrf.mxu2  ;;  %v12910_v14 = vadd.f32 %v14094_v42, %v14071_v48 }
 0xa07   : > { %v5976_v36 = vmul.f32 %v5958_v24, %v12910_v14  ;;  %v12931_v24 = vld [vmem:[%s13597_s20] sm:$0x1f] }
 0xa09   : > { %v5423_v18 = vpop.f32.mrf.mxu0 }
 0xa0a   : > { %3588 = vrot.lane.b32.xlu2 %v12421_v30, %s8639_s24  ;;  %v7788_v30 = vld [vmem:[%s13595_s18 + $0x48] sm:$0xff] }
 0xa0b   : > { %5452 = vrot.lane.b32.xlu0 %v5423_v18, %s8641_s7  ;;  %v5956_v18 = vpop.permute.xlu1 %5955 }
 0xa0c   : > { %6193 = vrot.lane.b32.xlu1 %v6167_v16, %s8638_s28  ;;  %v12922_v16 = vpop.f32.mrf.mxu1 }
 0xa0d   : > { %v12903_v12 = vpop.f32.mrf.mxu2 }
 0xa12   : > { %7601 = vmatmul.msk.bf16.gmra.mxu2 %vm704_vm0, %v7796_v2  ;;  %4520 = vrot.lane.b32.xlu2 %v12797_v57, %s8640_s2  ;;  %v12934_v57 = vperm.slane %v12931_v24, 1 }
 0xa13   : > { %5997 = vrot.lane.b32.xlu0 %v5976_v36, %s8638_s28 }
 0xa14   : > { %6197 = vrot.lane.b32.xlu1 %v6172_v13, %s8638_s28 }
 0xa15   : > { %7545 = vmatmul.msk.bf16.gmra.mxu0 %vm704_vm0, %v7788_v30  ;;  %v12924_v42 = vpop.f32.mrf.mxu2  ;;  %v14095_v30 = vld [vmem:[#allocation60_spill] sm:$0xff] }
 0xa16   : > { %v12938_v36 = vadd.f32 %v14095_v30, %v14080_v44 }
 0xa18   : > { %14096 = vst [vmem:[#allocation18_spill] sm:$0xff] %v12938_v36  ;;  %v6446_v11 = vmul.f32 %v6426_v6, %v12938_v36  ;;  %v14097_v6 = vld [vmem:[#allocation76_spill] sm:$0xff] }
 0xa19   : > { %v5975_v36 = vmul.f32 %v5956_v18, %v14097_v6  ;;  %v7790_v18 = vld [vmem:[%s13595_s18 + $0x58] sm:$0xff] }
 0xa1a   : > { %5450 = vrot.lane.b32.xlu2 %v5420_v20, %s8641_s7  ;;  %v12946_v20 = vpop.f32.mrf.mxu1 }
 0xa1c   : > { %6657 = vrot.lane.b32.xlu1 %v6629_v25, %s8638_s28  ;;  %v7797_v25 = vld [vmem:[%s13595_s18 + $0x90] sm:$0xff] }
 0xa1d   : > { %v5680_v13 = vpop.f32.mrf.mxu2 }
 0xa1e   : > { %v5988_v2 = vpop.permute.xlu1 %5987  ;;  %v12941_v51 = vadd.f32 %v5680_v13, %v12934_v57 }
 0xa22   : > { %v5426_v28 = vpop.f32.mrf.mxu0  ;;  %7602 = vmatmul.msk.bf16.gmra.mxu2 %vm704_vm0, %v7797_v25  ;;  %6465 = vrot.lane.b32.xlu2 %v6446_v11, %s8638_s28  ;;  %v6639_v15 = vpop.f32.mrf.mxu1 }
 0xa24   : > { %3120 = vrot.lane.b32.xlu1 %v12481_v40, %s8642_s6 }
 0xa25   : > { %7546 = vmatmul.msk.bf16.gmra.mxu0 %vm704_vm0, %v7789_v26  ;;  %v12957_v13 = vpop.f32.mrf.mxu2  ;;  %v7798_v26 = vld [vmem:[%s13595_s18 + $0x98] sm:$0xff] }
 0xa26   : > { %v12959_v30 = vpop.permute.xlu1 %5961 }
 0xa2a   : > { %v5429_v0 = vpop.f32.mrf.mxu0  ;;  %5995 = vrot.lane.b32.xlu2 %v5975_v36, %s8638_s28 }
 0xa2b   : > { %5456 = vrot.lane.b32.xlu0 %v5429_v0, %s8641_s7 }
 0xa2c   : > { %6665 = vrot.lane.b32.xlu1 %v6639_v15, %s8638_s28 }
 0xa2d   : > { %v5685_v11 = vpop.f32.mrf.mxu2 }
 0xa2e   : > { %v12965_v25 = vpop.permute.xlu1 %6459  ;;  %v12968_v40 = vadd.f32 %v5685_v11, %v12934_v57 }
 0xa2f   : > { %14098 = vst [vmem:[#allocation65_spill] sm:$0xff] %v12965_v25 }
 0xa32   : > { %v12978_v36 = vpop.f32.mrf.mxu0  ;;  %7603 = vmatmul.msk.bf16.gmra.mxu2 %vm704_vm0, %v7798_v26  ;;  %3592 = vrot.lane.b32.xlu2 %v12443_v10, %s8639_s24  ;;  %v12995_v26 = vpop.permute.xlu2 %3582 }
 0xa33   : > { %14099 = vst [vmem:[#allocation66_spill] sm:$0xff] %v12978_v36  ;;  %6185 = vrot.lane.b32.xlu0 %v12768_v22, %s8638_s28 }
 0xa34   : > { %3126 = vrot.lane.b32.xlu1 %v12515_v1, %s8642_s6 }
 0xa35   : > { %7547 = vmatmul.msk.bf16.gmra.mxu0 %vm704_vm0, %v7790_v18  ;;  %v5688_v15 = vpop.f32.mrf.mxu2  ;;  %v7811_v18 = vld [vmem:[%s13595_s18 + $0x100] sm:$0xff] }
 0xa36   : > { %v12988_v0 = vpop.permute.xlu1 %6431  ;;  %v12991_v11 = vadd.f32 %v5688_v15, %v12934_v57 }
 0xa37   : > { %14100 = vst [vmem:[#allocation38_spill] sm:$0xff] %v12988_v0  ;;  %v13023_v0 = vpop.permute.xlu0 %6429 }
 0xa3a   : > { %v12993_v25 = vpop.f32.mrf.mxu0  ;;  %4524 = vrot.lane.b32.xlu2 %v12830_v4, %s8640_s2  ;;  %v7803_v4 = vld [vmem:[%s13595_s18 + $0xc0] sm:$0xff] }
 0xa3b   : > { %14101 = vst [vmem:[#allocation75_spill] sm:$0xff] %v12993_v25  ;;  %6191 = vrot.lane.b32.xlu0 %v12818_v58, %s8638_s28 }
 0xa3c   : > { %4050 = vrot.lane.b32.xlu1 %v12676_v39, %s8643_s26  ;;  %v13018_v39 = vpop.permute.xlu2 %4514 }
 0xa3d   : > { %v5690_v10 = vpop.f32.mrf.mxu2  ;;  %14102 = vst [vmem:[#allocation72_spill] sm:$0xff] %v13018_v39 }
 0xa3e   : > { %v5994_v1 = vpop.permute.xlu1 %5993  ;;  %v13004_v22 = vadd.f32 %v5690_v10, %v12934_v57 }
 0xa42   : > { %v13012_v15 = vpop.f32.mrf.mxu0  ;;  %7712 = vmatmul.msk.bf16.vlgmr.msrb.gmra.mxu2 %vm704_vm0, %v7811_v18  ;;  %5454 = vrot.lane.b32.xlu2 %v5426_v28, %s8641_s7 }
 0xa43   : > { %6195 = vrot.lane.b32.xlu0 %v12846_v50, %s8638_s28 }
 0xa45   : > { %7656 = vmatmul.msk.bf16.vlgmr.msra.gmra.mxu0 %vm704_vm0, %v7803_v4  ;;  %v5833_v58 = vpop.f32.mrf.mxu2 }
 0xa46   : > { %v13021_v10 = vpop.permute.xlu1 %3586  ;;  %v5853_v25 = vmul.f32 %v5833_v58, %v12749_v43  ;;  %v7812_v43 = vld [vmem:[%s13595_s18 + $0x108] sm:$0xff] }
 0xa48   : > { %v13026_v41 = vadd.f32 %v5988_v2, %v5853_v25  ;;  %v13043_v2 = vpop.permute.xlu0 %3584  ;;  %v7804_v25 = vld [vmem:[%s13595_s18 + $0xc8] sm:$0xff] }
 0xa4a   : > { %v13028_v36 = vpop.f32.mrf.mxu0  ;;  %6183 = vrot.lane.b32.xlu2 %v12751_v19, %s8638_s28 }
 0xa4b   : > { %6655 = vrot.lane.b32.xlu0 %v12873_v59, %s8638_s28 }
 0xa4c   : > { %v13034_v28 = vpop.permute.xlu2 %5446 }
 0xa4d   : > { %14103 = vst [vmem:[#allocation81_spill] sm:$0xff] %v13034_v28  ;;  %v13036_v50 = vpop.f32.mrf.mxu2 }
 0xa4e   : > { %v13038_v18 = vpop.permute.xlu1 %4518 }
 0xa50   : > { %v13062_v34 = vpop.permute.xlu0 %4516 }
 0xa52   : > { %v13048_v19 = vpop.f32.mrf.mxu0  ;;  %7713 = vmatmul.msk.bf16.gmra.mxu2 %vm704_vm0, %v7812_v43  ;;  %6189 = vrot.lane.b32.xlu2 %v12795_v52, %s8638_s28 }
 0xa53   : > { %3116 = vrot.lane.b32.xlu0 %v12457_v33, %s8642_s6 }
 0xa54   : > { %v13055_v59 = vpop.permute.xlu2 %6461 }
 0xa55   : > { %14104 = vst [vmem:[#allocation34_spill] sm:$0xff] %v13055_v59  ;;  %7657 = vmatmul.msk.bf16.gmra.mxu0 %vm704_vm0, %v7804_v25  ;;  %v5838_v4 = vpop.f32.mrf.mxu2 }
 0xa56   : > { %v13058_v58 = vpop.permute.xlu1 %6463 }
 0xa57   : > { %14105 = vst [vmem:[#allocation50_spill] sm:$0xff] %v13058_v58  ;;  %v7813_v58 = vld [vmem:[%s13595_s18 + $0x110] sm:$0xff] }
 0xa5a   : > { %v13060_v28 = vpop.f32.mrf.mxu0  ;;  %6659 = vrot.lane.b32.xlu2 %v12899_v61, %s8638_s28  ;;  %v7805_v61 = vld [vmem:[%s13595_s18 + $0xd0] sm:$0xff] }
 0xa5b   : > { %6661 = vrot.lane.b32.xlu0 %v12922_v16, %s8638_s28 }
 0xa5c   : > { %v13068_v52 = vpop.permute.xlu2 %6433 }
 0xa5d   : > { %14106 = vst [vmem:[#allocation52_spill] sm:$0xff] %v13068_v52  ;;  %v5840_v33 = vpop.f32.mrf.mxu2 }
 0xa5e   : > { %v13070_v43 = vpop.permute.xlu1 %3590  ;;  %v5856_v25 = vmul.f32 %v5840_v33, %v12802_v9  ;;  %v13088_v9 = vpop.permute.xlu0 %5959 }
 0xa5f   : > { %v6642_v33 = vpop.f32.mrf.mxu1 }
 0xa60   : > { %v13076_v59 = vadd.f32 %v5994_v1, %v5856_v25 }
 0xa62   : > { %v13081_v32 = vpop.f32.mrf.mxu0  ;;  %7714 = vmatmul.msk.bf16.gmra.mxu2 %vm704_vm0, %v7813_v58  ;;  %3118 = vrot.lane.b32.xlu2 %v12474_v63, %s8642_s6 }
 0xa63   : > { %6663 = vrot.lane.b32.xlu0 %v12946_v20, %s8638_s28 }
 0xa64   : > { %v13090_v16 = vpop.permute.xlu2 %3588 }
 0xa65   : > { %7658 = vmatmul.msk.bf16.gmra.mxu0 %vm704_vm0, %v7805_v61  ;;  %v7814_v61 = vld [vmem:[%s13595_s18 + $0x118] sm:$0xff]  ;;  %v5843_v45 = vpop.f32.mrf.mxu2 }
 0xa66   : > { %v13093_v1 = vpop.permute.xlu1 %4522 }
 0xa67   : > { %v6644_v52 = vpop.f32.mrf.mxu1 }
 0xa6a   : > { %v13095_v25 = vpop.f32.mrf.mxu0  ;;  %3124 = vrot.lane.b32.xlu2 %v12502_v46, %s8642_s6 }
 0xa6b   : > { %14107 = vst [vmem:[#allocation37_spill] sm:$0xff] %v13095_v25  ;;  %3122 = vrot.lane.b32.xlu0 %v12493_v7, %s8642_s6  ;;  %v5855_v7 = vmul.f32 %v5838_v4, %v14093_v60 }
 0xa6c   : > { %v13101_v63 = vpop.permute.xlu2 %4520  ;;  %v13103_v20 = vpop.permute.xlu0 %5448 }
 0xa6d   : > { %14108 = vst [vmem:[#allocation54_spill] sm:$0xff] %v13101_v63 }
 0xa6e   : > { %14109 = vst [vmem:[#allocation73_spill] sm:$0xff] %v13103_v20  ;;  %v13105_v58 = vpop.permute.xlu1 %6467 }
 0xa6f   : > { %14110 = vst [vmem:[#allocation74_spill] sm:$0xff] %v13105_v58  ;;  %v5679_v58 = vadd.f32 %v12924_v42, %v12934_v57 }
 0xa72   : > { %v13113_v39 = vpop.f32.mrf.mxu0  ;;  %7715 = vmatmul.msk.bf16.gmra.mxu2 %vm704_vm0, %v7814_v61  ;;  %6667 = vrot.lane.b32.xlu2 %v6642_v33, %s8638_s28  ;;  %v5845_v33 = vpop.f32.mrf.mxu2 }
 0xa73   : > { %6669 = vrot.lane.b32.xlu0 %v6644_v52, %s8638_s28  ;;  %v5674_v52 = vadd.f32 %v12895_v27, %v12934_v57 }
 0xa74   : > { %v13119_v46 = vpop.permute.xlu2 %5450 }
 0xa75   : > { %14111 = vst [vmem:[#allocation86_spill] sm:$0xff] %v13119_v46  ;;  %7659 = vmatmul.msk.bf16.gmra.mxu0 %vm704_vm0, %v7806_v37  ;;  %v5992_v20 = vpop.permute.xlu0 %5991 }
 0xa76   : > { %v6013_v63 = vadd.f32 %v5992_v20, %v5855_v7  ;;  %v6188_v25 = vpop.permute.xlu1 %6187  ;;  %v5857_v20 = vmul.f32 %v5843_v45, %v14097_v6 }
 0xa77   : > { %v13124_v3 = vmul.f32 %v6188_v25, %v5679_v58 }
 0xa79   : > { %14112 = vst [vmem:[#allocation58_spill] sm:$0xff] %v13124_v3 }
 0xa7a   : > { %v13126_v61 = vpop.f32.mrf.mxu0  ;;  %3130 = vrot.lane.b32.xlu2 %v12564_v47, %s8642_s6 }
 0xa7b   : > { %3128 = vrot.lane.b32.xlu0 %v12534_v31, %s8642_s6  ;;  %v5858_v31 = vmul.f32 %v5845_v33, %v12910_v14  ;;  %s8644_s6 = smov 48  }
 0xa7c   : > { %v13132_v60 = vpop.permute.xlu2 %6465 }
 0xa7d   : > { %14113 = vst [vmem:[#allocation41_spill] sm:$0xff] %v13132_v60  ;;  %v13134_v37 = vpop.permute.xlu0 %5452 }
 0xa7e   : > { %14114 = vst [vmem:[#allocation59_spill] sm:$0xff] %v13134_v37  ;;  %v6194_v4 = vpop.permute.xlu1 %6193 }
 0xa7f   : > { %v13137_v42 = vmul.f32 %v6194_v4, %v12968_v40 }
 0xa81   : > { %14115 = vst [vmem:[#allocation62_spill] sm:$0xff] %v13137_v42 }
 0xa82   : > { %v6069_v25 = vpop.f32.mrf.mxu0  ;;  %4052 = vrot.lane.b32.xlu2 %v12703_v29, %s8643_s26  ;;  %v5854_v29 = vmul.f32 %v13036_v50, %v12686_v23  ;;  %v13172_v23 = vperm.slane %v12931_v24, 3 }
 0xa83   : > { %v6089_v47 = vmul.f32 %v6069_v25, %v5674_v52  ;;  %4048 = vrot.lane.b32.xlu0 %v12631_v53, %s8643_s26  ;;  %v13157_v53 = vadd.f32 %v12903_v12, %v12934_v57 }
 0xa84   : > { %v5996_v7 = vpop.permute.xlu2 %5995  ;;  %v13176_v50 = vadd.f32 %v13028_v36, %v13172_v23 }
 0xa85   : > { %v6015_v60 = vadd.f32 %v5996_v7, %v5857_v20  ;;  %v5998_v4 = vpop.permute.xlu0 %5997  ;;  %v13151_v3 = vadd.f32 %v6089_v47, %v13026_v41  ;;  %v6012_v41 = vadd.f32 %v12973_v54, %v5854_v29  ;;  %v5684_v47 = vadd.f32 %v12957_v13, %v12934_v57 }
 0xa86   : > { %v6016_v37 = vadd.f32 %v5998_v4, %v5858_v31  ;;  %v6198_v46 = vpop.permute.xlu1 %6197 }
 0xa87   : > { %v13148_v27 = vmul.f32 %v6198_v46, %v13004_v22 }
 0xa8a   : > { %v6071_v42 = vpop.f32.mrf.mxu0  ;;  %4056 = vrot.lane.b32.xlu2 %v12730_v17, %s8643_s26 }
 0xa8b   : > { %4054 = vrot.lane.b32.xlu0 %v12718_v55, %s8643_s26  ;;  %v6090_v14 = vmul.f32 %v6071_v42, %v13157_v53 }
 0xa8c   : > { %v3593_v45 = vpop.permute.xlu2 %3592 }
 0xa8d   : > { %v13165_v33 = vadd.f32 %v6090_v14, %v6012_v41 }
 0xa8e   : > { %v6658_v6 = vpop.permute.xlu1 %6657 }
 0xa8f   : > { %v6680_v54 = vmul.f32 %v6658_v6, %v13176_v50 }
 0xa92   : > { %v6074_v46 = vpop.f32.mrf.mxu0 }
 0xa93   : > { %v6091_v17 = vmul.f32 %v6074_v46, %v5679_v58  ;;  %4058 = vrot.lane.b32.xlu0 %v12742_v8, %s8643_s26 }
 0xa94   : > { %v13169_v12 = vpop.permute.xlu2 %4524 }
 0xa95   : > { %v13180_v58 = vadd.f32 %v6091_v17, %v6013_v63 }
 0xa96   : > { %v3121_v55 = vpop.permute.xlu1 %3120 }
 0xa97   : > { %3143 = vst.msk [vmem:[#allocation2 + $0x10] sm:$0xff] %vm3140_vm5, %v3121_v55 }
 0xa98   : > { %3609 = vst.msk [vmem:[#allocation2 + $0x10] sm:$0xff] %vm3606_vm2, %v13021_v10 }
 0xa9a   : > { %v6076_v42 = vpop.f32.mrf.mxu0 }
 0xa9b   : > { %v6092_v8 = vmul.f32 %v6076_v42, %v12941_v51  ;;  %6697 = vrot.lane.b32.xlu0 %v6680_v54, %s8638_s28 }
 0xa9c   : > { %v13186_v24 = vpop.permute.xlu2 %5454 }
 0xa9d   : > { %v13188_v25 = vpop.permute.xlu0 %5456  ;;  %v13195_v63 = vadd.f32 %v6092_v8, %v13076_v59  ;;  %v13228_v8 = vadd.f32 %v13012_v15, %v13172_v23 }
 0xa9e   : > { %v13190_v36 = vpop.permute.xlu1 %6665 }
 0xaa2   : > { %v6079_v20 = vpop.f32.mrf.mxu0 }
 0xaa3   : > { %v6093_v31 = vmul.f32 %v6079_v20, %v5684_v47 }
 0xaa4   : > { %v6184_v7 = vpop.permute.xlu2 %6183 }
 0xaa5   : > { %v13197_v4 = vmul.f32 %v6184_v7, %v5674_v52  ;;  %v6186_v29 = vpop.permute.xlu0 %6185  ;;  %v13201_v6 = vadd.f32 %v6093_v31, %v6015_v60 }
 0xaa6   : > { %v3127_v14 = vpop.permute.xlu1 %3126 }
 0xaa7   : > { %3146 = vst.msk [vmem:[#allocation2 + $0x28] sm:$0xff] %vm3140_vm5, %v3127_v14 }
 0xaa8   : > { %3612 = vst.msk [vmem:[#allocation2 + $0x28] sm:$0xff] %vm3606_vm2, %v3593_v45  ;;  %v13216_v45 = vadd.f32 %v13048_v19, %v13172_v23 }
 0xaaa   : > { %v6081_v10 = vpop.f32.mrf.mxu0 }
 0xaab   : > { %v6094_v41 = vmul.f32 %v6081_v10, %v12968_v40 }
 0xaac   : > { %v6190_v57 = vpop.permute.xlu2 %6189 }
 0xaad   : > { %v13205_v13 = vmul.f32 %v6190_v57, %v12941_v51  ;;  %v6192_v59 = vpop.permute.xlu0 %6191  ;;  %v13209_v17 = vadd.f32 %v6094_v41, %v6016_v37 }
 0xaae   : > { %v13207_v46 = vmul.f32 %v6192_v59, %v5684_v47  ;;  %v4051_v20 = vpop.permute.xlu1 %4050 }
 0xab2   : > { %v6084_v52 = vpop.f32.mrf.mxu0 }
 0xab3   : > { %v13212_v55 = vmul.f32 %v6084_v52, %v12991_v11 }
 0xab4   : > { %v6660_v60 = vpop.permute.xlu2 %6659 }
 0xab5   : > { %v6681_v40 = vmul.f32 %v6660_v60, %v13216_v45  ;;  %v6196_v54 = vpop.permute.xlu0 %6195 }
 0xab6   : > { %v13220_v51 = vmul.f32 %v6196_v54, %v12991_v11 }
 0xab7   : > { %6699 = vrot.lane.b32.xlu0 %v6681_v40, %s8638_s28 }
 0xaba   : > { %v6086_v42 = vpop.f32.mrf.mxu0 }
 0xabb   : > { %v13224_v37 = vmul.f32 %v6086_v42, %v13004_v22  ;;  %v13238_v22 = vpop.f32.mrf.mxu2  ;;  %v14120_v42 = vld [vmem:[#allocation58_spill] sm:$0xff] }
 0xabc   : > { %v3119_v47 = vpop.permute.xlu2 %3118 }
 0xabd   : > { %3142 = vst.msk [vmem:[#allocation2 + $0x8] sm:$0xff] %vm3140_vm5, %v3119_v47  ;;  %v6656_v19 = vpop.permute.xlu0 %6655 }
 0xabe   : > { %3608 = vst.msk [vmem:[#allocation2 + $0x8] sm:$0xff] %vm3606_vm2, %v13043_v2  ;;  %v6679_v11 = vmul.f32 %v6656_v19, %v13228_v8 }
 0xabf   : > { %4984 = vrot.lane.b32.xlu0 %v12824_v38, %s8644_s6  ;;  %4074 = vst.msk [vmem:[#allocation2 + $0x8] sm:$0xff] %vm4072_vm4, %v4051_v20  ;;  %v13258_v38 = vadd.f32 %v13060_v28, %v13172_v23  ;;  %v14116_v28 = vld [vmem:[#allocation26_spill] sm:$0xff] }
 0xac0   : > { %6695 = vrot.lane.b32.xlu2 %v6679_v11, %s8638_s28  ;;  %4540 = vst.msk [vmem:[#allocation2 + $0x8] sm:$0xff] %vm4538_vm8, %v13062_v34  ;;  %v13254_v34 = vadd.f32 %v13113_v39, %v13172_v23  ;;  %v13275_v10 = vadd.f32 %v14116_v28, %v14080_v44  ;;  %v14123_v11 = vld [vmem:[#allocation72_spill] sm:$0xff] }
 0xac1   : > { %v14130_v28 = vld [vmem:[#allocation52_spill] sm:$0xff] }
 0xac4   : > { %v3125_v15 = vpop.permute.xlu2 %3124 }
 0xac5   : > { %3145 = vst.msk [vmem:[#allocation2 + $0x20] sm:$0xff] %vm3140_vm5, %v3125_v15  ;;  %v3117_v2 = vpop.permute.xlu0 %3116  ;;  %v14125_v15 = vld [vmem:[#allocation89_spill] sm:$0xff] }
 0xac6   : > { %3611 = vst.msk [vmem:[#allocation2 + $0x20] sm:$0xff] %vm3606_vm2, %v13070_v43  ;;  %v13260_v43 = vpop.f32.mrf.mxu2 }
 0xac7   : > { %3141 = vst.msk [vmem:[#allocation2] sm:$0xff] %vm3140_vm5, %v3117_v2  ;;  %4988 = vrot.lane.b32.xlu0 %v12851_v62, %s8644_s6 }
 0xac8   : > { %3607 = vst.msk [vmem:[#allocation2] sm:$0xff] %vm3606_vm2, %v12995_v26  ;;  %4982 = vrot.lane.b32.xlu2 %v12805_v35, %s8644_s6  ;;  %v6208_v26 = vmul.f32 %v6186_v29, %v13157_v53  ;;  %v13271_v35 = vadd.f32 %v13081_v32, %v13172_v23  ;;  %v6448_v29 = vmul.f32 %v13023_v0, %v13275_v10  ;;  %v14117_v32 = vld [vmem:[#allocation49_spill] sm:$0xff] }
 0xac9   : > { %v13289_v59 = vadd.f32 %v14117_v32, %v14071_v48  ;;  %v14118_v0 = vld [vmem:[#allocation85_spill] sm:$0xff]  ;;  %v13309_v48 = vadd.f32 %v13126_v61, %v13172_v23 }
 0xacb   : > { %v5978_v40 = vmul.f32 %v12959_v30, %v13289_v59 }
 0xacc   : > { %v6668_v31 = vpop.permute.xlu2 %6667 }
 0xacd   : > { %v13263_v7 = vmul.f32 %v6668_v31, %v13254_v34  ;;  %v6662_v62 = vpop.permute.xlu0 %6661  ;;  %v14126_v31 = vld [vmem:[#allocation54_spill] sm:$0xff] }
 0xace   : > { %v6682_v14 = vmul.f32 %v6662_v62, %v13258_v38  ;;  %v13278_v57 = vpop.f32.mrf.mxu2  ;;  %v14128_v62 = vld [vmem:[#allocation66_spill] sm:$0xff] }
 0xad0   : > { %6701 = vrot.lane.b32.xlu1 %v6682_v14, %s8638_s28  ;;  %6225 = vrot.lane.b32.xlu2 %v6208_v26, %s8638_s28  ;;  %v14129_v26 = vld [vmem:[#allocation101_spill] sm:$0xff] }
 0xad1   : > { %v13361_v14 = vadd.f32 %v14129_v26, %v14080_v44  ;;  %v14142_v26 = vld [vmem:[#allocation57_spill] sm:$0xff] }
 0xad4   : > { %v3131_v39 = vpop.permute.xlu2 %3130 }
 0xad5   : > { %3148 = vst.msk [vmem:[#allocation2 + $0x38] sm:$0xff] %vm3140_vm5, %v3131_v39  ;;  %v6664_v41 = vpop.permute.xlu0 %6663 }
 0xad6   : > { %v6683_v53 = vmul.f32 %v6664_v41, %v13271_v35  ;;  %v13299_v54 = vpop.f32.mrf.mxu2  ;;  %v6450_v41 = vmul.f32 %v14130_v28, %v13361_v14 }
 0xad8   : > { %4980 = vrot.lane.b32.xlu1 %v12788_v5, %s8644_s6  ;;  %6703 = vrot.lane.b32.xlu0 %v6683_v53, %s8638_s28  ;;  %v5977_v5 = vmul.f32 %v13088_v9, %v14118_v0 }
 0xad9   : > { %6469 = vrot.lane.b32.xlu2 %v6448_v29, %s8638_s28  ;;  %v14132_v29 = vld [vmem:[#allocation75_spill] sm:$0xff] }
 0xadc   : > { %v4053_v52 = vpop.permute.xlu2 %4052 }
 0xadd   : > { %4075 = vst.msk [vmem:[#allocation2 + $0x10] sm:$0xff] %vm4072_vm4, %v4053_v52  ;;  %v3123_v60 = vpop.permute.xlu0 %3122 }
 0xade   : > { %3144 = vst.msk [vmem:[#allocation2 + $0x18] sm:$0xff] %vm3140_vm5, %v3123_v60  ;;  %v14134_v60 = vld [vmem:[#allocation62_spill] sm:$0xff] }
 0xadf   : > { %3610 = vst.msk [vmem:[#allocation2 + $0x18] sm:$0xff] %vm3606_vm2, %v13090_v16 }
 0xae0   : > { %4986 = vrot.lane.b32.xlu1 %v12833_v21, %s8644_s6  ;;  %6001 = vrot.lane.b32.xlu0 %v5978_v40, %s8638_s28  ;;  %4541 = vst.msk [vmem:[#allocation2 + $0x10] sm:$0xff] %vm4538_vm8, %v13038_v18  ;;  %v14119_v21 = vld [vmem:[#allocation97_spill] sm:$0xff]  ;;  %v13323_v18 = vpop.f32.mrf.mxu2  ;;  %v13391_v40 = vpop.f32.mrf.mxu0 }
 0xae1   : > { %5999 = vrot.lane.b32.xlu2 %v5977_v5, %s8638_s28  ;;  %v14135_v5 = vld [vmem:[#allocation73_spill] sm:$0xff] }
 0xae4   : > { %v4057_v30 = vpop.permute.xlu2 %4056 }
 0xae5   : > { %4077 = vst.msk [vmem:[#allocation2 + $0x20] sm:$0xff] %vm4072_vm4, %v4057_v30  ;;  %v6670_v9 = vpop.permute.xlu0 %6669  ;;  %v14136_v30 = vld [vmem:[#allocation27_spill] sm:$0xff] }
 0xae6   : > { %v13313_v16 = vmul.f32 %v6670_v9, %v13309_v48  ;;  %4543 = vst.msk [vmem:[#allocation2 + $0x20] sm:$0xff] %vm4538_vm8, %v13093_v1  ;;  %v14121_v1 = vld [vmem:[#allocation17_spill] sm:$0xff] }
 0xae8   : > { %4990 = vrot.lane.b32.xlu1 %v12857_v49, %s8644_s6  ;;  %4062 = vrot.lane.b32.xlu0 %v12773_v56, %s8643_s26  ;;  %v14122_v49 = vld [vmem:[#allocation37_spill] sm:$0xff]  ;;  %v13336_v47 = vpop.f32.mrf.mxu2 }
 0xae9   : > { %3596 = vrot.lane.b32.xlu2 %v14119_v21, %s8639_s24  ;;  %v13334_v56 = vadd.f32 %v14122_v49, %v13172_v23 }
 0xaeb   : > { %v6684_v20 = vmul.f32 %v13190_v36, %v13334_v56  ;;  %v14127_v36 = vld [vmem:[#allocation84_spill] sm:$0xff] }
 0xaed   : > { %v3129_v61 = vpop.permute.xlu0 %3128 }
 0xaee   : > { %3147 = vst.msk [vmem:[#allocation2 + $0x30] sm:$0xff] %vm3140_vm5, %v3129_v61 }
 0xaf0   : > { %6223 = vrot.lane.b32.xlu1 %v13197_v4, %s8638_s28  ;;  %6227 = vrot.lane.b32.xlu0 %v14120_v42, %s8638_s28  ;;  %v14124_v4 = vld [vmem:[#allocation88_spill] sm:$0xff]  ;;  %v13348_v2 = vpop.f32.mrf.mxu2 }
 0xaf1   : > { %4060 = vrot.lane.b32.xlu2 %v14121_v1, %s8643_s26  ;;  %v14138_v1 = vld [vmem:[#allocation40_spill] sm:$0xff]  ;;  %s7819_s26 = sshll.u32 %s8777_s3, 6 }
 0xaf2   : > { %v6326_v49 = vmul.f32 %v13299_v54, %v14138_v1  ;;  %s6930_s27 = scalar_lea.hbm %s13598_s21, %s7819_s26  ;;  %s8585_s26 = scalar_lea.hbm %s13598_s21, 128 }
 0xaf5   : > { %v4049_v19 = vpop.permute.xlu0 %4048 }
 0xaf6   : > { %4073 = vst.msk [vmem:[#allocation2] sm:$0xff] %vm4072_vm4, %v4049_v19 }
 0xaf7   : > { %4539 = vst.msk [vmem:[#allocation2] sm:$0xff] %vm4538_vm8, %v14123_v11  ;;  %v7818_v11 = vld [vmem:[%s14139_s9 + $0x18] sm:$0xff] }
 0xaf8   : > { %6705 = vrot.lane.b32.xlu1 %v6684_v20, %s8638_s28  ;;  %4992 = vrot.lane.b32.xlu0 %v14124_v4, %s8644_s6  ;;  %v13368_v53 = vpop.f32.mrf.mxu2  ;;  %v6543_v20 = vpop.f32.mrf.mxu0 }
 0xaf9   : > { %4528 = vrot.lane.b32.xlu2 %v14125_v15, %s8640_s2  ;;  %6885 = vmatpush.bf16.msrb.mxu3 %v7818_v11  ;;  %v6562_v15 = vmul.f32 %v6543_v20, %v13176_v50  ;;  %v7815_v20 = vld [vmem:[%s14139_s9] sm:$0xff]  ;;  %v14145_v11 = vld [vmem:[#allocation59_spill] sm:$0xff] }
 0xafd   : > { %v4055_v23 = vpop.permute.xlu0 %4054 }
 0xafe   : > { %4076 = vst.msk [vmem:[#allocation2 + $0x18] sm:$0xff] %vm4072_vm4, %v4055_v23  ;;  %v14140_v23 = vld [vmem:[#allocation34_spill] sm:$0xff] }
 0xaff   : > { %4542 = vst.msk [vmem:[#allocation2 + $0x18] sm:$0xff] %vm4538_vm8, %v14126_v31 }
 0xb00   : > { %3594 = vrot.lane.b32.xlu1 %v14127_v36, %s8639_s24  ;;  %6231 = vrot.lane.b32.xlu0 %v13207_v46, %s8638_s28  ;;  %v14131_v46 = vld [vmem:[#allocation36_spill] sm:$0xff]  ;;  %v13379_v44 = vpop.f32.mrf.mxu2  ;;  %s6919_s24 = scalar_lea.sflag [#allocation4], %s647_s1 }
 0xb01   : > { %5458 = vrot.lane.b32.xlu2 %v14128_v62, %s8641_s7  ;;  %v14141_v62 = vld [vmem:[#allocation99_spill] sm:$0xff] }
 0xb02   : > { %v5763_v54 = vadd.f32 %v14142_v26, %v14141_v62  ;;  %v14146_v26 = vld [vmem:[#allocation92_spill] sm:$0xff] }
 0xb05   : > { %v4059_v39 = vpop.permute.xlu0 %4058 }
 0xb06   : > { %4078 = vst.msk [vmem:[#allocation2 + $0x28] sm:$0xff] %vm4072_vm4, %v4059_v39 }
 0xb07   : > { %4544 = vst.msk [vmem:[#allocation2 + $0x28] sm:$0xff] %vm4538_vm8, %v13169_v12  ;;  %v14133_v12 = vld [vmem:[#allocation67_spill] sm:$0xff] }
 0xb08   : > { %4526 = vrot.lane.b32.xlu1 %v14131_v46, %s8640_s2  ;;  %5460 = vrot.lane.b32.xlu0 %v14132_v29, %s8641_s7  ;;  %v13387_v52 = vpop.f32.mrf.mxu2  ;;  %v14143_v46 = vld [vmem:[#allocation86_spill] sm:$0xff] }
 0xb09   : > { %6473 = vrot.lane.b32.xlu2 %v6450_v41, %s8638_s28 }
 0xb10   : > { %6229 = vrot.lane.b32.xlu1 %v13205_v13, %s8638_s28  ;;  %6235 = vrot.lane.b32.xlu0 %v13220_v51, %s8638_s28  ;;  %v6698_v13 = vpop.permute.xlu0 %6697  ;;  %v13398_v21 = vpop.f32.mrf.mxu2 }
 0xb18   : > { %4994 = vrot.lane.b32.xlu1 %v14133_v12, %s8644_s6  ;;  %6707 = vrot.lane.b32.xlu0 %v13263_v7, %s8638_s28  ;;  %v14137_v7 = vld [vmem:[#allocation38_spill] sm:$0xff]  ;;  %v6779_v36 = vpop.f32.mrf.mxu2  ;;  %v5859_v12 = vmul.f32 %v13238_v22, %v14118_v0  ;;  %s7000_s6 = sshll.u32 %s647_s1, 6 }
 0xb19   : > { %v6449_v9 = vmul.f32 %v14137_v7, %v14136_v30  ;;  %v6798_v28 = vmul.f32 %v6779_v36, %v5763_v54  ;;  %v6325_v54 = vmul.f32 %v13278_v57, %v14146_v26  ;;  %v14150_v57 = vld [vmem:[#allocation63_spill] sm:$0xff]  ;;  %s649_s7 = scalar_lea.vmem [#allocation3], %s7000_s6  ;;  %s6933_s6 = sshll.u32 %s6930_s27, 4  ;;  %s6934_s6 = int_to_ptr.hbm [resolvable:$true] %s6933_s6 }
 0xb1a   : > { %v13385_v32 = vpop.permute.xlu2 %6695  ;;  %s6931_s0 = sshll.u32 %s649_s7, 4  ;;  %s8579_s2 = sshra.s32 %s6934_s6, 4  ;;  %s6932_s0 = int_to_ptr.vmem [resolvable:$true] %s6931_s0  ;;  %s8580_s2 = int_to_ptr.hbm [resolvable:$true] %s8579_s2 }
 0xb1b   : > { %s8581_s3 = scalar_lea.hbm %s8580_s2, 64  ;;  %p8586_p0 = scmp.lt.s32.totalorder %s8580_s2, %s13598_s21 }
 0xb1c   : > { %p8582_p11 = scmp.ne.s32.totalorder %s8580_s2, %s8581_s3  ;;  %p8587_p1 = scmp.lt.s32.totalorder %s8585_s26, %s8581_s3 }
 0xb1e   : > { %p8583_p12 = pnand %p8582_p11, %p8794_p5  ;;  %p8588_p2 = por %p8587_p1, %p8586_p0 }
 0xb20   : > { %6233 = vrot.lane.b32.xlu1 %v14134_v60, %s8638_s28  ;;  %p8584_p13 = pneg %p8583_p12 }
 0xb22   : > { %v4983_v51 = vpop.permute.xlu2 %4982  ;;  %p8589_p3 = pnand %p8588_p2, %p8584_p13 }
 0xb23   : > { %5006 = vst.msk [vmem:[#allocation2 + $0x8] sm:$0xff] %vm5004_vm6, %v4983_v51  ;;  %v7817_v51 = vld [vmem:[%s14139_s9 + $0x10] sm:$0xff] }
 0xb24   : > { %5472 = vst.msk [vmem:[#allocation2 + $0x8] sm:$0xff] %vm5470_vm10, %v14135_v5  ;;  %6886 = vmatpush.bf16.msrb.mxu3 %v7817_v51  ;;  %v14149_v51 = vld [vmem:[#allocation50_spill] sm:$0xff] }
 0xb28   : > { %6471 = vrot.lane.b32.xlu1 %v6449_v9, %s8638_s28  ;;  %v5860_v9 = vmul.f32 %v13260_v43, %v13289_v59 }
 0xb29   : > { %v13401_v61 = vpop.permute.xlu0 %6699 }
 0xb2a   : > { %v6226_v42 = vpop.permute.xlu2 %6225 }
 0xb2b   : > { %v6248_v19 = vadd.f32 %v6226_v42, %v13165_v33 }
 0xb2d   : > { %v6334_v4 = vadd.f32 %v6326_v49, %v6248_v19 }
 0xb2f   : > { %v6484_v31 = vadd.f32 %v14140_v23, %v6334_v4  ;;  %v6546_v23 = vpop.f32.mrf.mxu0 }
 0xb30   : > { %6237 = vrot.lane.b32.xlu1 %v13148_v27, %s8638_s28 }
 0xb31   : > { %v6570_v39 = vadd.f32 %v6562_v15, %v6484_v31  ;;  %v4985_v33 = vpop.permute.xlu0 %4984 }
 0xb32   : > { %5007 = vst.msk [vmem:[#allocation2 + $0x10] sm:$0xff] %vm5004_vm6, %v4985_v33 }
 0xb33   : > { %v6720_v41 = vadd.f32 %v6698_v13, %v6570_v39  ;;  %5473 = vst.msk [vmem:[#allocation2 + $0x10] sm:$0xff] %vm5470_vm10, %v14143_v46  ;;  %v13418_v29 = vpop.permute.xlu2 %6469 }
 0xb35   : > { %v13420_v50 = vadd.f32 %v6798_v28, %v6720_v41  ;;  %v6782_v41 = vpop.f32.mrf.mxu2 }
 0xb38   : > { %6709 = vrot.lane.b32.xlu1 %v13313_v16, %s8638_s28 }
 0xb39   : > { %v4989_v27 = vpop.permute.xlu0 %4988 }
 0xb3a   : > { %5009 = vst.msk [vmem:[#allocation2 + $0x20] sm:$0xff] %vm5004_vm6, %v4989_v27  ;;  %v6561_v27 = vmul.f32 %v13391_v40, %v13228_v8 }
 0xb3b   : > { %5475 = vst.msk [vmem:[#allocation2 + $0x20] sm:$0xff] %vm5470_vm10, %v13186_v24  ;;  %v6000_v60 = vpop.permute.xlu2 %5999  ;;  %v14144_v24 = vld [vmem:[#allocation81_spill] sm:$0xff] }
 0xb3c   : > { %v6017_v13 = vadd.f32 %v6000_v60, %v5859_v12  ;;  %v6563_v12 = vmul.f32 %v6546_v23, %v13216_v45  ;;  %v14148_v60 = vld [vmem:[#allocation65_spill] sm:$0xff] }
 0xb3e   : > { %v13433_v5 = vadd.f32 %v13212_v55, %v6017_v13  ;;  %v7816_v55 = vld [vmem:[%s14139_s9 + $0x8] sm:$0xff] }
 0xb3f   : > { %6887 = vmatpush.bf16.msrb.mxu3 %v7816_v55 }
 0xb42   : > { %v13435_v16 = vpop.permute.xlu1 %6701 }
 0xb43   : > { %v3597_v7 = vpop.permute.xlu2 %3596  ;;  %6888 = vmatpush.bf16.msrb.mxu3 %v7815_v20 }
 0xb44   : > { %3614 = vst.msk [vmem:[#allocation2 + $0x38] sm:$0xff] %vm3606_vm2, %v3597_v7 }
 0xb4a   : > { %v4981_v22 = vpop.permute.xlu1 %4980  ;;  %v13438_v0 = vpop.permute.xlu0 %6703 }
 0xb4b   : > { %5005 = vst.msk [vmem:[#allocation2] sm:$0xff] %vm5004_vm6, %v4981_v22  ;;  %v4061_v49 = vpop.permute.xlu2 %4060  ;;  %v5761_v22 = vadd.f32 %v14150_v57, %v14141_v62  ;;  %v6331_v57 = vmul.f32 %v13379_v44, %v14136_v30  ;;  %v6815_v30 = vld [vmem:[#allocation2 + $0x10] sm:$0xff] }
 0xb4c   : > { %5471 = vst.msk [vmem:[#allocation2] sm:$0xff] %vm5470_vm10, %v14144_v24  ;;  %v6548_v24 = vpop.f32.mrf.mxu0 }
 0xb4d   : > { %v6797_v8 = vmul.f32 %v13398_v21, %v5761_v22 }
 0xb52   : > { %v4987_v42 = vpop.permute.xlu1 %4986  ;;  %v6002_v1 = vpop.permute.xlu0 %6001 }
 0xb53   : > { %5008 = vst.msk [vmem:[#allocation2 + $0x18] sm:$0xff] %vm5004_vm6, %v4987_v42  ;;  %v6018_v19 = vadd.f32 %v6002_v1, %v5860_v9  ;;  %v4529_v15 = vpop.permute.xlu2 %4528 }
 0xb54   : > { %5474 = vst.msk [vmem:[#allocation2 + $0x18] sm:$0xff] %vm5470_vm10, %v14145_v11  ;;  %v6784_v11 = vpop.f32.mrf.mxu2  ;;  %v6551_v21 = vpop.f32.mrf.mxu0 }
 0xb55   : > { %v13455_v43 = vadd.f32 %v13224_v37, %v6018_v19  ;;  %v14147_v37 = vld [vmem:[#allocation94_spill] sm:$0xff] }
 0xb56   : > { %v6327_v39 = vmul.f32 %v13323_v18, %v14147_v37  ;;  %v14151_v18 = vld [vmem:[#allocation56_spill] sm:$0xff] }
 0xb5a   : > { %v4991_v59 = vpop.permute.xlu1 %4990  ;;  %v4063_v4 = vpop.permute.xlu0 %4062 }
 0xb5b   : > { %5010 = vst.msk [vmem:[#allocation2 + $0x28] sm:$0xff] %vm5004_vm6, %v4991_v59  ;;  %v6814_v59 = vld [vmem:[#allocation2 + $0x8] sm:$0xff] }
 0xb5c   : > { %5476 = vst.msk [vmem:[#allocation2 + $0x28] sm:$0xff] %vm5470_vm10, %v13188_v25  ;;  %v6553_v44 = vpop.f32.mrf.mxu0 }
 0xb5d   : > { %4080 = vst.msk [vmem:[#allocation2 + $0x38] sm:$0xff] %vm4072_vm4, %v4063_v4  ;;  %v6813_v4 = vld [vmem:[#allocation2] sm:$0xff] }
 0xb5e   : > { %4546 = vst.msk [vmem:[#allocation2 + $0x38] sm:$0xff] %vm4538_vm8, %v4529_v15  ;;  %v6822_v15 = vadd.f32 %v6814_v59, %v13420_v50  ;;  %v14153_v50 = vld [vmem:[#allocation74_spill] sm:$0xff] }
 0xb62   : > { %v6224_v31 = vpop.permute.xlu1 %6223  ;;  %v6228_v36 = vpop.permute.xlu0 %6227 }
 0xb63   : > { %v6247_v33 = vadd.f32 %v6224_v31, %v13151_v3  ;;  %v6249_v28 = vadd.f32 %v6228_v36, %v13180_v58  ;;  %v5766_v3 = vadd.f32 %v14151_v18, %v14141_v62 }
 0xb65   : > { %v6333_v25 = vadd.f32 %v6325_v54, %v6247_v33  ;;  %v6335_v46 = vadd.f32 %v6327_v39, %v6249_v28  ;;  %v6799_v40 = vmul.f32 %v6782_v41, %v5766_v3  ;;  %v14152_v54 = vld [vmem:[#allocation61_spill] sm:$0xff]  ;;  %v6565_v39 = vmul.f32 %v6551_v21, %v13271_v35  ;;  %v6787_v28 = vpop.f32.mrf.mxu2 }
 0xb66   : > { %v6329_v37 = vmul.f32 %v13348_v2, %v14152_v54  ;;  %v14154_v41 = vld [vmem:[#allocation13_spill] sm:$0xff]  ;;  %v14158_v54 = vld [vmem:[#allocation12_spill] sm:$0xff] }
 0xb67   : > { %v6483_v13 = vadd.f32 %v14148_v60, %v6333_v25  ;;  %v6485_v7 = vadd.f32 %v14149_v51, %v6335_v46  ;;  %v5771_v25 = vadd.f32 %v14154_v41, %v14141_v62  ;;  %v5459_v60 = vpop.permute.xlu2 %5458  ;;  %v14155_v51 = vld [vmem:[#allocation18_spill] sm:$0xff]  ;;  %v14159_v41 = vld [vmem:[#allocation23_spill] sm:$0xff] }
 0xb69   : > { %v6569_v58 = vadd.f32 %v6561_v27, %v6483_v13  ;;  %v6571_v9 = vadd.f32 %v6563_v12, %v6485_v7  ;;  %v6801_v12 = vmul.f32 %v6787_v28, %v5771_v25  ;;  %v6328_v7 = vmul.f32 %v13336_v47, %v14155_v51  ;;  %v6817_v28 = vld [vmem:[#allocation2 + $0x20] sm:$0xff] }
 0xb6a   : > { %v13477_v55 = vpop.permute.xlu1 %6705  ;;  %v4993_v42 = vpop.permute.xlu0 %4992 }
 0xb6b   : > { %v6719_v45 = vadd.f32 %v13385_v32, %v6569_v58  ;;  %v6721_v1 = vadd.f32 %v13401_v61, %v6571_v9  ;;  %v6564_v58 = vmul.f32 %v6548_v24, %v13258_v38  ;;  %v14156_v9 = vld [vmem:[#allocation41_spill] sm:$0xff] }
 0xb6d   : > { %v6805_v19 = vadd.f32 %v6797_v8, %v6719_v45  ;;  %v6807_v20 = vadd.f32 %v6799_v40, %v6721_v1  ;;  %v14157_v8 = vld [vmem:[#allocation16_spill] sm:$0xff] }
 0xb6e   : > { %v5768_v40 = vadd.f32 %v14157_v8, %v14141_v62 }
 0xb6f   : > { %v6821_v23 = vadd.f32 %v6813_v4, %v6805_v19  ;;  %v6823_v59 = vadd.f32 %v6815_v30, %v6807_v20  ;;  %v6789_v4 = vpop.f32.mrf.mxu2  ;;  %v5773_v20 = vadd.f32 %v14158_v54, %v14141_v62 }
 0xb70   : > { %v6800_v19 = vmul.f32 %v6784_v11, %v5768_v40 }
 0xb71   : > { %v6829_v31 = vpack.c.bf16 %v6822_v15, %v6821_v23  ;;  %v6330_v23 = vmul.f32 %v13368_v53, %v13275_v10  ;;  %v6802_v21 = vmul.f32 %v6789_v4, %v5773_v20 }
 0xb72   : > { %v3595_v36 = vpop.permute.xlu1 %3594  ;;  %v6232_v26 = vpop.permute.xlu0 %6231 }
 0xb73   : > { %3613 = vst.msk [vmem:[#allocation2 + $0x30] sm:$0xff] %vm3606_vm2, %v3595_v36  ;;  %v6251_v32 = vadd.f32 %v6232_v26, %v13201_v6  ;;  %7732 = vmatmul.msk.bf16.vlgmr.msrb.gmra.mxu3 %vm704_vm0, %v6829_v31  ;;  %v6566_v31 = vmul.f32 %v6553_v44, %v13334_v56  ;;  %v6556_v26 = vpop.f32.mrf.mxu0  ;;  %v6818_v56 = vld [vmem:[#allocation2 + $0x28] sm:$0xff] }
 0xb74   : > { %4079 = vst.msk [vmem:[#allocation2 + $0x30] sm:$0xff] %vm4072_vm4, %v4061_v49 }
 0xb75   : > { %v6337_v61 = vadd.f32 %v6329_v37, %v6251_v32 }
 0xb77   : > { %v6487_v33 = vadd.f32 %v14153_v50, %v6337_v61  ;;  %v6567_v61 = vmul.f32 %v6556_v26, %v13254_v34  ;;  %v6332_v34 = vmul.f32 %v13387_v52, %v13361_v14 }
 0xb79   : > { %v6573_v46 = vadd.f32 %v6565_v39, %v6487_v33 }
 0xb7a   : > { %v4527_v2 = vpop.permute.xlu1 %4526  ;;  %v5461_v27 = vpop.permute.xlu0 %5460 }
 0xb7b   : > { %v6723_v6 = vadd.f32 %v13438_v0, %v6573_v46  ;;  %4545 = vst.msk [vmem:[#allocation2 + $0x30] sm:$0xff] %vm4538_vm8, %v4527_v2 }
 0xb7c   : > { %5011 = vst.msk [vmem:[#allocation2 + $0x30] sm:$0xff] %vm5004_vm6, %v4993_v42 }
 0xb7d   : > { %v6809_v49 = vadd.f32 %v6801_v12, %v6723_v6  ;;  %5477 = vst.msk [vmem:[#allocation2 + $0x30] sm:$0xff] %vm5470_vm10, %v5459_v60  ;;  %v6558_v60 = vpop.f32.mrf.mxu0 }
 0xb7e   : > { %v6568_v51 = vmul.f32 %v6558_v60, %v13309_v48  ;;  %v8225_v48 = vld [vmem:[%s14161_s10] ss:$0 sm:$0xff] }
 0xb7f   : > { %v6825_v46 = vadd.f32 %v6817_v28, %v6809_v49 }
 0xb82   : > { %v6230_v35 = vpop.permute.xlu1 %6229  ;;  %v6236_v13 = vpop.permute.xlu0 %6235 }
 0xb83   : > { %v6250_v22 = vadd.f32 %v6230_v35, %v13195_v63  ;;  %v6253_v0 = vadd.f32 %v6236_v13, %v13433_v5  ;;  %v6816_v5 = vld [vmem:[#allocation2 + $0x18] sm:$0xff]  ;;  %v6474_v13 = vpop.permute.xlu2 %6473 }
 0xb85   : > { %v6336_v18 = vadd.f32 %v6328_v7, %v6250_v22  ;;  %v6339_v3 = vadd.f32 %v6331_v57, %v6253_v0  ;;  %v14160_v57 = vld [vmem:[#allocation98_spill] sm:$0xff] }
 0xb86   : > { %v5778_v22 = vadd.f32 %v14160_v57, %v14141_v62 }
 0xb87   : > { %v6486_v42 = vadd.f32 %v14156_v9, %v6336_v18 }
 0xb89   : > { %v6572_v45 = vadd.f32 %v6564_v58, %v6486_v42 }
 0xb8a   : > { %v4995_v1 = vpop.permute.xlu1 %4994  ;;  %v6708_v33 = vpop.permute.xlu0 %6707 }
 0xb8b   : > { %v6722_v47 = vadd.f32 %v13435_v16, %v6572_v45  ;;  %5012 = vst.msk [vmem:[#allocation2 + $0x38] sm:$0xff] %vm5004_vm6, %v4995_v1 }
 0xb8c   : > { %5478 = vst.msk [vmem:[#allocation2 + $0x38] sm:$0xff] %vm5470_vm10, %v5461_v27 }
 0xb8d   : > { %v6808_v63 = vadd.f32 %v6800_v19, %v6722_v47 }
 0xb8f   : > { %v6824_v38 = vadd.f32 %v6816_v5, %v6808_v63 }
 0xb91   : > { %v6830_v24 = vpack.c.bf16 %v6824_v38, %v6823_v59 }
 0xb92   : > { %v6234_v15 = vpop.permute.xlu1 %6233 }
 0xb93   : > { %v6252_v11 = vadd.f32 %v6234_v15, %v13209_v17  ;;  %7733 = vmatmul.msk.bf16.gmra.mxu3 %vm704_vm0, %v6830_v24  ;;  %v6792_v17 = vpop.f32.mrf.mxu2  ;;  %v6820_v58 = vld [vmem:[#allocation2 + $0x38] sm:$0xff] }
 0xb95   : > { %v6338_v16 = vadd.f32 %v6330_v23, %v6252_v11 }
 0xb97   : > { %v6488_v36 = vadd.f32 %v13418_v29, %v6338_v16  ;;  %v6803_v29 = vmul.f32 %v6792_v17, %v14159_v41 }
 0xb99   : > { %v6574_v37 = vadd.f32 %v6566_v31, %v6488_v36 }
 0xb9a   : > { %v6472_v32 = vpop.permute.xlu1 %6471 }
 0xb9b   : > { %v6724_v10 = vadd.f32 %v13477_v55, %v6574_v37  ;;  %v6489_v53 = vadd.f32 %v6472_v32, %v6339_v3  ;;  %v6794_v49 = vpop.f32.mrf.mxu2 }
 0xb9c   : > { %v6804_v3 = vmul.f32 %v6794_v49, %v5778_v22 }
 0xb9d   : > { %v6810_v39 = vadd.f32 %v6802_v21, %v6724_v10  ;;  %v6575_v50 = vadd.f32 %v6567_v61, %v6489_v53 }
 0xb9f   : > { %v6725_v25 = vadd.f32 %v6708_v33, %v6575_v50  ;;  %v6826_v2 = vadd.f32 %v6818_v56, %v6810_v39 }
 0xba1   : > { %v6811_v27 = vadd.f32 %v6803_v29, %v6725_v25  ;;  %v6831_v12 = vpack.c.bf16 %v6826_v2, %v6825_v46 }
 0xba2   : > { %v6238_v6 = vpop.permute.xlu1 %6237 }
 0xba3   : > { %v6254_v55 = vadd.f32 %v6238_v6, %v13455_v43  ;;  %7734 = vmatmul.msk.bf16.gmra.mxu3 %vm704_vm0, %v6831_v12  ;;  %v6819_v43 = vld [vmem:[#allocation2 + $0x30] sm:$0xff] }
 0xba4   : > { %v6827_v9 = vadd.f32 %v6819_v43, %v6811_v27 }
 0xba5   : > { %v6340_v35 = vadd.f32 %v6332_v34, %v6254_v55 }
 0xba7   : > { %v6490_v7 = vadd.f32 %v6474_v13, %v6340_v35 }
 0xba9   : > { %v6576_v0 = vadd.f32 %v6568_v51, %v6490_v7 }
 0xbaa   : > { %v6710_v18 = vpop.permute.xlu1 %6709 }
 0xbab   : > { %v6726_v14 = vadd.f32 %v6710_v18, %v6576_v0 }
 0xbad   : > { %v6812_v52 = vadd.f32 %v6804_v3, %v6726_v14 }
 0xbaf   : > { %v6828_v42 = vadd.f32 %v6820_v58, %v6812_v52 }
 0xbb1   : > { %v6832_v8 = vpack.c.bf16 %v6828_v42, %v6827_v9 }
 0xbb3   : > { %7735 = vmatmul.msk.bf16.gmra.mxu3 %vm704_vm0, %v6832_v8 }
 0xbf6   : > { %v6890_v62 = vpop.f32.mrf.mxu3 }
 0xbf7   : > { %v6891_v40 = vadd.f32 %v8225_v48, %v6890_v62 }
 0xbf9   : > { %6910 = vst.msk [vmem:[%s649_s7] sm:$0xff] %vm704_vm0, %v6891_v40 }
 0xbfe   : > { %v6892_v45 = vpop.f32.mrf.mxu3 }
 0xbff   : > { %v6893_v1 = vadd.f32 %v8225_v48, %v6892_v45 }
 0xc01   : > { %6911 = vst.msk [vmem:[%s649_s7 + $0x8] sm:$0xff] %vm704_vm0, %v6893_v1 }
 0xc16   : > { %v6895_v19 = vpop.f32.mrf.mxu3 }
 0xc17   : > { %v6896_v47 = vadd.f32 %v8225_v48, %v6895_v19 }
 0xc19   : > { %6912 = vst.msk [vmem:[%s649_s7 + $0x10] sm:$0xff] %vm704_vm0, %v6896_v47 }
 0xc1e   : > { %v6897_v63 = vpop.f32.mrf.mxu3 }
 0xc1f   : > { %v6898_v44 = vadd.f32 %v8225_v48, %v6897_v63 }
 0xc21   : > { %6913 = vst.msk [vmem:[%s649_s7 + $0x18] sm:$0xff] %vm704_vm0, %v6898_v44 }
 0xc26   : > { %v6900_v30 = vpop.f32.mrf.mxu3 }
 0xc27   : > { %v6901_v5 = vadd.f32 %v8225_v48, %v6900_v30 }
 0xc29   : > { %6914 = vst.msk [vmem:[%s649_s7 + $0x20] sm:$0xff] %vm704_vm0, %v6901_v5 }
 0xc2e   : > { %v6902_v59 = vpop.f32.mrf.mxu3 }
 0xc2f   : > { %v6903_v38 = vadd.f32 %v8225_v48, %v6902_v59 }
 0xc31   : > { %6915 = vst.msk [vmem:[%s649_s7 + $0x28] sm:$0xff] %vm704_vm0, %v6903_v38 }
 0xc36   : > { %v6905_v24 = vpop.f32.mrf.mxu3 }
 0xc37   : > { %v6906_v4 = vadd.f32 %v8225_v48, %v6905_v24 }
 0xc39   : > { %6916 = vst.msk [vmem:[%s649_s7 + $0x30] sm:$0xff] %vm704_vm0, %v6906_v4 }
 0xc3e   : > { %v6907_v15 = vpop.f32.mrf.mxu3 }
 0xc3f   : > { %v6908_v23 = vadd.f32 %v8225_v48, %v6907_v15 }
 0xc41   : > { %6917 = vst.msk [vmem:[%s649_s7 + $0x38] sm:$0xff] %vm704_vm0, %v6908_v23 }
 0xc42   : > { %8592 = shalt.err (!%p8589_p3)
}
 0xc43   : > { %s8645_s1 = smov 128   ;;  %s14162_s7 = smov 8  }
 0xc44   : > { %7987 = dma.vmem_to_hbm [thread:$0]  (%p8794_p5), %s6932_s0, 1024, %s6934_s6, %s6919_s24, %s8645_s1, %s8645_s1, %s14162_s7  }
 0xc45 PF: > { %s14163_s8 = sld [smem:[#allocation8_spill]] }
 0xc46   : > { %s14164_s9 = sld [smem:[#allocation6_spill]] }
 0xc4b   : > { %p7993_p4 = scmp.ge.s32.totalorder %s14163_s8, 2 }
 0xc4c   : > { %s6948_s22 = sand.u32 1, %s14164_s9  }
 0xc4d   : > { %p7990_p7 = pnand %p7993_p4, %p8798_p6  ;;  %s6949_s28 = scalar_lea.sflag [#allocation4], %s6948_s22 }
 0xc4f   : > { %p7991_p8 = pneg %p7990_p7 }
 0xc51   : > { %8610 = dma.done.wait (%p7991_p8), %s6949_s28, 1024  }
 0xc52   : > { %8612 = vsyncadd (%p7991_p8), %s6949_s28, 4294966272  ;;  %s14166_s27 = sld [smem:[#allocation9_spill]]  ;;  %s14169_s2 = smov %s8619_s25 }
 0xc53   : > { %s14167_s3 = sld [smem:[#allocation7_spill]] }
 0xc54   : > { %s14168_s26 = sld [smem:[#allocation10_spill]] }
 0xc58   : > { %p31_p9 = scmp.ge.s32.totalorder %s14166_s27, 4  }
 0xc59   : > { %s14170_s25 = smov %s14167_s3 }
 0xc5a   :  { %33 = sbr.rel (!%p31_p9) target bundleno = 15 (0xf), region = 154 }
 0xc5f   :  { %6955 = vsyncpa [#allocation4], 1 }
 0xc60   :  { %6957 = vsyncpa [#allocation4 + $0x1], 1 }

</bundles_post_ra>
